<compile_context>
chip_gen: v7x
topology: tpu7x:2x2x1
jax: 0.10.0
libtpu: 0.0.40
codegen_flags: <defaults>
</compile_context>

<pallas_src>
import numpy as np
import jax
import jax.numpy as jnp
from jax.experimental import pallas as pl
from jax.experimental.pallas import tpu as pltpu

EPS = 1e-5                      # nn.InstanceNorm3d default (affine=False, biased var)
F32 = jnp.float32
_VMEM_LIMIT = 48 * 1024 * 1024  # < 64 MiB physical VMEM on v7x, generous on v5e/v6e


# ---------------------------------------------------------------------------
# "padded-flat" activation layout
#   activation (N, C, D, H, W)  ->  (N, C, L) with
#     voxel (d,h,w) stored at lane  base + d*plane + h*Wp + w
#     plane = (H+2)*(W+2), Wp = W+2, base = plane + Wp + 1, zeros elsewhere.
#   With this layout every (kd,kh,kw) tap of a 3x3x3/pad=1 conv is the contiguous
#   lane slice [t, t+Q) with t = kd*plane + kh*Wp + kw and Q = D*plane, so the conv
#   kernel only needs static slice loads + MXU dots (no reshapes, no im2col).
# ---------------------------------------------------------------------------
def _spatial_consts(Dz, Hz, Wz):
    Hp, Wp = Hz + 2, Wz + 2
    plane = Hp * Wp
    q_len = Dz * plane
    base = plane + Wp + 1
    return Hp, Wp, plane, q_len, base


def ncdhw_to_flat(x):
    """(N, C, D, H, W) -> padded-flat (N, C, L) conv-input format."""
    N, C, Dz, Hz, Wz = x.shape
    _, _, _, q_len, base = _spatial_consts(Dz, Hz, Wz)
    xq = jnp.pad(x, ((0, 0), (0, 0), (0, 0), (0, 2), (0, 2))).reshape(N, C, q_len)
    return jnp.pad(xq, ((0, 0), (0, 0), (base, base)))


def qflat_to_flat(xq, spatial):
    """conv-kernel output (N, C, Q) -> padded-flat (N, C, L) input for next conv."""
    Dz, Hz, Wz = spatial
    _, _, _, _, base = _spatial_consts(Dz, Hz, Wz)
    return jnp.pad(xq, ((0, 0), (0, 0), (base, base)))


def qflat_to_ncdhw(xq, spatial):
    """conv-kernel output (N, C, Q) -> (N, C, D, H, W)."""
    Dz, Hz, Wz = spatial
    Hp, Wp, _, _, _ = _spatial_consts(Dz, Hz, Wz)
    N, C, _ = xq.shape
    return xq.reshape(N, C, Dz, Hp, Wp)[:, :, :, :Hz, :Wz]


def _valid_mask(Dz, Hz, Wz):
    """(1, Q) f32 mask of real voxels inside the (D, Hp, Wp) flattened grid."""
    Hp, Wp = Hz + 2, Wz + 2
    m = np.zeros((Dz, Hp, Wp), np.float32)
    m[:, :Hz, :Wz] = 1.0
    return jnp.asarray(m.reshape(1, Dz * Hp * Wp))


# ---------------------------------------------------------------------------
# Pallas kernels
# ---------------------------------------------------------------------------
def _upconv_kernel(x_ref, w_ref, b_ref, o_ref):
    # (Cout*8, Cin) @ (Cin, DHWc) + (Cout*8, 1)    (lane axis = coarse voxels)
    o_ref[...] = (
        jnp.dot(w_ref[...], x_ref[...], preferred_element_type=jnp.float32)
        + b_ref[...]
    ).astype(o_ref.dtype)


def _make_conv_in_relu_kernel(n_groups, c_out, q_len, plane, wp, n_valid):
    """Fused Conv3d(k=3,p=1) + bias + InstanceNorm3d + ReLU over one batch element.

    Inputs (per grid step / batch element):
      x_g : (C_g, L)  padded-flat activation of concat group g
      w_g : (27, c_out, C_g)  per-tap weights
      b   : (c_out, 1), mask : (1, Q)
    Output: (c_out, Q) lane-dense, invalid lanes forced to zero.
    """
    taps = [(kd, kh, kw) for kd in range(3) for kh in range(3) for kw in range(3)]
    inv_n = 1.0 / float(n_valid)

    def kernel(*refs):
        x_refs = refs[:n_groups]
        w_refs = refs[n_groups:2 * n_groups]
        b_ref = refs[2 * n_groups]
        m_ref = refs[2 * n_groups + 1]
        o_ref = refs[2 * n_groups + 2]

        acc = jnp.zeros((c_out, q_len), dtype=jnp.float32)
        for g in range(n_groups):                      # fused channel-concat
            xg = x_refs[g]
            wg = w_refs[g]
            for t_idx, (kd, kh, kw) in enumerate(taps):  # in-kernel "im2col"
                off = kd * plane + kh * wp + kw
                acc = acc + jnp.dot(
                    wg[t_idx], xg[:, off:off + q_len],
                    preferred_element_type=jnp.float32)

        acc = acc + b_ref[...]                         # bias added exactly once

        # fused InstanceNorm (biased var, eps=1e-5, no affine) + ReLU epilogue
        mask = m_ref[...]                              # (1, Q) real-voxel mask
        mean = jnp.sum(acc * mask, axis=1, keepdims=True) * inv_n
        diff = (acc - mean) * mask
        var = jnp.sum(diff * diff, axis=1, keepdims=True) * inv_n
        y = jnp.maximum(diff * jax.lax.rsqrt(var + EPS), 0.0)
        o_ref[...] = y.astype(o_ref.dtype)             # zeros stay zero at pad lanes

    return kernel


# ---------------------------------------------------------------------------
# Wrappers
# ---------------------------------------------------------------------------
def conv_transpose3d_k2s2(x1, weight, bias):
    """ConvTranspose3d(k=2, s=2): one lane-dense matmul per batch element."""
    N, Cin, Dc, Hc, Wc = x1.shape
    Cout = weight.shape[1]
    dhw = Dc * Hc * Wc
    x_flat = x1.reshape(N, Cin, dhw).astype(F32)
    w_mat = jnp.transpose(weight, (1, 2, 3, 4, 0)).reshape(Cout * 8, Cin).astype(F32)
    b_col = jnp.repeat(bias, 8).reshape(Cout * 8, 1).astype(F32)

    y8 = pl.pallas_call(
        _upconv_kernel,
        grid=(N,),
        in_specs=[
            pl.BlockSpec((None, Cin, dhw), lambda n: (n, 0, 0)),
            pl.BlockSpec((Cout * 8, Cin), lambda n: (0, 0)),
            pl.BlockSpec((Cout * 8, 1), lambda n: (0, 0)),
        ],
        out_specs=pl.BlockSpec((None, Cout * 8, dhw), lambda n: (n, 0, 0)),
        out_shape=jax.ShapeDtypeStruct((N, Cout * 8, dhw), F32),
        compiler_params=pltpu.CompilerParams(
            dimension_semantics=("parallel",),
            vmem_limit_bytes=_VMEM_LIMIT),
    )(x_flat, w_mat, b_col)

    # un-shuffle the 8 stride-2 taps back into fine spatial positions (small tensor)
    y = y8.reshape(N, Cout, 2, 2, 2, Dc, Hc, Wc)
    y = jnp.transpose(y, (0, 1, 5, 2, 6, 3, 7, 4))
    return y.reshape(N, Cout, 2 * Dc, 2 * Hc, 2 * Wc)


def conv3d_in_relu(xf_groups, weight, bias, spatial):
    """Fused [concat ->] Conv3d(k=3,p=1) -> InstanceNorm3d -> ReLU.

    xf_groups: list of padded-flat (N, C_g, L) activations (channel-concat order).
    weight: (c_out, sum(C_g), 3, 3, 3);  bias: (c_out,).
    Returns (N, c_out, Q) in lane-dense q-format.
    """
    Dz, Hz, Wz = spatial
    _, Wp, plane, q_len, base = _spatial_consts(Dz, Hz, Wz)
    lin = q_len + 2 * base
    N = xf_groups[0].shape[0]
    c_out = weight.shape[0]
    gch = [int(x.shape[1]) for x in xf_groups]
    assert sum(gch) == weight.shape[1]
    assert all(int(x.shape[2]) == lin for x in xf_groups)

    # split the weight along Cin to match the fused concat groups; reorder each to
    # (27, c_out, C_g) so taps index the cheap leading dim inside the kernel.
    w_groups, off = [], 0
    for cg in gch:
        wg = weight[:, off:off + cg]
        w_groups.append(
            jnp.transpose(wg, (2, 3, 4, 0, 1)).reshape(27, c_out, cg).astype(F32))
        off += cg

    mask = _valid_mask(Dz, Hz, Wz)
    b_col = bias.reshape(c_out, 1).astype(F32)

    n_groups = len(xf_groups)
    kernel = _make_conv_in_relu_kernel(
        n_groups, c_out, q_len, plane, Wp, n_valid=Dz * Hz * Wz)

    in_specs = (
        [pl.BlockSpec((None, cg, lin), lambda n: (n, 0, 0)) for cg in gch]
        + [pl.BlockSpec((27, c_out, cg), lambda n: (0, 0, 0)) for cg in gch]
        + [pl.BlockSpec((c_out, 1), lambda n: (0, 0)),
           pl.BlockSpec((1, q_len), lambda n: (0, 0))]
    )

    cin_tot = sum(gch)
    cost = pl.CostEstimate(
        flops=int(2 * N * c_out * cin_tot * 27 * q_len),
        transcendentals=int(N * c_out),
        bytes_accessed=int(4 * (N * cin_tot * lin + N * c_out * q_len
                                + 27 * c_out * cin_tot)))

    operands = [x.astype(F32) for x in xf_groups] + w_groups + [b_col, mask]
    return pl.pallas_call(
        kernel,
        grid=(N,),
        in_specs=in_specs,
        out_specs=pl.BlockSpec((None, c_out, q_len), lambda n: (n, 0, 0)),
        out_shape=jax.ShapeDtypeStruct((N, c_out, q_len), F32),
        compiler_params=pltpu.CompilerParams(
            dimension_semantics=("parallel",),
            vmem_limit_bytes=_VMEM_LIMIT),
        cost_estimate=cost,
    )(*operands)


# ---------------------------------------------------------------------------
# Up.forward
# ---------------------------------------------------------------------------
def up_forward(x1, x2, params):
    N, C2, Dz, Hz, Wz = x2.shape
    spatial = (Dz, Hz, Wz)
    # up_conv
    x1u = conv_transpose3d_k2s2(x1, params["up_w"], params["up_b"])
    # DoubleConv stage 1: concat([x2, x1u]) fused into the conv as two input groups
    h = conv3d_in_relu([ncdhw_to_flat(x2), ncdhw_to_flat(x1u)],
                       params["c1_w"], params["c1_b"], spatial)
    # DoubleConv stage 2 (input already flat up to the lane-margin pad)
    h = conv3d_in_relu([qflat_to_flat(h, spatial)],
                       params["c2_w"], params["c2_b"], spatial)
    return qflat_to_ncdhw(h, spatial)


# ---------------------------------------------------------------------------
# pure-JAX reference (for a sanity check against the PyTorch semantics)
# ---------------------------------------------------------------------------
def _conv3d_ref(x, w, b):
    y = jax.lax.conv_general_dilated(
        x, w, window_strides=(1, 1, 1), padding=((1, 1), (1, 1), (1, 1)),
        dimension_numbers=("NCDHW", "OIDHW", "NCDHW"),
        precision=jax.lax.Precision.HIGHEST)
    return y + b[None, :, None, None, None]


def _instnorm_relu_ref(x):
    mean = jnp.mean(x, axis=(2, 3, 4), keepdims=True)
    var = jnp.mean(jnp.square(x - mean), axis=(2, 3, 4), keepdims=True)
    return jnp.maximum((x - mean) * jax.lax.rsqrt(var + EPS), 0.0)


def up_forward_ref(x1, x2, params):
    w, b = params["up_w"], params["up_b"]
    N, Ci, D, H, W = x1.shape
    Co = w.shape[1]
    y = jnp.einsum("nidhw,ioabc->nodahbwc", x1, w,
                   precision=jax.lax.Precision.HIGHEST)
    y = y.reshape(N, Co, 2 * D, 2 * H, 2 * W) + b[None, :, None, None, None]
    x = jnp.concatenate([x2, y], axis=1)
    h = _instnorm_relu_ref(_conv3d_ref(x, params["c1_w"], params["c1_b"]))
    h = _instnorm_relu_ref(_conv3d_ref(h, params["c2_w"], params["c2_b"]))
    return h


# ---------------------------------------------------------------------------
# main
# ---------------------------------------------------------------------------
if __name__ == "__main__":
    key = jax.random.PRNGKey(0)
    k = jax.random.split(key, 8)

    # Small UNet-like shapes: c_in = 4 (coarse features), c_out = 2 (skip features).
    N, c_in, c_out = 2, 4, 2
    D = H = W = 4  # coarse spatial; upsampled to 8

    x1 = jax.random.normal(k[0], (N, c_in, D, H, W), F32)                 # coarse input
    x2 = jax.random.normal(k[1], (N, c_out, 2 * D, 2 * H, 2 * W), F32)    # skip

    params = {
        # ConvTranspose3d(c_in, c_out, kernel_size=2, stride=2): weight (c_in, c_out, 2,2,2)
        "up_w": 0.1 * jax.random.normal(k[2], (c_in, c_out, 2, 2, 2), F32),
        "up_b": 0.01 * jax.random.normal(k[3], (c_out,), F32),
        # Conv3d(c_in, c_out, 3, padding=1)
        "c1_w": 0.1 * jax.random.normal(k[4], (c_out, c_in, 3, 3, 3), F32),
        "c1_b": 0.01 * jax.random.normal(k[5], (c_out,), F32),
        # Conv3d(c_out, c_out, 3, padding=1)
        "c2_w": 0.1 * jax.random.normal(k[6], (c_out, c_out, 3, 3, 3), F32),
        "c2_b": 0.01 * jax.random.normal(k[7], (c_out,), F32),
    }

    out = jax.jit(up_forward)(x1, x2, params)
    out = jax.block_until_ready(out)

    assert out.shape == (N, c_out, 2 * D, 2 * H, 2 * W), out.shape
    assert bool(jnp.all(jnp.isfinite(out)))
    assert bool(jnp.all(out >= 0.0))  # final ReLU

    ref = jax.block_until_ready(up_forward_ref(x1, x2, params))
    err = float(jnp.max(jnp.abs(out - ref)))
    assert err < 3e-2, f"mismatch vs pure-JAX reference: max|diff|={err}"

    print("KERNEL_OK")
</pallas_src>

<mosaic_0001>
module attributes {stable_mosaic.version = 11 : i64} {
  func.func @_upconv_kernel(%arg0: i32, %arg1: memref<1x4x64xf32, #tpu.memory_space<vmem>>, %arg2: memref<16x4xf32, #tpu.memory_space<vmem>>, %arg3: memref<16x1xf32, #tpu.memory_space<vmem>>, %arg4: memref<1x16x64xf32, #tpu.memory_space<vmem>>) attributes {dimension_semantics = [#tpu.dimension_semantics<parallel>], iteration_bounds = array<i64: 2>, scalar_prefetch = 0 : i64, scratch_operands = 0 : i64, tpu.core_type = #tpu.core_type<tc>, window_params = [{transform_indices = @transform_0, window_bounds = array<i64: 1, 4, 64>}, {pipeline_mode = #tpu.pipeline_mode<synchronous>, transform_indices = @transform_1, window_bounds = array<i64: 16, 4>}, {pipeline_mode = #tpu.pipeline_mode<synchronous>, transform_indices = @transform_2, window_bounds = array<i64: 16, 1>}, {transform_indices = @transform_3, window_bounds = array<i64: 1, 16, 64>}]} {
    %c0 = arith.constant 0 : index
    %c0_0 = arith.constant 0 : index
    %0 = vector.load %arg2[%c0, %c0_0] : memref<16x4xf32, #tpu.memory_space<vmem>>, vector<16x4xf32>
    %c0_1 = arith.constant 0 : index
    %c0_2 = arith.constant 0 : index
    %c0_3 = arith.constant 0 : index
    %1 = vector.load %arg1[%c0_1, %c0_2, %c0_3] : memref<1x4x64xf32, #tpu.memory_space<vmem>>, vector<1x4x64xf32>
    %2 = vector.shape_cast %1 : vector<1x4x64xf32> to vector<4x64xf32>
    %cst = arith.constant dense<0.000000e+00> : vector<16x64xf32>
    %3 = tpu.matmul %0, %2, %cst {dimension_numbers = #tpu.dot_dimension_numbers<[1], [0], [0], [1], [0, 0, 1, 1], [], []>} : vector<16x4xf32>, vector<4x64xf32>, vector<16x64xf32> -> vector<16x64xf32>
    %c0_4 = arith.constant 0 : index
    %c0_5 = arith.constant 0 : index
    %4 = vector.load %arg3[%c0_4, %c0_5] : memref<16x1xf32, #tpu.memory_space<vmem>>, vector<16x1xf32>
    %5 = vector.broadcast %4 : vector<16x1xf32> to vector<16x64xf32>
    %6 = arith.addf %3, %5 : vector<16x64xf32>
    %c0_6 = arith.constant 0 : index
    %c0_7 = arith.constant 0 : index
    %c0_8 = arith.constant 0 : index
    %7 = vector.load %arg4[%c0_6, %c0_7, %c0_8] : memref<1x16x64xf32, #tpu.memory_space<vmem>>, vector<1x16x64xf32>
    %8 = vector.shape_cast %7 : vector<1x16x64xf32> to vector<16x64xf32>
    %9 = vector.shape_cast %6 : vector<16x64xf32> to vector<1x16x64xf32>
    tpu.vector_store %arg4[%c0_6, %c0_7, %c0_8], %9 {strides = array<i32>} : memref<1x16x64xf32, #tpu.memory_space<vmem>>, vector<1x16x64xf32>,
    return
  }
  func.func @transform_0(%arg0: i32) -> (i32, i32, i32) {
    %c0_i32 = arith.constant 0 : i32
    %c0_i32_0 = arith.constant 0 : i32
    %c0_i32_1 = arith.constant 0 : i32
    return %arg0, %c0_i32, %c0_i32_0 : i32, i32, i32
  }
  func.func @transform_1(%arg0: i32) -> (i32, i32) {
    %c0_i32 = arith.constant 0 : i32
    %c0_i32_0 = arith.constant 0 : i32
    %c0_i32_1 = arith.constant 0 : i32
    return %c0_i32, %c0_i32_0 : i32, i32
  }
  func.func @transform_2(%arg0: i32) -> (i32, i32) {
    %c0_i32 = arith.constant 0 : i32
    %c0_i32_0 = arith.constant 0 : i32
    %c0_i32_1 = arith.constant 0 : i32
    return %c0_i32, %c0_i32_0 : i32, i32
  }
  func.func @transform_3(%arg0: i32) -> (i32, i32, i32) {
    %c0_i32 = arith.constant 0 : i32
    %c0_i32_0 = arith.constant 0 : i32
    %c0_i32_1 = arith.constant 0 : i32
    return %arg0, %c0_i32, %c0_i32_0 : i32, i32, i32
  }
}

module attributes {stable_mosaic.version = 11 : i64} {
  func.func @kernel(%arg0: i32, %arg1: memref<1x2x1022xf32, #tpu.memory_space<vmem>>, %arg2: memref<1x2x1022xf32, #tpu.memory_space<vmem>>, %arg3: memref<27x2x2xf32, #tpu.memory_space<vmem>>, %arg4: memref<27x2x2xf32, #tpu.memory_space<vmem>>, %arg5: memref<2x1xf32, #tpu.memory_space<vmem>>, %arg6: memref<1x800xf32, #tpu.memory_space<vmem>>, %arg7: memref<1x2x800xf32, #tpu.memory_space<vmem>>) attributes {dimension_semantics = [#tpu.dimension_semantics<parallel>], iteration_bounds = array<i64: 2>, scalar_prefetch = 0 : i64, scratch_operands = 0 : i64, tpu.core_type = #tpu.core_type<tc>, window_params = [{transform_indices = @transform_0, window_bounds = array<i64: 1, 2, 1022>}, {transform_indices = @transform_1, window_bounds = array<i64: 1, 2, 1022>}, {pipeline_mode = #tpu.pipeline_mode<synchronous>, transform_indices = @transform_2, window_bounds = array<i64: 27, 2, 2>}, {pipeline_mode = #tpu.pipeline_mode<synchronous>, transform_indices = @transform_3, window_bounds = array<i64: 27, 2, 2>}, {pipeline_mode = #tpu.pipeline_mode<synchronous>, transform_indices = @transform_4, window_bounds = array<i64: 2, 1>}, {pipeline_mode = #tpu.pipeline_mode<synchronous>, transform_indices = @transform_5, window_bounds = array<i64: 1, 800>}, {transform_indices = @transform_6, window_bounds = array<i64: 1, 2, 800>}]} {
    %cst = arith.constant 0.000000e+00 : f32
    %0 = vector.broadcast %cst : f32 to vector<2x800xf32>
    %c0 = arith.constant 0 : index
    %c0_0 = arith.constant 0 : index
    %c0_1 = arith.constant 0 : index
    %1 = vector.load %arg3[%c0, %c0_0, %c0_1] : memref<27x2x2xf32, #tpu.memory_space<vmem>>, vector<1x2x2xf32>
    %2 = vector.shape_cast %1 : vector<1x2x2xf32> to vector<2x2xf32>
    %c0_2 = arith.constant 0 : index
    %c0_3 = arith.constant 0 : index
    %c0_4 = arith.constant 0 : index
    %3 = vector.load %arg1[%c0_2, %c0_3, %c0_4] : memref<1x2x1022xf32, #tpu.memory_space<vmem>>, vector<1x2x800xf32>
    %4 = vector.shape_cast %3 : vector<1x2x800xf32> to vector<2x800xf32>
    %cst_5 = arith.constant dense<0.000000e+00> : vector<2x800xf32>
    %5 = tpu.matmul %2, %4, %cst_5 {dimension_numbers = #tpu.dot_dimension_numbers<[1], [0], [0], [1], [0, 0, 1, 1], [], []>} : vector<2x2xf32>, vector<2x800xf32>, vector<2x800xf32> -> vector<2x800xf32>
    %6 = arith.addf %0, %5 : vector<2x800xf32>
    %c1 = arith.constant 1 : index
    %c0_6 = arith.constant 0 : index
    %c0_7 = arith.constant 0 : index
    %7 = vector.load %arg3[%c1, %c0_6, %c0_7] : memref<27x2x2xf32, #tpu.memory_space<vmem>>, vector<1x2x2xf32>
    %8 = vector.shape_cast %7 : vector<1x2x2xf32> to vector<2x2xf32>
    %c0_8 = arith.constant 0 : index
    %c0_9 = arith.constant 0 : index
    %c1_10 = arith.constant 1 : index
    %9 = vector.load %arg1[%c0_8, %c0_9, %c1_10] : memref<1x2x1022xf32, #tpu.memory_space<vmem>>, vector<1x2x800xf32>
    %10 = vector.shape_cast %9 : vector<1x2x800xf32> to vector<2x800xf32>
    %cst_11 = arith.constant dense<0.000000e+00> : vector<2x800xf32>
    %11 = tpu.matmul %8, %10, %cst_11 {dimension_numbers = #tpu.dot_dimension_numbers<[1], [0], [0], [1], [0, 0, 1, 1], [], []>} : vector<2x2xf32>, vector<2x800xf32>, vector<2x800xf32> -> vector<2x800xf32>
    %12 = arith.addf %6, %11 : vector<2x800xf32>
    %c2 = arith.constant 2 : index
    %c0_12 = arith.constant 0 : index
    %c0_13 = arith.constant 0 : index
    %13 = vector.load %arg3[%c2, %c0_12, %c0_13] : memref<27x2x2xf32, #tpu.memory_space<vmem>>, vector<1x2x2xf32>
    %14 = vector.shape_cast %13 : vector<1x2x2xf32> to vector<2x2xf32>
    %c0_14 = arith.constant 0 : index
    %c0_15 = arith.constant 0 : index
    %c2_16 = arith.constant 2 : index
    %15 = vector.load %arg1[%c0_14, %c0_15, %c2_16] : memref<1x2x1022xf32, #tpu.memory_space<vmem>>, vector<1x2x800xf32>
    %16 = vector.shape_cast %15 : vector<1x2x800xf32> to vector<2x800xf32>
    %cst_17 = arith.constant dense<0.000000e+00> : vector<2x800xf32>
    %17 = tpu.matmul %14, %16, %cst_17 {dimension_numbers = #tpu.dot_dimension_numbers<[1], [0], [0], [1], [0, 0, 1, 1], [], []>} : vector<2x2xf32>, vector<2x800xf32>, vector<2x800xf32> -> vector<2x800xf32>
    %18 = arith.addf %12, %17 : vector<2x800xf32>
    %c3 = arith.constant 3 : index
    %c0_18 = arith.constant 0 : index
    %c0_19 = arith.constant 0 : index
    %19 = vector.load %arg3[%c3, %c0_18, %c0_19] : memref<27x2x2xf32, #tpu.memory_space<vmem>>, vector<1x2x2xf32>
    %20 = vector.shape_cast %19 : vector<1x2x2xf32> to vector<2x2xf32>
    %c0_20 = arith.constant 0 : index
    %c0_21 = arith.constant 0 : index
    %c10 = arith.constant 10 : index
    %21 = vector.load %arg1[%c0_20, %c0_21, %c10] : memref<1x2x1022xf32, #tpu.memory_space<vmem>>, vector<1x2x800xf32>
    %22 = vector.shape_cast %21 : vector<1x2x800xf32> to vector<2x800xf32>
    %cst_22 = arith.constant dense<0.000000e+00> : vector<2x800xf32>
    %23 = tpu.matmul %20, %22, %cst_22 {dimension_numbers = #tpu.dot_dimension_numbers<[1], [0], [0], [1], [0, 0, 1, 1], [], []>} : vector<2x2xf32>, vector<2x800xf32>, vector<2x800xf32> -> vector<2x800xf32>
    %24 = arith.addf %18, %23 : vector<2x800xf32>
    %c4 = arith.constant 4 : index
    %c0_23 = arith.constant 0 : index
    %c0_24 = arith.constant 0 : index
    %25 = vector.load %arg3[%c4, %c0_23, %c0_24] : memref<27x2x2xf32, #tpu.memory_space<vmem>>, vector<1x2x2xf32>
    %26 = vector.shape_cast %25 : vector<1x2x2xf32> to vector<2x2xf32>
    %c0_25 = arith.constant 0 : index
    %c0_26 = arith.constant 0 : index
    %c11 = arith.constant 11 : index
    %27 = vector.load %arg1[%c0_25, %c0_26, %c11] : memref<1x2x1022xf32, #tpu.memory_space<vmem>>, vector<1x2x800xf32>
    %28 = vector.shape_cast %27 : vector<1x2x800xf32> to vector<2x800xf32>
    %cst_27 = arith.constant dense<0.000000e+00> : vector<2x800xf32>
    %29 = tpu.matmul %26, %28, %cst_27 {dimension_numbers = #tpu.dot_dimension_numbers<[1], [0], [0], [1], [0, 0, 1, 1], [], []>} : vector<2x2xf32>, vector<2x800xf32>, vector<2x800xf32> -> vector<2x800xf32>
    %30 = arith.addf %24, %29 : vector<2x800xf32>
    %c5 = arith.constant 5 : index
    %c0_28 = arith.constant 0 : index
    %c0_29 = arith.constant 0 : index
    %31 = vector.load %arg3[%c5, %c0_28, %c0_29] : memref<27x2x2xf32, #tpu.memory_space<vmem>>, vector<1x2x2xf32>
    %32 = vector.shape_cast %31 : vector<1x2x2xf32> to vector<2x2xf32>
    %c0_30 = arith.constant 0 : index
    %c0_31 = arith.constant 0 : index
    %c12 = arith.constant 12 : index
    %33 = vector.load %arg1[%c0_30, %c0_31, %c12] : memref<1x2x1022xf32, #tpu.memory_space<vmem>>, vector<1x2x800xf32>
    %34 = vector.shape_cast %33 : vector<1x2x800xf32> to vector<2x800xf32>
    %cst_32 = arith.constant dense<0.000000e+00> : vector<2x800xf32>
    %35 = tpu.matmul %32, %34, %cst_32 {dimension_numbers = #tpu.dot_dimension_numbers<[1], [0], [0], [1], [0, 0, 1, 1], [], []>} : vector<2x2xf32>, vector<2x800xf32>, vector<2x800xf32> -> vector<2x800xf32>
    %36 = arith.addf %30, %35 : vector<2x800xf32>
    %c6 = arith.constant 6 : index
    %c0_33 = arith.constant 0 : index
    %c0_34 = arith.constant 0 : index
    %37 = vector.load %arg3[%c6, %c0_33, %c0_34] : memref<27x2x2xf32, #tpu.memory_space<vmem>>, vector<1x2x2xf32>
    %38 = vector.shape_cast %37 : vector<1x2x2xf32> to vector<2x2xf32>
    %c0_35 = arith.constant 0 : index
    %c0_36 = arith.constant 0 : index
    %c20 = arith.constant 20 : index
    %39 = vector.load %arg1[%c0_35, %c0_36, %c20] : memref<1x2x1022xf32, #tpu.memory_space<vmem>>, vector<1x2x800xf32>
    %40 = vector.shape_cast %39 : vector<1x2x800xf32> to vector<2x800xf32>
    %cst_37 = arith.constant dense<0.000000e+00> : vector<2x800xf32>
    %41 = tpu.matmul %38, %40, %cst_37 {dimension_numbers = #tpu.dot_dimension_numbers<[1], [0], [0], [1], [0, 0, 1, 1], [], []>} : vector<2x2xf32>, vector<2x800xf32>, vector<2x800xf32> -> vector<2x800xf32>
    %42 = arith.addf %36, %41 : vector<2x800xf32>
    %c7 = arith.constant 7 : index
    %c0_38 = arith.constant 0 : index
    %c0_39 = arith.constant 0 : index
    %43 = vector.load %arg3[%c7, %c0_38, %c0_39] : memref<27x2x2xf32, #tpu.memory_space<vmem>>, vector<1x2x2xf32>
    %44 = vector.shape_cast %43 : vector<1x2x2xf32> to vector<2x2xf32>
    %c0_40 = arith.constant 0 : index
    %c0_41 = arith.constant 0 : index
    %c21 = arith.constant 21 : index
    %45 = vector.load %arg1[%c0_40, %c0_41, %c21] : memref<1x2x1022xf32, #tpu.memory_space<vmem>>, vector<1x2x800xf32>
    %46 = vector.shape_cast %45 : vector<1x2x800xf32> to vector<2x800xf32>
    %cst_42 = arith.constant dense<0.000000e+00> : vector<2x800xf32>
    %47 = tpu.matmul %44, %46, %cst_42 {dimension_numbers = #tpu.dot_dimension_numbers<[1], [0], [0], [1], [0, 0, 1, 1], [], []>} : vector<2x2xf32>, vector<2x800xf32>, vector<2x800xf32> -> vector<2x800xf32>
    %48 = arith.addf %42, %47 : vector<2x800xf32>
    %c8 = arith.constant 8 : index
    %c0_43 = arith.constant 0 : index
    %c0_44 = arith.constant 0 : index
    %49 = vector.load %arg3[%c8, %c0_43, %c0_44] : memref<27x2x2xf32, #tpu.memory_space<vmem>>, vector<1x2x2xf32>
    %50 = vector.shape_cast %49 : vector<1x2x2xf32> to vector<2x2xf32>
    %c0_45 = arith.constant 0 : index
    %c0_46 = arith.constant 0 : index
    %c22 = arith.constant 22 : index
    %51 = vector.load %arg1[%c0_45, %c0_46, %c22] : memref<1x2x1022xf32, #tpu.memory_space<vmem>>, vector<1x2x800xf32>
    %52 = vector.shape_cast %51 : vector<1x2x800xf32> to vector<2x800xf32>
    %cst_47 = arith.constant dense<0.000000e+00> : vector<2x800xf32>
    %53 = tpu.matmul %50, %52, %cst_47 {dimension_numbers = #tpu.dot_dimension_numbers<[1], [0], [0], [1], [0, 0, 1, 1], [], []>} : vector<2x2xf32>, vector<2x800xf32>, vector<2x800xf32> -> vector<2x800xf32>
    %54 = arith.addf %48, %53 : vector<2x800xf32>
    %c9 = arith.constant 9 : index
    %c0_48 = arith.constant 0 : index
    %c0_49 = arith.constant 0 : index
    %55 = vector.load %arg3[%c9, %c0_48, %c0_49] : memref<27x2x2xf32, #tpu.memory_space<vmem>>, vector<1x2x2xf32>
    %56 = vector.shape_cast %55 : vector<1x2x2xf32> to vector<2x2xf32>
    %c0_50 = arith.constant 0 : index
    %c0_51 = arith.constant 0 : index
    %c100 = arith.constant 100 : index
    %57 = vector.load %arg1[%c0_50, %c0_51, %c100] : memref<1x2x1022xf32, #tpu.memory_space<vmem>>, vector<1x2x800xf32>
    %58 = vector.shape_cast %57 : vector<1x2x800xf32> to vector<2x800xf32>
    %cst_52 = arith.constant dense<0.000000e+00> : vector<2x800xf32>
    %59 = tpu.matmul %56, %58, %cst_52 {dimension_numbers = #tpu.dot_dimension_numbers<[1], [0], [0], [1], [0, 0, 1, 1], [], []>} : vector<2x2xf32>, vector<2x800xf32>, vector<2x800xf32> -> vector<2x800xf32>
    %60 = arith.addf %54, %59 : vector<2x800xf32>
    %c10_53 = arith.constant 10 : index
    %c0_54 = arith.constant 0 : index
    %c0_55 = arith.constant 0 : index
    %61 = vector.load %arg3[%c10_53, %c0_54, %c0_55] : memref<27x2x2xf32, #tpu.memory_space<vmem>>, vector<1x2x2xf32>
    %62 = vector.shape_cast %61 : vector<1x2x2xf32> to vector<2x2xf32>
    %c0_56 = arith.constant 0 : index
    %c0_57 = arith.constant 0 : index
    %c101 = arith.constant 101 : index
    %63 = vector.load %arg1[%c0_56, %c0_57, %c101] : memref<1x2x1022xf32, #tpu.memory_space<vmem>>, vector<1x2x800xf32>
    %64 = vector.shape_cast %63 : vector<1x2x800xf32> to vector<2x800xf32>
    %cst_58 = arith.constant dense<0.000000e+00> : vector<2x800xf32>
    %65 = tpu.matmul %62, %64, %cst_58 {dimension_numbers = #tpu.dot_dimension_numbers<[1], [0], [0], [1], [0, 0, 1, 1], [], []>} : vector<2x2xf32>, vector<2x800xf32>, vector<2x800xf32> -> vector<2x800xf32>
    %66 = arith.addf %60, %65 : vector<2x800xf32>
    %c11_59 = arith.constant 11 : index
    %c0_60 = arith.constant 0 : index
    %c0_61 = arith.constant 0 : index
    %67 = vector.load %arg3[%c11_59, %c0_60, %c0_61] : memref<27x2x2xf32, #tpu.memory_space<vmem>>, vector<1x2x2xf32>
    %68 = vector.shape_cast %67 : vector<1x2x2xf32> to vector<2x2xf32>
    %c0_62 = arith.constant 0 : index
    %c0_63 = arith.constant 0 : index
    %c102 = arith.constant 102 : index
    %69 = vector.load %arg1[%c0_62, %c0_63, %c102] : memref<1x2x1022xf32, #tpu.memory_space<vmem>>, vector<1x2x800xf32>
    %70 = vector.shape_cast %69 : vector<1x2x800xf32> to vector<2x800xf32>
    %cst_64 = arith.constant dense<0.000000e+00> : vector<2x800xf32>
    %71 = tpu.matmul %68, %70, %cst_64 {dimension_numbers = #tpu.dot_dimension_numbers<[1], [0], [0], [1], [0, 0, 1, 1], [], []>} : vector<2x2xf32>, vector<2x800xf32>, vector<2x800xf32> -> vector<2x800xf32>
    %72 = arith.addf %66, %71 : vector<2x800xf32>
    %c12_65 = arith.constant 12 : index
    %c0_66 = arith.constant 0 : index
    %c0_67 = arith.constant 0 : index
    %73 = vector.load %arg3[%c12_65, %c0_66, %c0_67] : memref<27x2x2xf32, #tpu.memory_space<vmem>>, vector<1x2x2xf32>
    %74 = vector.shape_cast %73 : vector<1x2x2xf32> to vector<2x2xf32>
    %c0_68 = arith.constant 0 : index
    %c0_69 = arith.constant 0 : index
    %c110 = arith.constant 110 : index
    %75 = vector.load %arg1[%c0_68, %c0_69, %c110] : memref<1x2x1022xf32, #tpu.memory_space<vmem>>, vector<1x2x800xf32>
    %76 = vector.shape_cast %75 : vector<1x2x800xf32> to vector<2x800xf32>
    %cst_70 = arith.constant dense<0.000000e+00> : vector<2x800xf32>
    %77 = tpu.matmul %74, %76, %cst_70 {dimension_numbers = #tpu.dot_dimension_numbers<[1], [0], [0], [1], [0, 0, 1, 1], [], []>} : vector<2x2xf32>, vector<2x800xf32>, vector<2x800xf32> -> vector<2x800xf32>
    %78 = arith.addf %72, %77 : vector<2x800xf32>
    %c13 = arith.constant 13 : index
    %c0_71 = arith.constant 0 : index
    %c0_72 = arith.constant 0 : index
    %79 = vector.load %arg3[%c13, %c0_71, %c0_72] : memref<27x2x2xf32, #tpu.memory_space<vmem>>, vector<1x2x2xf32>
    %80 = vector.shape_cast %79 : vector<1x2x2xf32> to vector<2x2xf32>
    %c0_73 = arith.constant 0 : index
    %c0_74 = arith.constant 0 : index
    %c111 = arith.constant 111 : index
    %81 = vector.load %arg1[%c0_73, %c0_74, %c111] : memref<1x2x1022xf32, #tpu.memory_space<vmem>>, vector<1x2x800xf32>
    %82 = vector.shape_cast %81 : vector<1x2x800xf32> to vector<2x800xf32>
    %cst_75 = arith.constant dense<0.000000e+00> : vector<2x800xf32>
    %83 = tpu.matmul %80, %82, %cst_75 {dimension_numbers = #tpu.dot_dimension_numbers<[1], [0], [0], [1], [0, 0, 1, 1], [], []>} : vector<2x2xf32>, vector<2x800xf32>, vector<2x800xf32> -> vector<2x800xf32>
    %84 = arith.addf %78, %83 : vector<2x800xf32>
    %c14 = arith.constant 14 : index
    %c0_76 = arith.constant 0 : index
    %c0_77 = arith.constant 0 : index
    %85 = vector.load %arg3[%c14, %c0_76, %c0_77] : memref<27x2x2xf32, #tpu.memory_space<vmem>>, vector<1x2x2xf32>
    %86 = vector.shape_cast %85 : vector<1x2x2xf32> to vector<2x2xf32>
    %c0_78 = arith.constant 0 : index
    %c0_79 = arith.constant 0 : index
    %c112 = arith.constant 112 : index
    %87 = vector.load %arg1[%c0_78, %c0_79, %c112] : memref<1x2x1022xf32, #tpu.memory_space<vmem>>, vector<1x2x800xf32>
    %88 = vector.shape_cast %87 : vector<1x2x800xf32> to vector<2x800xf32>
    %cst_80 = arith.constant dense<0.000000e+00> : vector<2x800xf32>
    %89 = tpu.matmul %86, %88, %cst_80 {dimension_numbers = #tpu.dot_dimension_numbers<[1], [0], [0], [1], [0, 0, 1, 1], [], []>} : vector<2x2xf32>, vector<2x800xf32>, vector<2x800xf32> -> vector<2x800xf32>
    %90 = arith.addf %84, %89 : vector<2x800xf32>
    %c15 = arith.constant 15 : index
    %c0_81 = arith.constant 0 : index
    %c0_82 = arith.constant 0 : index
    %91 = vector.load %arg3[%c15, %c0_81, %c0_82] : memref<27x2x2xf32, #tpu.memory_space<vmem>>, vector<1x2x2xf32>
    %92 = vector.shape_cast %91 : vector<1x2x2xf32> to vector<2x2xf32>
    %c0_83 = arith.constant 0 : index
    %c0_84 = arith.constant 0 : index
    %c120 = arith.constant 120 : index
    %93 = vector.load %arg1[%c0_83, %c0_84, %c120] : memref<1x2x1022xf32, #tpu.memory_space<vmem>>, vector<1x2x800xf32>
    %94 = vector.shape_cast %93 : vector<1x2x800xf32> to vector<2x800xf32>
    %cst_85 = arith.constant dense<0.000000e+00> : vector<2x800xf32>
    %95 = tpu.matmul %92, %94, %cst_85 {dimension_numbers = #tpu.dot_dimension_numbers<[1], [0], [0], [1], [0, 0, 1, 1], [], []>} : vector<2x2xf32>, vector<2x800xf32>, vector<2x800xf32> -> vector<2x800xf32>
    %96 = arith.addf %90, %95 : vector<2x800xf32>
    %c16 = arith.constant 16 : index
    %c0_86 = arith.constant 0 : index
    %c0_87 = arith.constant 0 : index
    %97 = vector.load %arg3[%c16, %c0_86, %c0_87] : memref<27x2x2xf32, #tpu.memory_space<vmem>>, vector<1x2x2xf32>
    %98 = vector.shape_cast %97 : vector<1x2x2xf32> to vector<2x2xf32>
    %c0_88 = arith.constant 0 : index
    %c0_89 = arith.constant 0 : index
    %c121 = arith.constant 121 : index
    %99 = vector.load %arg1[%c0_88, %c0_89, %c121] : memref<1x2x1022xf32, #tpu.memory_space<vmem>>, vector<1x2x800xf32>
    %100 = vector.shape_cast %99 : vector<1x2x800xf32> to vector<2x800xf32>
    %cst_90 = arith.constant dense<0.000000e+00> : vector<2x800xf32>
    %101 = tpu.matmul %98, %100, %cst_90 {dimension_numbers = #tpu.dot_dimension_numbers<[1], [0], [0], [1], [0, 0, 1, 1], [], []>} : vector<2x2xf32>, vector<2x800xf32>, vector<2x800xf32> -> vector<2x800xf32>
    %102 = arith.addf %96, %101 : vector<2x800xf32>
    %c17 = arith.constant 17 : index
    %c0_91 = arith.constant 0 : index
    %c0_92 = arith.constant 0 : index
    %103 = vector.load %arg3[%c17, %c0_91, %c0_92] : memref<27x2x2xf32, #tpu.memory_space<vmem>>, vector<1x2x2xf32>
    %104 = vector.shape_cast %103 : vector<1x2x2xf32> to vector<2x2xf32>
    %c0_93 = arith.constant 0 : index
    %c0_94 = arith.constant 0 : index
    %c122 = arith.constant 122 : index
    %105 = vector.load %arg1[%c0_93, %c0_94, %c122] : memref<1x2x1022xf32, #tpu.memory_space<vmem>>, vector<1x2x800xf32>
    %106 = vector.shape_cast %105 : vector<1x2x800xf32> to vector<2x800xf32>
    %cst_95 = arith.constant dense<0.000000e+00> : vector<2x800xf32>
    %107 = tpu.matmul %104, %106, %cst_95 {dimension_numbers = #tpu.dot_dimension_numbers<[1], [0], [0], [1], [0, 0, 1, 1], [], []>} : vector<2x2xf32>, vector<2x800xf32>, vector<2x800xf32> -> vector<2x800xf32>
    %108 = arith.addf %102, %107 : vector<2x800xf32>
    %c18 = arith.constant 18 : index
    %c0_96 = arith.constant 0 : index
    %c0_97 = arith.constant 0 : index
    %109 = vector.load %arg3[%c18, %c0_96, %c0_97] : memref<27x2x2xf32, #tpu.memory_space<vmem>>, vector<1x2x2xf32>
    %110 = vector.shape_cast %109 : vector<1x2x2xf32> to vector<2x2xf32>
    %c0_98 = arith.constant 0 : index
    %c0_99 = arith.constant 0 : index
    %c200 = arith.constant 200 : index
    %111 = vector.load %arg1[%c0_98, %c0_99, %c200] : memref<1x2x1022xf32, #tpu.memory_space<vmem>>, vector<1x2x800xf32>
    %112 = vector.shape_cast %111 : vector<1x2x800xf32> to vector<2x800xf32>
    %cst_100 = arith.constant dense<0.000000e+00> : vector<2x800xf32>
    %113 = tpu.matmul %110, %112, %cst_100 {dimension_numbers = #tpu.dot_dimension_numbers<[1], [0], [0], [1], [0, 0, 1, 1], [], []>} : vector<2x2xf32>, vector<2x800xf32>, vector<2x800xf32> -> vector<2x800xf32>
    %114 = arith.addf %108, %113 : vector<2x800xf32>
    %c19 = arith.constant 19 : index
    %c0_101 = arith.constant 0 : index
    %c0_102 = arith.constant 0 : index
    %115 = vector.load %arg3[%c19, %c0_101, %c0_102] : memref<27x2x2xf32, #tpu.memory_space<vmem>>, vector<1x2x2xf32>
    %116 = vector.shape_cast %115 : vector<1x2x2xf32> to vector<2x2xf32>
    %c0_103 = arith.constant 0 : index
    %c0_104 = arith.constant 0 : index
    %c201 = arith.constant 201 : index
    %117 = vector.load %arg1[%c0_103, %c0_104, %c201] : memref<1x2x1022xf32, #tpu.memory_space<vmem>>, vector<1x2x800xf32>
    %118 = vector.shape_cast %117 : vector<1x2x800xf32> to vector<2x800xf32>
    %cst_105 = arith.constant dense<0.000000e+00> : vector<2x800xf32>
    %119 = tpu.matmul %116, %118, %cst_105 {dimension_numbers = #tpu.dot_dimension_numbers<[1], [0], [0], [1], [0, 0, 1, 1], [], []>} : vector<2x2xf32>, vector<2x800xf32>, vector<2x800xf32> -> vector<2x800xf32>
    %120 = arith.addf %114, %119 : vector<2x800xf32>
    %c20_106 = arith.constant 20 : index
    %c0_107 = arith.constant 0 : index
    %c0_108 = arith.constant 0 : index
    %121 = vector.load %arg3[%c20_106, %c0_107, %c0_108] : memref<27x2x2xf32, #tpu.memory_space<vmem>>, vector<1x2x2xf32>
    %122 = vector.shape_cast %121 : vector<1x2x2xf32> to vector<2x2xf32>
    %c0_109 = arith.constant 0 : index
    %c0_110 = arith.constant 0 : index
    %c202 = arith.constant 202 : index
    %123 = vector.load %arg1[%c0_109, %c0_110, %c202] : memref<1x2x1022xf32, #tpu.memory_space<vmem>>, vector<1x2x800xf32>
    %124 = vector.shape_cast %123 : vector<1x2x800xf32> to vector<2x800xf32>
    %cst_111 = arith.constant dense<0.000000e+00> : vector<2x800xf32>
    %125 = tpu.matmul %122, %124, %cst_111 {dimension_numbers = #tpu.dot_dimension_numbers<[1], [0], [0], [1], [0, 0, 1, 1], [], []>} : vector<2x2xf32>, vector<2x800xf32>, vector<2x800xf32> -> vector<2x800xf32>
    %126 = arith.addf %120, %125 : vector<2x800xf32>
    %c21_112 = arith.constant 21 : index
    %c0_113 = arith.constant 0 : index
    %c0_114 = arith.constant 0 : index
    %127 = vector.load %arg3[%c21_112, %c0_113, %c0_114] : memref<27x2x2xf32, #tpu.memory_space<vmem>>, vector<1x2x2xf32>
    %128 = vector.shape_cast %127 : vector<1x2x2xf32> to vector<2x2xf32>
    %c0_115 = arith.constant 0 : index
    %c0_116 = arith.constant 0 : index
    %c210 = arith.constant 210 : index
    %129 = vector.load %arg1[%c0_115, %c0_116, %c210] : memref<1x2x1022xf32, #tpu.memory_space<vmem>>, vector<1x2x800xf32>
    %130 = vector.shape_cast %129 : vector<1x2x800xf32> to vector<2x800xf32>
    %cst_117 = arith.constant dense<0.000000e+00> : vector<2x800xf32>
    %131 = tpu.matmul %128, %130, %cst_117 {dimension_numbers = #tpu.dot_dimension_numbers<[1], [0], [0], [1], [0, 0, 1, 1], [], []>} : vector<2x2xf32>, vector<2x800xf32>, vector<2x800xf32> -> vector<2x800xf32>
    %132 = arith.addf %126, %131 : vector<2x800xf32>
    %c22_118 = arith.constant 22 : index
    %c0_119 = arith.constant 0 : index
    %c0_120 = arith.constant 0 : index
    %133 = vector.load %arg3[%c22_118, %c0_119, %c0_120] : memref<27x2x2xf32, #tpu.memory_space<vmem>>, vector<1x2x2xf32>
    %134 = vector.shape_cast %133 : vector<1x2x2xf32> to vector<2x2xf32>
    %c0_121 = arith.constant 0 : index
    %c0_122 = arith.constant 0 : index
    %c211 = arith.constant 211 : index
    %135 = vector.load %arg1[%c0_121, %c0_122, %c211] : memref<1x2x1022xf32, #tpu.memory_space<vmem>>, vector<1x2x800xf32>
    %136 = vector.shape_cast %135 : vector<1x2x800xf32> to vector<2x800xf32>
    %cst_123 = arith.constant dense<0.000000e+00> : vector<2x800xf32>
    %137 = tpu.matmul %134, %136, %cst_123 {dimension_numbers = #tpu.dot_dimension_numbers<[1], [0], [0], [1], [0, 0, 1, 1], [], []>} : vector<2x2xf32>, vector<2x800xf32>, vector<2x800xf32> -> vector<2x800xf32>
    %138 = arith.addf %132, %137 : vector<2x800xf32>
    %c23 = arith.constant 23 : index
    %c0_124 = arith.constant 0 : index
    %c0_125 = arith.constant 0 : index
    %139 = vector.load %arg3[%c23, %c0_124, %c0_125] : memref<27x2x2xf32, #tpu.memory_space<vmem>>, vector<1x2x2xf32>
    %140 = vector.shape_cast %139 : vector<1x2x2xf32> to vector<2x2xf32>
    %c0_126 = arith.constant 0 : index
    %c0_127 = arith.constant 0 : index
    %c212 = arith.constant 212 : index
    %141 = vector.load %arg1[%c0_126, %c0_127, %c212] : memref<1x2x1022xf32, #tpu.memory_space<vmem>>, vector<1x2x800xf32>
    %142 = vector.shape_cast %141 : vector<1x2x800xf32> to vector<2x800xf32>
    %cst_128 = arith.constant dense<0.000000e+00> : vector<2x800xf32>
    %143 = tpu.matmul %140, %142, %cst_128 {dimension_numbers = #tpu.dot_dimension_numbers<[1], [0], [0], [1], [0, 0, 1, 1], [], []>} : vector<2x2xf32>, vector<2x800xf32>, vector<2x800xf32> -> vector<2x800xf32>
    %144 = arith.addf %138, %143 : vector<2x800xf32>
    %c24 = arith.constant 24 : index
    %c0_129 = arith.constant 0 : index
    %c0_130 = arith.constant 0 : index
    %145 = vector.load %arg3[%c24, %c0_129, %c0_130] : memref<27x2x2xf32, #tpu.memory_space<vmem>>, vector<1x2x2xf32>
    %146 = vector.shape_cast %145 : vector<1x2x2xf32> to vector<2x2xf32>
    %c0_131 = arith.constant 0 : index
    %c0_132 = arith.constant 0 : index
    %c220 = arith.constant 220 : index
    %147 = vector.load %arg1[%c0_131, %c0_132, %c220] : memref<1x2x1022xf32, #tpu.memory_space<vmem>>, vector<1x2x800xf32>
    %148 = vector.shape_cast %147 : vector<1x2x800xf32> to vector<2x800xf32>
    %cst_133 = arith.constant dense<0.000000e+00> : vector<2x800xf32>
    %149 = tpu.matmul %146, %148, %cst_133 {dimension_numbers = #tpu.dot_dimension_numbers<[1], [0], [0], [1], [0, 0, 1, 1], [], []>} : vector<2x2xf32>, vector<2x800xf32>, vector<2x800xf32> -> vector<2x800xf32>
    %150 = arith.addf %144, %149 : vector<2x800xf32>
    %c25 = arith.constant 25 : index
    %c0_134 = arith.constant 0 : index
    %c0_135 = arith.constant 0 : index
    %151 = vector.load %arg3[%c25, %c0_134, %c0_135] : memref<27x2x2xf32, #tpu.memory_space<vmem>>, vector<1x2x2xf32>
    %152 = vector.shape_cast %151 : vector<1x2x2xf32> to vector<2x2xf32>
    %c0_136 = arith.constant 0 : index
    %c0_137 = arith.constant 0 : index
    %c221 = arith.constant 221 : index
    %153 = vector.load %arg1[%c0_136, %c0_137, %c221] : memref<1x2x1022xf32, #tpu.memory_space<vmem>>, vector<1x2x800xf32>
    %154 = vector.shape_cast %153 : vector<1x2x800xf32> to vector<2x800xf32>
    %cst_138 = arith.constant dense<0.000000e+00> : vector<2x800xf32>
    %155 = tpu.matmul %152, %154, %cst_138 {dimension_numbers = #tpu.dot_dimension_numbers<[1], [0], [0], [1], [0, 0, 1, 1], [], []>} : vector<2x2xf32>, vector<2x800xf32>, vector<2x800xf32> -> vector<2x800xf32>
    %156 = arith.addf %150, %155 : vector<2x800xf32>
    %c26 = arith.constant 26 : index
    %c0_139 = arith.constant 0 : index
    %c0_140 = arith.constant 0 : index
    %157 = vector.load %arg3[%c26, %c0_139, %c0_140] : memref<27x2x2xf32, #tpu.memory_space<vmem>>, vector<1x2x2xf32>
    %158 = vector.shape_cast %157 : vector<1x2x2xf32> to vector<2x2xf32>
    %c0_141 = arith.constant 0 : index
    %c0_142 = arith.constant 0 : index
    %c222 = arith.constant 222 : index
    %159 = vector.load %arg1[%c0_141, %c0_142, %c222] : memref<1x2x1022xf32, #tpu.memory_space<vmem>>, vector<1x2x800xf32>
    %160 = vector.shape_cast %159 : vector<1x2x800xf32> to vector<2x800xf32>
    %cst_143 = arith.constant dense<0.000000e+00> : vector<2x800xf32>
    %161 = tpu.matmul %158, %160, %cst_143 {dimension_numbers = #tpu.dot_dimension_numbers<[1], [0], [0], [1], [0, 0, 1, 1], [], []>} : vector<2x2xf32>, vector<2x800xf32>, vector<2x800xf32> -> vector<2x800xf32>
    %162 = arith.addf %156, %161 : vector<2x800xf32>
    %c0_144 = arith.constant 0 : index
    %c0_145 = arith.constant 0 : index
    %c0_146 = arith.constant 0 : index
    %163 = vector.load %arg4[%c0_144, %c0_145, %c0_146] : memref<27x2x2xf32, #tpu.memory_space<vmem>>, vector<1x2x2xf32>
    %164 = vector.shape_cast %163 : vector<1x2x2xf32> to vector<2x2xf32>
    %c0_147 = arith.constant 0 : index
    %c0_148 = arith.constant 0 : index
    %c0_149 = arith.constant 0 : index
    %165 = vector.load %arg2[%c0_147, %c0_148, %c0_149] : memref<1x2x1022xf32, #tpu.memory_space<vmem>>, vector<1x2x800xf32>
    %166 = vector.shape_cast %165 : vector<1x2x800xf32> to vector<2x800xf32>
    %cst_150 = arith.constant dense<0.000000e+00> : vector<2x800xf32>
    %167 = tpu.matmul %164, %166, %cst_150 {dimension_numbers = #tpu.dot_dimension_numbers<[1], [0], [0], [1], [0, 0, 1, 1], [], []>} : vector<2x2xf32>, vector<2x800xf32>, vector<2x800xf32> -> vector<2x800xf32>
    %168 = arith.addf %162, %167 : vector<2x800xf32>
    %c1_151 = arith.constant 1 : index
    %c0_152 = arith.constant 0 : index
    %c0_153 = arith.constant 0 : index
    %169 = vector.load %arg4[%c1_151, %c0_152, %c0_153] : memref<27x2x2xf32, #tpu.memory_space<vmem>>, vector<1x2x2xf32>
    %170 = vector.shape_cast %169 : vector<1x2x2xf32> to vector<2x2xf32>
    %c0_154 = arith.constant 0 : index
    %c0_155 = arith.constant 0 : index
    %c1_156 = arith.constant 1 : index
    %171 = vector.load %arg2[%c0_154, %c0_155, %c1_156] : memref<1x2x1022xf32, #tpu.memory_space<vmem>>, vector<1x2x800xf32>
    %172 = vector.shape_cast %171 : vector<1x2x800xf32> to vector<2x800xf32>
    %cst_157 = arith.constant dense<0.000000e+00> : vector<2x800xf32>
    %173 = tpu.matmul %170, %172, %cst_157 {dimension_numbers = #tpu.dot_dimension_numbers<[1], [0], [0], [1], [0, 0, 1, 1], [], []>} : vector<2x2xf32>, vector<2x800xf32>, vector<2x800xf32> -> vector<2x800xf32>
    %174 = arith.addf %168, %173 : vector<2x800xf32>
    %c2_158 = arith.constant 2 : index
    %c0_159 = arith.constant 0 : index
    %c0_160 = arith.constant 0 : index
    %175 = vector.load %arg4[%c2_158, %c0_159, %c0_160] : memref<27x2x2xf32, #tpu.memory_space<vmem>>, vector<1x2x2xf32>
    %176 = vector.shape_cast %175 : vector<1x2x2xf32> to vector<2x2xf32>
    %c0_161 = arith.constant 0 : index
    %c0_162 = arith.constant 0 : index
    %c2_163 = arith.constant 2 : index
    %177 = vector.load %arg2[%c0_161, %c0_162, %c2_163] : memref<1x2x1022xf32, #tpu.memory_space<vmem>>, vector<1x2x800xf32>
    %178 = vector.shape_cast %177 : vector<1x2x800xf32> to vector<2x800xf32>
    %cst_164 = arith.constant dense<0.000000e+00> : vector<2x800xf32>
    %179 = tpu.matmul %176, %178, %cst_164 {dimension_numbers = #tpu.dot_dimension_numbers<[1], [0], [0], [1], [0, 0, 1, 1], [], []>} : vector<2x2xf32>, vector<2x800xf32>, vector<2x800xf32> -> vector<2x800xf32>
    %180 = arith.addf %174, %179 : vector<2x800xf32>
    %c3_165 = arith.constant 3 : index
    %c0_166 = arith.constant 0 : index
    %c0_167 = arith.constant 0 : index
    %181 = vector.load %arg4[%c3_165, %c0_166, %c0_167] : memref<27x2x2xf32, #tpu.memory_space<vmem>>, vector<1x2x2xf32>
    %182 = vector.shape_cast %181 : vector<1x2x2xf32> to vector<2x2xf32>
    %c0_168 = arith.constant 0 : index
    %c0_169 = arith.constant 0 : index
    %c10_170 = arith.constant 10 : index
    %183 = vector.load %arg2[%c0_168, %c0_169, %c10_170] : memref<1x2x1022xf32, #tpu.memory_space<vmem>>, vector<1x2x800xf32>
    %184 = vector.shape_cast %183 : vector<1x2x800xf32> to vector<2x800xf32>
    %cst_171 = arith.constant dense<0.000000e+00> : vector<2x800xf32>
    %185 = tpu.matmul %182, %184, %cst_171 {dimension_numbers = #tpu.dot_dimension_numbers<[1], [0], [0], [1], [0, 0, 1, 1], [], []>} : vector<2x2xf32>, vector<2x800xf32>, vector<2x800xf32> -> vector<2x800xf32>
    %186 = arith.addf %180, %185 : vector<2x800xf32>
    %c4_172 = arith.constant 4 : index
    %c0_173 = arith.constant 0 : index
    %c0_174 = arith.constant 0 : index
    %187 = vector.load %arg4[%c4_172, %c0_173, %c0_174] : memref<27x2x2xf32, #tpu.memory_space<vmem>>, vector<1x2x2xf32>
    %188 = vector.shape_cast %187 : vector<1x2x2xf32> to vector<2x2xf32>
    %c0_175 = arith.constant 0 : index
    %c0_176 = arith.constant 0 : index
    %c11_177 = arith.constant 11 : index
    %189 = vector.load %arg2[%c0_175, %c0_176, %c11_177] : memref<1x2x1022xf32, #tpu.memory_space<vmem>>, vector<1x2x800xf32>
    %190 = vector.shape_cast %189 : vector<1x2x800xf32> to vector<2x800xf32>
    %cst_178 = arith.constant dense<0.000000e+00> : vector<2x800xf32>
    %191 = tpu.matmul %188, %190, %cst_178 {dimension_numbers = #tpu.dot_dimension_numbers<[1], [0], [0], [1], [0, 0, 1, 1], [], []>} : vector<2x2xf32>, vector<2x800xf32>, vector<2x800xf32> -> vector<2x800xf32>
    %192 = arith.addf %186, %191 : vector<2x800xf32>
    %c5_179 = arith.constant 5 : index
    %c0_180 = arith.constant 0 : index
    %c0_181 = arith.constant 0 : index
    %193 = vector.load %arg4[%c5_179, %c0_180, %c0_181] : memref<27x2x2xf32, #tpu.memory_space<vmem>>, vector<1x2x2xf32>
    %194 = vector.shape_cast %193 : vector<1x2x2xf32> to vector<2x2xf32>
    %c0_182 = arith.constant 0 : index
    %c0_183 = arith.constant 0 : index
    %c12_184 = arith.constant 12 : index
    %195 = vector.load %arg2[%c0_182, %c0_183, %c12_184] : memref<1x2x1022xf32, #tpu.memory_space<vmem>>, vector<1x2x800xf32>
    %196 = vector.shape_cast %195 : vector<1x2x800xf32> to vector<2x800xf32>
    %cst_185 = arith.constant dense<0.000000e+00> : vector<2x800xf32>
    %197 = tpu.matmul %194, %196, %cst_185 {dimension_numbers = #tpu.dot_dimension_numbers<[1], [0], [0], [1], [0, 0, 1, 1], [], []>} : vector<2x2xf32>, vector<2x800xf32>, vector<2x800xf32> -> vector<2x800xf32>
    %198 = arith.addf %192, %197 : vector<2x800xf32>
    %c6_186 = arith.constant 6 : index
    %c0_187 = arith.constant 0 : index
    %c0_188 = arith.constant 0 : index
    %199 = vector.load %arg4[%c6_186, %c0_187, %c0_188] : memref<27x2x2xf32, #tpu.memory_space<vmem>>, vector<1x2x2xf32>
    %200 = vector.shape_cast %199 : vector<1x2x2xf32> to vector<2x2xf32>
    %c0_189 = arith.constant 0 : index
    %c0_190 = arith.constant 0 : index
    %c20_191 = arith.constant 20 : index
    %201 = vector.load %arg2[%c0_189, %c0_190, %c20_191] : memref<1x2x1022xf32, #tpu.memory_space<vmem>>, vector<1x2x800xf32>
    %202 = vector.shape_cast %201 : vector<1x2x800xf32> to vector<2x800xf32>
    %cst_192 = arith.constant dense<0.000000e+00> : vector<2x800xf32>
    %203 = tpu.matmul %200, %202, %cst_192 {dimension_numbers = #tpu.dot_dimension_numbers<[1], [0], [0], [1], [0, 0, 1, 1], [], []>} : vector<2x2xf32>, vector<2x800xf32>, vector<2x800xf32> -> vector<2x800xf32>
    %204 = arith.addf %198, %203 : vector<2x800xf32>
    %c7_193 = arith.constant 7 : index
    %c0_194 = arith.constant 0 : index
    %c0_195 = arith.constant 0 : index
    %205 = vector.load %arg4[%c7_193, %c0_194, %c0_195] : memref<27x2x2xf32, #tpu.memory_space<vmem>>, vector<1x2x2xf32>
    %206 = vector.shape_cast %205 : vector<1x2x2xf32> to vector<2x2xf32>
    %c0_196 = arith.constant 0 : index
    %c0_197 = arith.constant 0 : index
    %c21_198 = arith.constant 21 : index
    %207 = vector.load %arg2[%c0_196, %c0_197, %c21_198] : memref<1x2x1022xf32, #tpu.memory_space<vmem>>, vector<1x2x800xf32>
    %208 = vector.shape_cast %207 : vector<1x2x800xf32> to vector<2x800xf32>
    %cst_199 = arith.constant dense<0.000000e+00> : vector<2x800xf32>
    %209 = tpu.matmul %206, %208, %cst_199 {dimension_numbers = #tpu.dot_dimension_numbers<[1], [0], [0], [1], [0, 0, 1, 1], [], []>} : vector<2x2xf32>, vector<2x800xf32>, vector<2x800xf32> -> vector<2x800xf32>
    %210 = arith.addf %204, %209 : vector<2x800xf32>
    %c8_200 = arith.constant 8 : index
    %c0_201 = arith.constant 0 : index
    %c0_202 = arith.constant 0 : index
    %211 = vector.load %arg4[%c8_200, %c0_201, %c0_202] : memref<27x2x2xf32, #tpu.memory_space<vmem>>, vector<1x2x2xf32>
    %212 = vector.shape_cast %211 : vector<1x2x2xf32> to vector<2x2xf32>
    %c0_203 = arith.constant 0 : index
    %c0_204 = arith.constant 0 : index
    %c22_205 = arith.constant 22 : index
    %213 = vector.load %arg2[%c0_203, %c0_204, %c22_205] : memref<1x2x1022xf32, #tpu.memory_space<vmem>>, vector<1x2x800xf32>
    %214 = vector.shape_cast %213 : vector<1x2x800xf32> to vector<2x800xf32>
    %cst_206 = arith.constant dense<0.000000e+00> : vector<2x800xf32>
    %215 = tpu.matmul %212, %214, %cst_206 {dimension_numbers = #tpu.dot_dimension_numbers<[1], [0], [0], [1], [0, 0, 1, 1], [], []>} : vector<2x2xf32>, vector<2x800xf32>, vector<2x800xf32> -> vector<2x800xf32>
    %216 = arith.addf %210, %215 : vector<2x800xf32>
    %c9_207 = arith.constant 9 : index
    %c0_208 = arith.constant 0 : index
    %c0_209 = arith.constant 0 : index
    %217 = vector.load %arg4[%c9_207, %c0_208, %c0_209] : memref<27x2x2xf32, #tpu.memory_space<vmem>>, vector<1x2x2xf32>
    %218 = vector.shape_cast %217 : vector<1x2x2xf32> to vector<2x2xf32>
    %c0_210 = arith.constant 0 : index
    %c0_211 = arith.constant 0 : index
    %c100_212 = arith.constant 100 : index
    %219 = vector.load %arg2[%c0_210, %c0_211, %c100_212] : memref<1x2x1022xf32, #tpu.memory_space<vmem>>, vector<1x2x800xf32>
    %220 = vector.shape_cast %219 : vector<1x2x800xf32> to vector<2x800xf32>
    %cst_213 = arith.constant dense<0.000000e+00> : vector<2x800xf32>
    %221 = tpu.matmul %218, %220, %cst_213 {dimension_numbers = #tpu.dot_dimension_numbers<[1], [0], [0], [1], [0, 0, 1, 1], [], []>} : vector<2x2xf32>, vector<2x800xf32>, vector<2x800xf32> -> vector<2x800xf32>
    %222 = arith.addf %216, %221 : vector<2x800xf32>
    %c10_214 = arith.constant 10 : index
    %c0_215 = arith.constant 0 : index
    %c0_216 = arith.constant 0 : index
    %223 = vector.load %arg4[%c10_214, %c0_215, %c0_216] : memref<27x2x2xf32, #tpu.memory_space<vmem>>, vector<1x2x2xf32>
    %224 = vector.shape_cast %223 : vector<1x2x2xf32> to vector<2x2xf32>
    %c0_217 = arith.constant 0 : index
    %c0_218 = arith.constant 0 : index
    %c101_219 = arith.constant 101 : index
    %225 = vector.load %arg2[%c0_217, %c0_218, %c101_219] : memref<1x2x1022xf32, #tpu.memory_space<vmem>>, vector<1x2x800xf32>
    %226 = vector.shape_cast %225 : vector<1x2x800xf32> to vector<2x800xf32>
    %cst_220 = arith.constant dense<0.000000e+00> : vector<2x800xf32>
    %227 = tpu.matmul %224, %226, %cst_220 {dimension_numbers = #tpu.dot_dimension_numbers<[1], [0], [0], [1], [0, 0, 1, 1], [], []>} : vector<2x2xf32>, vector<2x800xf32>, vector<2x800xf32> -> vector<2x800xf32>
    %228 = arith.addf %222, %227 : vector<2x800xf32>
    %c11_221 = arith.constant 11 : index
    %c0_222 = arith.constant 0 : index
    %c0_223 = arith.constant 0 : index
    %229 = vector.load %arg4[%c11_221, %c0_222, %c0_223] : memref<27x2x2xf32, #tpu.memory_space<vmem>>, vector<1x2x2xf32>
    %230 = vector.shape_cast %229 : vector<1x2x2xf32> to vector<2x2xf32>
    %c0_224 = arith.constant 0 : index
    %c0_225 = arith.constant 0 : index
    %c102_226 = arith.constant 102 : index
    %231 = vector.load %arg2[%c0_224, %c0_225, %c102_226] : memref<1x2x1022xf32, #tpu.memory_space<vmem>>, vector<1x2x800xf32>
    %232 = vector.shape_cast %231 : vector<1x2x800xf32> to vector<2x800xf32>
    %cst_227 = arith.constant dense<0.000000e+00> : vector<2x800xf32>
    %233 = tpu.matmul %230, %232, %cst_227 {dimension_numbers = #tpu.dot_dimension_numbers<[1], [0], [0], [1], [0, 0, 1, 1], [], []>} : vector<2x2xf32>, vector<2x800xf32>, vector<2x800xf32> -> vector<2x800xf32>
    %234 = arith.addf %228, %233 : vector<2x800xf32>
    %c12_228 = arith.constant 12 : index
    %c0_229 = arith.constant 0 : index
    %c0_230 = arith.constant 0 : index
    %235 = vector.load %arg4[%c12_228, %c0_229, %c0_230] : memref<27x2x2xf32, #tpu.memory_space<vmem>>, vector<1x2x2xf32>
    %236 = vector.shape_cast %235 : vector<1x2x2xf32> to vector<2x2xf32>
    %c0_231 = arith.constant 0 : index
    %c0_232 = arith.constant 0 : index
    %c110_233 = arith.constant 110 : index
    %237 = vector.load %arg2[%c0_231, %c0_232, %c110_233] : memref<1x2x1022xf32, #tpu.memory_space<vmem>>, vector<1x2x800xf32>
    %238 = vector.shape_cast %237 : vector<1x2x800xf32> to vector<2x800xf32>
    %cst_234 = arith.constant dense<0.000000e+00> : vector<2x800xf32>
    %239 = tpu.matmul %236, %238, %cst_234 {dimension_numbers = #tpu.dot_dimension_numbers<[1], [0], [0], [1], [0, 0, 1, 1], [], []>} : vector<2x2xf32>, vector<2x800xf32>, vector<2x800xf32> -> vector<2x800xf32>
    %240 = arith.addf %234, %239 : vector<2x800xf32>
    %c13_235 = arith.constant 13 : index
    %c0_236 = arith.constant 0 : index
    %c0_237 = arith.constant 0 : index
    %241 = vector.load %arg4[%c13_235, %c0_236, %c0_237] : memref<27x2x2xf32, #tpu.memory_space<vmem>>, vector<1x2x2xf32>
    %242 = vector.shape_cast %241 : vector<1x2x2xf32> to vector<2x2xf32>
    %c0_238 = arith.constant 0 : index
    %c0_239 = arith.constant 0 : index
    %c111_240 = arith.constant 111 : index
    %243 = vector.load %arg2[%c0_238, %c0_239, %c111_240] : memref<1x2x1022xf32, #tpu.memory_space<vmem>>, vector<1x2x800xf32>
    %244 = vector.shape_cast %243 : vector<1x2x800xf32> to vector<2x800xf32>
    %cst_241 = arith.constant dense<0.000000e+00> : vector<2x800xf32>
    %245 = tpu.matmul %242, %244, %cst_241 {dimension_numbers = #tpu.dot_dimension_numbers<[1], [0], [0], [1], [0, 0, 1, 1], [], []>} : vector<2x2xf32>, vector<2x800xf32>, vector<2x800xf32> -> vector<2x800xf32>
    %246 = arith.addf %240, %245 : vector<2x800xf32>
    %c14_242 = arith.constant 14 : index
    %c0_243 = arith.constant 0 : index
    %c0_244 = arith.constant 0 : index
    %247 = vector.load %arg4[%c14_242, %c0_243, %c0_244] : memref<27x2x2xf32, #tpu.memory_space<vmem>>, vector<1x2x2xf32>
    %248 = vector.shape_cast %247 : vector<1x2x2xf32> to vector<2x2xf32>
    %c0_245 = arith.constant 0 : index
    %c0_246 = arith.constant 0 : index
    %c112_247 = arith.constant 112 : index
    %249 = vector.load %arg2[%c0_245, %c0_246, %c112_247] : memref<1x2x1022xf32, #tpu.memory_space<vmem>>, vector<1x2x800xf32>
    %250 = vector.shape_cast %249 : vector<1x2x800xf32> to vector<2x800xf32>
    %cst_248 = arith.constant dense<0.000000e+00> : vector<2x800xf32>
    %251 = tpu.matmul %248, %250, %cst_248 {dimension_numbers = #tpu.dot_dimension_numbers<[1], [0], [0], [1], [0, 0, 1, 1], [], []>} : vector<2x2xf32>, vector<2x800xf32>, vector<2x800xf32> -> vector<2x800xf32>
    %252 = arith.addf %246, %251 : vector<2x800xf32>
    %c15_249 = arith.constant 15 : index
    %c0_250 = arith.constant 0 : index
    %c0_251 = arith.constant 0 : index
    %253 = vector.load %arg4[%c15_249, %c0_250, %c0_251] : memref<27x2x2xf32, #tpu.memory_space<vmem>>, vector<1x2x2xf32>
    %254 = vector.shape_cast %253 : vector<1x2x2xf32> to vector<2x2xf32>
    %c0_252 = arith.constant 0 : index
    %c0_253 = arith.constant 0 : index
    %c120_254 = arith.constant 120 : index
    %255 = vector.load %arg2[%c0_252, %c0_253, %c120_254] : memref<1x2x1022xf32, #tpu.memory_space<vmem>>, vector<1x2x800xf32>
    %256 = vector.shape_cast %255 : vector<1x2x800xf32> to vector<2x800xf32>
    %cst_255 = arith.constant dense<0.000000e+00> : vector<2x800xf32>
    %257 = tpu.matmul %254, %256, %cst_255 {dimension_numbers = #tpu.dot_dimension_numbers<[1], [0], [0], [1], [0, 0, 1, 1], [], []>} : vector<2x2xf32>, vector<2x800xf32>, vector<2x800xf32> -> vector<2x800xf32>
    %258 = arith.addf %252, %257 : vector<2x800xf32>
    %c16_256 = arith.constant 16 : index
    %c0_257 = arith.constant 0 : index
    %c0_258 = arith.constant 0 : index
    %259 = vector.load %arg4[%c16_256, %c0_257, %c0_258] : memref<27x2x2xf32, #tpu.memory_space<vmem>>, vector<1x2x2xf32>
    %260 = vector.shape_cast %259 : vector<1x2x2xf32> to vector<2x2xf32>
    %c0_259 = arith.constant 0 : index
    %c0_260 = arith.constant 0 : index
    %c121_261 = arith.constant 121 : index
    %261 = vector.load %arg2[%c0_259, %c0_260, %c121_261] : memref<1x2x1022xf32, #tpu.memory_space<vmem>>, vector<1x2x800xf32>
    %262 = vector.shape_cast %261 : vector<1x2x800xf32> to vector<2x800xf32>
    %cst_262 = arith.constant dense<0.000000e+00> : vector<2x800xf32>
    %263 = tpu.matmul %260, %262, %cst_262 {dimension_numbers = #tpu.dot_dimension_numbers<[1], [0], [0], [1], [0, 0, 1, 1], [], []>} : vector<2x2xf32>, vector<2x800xf32>, vector<2x800xf32> -> vector<2x800xf32>
    %264 = arith.addf %258, %263 : vector<2x800xf32>
    %c17_263 = arith.constant 17 : index
    %c0_264 = arith.constant 0 : index
    %c0_265 = arith.constant 0 : index
    %265 = vector.load %arg4[%c17_263, %c0_264, %c0_265] : memref<27x2x2xf32, #tpu.memory_space<vmem>>, vector<1x2x2xf32>
    %266 = vector.shape_cast %265 : vector<1x2x2xf32> to vector<2x2xf32>
    %c0_266 = arith.constant 0 : index
    %c0_267 = arith.constant 0 : index
    %c122_268 = arith.constant 122 : index
    %267 = vector.load %arg2[%c0_266, %c0_267, %c122_268] : memref<1x2x1022xf32, #tpu.memory_space<vmem>>, vector<1x2x800xf32>
    %268 = vector.shape_cast %267 : vector<1x2x800xf32> to vector<2x800xf32>
    %cst_269 = arith.constant dense<0.000000e+00> : vector<2x800xf32>
    %269 = tpu.matmul %266, %268, %cst_269 {dimension_numbers = #tpu.dot_dimension_numbers<[1], [0], [0], [1], [0, 0, 1, 1], [], []>} : vector<2x2xf32>, vector<2x800xf32>, vector<2x800xf32> -> vector<2x800xf32>
    %270 = arith.addf %264, %269 : vector<2x800xf32>
    %c18_270 = arith.constant 18 : index
    %c0_271 = arith.constant 0 : index
    %c0_272 = arith.constant 0 : index
    %271 = vector.load %arg4[%c18_270, %c0_271, %c0_272] : memref<27x2x2xf32, #tpu.memory_space<vmem>>, vector<1x2x2xf32>
    %272 = vector.shape_cast %271 : vector<1x2x2xf32> to vector<2x2xf32>
    %c0_273 = arith.constant 0 : index
    %c0_274 = arith.constant 0 : index
    %c200_275 = arith.constant 200 : index
    %273 = vector.load %arg2[%c0_273, %c0_274, %c200_275] : memref<1x2x1022xf32, #tpu.memory_space<vmem>>, vector<1x2x800xf32>
    %274 = vector.shape_cast %273 : vector<1x2x800xf32> to vector<2x800xf32>
    %cst_276 = arith.constant dense<0.000000e+00> : vector<2x800xf32>
    %275 = tpu.matmul %272, %274, %cst_276 {dimension_numbers = #tpu.dot_dimension_numbers<[1], [0], [0], [1], [0, 0, 1, 1], [], []>} : vector<2x2xf32>, vector<2x800xf32>, vector<2x800xf32> -> vector<2x800xf32>
    %276 = arith.addf %270, %275 : vector<2x800xf32>
    %c19_277 = arith.constant 19 : index
    %c0_278 = arith.constant 0 : index
    %c0_279 = arith.constant 0 : index
    %277 = vector.load %arg4[%c19_277, %c0_278, %c0_279] : memref<27x2x2xf32, #tpu.memory_space<vmem>>, vector<1x2x2xf32>
    %278 = vector.shape_cast %277 : vector<1x2x2xf32> to vector<2x2xf32>
    %c0_280 = arith.constant 0 : index
    %c0_281 = arith.constant 0 : index
    %c201_282 = arith.constant 201 : index
    %279 = vector.load %arg2[%c0_280, %c0_281, %c201_282] : memref<1x2x1022xf32, #tpu.memory_space<vmem>>, vector<1x2x800xf32>
    %280 = vector.shape_cast %279 : vector<1x2x800xf32> to vector<2x800xf32>
    %cst_283 = arith.constant dense<0.000000e+00> : vector<2x800xf32>
    %281 = tpu.matmul %278, %280, %cst_283 {dimension_numbers = #tpu.dot_dimension_numbers<[1], [0], [0], [1], [0, 0, 1, 1], [], []>} : vector<2x2xf32>, vector<2x800xf32>, vector<2x800xf32> -> vector<2x800xf32>
    %282 = arith.addf %276, %281 : vector<2x800xf32>
    %c20_284 = arith.constant 20 : index
    %c0_285 = arith.constant 0 : index
    %c0_286 = arith.constant 0 : index
    %283 = vector.load %arg4[%c20_284, %c0_285, %c0_286] : memref<27x2x2xf32, #tpu.memory_space<vmem>>, vector<1x2x2xf32>
    %284 = vector.shape_cast %283 : vector<1x2x2xf32> to vector<2x2xf32>
    %c0_287 = arith.constant 0 : index
    %c0_288 = arith.constant 0 : index
    %c202_289 = arith.constant 202 : index
    %285 = vector.load %arg2[%c0_287, %c0_288, %c202_289] : memref<1x2x1022xf32, #tpu.memory_space<vmem>>, vector<1x2x800xf32>
    %286 = vector.shape_cast %285 : vector<1x2x800xf32> to vector<2x800xf32>
    %cst_290 = arith.constant dense<0.000000e+00> : vector<2x800xf32>
    %287 = tpu.matmul %284, %286, %cst_290 {dimension_numbers = #tpu.dot_dimension_numbers<[1], [0], [0], [1], [0, 0, 1, 1], [], []>} : vector<2x2xf32>, vector<2x800xf32>, vector<2x800xf32> -> vector<2x800xf32>
    %288 = arith.addf %282, %287 : vector<2x800xf32>
    %c21_291 = arith.constant 21 : index
    %c0_292 = arith.constant 0 : index
    %c0_293 = arith.constant 0 : index
    %289 = vector.load %arg4[%c21_291, %c0_292, %c0_293] : memref<27x2x2xf32, #tpu.memory_space<vmem>>, vector<1x2x2xf32>
    %290 = vector.shape_cast %289 : vector<1x2x2xf32> to vector<2x2xf32>
    %c0_294 = arith.constant 0 : index
    %c0_295 = arith.constant 0 : index
    %c210_296 = arith.constant 210 : index
    %291 = vector.load %arg2[%c0_294, %c0_295, %c210_296] : memref<1x2x1022xf32, #tpu.memory_space<vmem>>, vector<1x2x800xf32>
    %292 = vector.shape_cast %291 : vector<1x2x800xf32> to vector<2x800xf32>
    %cst_297 = arith.constant dense<0.000000e+00> : vector<2x800xf32>
    %293 = tpu.matmul %290, %292, %cst_297 {dimension_numbers = #tpu.dot_dimension_numbers<[1], [0], [0], [1], [0, 0, 1, 1], [], []>} : vector<2x2xf32>, vector<2x800xf32>, vector<2x800xf32> -> vector<2x800xf32>
    %294 = arith.addf %288, %293 : vector<2x800xf32>
    %c22_298 = arith.constant 22 : index
    %c0_299 = arith.constant 0 : index
    %c0_300 = arith.constant 0 : index
    %295 = vector.load %arg4[%c22_298, %c0_299, %c0_300] : memref<27x2x2xf32, #tpu.memory_space<vmem>>, vector<1x2x2xf32>
    %296 = vector.shape_cast %295 : vector<1x2x2xf32> to vector<2x2xf32>
    %c0_301 = arith.constant 0 : index
    %c0_302 = arith.constant 0 : index
    %c211_303 = arith.constant 211 : index
    %297 = vector.load %arg2[%c0_301, %c0_302, %c211_303] : memref<1x2x1022xf32, #tpu.memory_space<vmem>>, vector<1x2x800xf32>
    %298 = vector.shape_cast %297 : vector<1x2x800xf32> to vector<2x800xf32>
    %cst_304 = arith.constant dense<0.000000e+00> : vector<2x800xf32>
    %299 = tpu.matmul %296, %298, %cst_304 {dimension_numbers = #tpu.dot_dimension_numbers<[1], [0], [0], [1], [0, 0, 1, 1], [], []>} : vector<2x2xf32>, vector<2x800xf32>, vector<2x800xf32> -> vector<2x800xf32>
    %300 = arith.addf %294, %299 : vector<2x800xf32>
    %c23_305 = arith.constant 23 : index
    %c0_306 = arith.constant 0 : index
    %c0_307 = arith.constant 0 : index
    %301 = vector.load %arg4[%c23_305, %c0_306, %c0_307] : memref<27x2x2xf32, #tpu.memory_space<vmem>>, vector<1x2x2xf32>
    %302 = vector.shape_cast %301 : vector<1x2x2xf32> to vector<2x2xf32>
    %c0_308 = arith.constant 0 : index
    %c0_309 = arith.constant 0 : index
    %c212_310 = arith.constant 212 : index
    %303 = vector.load %arg2[%c0_308, %c0_309, %c212_310] : memref<1x2x1022xf32, #tpu.memory_space<vmem>>, vector<1x2x800xf32>
    %304 = vector.shape_cast %303 : vector<1x2x800xf32> to vector<2x800xf32>
    %cst_311 = arith.constant dense<0.000000e+00> : vector<2x800xf32>
    %305 = tpu.matmul %302, %304, %cst_311 {dimension_numbers = #tpu.dot_dimension_numbers<[1], [0], [0], [1], [0, 0, 1, 1], [], []>} : vector<2x2xf32>, vector<2x800xf32>, vector<2x800xf32> -> vector<2x800xf32>
    %306 = arith.addf %300, %305 : vector<2x800xf32>
    %c24_312 = arith.constant 24 : index
    %c0_313 = arith.constant 0 : index
    %c0_314 = arith.constant 0 : index
    %307 = vector.load %arg4[%c24_312, %c0_313, %c0_314] : memref<27x2x2xf32, #tpu.memory_space<vmem>>, vector<1x2x2xf32>
    %308 = vector.shape_cast %307 : vector<1x2x2xf32> to vector<2x2xf32>
    %c0_315 = arith.constant 0 : index
    %c0_316 = arith.constant 0 : index
    %c220_317 = arith.constant 220 : index
    %309 = vector.load %arg2[%c0_315, %c0_316, %c220_317] : memref<1x2x1022xf32, #tpu.memory_space<vmem>>, vector<1x2x800xf32>
    %310 = vector.shape_cast %309 : vector<1x2x800xf32> to vector<2x800xf32>
    %cst_318 = arith.constant dense<0.000000e+00> : vector<2x800xf32>
    %311 = tpu.matmul %308, %310, %cst_318 {dimension_numbers = #tpu.dot_dimension_numbers<[1], [0], [0], [1], [0, 0, 1, 1], [], []>} : vector<2x2xf32>, vector<2x800xf32>, vector<2x800xf32> -> vector<2x800xf32>
    %312 = arith.addf %306, %311 : vector<2x800xf32>
    %c25_319 = arith.constant 25 : index
    %c0_320 = arith.constant 0 : index
    %c0_321 = arith.constant 0 : index
    %313 = vector.load %arg4[%c25_319, %c0_320, %c0_321] : memref<27x2x2xf32, #tpu.memory_space<vmem>>, vector<1x2x2xf32>
    %314 = vector.shape_cast %313 : vector<1x2x2xf32> to vector<2x2xf32>
    %c0_322 = arith.constant 0 : index
    %c0_323 = arith.constant 0 : index
    %c221_324 = arith.constant 221 : index
    %315 = vector.load %arg2[%c0_322, %c0_323, %c221_324] : memref<1x2x1022xf32, #tpu.memory_space<vmem>>, vector<1x2x800xf32>
    %316 = vector.shape_cast %315 : vector<1x2x800xf32> to vector<2x800xf32>
    %cst_325 = arith.constant dense<0.000000e+00> : vector<2x800xf32>
    %317 = tpu.matmul %314, %316, %cst_325 {dimension_numbers = #tpu.dot_dimension_numbers<[1], [0], [0], [1], [0, 0, 1, 1], [], []>} : vector<2x2xf32>, vector<2x800xf32>, vector<2x800xf32> -> vector<2x800xf32>
    %318 = arith.addf %312, %317 : vector<2x800xf32>
    %c26_326 = arith.constant 26 : index
    %c0_327 = arith.constant 0 : index
    %c0_328 = arith.constant 0 : index
    %319 = vector.load %arg4[%c26_326, %c0_327, %c0_328] : memref<27x2x2xf32, #tpu.memory_space<vmem>>, vector<1x2x2xf32>
    %320 = vector.shape_cast %319 : vector<1x2x2xf32> to vector<2x2xf32>
    %c0_329 = arith.constant 0 : index
    %c0_330 = arith.constant 0 : index
    %c222_331 = arith.constant 222 : index
    %321 = vector.load %arg2[%c0_329, %c0_330, %c222_331] : memref<1x2x1022xf32, #tpu.memory_space<vmem>>, vector<1x2x800xf32>
    %322 = vector.shape_cast %321 : vector<1x2x800xf32> to vector<2x800xf32>
    %cst_332 = arith.constant dense<0.000000e+00> : vector<2x800xf32>
    %323 = tpu.matmul %320, %322, %cst_332 {dimension_numbers = #tpu.dot_dimension_numbers<[1], [0], [0], [1], [0, 0, 1, 1], [], []>} : vector<2x2xf32>, vector<2x800xf32>, vector<2x800xf32> -> vector<2x800xf32>
    %324 = arith.addf %318, %323 : vector<2x800xf32>
    %c0_333 = arith.constant 0 : index
    %c0_334 = arith.constant 0 : index
    %325 = vector.load %arg5[%c0_333, %c0_334] : memref<2x1xf32, #tpu.memory_space<vmem>>, vector<2x1xf32>
    %326 = vector.broadcast %325 : vector<2x1xf32> to vector<2x800xf32>
    %327 = arith.addf %324, %326 : vector<2x800xf32>
    %c0_335 = arith.constant 0 : index
    %c0_336 = arith.constant 0 : index
    %328 = vector.load %arg6[%c0_335, %c0_336] : memref<1x800xf32, #tpu.memory_space<vmem>>, vector<1x800xf32>
    %329 = vector.broadcast %328 : vector<1x800xf32> to vector<2x800xf32>
    %330 = arith.mulf %327, %329 : vector<2x800xf32>
    %cst_337 = arith.constant dense<0.000000e+00> : vector<2xf32>
    %331 = vector.multi_reduction <add>, %330, %cst_337 [1] : vector<2x800xf32> to vector<2xf32>
    %332 = vector.shape_cast %331 : vector<2xf32> to vector<2x1xf32>
    %cst_338 = arith.constant 0.001953125 : f32
    %333 = vector.broadcast %cst_338 : f32 to vector<2x1xf32>
    %334 = arith.mulf %332, %333 : vector<2x1xf32>
    %335 = vector.broadcast %334 : vector<2x1xf32> to vector<2x800xf32>
    %336 = arith.subf %327, %335 : vector<2x800xf32>
    %337 = vector.broadcast %328 : vector<1x800xf32> to vector<2x800xf32>
    %338 = arith.mulf %336, %337 : vector<2x800xf32>
    %339 = arith.mulf %338, %338 : vector<2x800xf32>
    %cst_339 = arith.constant dense<0.000000e+00> : vector<2xf32>
    %340 = vector.multi_reduction <add>, %339, %cst_339 [1] : vector<2x800xf32> to vector<2xf32>
    %341 = vector.shape_cast %340 : vector<2xf32> to vector<2x1xf32>
    %cst_340 = arith.constant 0.001953125 : f32
    %342 = vector.broadcast %cst_340 : f32 to vector<2x1xf32>
    %343 = arith.mulf %341, %342 : vector<2x1xf32>
    %cst_341 = arith.constant 9.99999974E-6 : f32
    %344 = vector.broadcast %cst_341 : f32 to vector<2x1xf32>
    %345 = arith.addf %343, %344 : vector<2x1xf32>
    %346 = math.rsqrt %345 : vector<2x1xf32>
    %347 = vector.broadcast %346 : vector<2x1xf32> to vector<2x800xf32>
    %348 = arith.mulf %338, %347 : vector<2x800xf32>
    %cst_342 = arith.constant 0.000000e+00 : f32
    %349 = vector.broadcast %cst_342 : f32 to vector<2x800xf32>
    %350 = arith.maximumf %348, %349 : vector<2x800xf32>
    %c0_343 = arith.constant 0 : index
    %c0_344 = arith.constant 0 : index
    %c0_345 = arith.constant 0 : index
    %351 = vector.load %arg7[%c0_343, %c0_344, %c0_345] : memref<1x2x800xf32, #tpu.memory_space<vmem>>, vector<1x2x800xf32>
    %352 = vector.shape_cast %351 : vector<1x2x800xf32> to vector<2x800xf32>
    %353 = vector.shape_cast %350 : vector<2x800xf32> to vector<1x2x800xf32>
    tpu.vector_store %arg7[%c0_343, %c0_344, %c0_345], %353 {strides = array<i32>} : memref<1x2x800xf32, #tpu.memory_space<vmem>>, vector<1x2x800xf32>,
    return
  }
  func.func @transform_0(%arg0: i32) -> (i32, i32, i32) {
    %c0_i32 = arith.constant 0 : i32
    %c0_i32_0 = arith.constant 0 : i32
    %c0_i32_1 = arith.constant 0 : i32
    return %arg0, %c0_i32, %c0_i32_0 : i32, i32, i32
  }
  func.func @transform_1(%arg0: i32) -> (i32, i32, i32) {
    %c0_i32 = arith.constant 0 : i32
    %c0_i32_0 = arith.constant 0 : i32
    %c0_i32_1 = arith.constant 0 : i32
    return %arg0, %c0_i32, %c0_i32_0 : i32, i32, i32
  }
  func.func @transform_2(%arg0: i32) -> (i32, i32, i32) {
    %c0_i32 = arith.constant 0 : i32
    %c0_i32_0 = arith.constant 0 : i32
    %c0_i32_1 = arith.constant 0 : i32
    %c0_i32_2 = arith.constant 0 : i32
    return %c0_i32, %c0_i32_0, %c0_i32_1 : i32, i32, i32
  }
  func.func @transform_3(%arg0: i32) -> (i32, i32, i32) {
    %c0_i32 = arith.constant 0 : i32
    %c0_i32_0 = arith.constant 0 : i32
    %c0_i32_1 = arith.constant 0 : i32
    %c0_i32_2 = arith.constant 0 : i32
    return %c0_i32, %c0_i32_0, %c0_i32_1 : i32, i32, i32
  }
  func.func @transform_4(%arg0: i32) -> (i32, i32) {
    %c0_i32 = arith.constant 0 : i32
    %c0_i32_0 = arith.constant 0 : i32
    %c0_i32_1 = arith.constant 0 : i32
    return %c0_i32, %c0_i32_0 : i32, i32
  }
  func.func @transform_5(%arg0: i32) -> (i32, i32) {
    %c0_i32 = arith.constant 0 : i32
    %c0_i32_0 = arith.constant 0 : i32
    %c0_i32_1 = arith.constant 0 : i32
    return %c0_i32, %c0_i32_0 : i32, i32
  }
  func.func @transform_6(%arg0: i32) -> (i32, i32, i32) {
    %c0_i32 = arith.constant 0 : i32
    %c0_i32_0 = arith.constant 0 : i32
    %c0_i32_1 = arith.constant 0 : i32
    return %arg0, %c0_i32, %c0_i32_0 : i32, i32, i32
  }
}

module attributes {stable_mosaic.version = 11 : i64} {
  func.func @kernel(%arg0: i32, %arg1: memref<1x2x1022xf32, #tpu.memory_space<vmem>>, %arg2: memref<27x2x2xf32, #tpu.memory_space<vmem>>, %arg3: memref<2x1xf32, #tpu.memory_space<vmem>>, %arg4: memref<1x800xf32, #tpu.memory_space<vmem>>, %arg5: memref<1x2x800xf32, #tpu.memory_space<vmem>>) attributes {dimension_semantics = [#tpu.dimension_semantics<parallel>], iteration_bounds = array<i64: 2>, scalar_prefetch = 0 : i64, scratch_operands = 0 : i64, tpu.core_type = #tpu.core_type<tc>, window_params = [{transform_indices = @transform_0, window_bounds = array<i64: 1, 2, 1022>}, {pipeline_mode = #tpu.pipeline_mode<synchronous>, transform_indices = @transform_1, window_bounds = array<i64: 27, 2, 2>}, {pipeline_mode = #tpu.pipeline_mode<synchronous>, transform_indices = @transform_2, window_bounds = array<i64: 2, 1>}, {pipeline_mode = #tpu.pipeline_mode<synchronous>, transform_indices = @transform_3, window_bounds = array<i64: 1, 800>}, {transform_indices = @transform_4, window_bounds = array<i64: 1, 2, 800>}]} {
    %cst = arith.constant 0.000000e+00 : f32
    %0 = vector.broadcast %cst : f32 to vector<2x800xf32>
    %c0 = arith.constant 0 : index
    %c0_0 = arith.constant 0 : index
    %c0_1 = arith.constant 0 : index
    %1 = vector.load %arg2[%c0, %c0_0, %c0_1] : memref<27x2x2xf32, #tpu.memory_space<vmem>>, vector<1x2x2xf32>
    %2 = vector.shape_cast %1 : vector<1x2x2xf32> to vector<2x2xf32>
    %c0_2 = arith.constant 0 : index
    %c0_3 = arith.constant 0 : index
    %c0_4 = arith.constant 0 : index
    %3 = vector.load %arg1[%c0_2, %c0_3, %c0_4] : memref<1x2x1022xf32, #tpu.memory_space<vmem>>, vector<1x2x800xf32>
    %4 = vector.shape_cast %3 : vector<1x2x800xf32> to vector<2x800xf32>
    %cst_5 = arith.constant dense<0.000000e+00> : vector<2x800xf32>
    %5 = tpu.matmul %2, %4, %cst_5 {dimension_numbers = #tpu.dot_dimension_numbers<[1], [0], [0], [1], [0, 0, 1, 1], [], []>} : vector<2x2xf32>, vector<2x800xf32>, vector<2x800xf32> -> vector<2x800xf32>
    %6 = arith.addf %0, %5 : vector<2x800xf32>
    %c1 = arith.constant 1 : index
    %c0_6 = arith.constant 0 : index
    %c0_7 = arith.constant 0 : index
    %7 = vector.load %arg2[%c1, %c0_6, %c0_7] : memref<27x2x2xf32, #tpu.memory_space<vmem>>, vector<1x2x2xf32>
    %8 = vector.shape_cast %7 : vector<1x2x2xf32> to vector<2x2xf32>
    %c0_8 = arith.constant 0 : index
    %c0_9 = arith.constant 0 : index
    %c1_10 = arith.constant 1 : index
    %9 = vector.load %arg1[%c0_8, %c0_9, %c1_10] : memref<1x2x1022xf32, #tpu.memory_space<vmem>>, vector<1x2x800xf32>
    %10 = vector.shape_cast %9 : vector<1x2x800xf32> to vector<2x800xf32>
    %cst_11 = arith.constant dense<0.000000e+00> : vector<2x800xf32>
    %11 = tpu.matmul %8, %10, %cst_11 {dimension_numbers = #tpu.dot_dimension_numbers<[1], [0], [0], [1], [0, 0, 1, 1], [], []>} : vector<2x2xf32>, vector<2x800xf32>, vector<2x800xf32> -> vector<2x800xf32>
    %12 = arith.addf %6, %11 : vector<2x800xf32>
    %c2 = arith.constant 2 : index
    %c0_12 = arith.constant 0 : index
    %c0_13 = arith.constant 0 : index
    %13 = vector.load %arg2[%c2, %c0_12, %c0_13] : memref<27x2x2xf32, #tpu.memory_space<vmem>>, vector<1x2x2xf32>
    %14 = vector.shape_cast %13 : vector<1x2x2xf32> to vector<2x2xf32>
    %c0_14 = arith.constant 0 : index
    %c0_15 = arith.constant 0 : index
    %c2_16 = arith.constant 2 : index
    %15 = vector.load %arg1[%c0_14, %c0_15, %c2_16] : memref<1x2x1022xf32, #tpu.memory_space<vmem>>, vector<1x2x800xf32>
    %16 = vector.shape_cast %15 : vector<1x2x800xf32> to vector<2x800xf32>
    %cst_17 = arith.constant dense<0.000000e+00> : vector<2x800xf32>
    %17 = tpu.matmul %14, %16, %cst_17 {dimension_numbers = #tpu.dot_dimension_numbers<[1], [0], [0], [1], [0, 0, 1, 1], [], []>} : vector<2x2xf32>, vector<2x800xf32>, vector<2x800xf32> -> vector<2x800xf32>
    %18 = arith.addf %12, %17 : vector<2x800xf32>
    %c3 = arith.constant 3 : index
    %c0_18 = arith.constant 0 : index
    %c0_19 = arith.constant 0 : index
    %19 = vector.load %arg2[%c3, %c0_18, %c0_19] : memref<27x2x2xf32, #tpu.memory_space<vmem>>, vector<1x2x2xf32>
    %20 = vector.shape_cast %19 : vector<1x2x2xf32> to vector<2x2xf32>
    %c0_20 = arith.constant 0 : index
    %c0_21 = arith.constant 0 : index
    %c10 = arith.constant 10 : index
    %21 = vector.load %arg1[%c0_20, %c0_21, %c10] : memref<1x2x1022xf32, #tpu.memory_space<vmem>>, vector<1x2x800xf32>
    %22 = vector.shape_cast %21 : vector<1x2x800xf32> to vector<2x800xf32>
    %cst_22 = arith.constant dense<0.000000e+00> : vector<2x800xf32>
    %23 = tpu.matmul %20, %22, %cst_22 {dimension_numbers = #tpu.dot_dimension_numbers<[1], [0], [0], [1], [0, 0, 1, 1], [], []>} : vector<2x2xf32>, vector<2x800xf32>, vector<2x800xf32> -> vector<2x800xf32>
    %24 = arith.addf %18, %23 : vector<2x800xf32>
    %c4 = arith.constant 4 : index
    %c0_23 = arith.constant 0 : index
    %c0_24 = arith.constant 0 : index
    %25 = vector.load %arg2[%c4, %c0_23, %c0_24] : memref<27x2x2xf32, #tpu.memory_space<vmem>>, vector<1x2x2xf32>
    %26 = vector.shape_cast %25 : vector<1x2x2xf32> to vector<2x2xf32>
    %c0_25 = arith.constant 0 : index
    %c0_26 = arith.constant 0 : index
    %c11 = arith.constant 11 : index
    %27 = vector.load %arg1[%c0_25, %c0_26, %c11] : memref<1x2x1022xf32, #tpu.memory_space<vmem>>, vector<1x2x800xf32>
    %28 = vector.shape_cast %27 : vector<1x2x800xf32> to vector<2x800xf32>
    %cst_27 = arith.constant dense<0.000000e+00> : vector<2x800xf32>
    %29 = tpu.matmul %26, %28, %cst_27 {dimension_numbers = #tpu.dot_dimension_numbers<[1], [0], [0], [1], [0, 0, 1, 1], [], []>} : vector<2x2xf32>, vector<2x800xf32>, vector<2x800xf32> -> vector<2x800xf32>
    %30 = arith.addf %24, %29 : vector<2x800xf32>
    %c5 = arith.constant 5 : index
    %c0_28 = arith.constant 0 : index
    %c0_29 = arith.constant 0 : index
    %31 = vector.load %arg2[%c5, %c0_28, %c0_29] : memref<27x2x2xf32, #tpu.memory_space<vmem>>, vector<1x2x2xf32>
    %32 = vector.shape_cast %31 : vector<1x2x2xf32> to vector<2x2xf32>
    %c0_30 = arith.constant 0 : index
    %c0_31 = arith.constant 0 : index
    %c12 = arith.constant 12 : index
    %33 = vector.load %arg1[%c0_30, %c0_31, %c12] : memref<1x2x1022xf32, #tpu.memory_space<vmem>>, vector<1x2x800xf32>
    %34 = vector.shape_cast %33 : vector<1x2x800xf32> to vector<2x800xf32>
    %cst_32 = arith.constant dense<0.000000e+00> : vector<2x800xf32>
    %35 = tpu.matmul %32, %34, %cst_32 {dimension_numbers = #tpu.dot_dimension_numbers<[1], [0], [0], [1], [0, 0, 1, 1], [], []>} : vector<2x2xf32>, vector<2x800xf32>, vector<2x800xf32> -> vector<2x800xf32>
    %36 = arith.addf %30, %35 : vector<2x800xf32>
    %c6 = arith.constant 6 : index
    %c0_33 = arith.constant 0 : index
    %c0_34 = arith.constant 0 : index
    %37 = vector.load %arg2[%c6, %c0_33, %c0_34] : memref<27x2x2xf32, #tpu.memory_space<vmem>>, vector<1x2x2xf32>
    %38 = vector.shape_cast %37 : vector<1x2x2xf32> to vector<2x2xf32>
    %c0_35 = arith.constant 0 : index
    %c0_36 = arith.constant 0 : index
    %c20 = arith.constant 20 : index
    %39 = vector.load %arg1[%c0_35, %c0_36, %c20] : memref<1x2x1022xf32, #tpu.memory_space<vmem>>, vector<1x2x800xf32>
    %40 = vector.shape_cast %39 : vector<1x2x800xf32> to vector<2x800xf32>
    %cst_37 = arith.constant dense<0.000000e+00> : vector<2x800xf32>
    %41 = tpu.matmul %38, %40, %cst_37 {dimension_numbers = #tpu.dot_dimension_numbers<[1], [0], [0], [1], [0, 0, 1, 1], [], []>} : vector<2x2xf32>, vector<2x800xf32>, vector<2x800xf32> -> vector<2x800xf32>
    %42 = arith.addf %36, %41 : vector<2x800xf32>
    %c7 = arith.constant 7 : index
    %c0_38 = arith.constant 0 : index
    %c0_39 = arith.constant 0 : index
    %43 = vector.load %arg2[%c7, %c0_38, %c0_39] : memref<27x2x2xf32, #tpu.memory_space<vmem>>, vector<1x2x2xf32>
    %44 = vector.shape_cast %43 : vector<1x2x2xf32> to vector<2x2xf32>
    %c0_40 = arith.constant 0 : index
    %c0_41 = arith.constant 0 : index
    %c21 = arith.constant 21 : index
    %45 = vector.load %arg1[%c0_40, %c0_41, %c21] : memref<1x2x1022xf32, #tpu.memory_space<vmem>>, vector<1x2x800xf32>
    %46 = vector.shape_cast %45 : vector<1x2x800xf32> to vector<2x800xf32>
    %cst_42 = arith.constant dense<0.000000e+00> : vector<2x800xf32>
    %47 = tpu.matmul %44, %46, %cst_42 {dimension_numbers = #tpu.dot_dimension_numbers<[1], [0], [0], [1], [0, 0, 1, 1], [], []>} : vector<2x2xf32>, vector<2x800xf32>, vector<2x800xf32> -> vector<2x800xf32>
    %48 = arith.addf %42, %47 : vector<2x800xf32>
    %c8 = arith.constant 8 : index
    %c0_43 = arith.constant 0 : index
    %c0_44 = arith.constant 0 : index
    %49 = vector.load %arg2[%c8, %c0_43, %c0_44] : memref<27x2x2xf32, #tpu.memory_space<vmem>>, vector<1x2x2xf32>
    %50 = vector.shape_cast %49 : vector<1x2x2xf32> to vector<2x2xf32>
    %c0_45 = arith.constant 0 : index
    %c0_46 = arith.constant 0 : index
    %c22 = arith.constant 22 : index
    %51 = vector.load %arg1[%c0_45, %c0_46, %c22] : memref<1x2x1022xf32, #tpu.memory_space<vmem>>, vector<1x2x800xf32>
    %52 = vector.shape_cast %51 : vector<1x2x800xf32> to vector<2x800xf32>
    %cst_47 = arith.constant dense<0.000000e+00> : vector<2x800xf32>
    %53 = tpu.matmul %50, %52, %cst_47 {dimension_numbers = #tpu.dot_dimension_numbers<[1], [0], [0], [1], [0, 0, 1, 1], [], []>} : vector<2x2xf32>, vector<2x800xf32>, vector<2x800xf32> -> vector<2x800xf32>
    %54 = arith.addf %48, %53 : vector<2x800xf32>
    %c9 = arith.constant 9 : index
    %c0_48 = arith.constant 0 : index
    %c0_49 = arith.constant 0 : index
    %55 = vector.load %arg2[%c9, %c0_48, %c0_49] : memref<27x2x2xf32, #tpu.memory_space<vmem>>, vector<1x2x2xf32>
    %56 = vector.shape_cast %55 : vector<1x2x2xf32> to vector<2x2xf32>
    %c0_50 = arith.constant 0 : index
    %c0_51 = arith.constant 0 : index
    %c100 = arith.constant 100 : index
    %57 = vector.load %arg1[%c0_50, %c0_51, %c100] : memref<1x2x1022xf32, #tpu.memory_space<vmem>>, vector<1x2x800xf32>
    %58 = vector.shape_cast %57 : vector<1x2x800xf32> to vector<2x800xf32>
    %cst_52 = arith.constant dense<0.000000e+00> : vector<2x800xf32>
    %59 = tpu.matmul %56, %58, %cst_52 {dimension_numbers = #tpu.dot_dimension_numbers<[1], [0], [0], [1], [0, 0, 1, 1], [], []>} : vector<2x2xf32>, vector<2x800xf32>, vector<2x800xf32> -> vector<2x800xf32>
    %60 = arith.addf %54, %59 : vector<2x800xf32>
    %c10_53 = arith.constant 10 : index
    %c0_54 = arith.constant 0 : index
    %c0_55 = arith.constant 0 : index
    %61 = vector.load %arg2[%c10_53, %c0_54, %c0_55] : memref<27x2x2xf32, #tpu.memory_space<vmem>>, vector<1x2x2xf32>
    %62 = vector.shape_cast %61 : vector<1x2x2xf32> to vector<2x2xf32>
    %c0_56 = arith.constant 0 : index
    %c0_57 = arith.constant 0 : index
    %c101 = arith.constant 101 : index
    %63 = vector.load %arg1[%c0_56, %c0_57, %c101] : memref<1x2x1022xf32, #tpu.memory_space<vmem>>, vector<1x2x800xf32>
    %64 = vector.shape_cast %63 : vector<1x2x800xf32> to vector<2x800xf32>
    %cst_58 = arith.constant dense<0.000000e+00> : vector<2x800xf32>
    %65 = tpu.matmul %62, %64, %cst_58 {dimension_numbers = #tpu.dot_dimension_numbers<[1], [0], [0], [1], [0, 0, 1, 1], [], []>} : vector<2x2xf32>, vector<2x800xf32>, vector<2x800xf32> -> vector<2x800xf32>
    %66 = arith.addf %60, %65 : vector<2x800xf32>
    %c11_59 = arith.constant 11 : index
    %c0_60 = arith.constant 0 : index
    %c0_61 = arith.constant 0 : index
    %67 = vector.load %arg2[%c11_59, %c0_60, %c0_61] : memref<27x2x2xf32, #tpu.memory_space<vmem>>, vector<1x2x2xf32>
    %68 = vector.shape_cast %67 : vector<1x2x2xf32> to vector<2x2xf32>
    %c0_62 = arith.constant 0 : index
    %c0_63 = arith.constant 0 : index
    %c102 = arith.constant 102 : index
    %69 = vector.load %arg1[%c0_62, %c0_63, %c102] : memref<1x2x1022xf32, #tpu.memory_space<vmem>>, vector<1x2x800xf32>
    %70 = vector.shape_cast %69 : vector<1x2x800xf32> to vector<2x800xf32>
    %cst_64 = arith.constant dense<0.000000e+00> : vector<2x800xf32>
    %71 = tpu.matmul %68, %70, %cst_64 {dimension_numbers = #tpu.dot_dimension_numbers<[1], [0], [0], [1], [0, 0, 1, 1], [], []>} : vector<2x2xf32>, vector<2x800xf32>, vector<2x800xf32> -> vector<2x800xf32>
    %72 = arith.addf %66, %71 : vector<2x800xf32>
    %c12_65 = arith.constant 12 : index
    %c0_66 = arith.constant 0 : index
    %c0_67 = arith.constant 0 : index
    %73 = vector.load %arg2[%c12_65, %c0_66, %c0_67] : memref<27x2x2xf32, #tpu.memory_space<vmem>>, vector<1x2x2xf32>
    %74 = vector.shape_cast %73 : vector<1x2x2xf32> to vector<2x2xf32>
    %c0_68 = arith.constant 0 : index
    %c0_69 = arith.constant 0 : index
    %c110 = arith.constant 110 : index
    %75 = vector.load %arg1[%c0_68, %c0_69, %c110] : memref<1x2x1022xf32, #tpu.memory_space<vmem>>, vector<1x2x800xf32>
    %76 = vector.shape_cast %75 : vector<1x2x800xf32> to vector<2x800xf32>
    %cst_70 = arith.constant dense<0.000000e+00> : vector<2x800xf32>
    %77 = tpu.matmul %74, %76, %cst_70 {dimension_numbers = #tpu.dot_dimension_numbers<[1], [0], [0], [1], [0, 0, 1, 1], [], []>} : vector<2x2xf32>, vector<2x800xf32>, vector<2x800xf32> -> vector<2x800xf32>
    %78 = arith.addf %72, %77 : vector<2x800xf32>
    %c13 = arith.constant 13 : index
    %c0_71 = arith.constant 0 : index
    %c0_72 = arith.constant 0 : index
    %79 = vector.load %arg2[%c13, %c0_71, %c0_72] : memref<27x2x2xf32, #tpu.memory_space<vmem>>, vector<1x2x2xf32>
    %80 = vector.shape_cast %79 : vector<1x2x2xf32> to vector<2x2xf32>
    %c0_73 = arith.constant 0 : index
    %c0_74 = arith.constant 0 : index
    %c111 = arith.constant 111 : index
    %81 = vector.load %arg1[%c0_73, %c0_74, %c111] : memref<1x2x1022xf32, #tpu.memory_space<vmem>>, vector<1x2x800xf32>
    %82 = vector.shape_cast %81 : vector<1x2x800xf32> to vector<2x800xf32>
    %cst_75 = arith.constant dense<0.000000e+00> : vector<2x800xf32>
    %83 = tpu.matmul %80, %82, %cst_75 {dimension_numbers = #tpu.dot_dimension_numbers<[1], [0], [0], [1], [0, 0, 1, 1], [], []>} : vector<2x2xf32>, vector<2x800xf32>, vector<2x800xf32> -> vector<2x800xf32>
    %84 = arith.addf %78, %83 : vector<2x800xf32>
    %c14 = arith.constant 14 : index
    %c0_76 = arith.constant 0 : index
    %c0_77 = arith.constant 0 : index
    %85 = vector.load %arg2[%c14, %c0_76, %c0_77] : memref<27x2x2xf32, #tpu.memory_space<vmem>>, vector<1x2x2xf32>
    %86 = vector.shape_cast %85 : vector<1x2x2xf32> to vector<2x2xf32>
    %c0_78 = arith.constant 0 : index
    %c0_79 = arith.constant 0 : index
    %c112 = arith.constant 112 : index
    %87 = vector.load %arg1[%c0_78, %c0_79, %c112] : memref<1x2x1022xf32, #tpu.memory_space<vmem>>, vector<1x2x800xf32>
    %88 = vector.shape_cast %87 : vector<1x2x800xf32> to vector<2x800xf32>
    %cst_80 = arith.constant dense<0.000000e+00> : vector<2x800xf32>
    %89 = tpu.matmul %86, %88, %cst_80 {dimension_numbers = #tpu.dot_dimension_numbers<[1], [0], [0], [1], [0, 0, 1, 1], [], []>} : vector<2x2xf32>, vector<2x800xf32>, vector<2x800xf32> -> vector<2x800xf32>
    %90 = arith.addf %84, %89 : vector<2x800xf32>
    %c15 = arith.constant 15 : index
    %c0_81 = arith.constant 0 : index
    %c0_82 = arith.constant 0 : index
    %91 = vector.load %arg2[%c15, %c0_81, %c0_82] : memref<27x2x2xf32, #tpu.memory_space<vmem>>, vector<1x2x2xf32>
    %92 = vector.shape_cast %91 : vector<1x2x2xf32> to vector<2x2xf32>
    %c0_83 = arith.constant 0 : index
    %c0_84 = arith.constant 0 : index
    %c120 = arith.constant 120 : index
    %93 = vector.load %arg1[%c0_83, %c0_84, %c120] : memref<1x2x1022xf32, #tpu.memory_space<vmem>>, vector<1x2x800xf32>
    %94 = vector.shape_cast %93 : vector<1x2x800xf32> to vector<2x800xf32>
    %cst_85 = arith.constant dense<0.000000e+00> : vector<2x800xf32>
    %95 = tpu.matmul %92, %94, %cst_85 {dimension_numbers = #tpu.dot_dimension_numbers<[1], [0], [0], [1], [0, 0, 1, 1], [], []>} : vector<2x2xf32>, vector<2x800xf32>, vector<2x800xf32> -> vector<2x800xf32>
    %96 = arith.addf %90, %95 : vector<2x800xf32>
    %c16 = arith.constant 16 : index
    %c0_86 = arith.constant 0 : index
    %c0_87 = arith.constant 0 : index
    %97 = vector.load %arg2[%c16, %c0_86, %c0_87] : memref<27x2x2xf32, #tpu.memory_space<vmem>>, vector<1x2x2xf32>
    %98 = vector.shape_cast %97 : vector<1x2x2xf32> to vector<2x2xf32>
    %c0_88 = arith.constant 0 : index
    %c0_89 = arith.constant 0 : index
    %c121 = arith.constant 121 : index
    %99 = vector.load %arg1[%c0_88, %c0_89, %c121] : memref<1x2x1022xf32, #tpu.memory_space<vmem>>, vector<1x2x800xf32>
    %100 = vector.shape_cast %99 : vector<1x2x800xf32> to vector<2x800xf32>
    %cst_90 = arith.constant dense<0.000000e+00> : vector<2x800xf32>
    %101 = tpu.matmul %98, %100, %cst_90 {dimension_numbers = #tpu.dot_dimension_numbers<[1], [0], [0], [1], [0, 0, 1, 1], [], []>} : vector<2x2xf32>, vector<2x800xf32>, vector<2x800xf32> -> vector<2x800xf32>
    %102 = arith.addf %96, %101 : vector<2x800xf32>
    %c17 = arith.constant 17 : index
    %c0_91 = arith.constant 0 : index
    %c0_92 = arith.constant 0 : index
    %103 = vector.load %arg2[%c17, %c0_91, %c0_92] : memref<27x2x2xf32, #tpu.memory_space<vmem>>, vector<1x2x2xf32>
    %104 = vector.shape_cast %103 : vector<1x2x2xf32> to vector<2x2xf32>
    %c0_93 = arith.constant 0 : index
    %c0_94 = arith.constant 0 : index
    %c122 = arith.constant 122 : index
    %105 = vector.load %arg1[%c0_93, %c0_94, %c122] : memref<1x2x1022xf32, #tpu.memory_space<vmem>>, vector<1x2x800xf32>
    %106 = vector.shape_cast %105 : vector<1x2x800xf32> to vector<2x800xf32>
    %cst_95 = arith.constant dense<0.000000e+00> : vector<2x800xf32>
    %107 = tpu.matmul %104, %106, %cst_95 {dimension_numbers = #tpu.dot_dimension_numbers<[1], [0], [0], [1], [0, 0, 1, 1], [], []>} : vector<2x2xf32>, vector<2x800xf32>, vector<2x800xf32> -> vector<2x800xf32>
    %108 = arith.addf %102, %107 : vector<2x800xf32>
    %c18 = arith.constant 18 : index
    %c0_96 = arith.constant 0 : index
    %c0_97 = arith.constant 0 : index
    %109 = vector.load %arg2[%c18, %c0_96, %c0_97] : memref<27x2x2xf32, #tpu.memory_space<vmem>>, vector<1x2x2xf32>
    %110 = vector.shape_cast %109 : vector<1x2x2xf32> to vector<2x2xf32>
    %c0_98 = arith.constant 0 : index
    %c0_99 = arith.constant 0 : index
    %c200 = arith.constant 200 : index
    %111 = vector.load %arg1[%c0_98, %c0_99, %c200] : memref<1x2x1022xf32, #tpu.memory_space<vmem>>, vector<1x2x800xf32>
    %112 = vector.shape_cast %111 : vector<1x2x800xf32> to vector<2x800xf32>
    %cst_100 = arith.constant dense<0.000000e+00> : vector<2x800xf32>
    %113 = tpu.matmul %110, %112, %cst_100 {dimension_numbers = #tpu.dot_dimension_numbers<[1], [0], [0], [1], [0, 0, 1, 1], [], []>} : vector<2x2xf32>, vector<2x800xf32>, vector<2x800xf32> -> vector<2x800xf32>
    %114 = arith.addf %108, %113 : vector<2x800xf32>
    %c19 = arith.constant 19 : index
    %c0_101 = arith.constant 0 : index
    %c0_102 = arith.constant 0 : index
    %115 = vector.load %arg2[%c19, %c0_101, %c0_102] : memref<27x2x2xf32, #tpu.memory_space<vmem>>, vector<1x2x2xf32>
    %116 = vector.shape_cast %115 : vector<1x2x2xf32> to vector<2x2xf32>
    %c0_103 = arith.constant 0 : index
    %c0_104 = arith.constant 0 : index
    %c201 = arith.constant 201 : index
    %117 = vector.load %arg1[%c0_103, %c0_104, %c201] : memref<1x2x1022xf32, #tpu.memory_space<vmem>>, vector<1x2x800xf32>
    %118 = vector.shape_cast %117 : vector<1x2x800xf32> to vector<2x800xf32>
    %cst_105 = arith.constant dense<0.000000e+00> : vector<2x800xf32>
    %119 = tpu.matmul %116, %118, %cst_105 {dimension_numbers = #tpu.dot_dimension_numbers<[1], [0], [0], [1], [0, 0, 1, 1], [], []>} : vector<2x2xf32>, vector<2x800xf32>, vector<2x800xf32> -> vector<2x800xf32>
    %120 = arith.addf %114, %119 : vector<2x800xf32>
    %c20_106 = arith.constant 20 : index
    %c0_107 = arith.constant 0 : index
    %c0_108 = arith.constant 0 : index
    %121 = vector.load %arg2[%c20_106, %c0_107, %c0_108] : memref<27x2x2xf32, #tpu.memory_space<vmem>>, vector<1x2x2xf32>
    %122 = vector.shape_cast %121 : vector<1x2x2xf32> to vector<2x2xf32>
    %c0_109 = arith.constant 0 : index
    %c0_110 = arith.constant 0 : index
    %c202 = arith.constant 202 : index
    %123 = vector.load %arg1[%c0_109, %c0_110, %c202] : memref<1x2x1022xf32, #tpu.memory_space<vmem>>, vector<1x2x800xf32>
    %124 = vector.shape_cast %123 : vector<1x2x800xf32> to vector<2x800xf32>
    %cst_111 = arith.constant dense<0.000000e+00> : vector<2x800xf32>
    %125 = tpu.matmul %122, %124, %cst_111 {dimension_numbers = #tpu.dot_dimension_numbers<[1], [0], [0], [1], [0, 0, 1, 1], [], []>} : vector<2x2xf32>, vector<2x800xf32>, vector<2x800xf32> -> vector<2x800xf32>
    %126 = arith.addf %120, %125 : vector<2x800xf32>
    %c21_112 = arith.constant 21 : index
    %c0_113 = arith.constant 0 : index
    %c0_114 = arith.constant 0 : index
    %127 = vector.load %arg2[%c21_112, %c0_113, %c0_114] : memref<27x2x2xf32, #tpu.memory_space<vmem>>, vector<1x2x2xf32>
    %128 = vector.shape_cast %127 : vector<1x2x2xf32> to vector<2x2xf32>
    %c0_115 = arith.constant 0 : index
    %c0_116 = arith.constant 0 : index
    %c210 = arith.constant 210 : index
    %129 = vector.load %arg1[%c0_115, %c0_116, %c210] : memref<1x2x1022xf32, #tpu.memory_space<vmem>>, vector<1x2x800xf32>
    %130 = vector.shape_cast %129 : vector<1x2x800xf32> to vector<2x800xf32>
    %cst_117 = arith.constant dense<0.000000e+00> : vector<2x800xf32>
    %131 = tpu.matmul %128, %130, %cst_117 {dimension_numbers = #tpu.dot_dimension_numbers<[1], [0], [0], [1], [0, 0, 1, 1], [], []>} : vector<2x2xf32>, vector<2x800xf32>, vector<2x800xf32> -> vector<2x800xf32>
    %132 = arith.addf %126, %131 : vector<2x800xf32>
    %c22_118 = arith.constant 22 : index
    %c0_119 = arith.constant 0 : index
    %c0_120 = arith.constant 0 : index
    %133 = vector.load %arg2[%c22_118, %c0_119, %c0_120] : memref<27x2x2xf32, #tpu.memory_space<vmem>>, vector<1x2x2xf32>
    %134 = vector.shape_cast %133 : vector<1x2x2xf32> to vector<2x2xf32>
    %c0_121 = arith.constant 0 : index
    %c0_122 = arith.constant 0 : index
    %c211 = arith.constant 211 : index
    %135 = vector.load %arg1[%c0_121, %c0_122, %c211] : memref<1x2x1022xf32, #tpu.memory_space<vmem>>, vector<1x2x800xf32>
    %136 = vector.shape_cast %135 : vector<1x2x800xf32> to vector<2x800xf32>
    %cst_123 = arith.constant dense<0.000000e+00> : vector<2x800xf32>
    %137 = tpu.matmul %134, %136, %cst_123 {dimension_numbers = #tpu.dot_dimension_numbers<[1], [0], [0], [1], [0, 0, 1, 1], [], []>} : vector<2x2xf32>, vector<2x800xf32>, vector<2x800xf32> -> vector<2x800xf32>
    %138 = arith.addf %132, %137 : vector<2x800xf32>
    %c23 = arith.constant 23 : index
    %c0_124 = arith.constant 0 : index
    %c0_125 = arith.constant 0 : index
    %139 = vector.load %arg2[%c23, %c0_124, %c0_125] : memref<27x2x2xf32, #tpu.memory_space<vmem>>, vector<1x2x2xf32>
    %140 = vector.shape_cast %139 : vector<1x2x2xf32> to vector<2x2xf32>
    %c0_126 = arith.constant 0 : index
    %c0_127 = arith.constant 0 : index
    %c212 = arith.constant 212 : index
    %141 = vector.load %arg1[%c0_126, %c0_127, %c212] : memref<1x2x1022xf32, #tpu.memory_space<vmem>>, vector<1x2x800xf32>
    %142 = vector.shape_cast %141 : vector<1x2x800xf32> to vector<2x800xf32>
    %cst_128 = arith.constant dense<0.000000e+00> : vector<2x800xf32>
    %143 = tpu.matmul %140, %142, %cst_128 {dimension_numbers = #tpu.dot_dimension_numbers<[1], [0], [0], [1], [0, 0, 1, 1], [], []>} : vector<2x2xf32>, vector<2x800xf32>, vector<2x800xf32> -> vector<2x800xf32>
    %144 = arith.addf %138, %143 : vector<2x800xf32>
    %c24 = arith.constant 24 : index
    %c0_129 = arith.constant 0 : index
    %c0_130 = arith.constant 0 : index
    %145 = vector.load %arg2[%c24, %c0_129, %c0_130] : memref<27x2x2xf32, #tpu.memory_space<vmem>>, vector<1x2x2xf32>
    %146 = vector.shape_cast %145 : vector<1x2x2xf32> to vector<2x2xf32>
    %c0_131 = arith.constant 0 : index
    %c0_132 = arith.constant 0 : index
    %c220 = arith.constant 220 : index
    %147 = vector.load %arg1[%c0_131, %c0_132, %c220] : memref<1x2x1022xf32, #tpu.memory_space<vmem>>, vector<1x2x800xf32>
    %148 = vector.shape_cast %147 : vector<1x2x800xf32> to vector<2x800xf32>
    %cst_133 = arith.constant dense<0.000000e+00> : vector<2x800xf32>
    %149 = tpu.matmul %146, %148, %cst_133 {dimension_numbers = #tpu.dot_dimension_numbers<[1], [0], [0], [1], [0, 0, 1, 1], [], []>} : vector<2x2xf32>, vector<2x800xf32>, vector<2x800xf32> -> vector<2x800xf32>
    %150 = arith.addf %144, %149 : vector<2x800xf32>
    %c25 = arith.constant 25 : index
    %c0_134 = arith.constant 0 : index
    %c0_135 = arith.constant 0 : index
    %151 = vector.load %arg2[%c25, %c0_134, %c0_135] : memref<27x2x2xf32, #tpu.memory_space<vmem>>, vector<1x2x2xf32>
    %152 = vector.shape_cast %151 : vector<1x2x2xf32> to vector<2x2xf32>
    %c0_136 = arith.constant 0 : index
    %c0_137 = arith.constant 0 : index
    %c221 = arith.constant 221 : index
    %153 = vector.load %arg1[%c0_136, %c0_137, %c221] : memref<1x2x1022xf32, #tpu.memory_space<vmem>>, vector<1x2x800xf32>
    %154 = vector.shape_cast %153 : vector<1x2x800xf32> to vector<2x800xf32>
    %cst_138 = arith.constant dense<0.000000e+00> : vector<2x800xf32>
    %155 = tpu.matmul %152, %154, %cst_138 {dimension_numbers = #tpu.dot_dimension_numbers<[1], [0], [0], [1], [0, 0, 1, 1], [], []>} : vector<2x2xf32>, vector<2x800xf32>, vector<2x800xf32> -> vector<2x800xf32>
    %156 = arith.addf %150, %155 : vector<2x800xf32>
    %c26 = arith.constant 26 : index
    %c0_139 = arith.constant 0 : index
    %c0_140 = arith.constant 0 : index
    %157 = vector.load %arg2[%c26, %c0_139, %c0_140] : memref<27x2x2xf32, #tpu.memory_space<vmem>>, vector<1x2x2xf32>
    %158 = vector.shape_cast %157 : vector<1x2x2xf32> to vector<2x2xf32>
    %c0_141 = arith.constant 0 : index
    %c0_142 = arith.constant 0 : index
    %c222 = arith.constant 222 : index
    %159 = vector.load %arg1[%c0_141, %c0_142, %c222] : memref<1x2x1022xf32, #tpu.memory_space<vmem>>, vector<1x2x800xf32>
    %160 = vector.shape_cast %159 : vector<1x2x800xf32> to vector<2x800xf32>
    %cst_143 = arith.constant dense<0.000000e+00> : vector<2x800xf32>
    %161 = tpu.matmul %158, %160, %cst_143 {dimension_numbers = #tpu.dot_dimension_numbers<[1], [0], [0], [1], [0, 0, 1, 1], [], []>} : vector<2x2xf32>, vector<2x800xf32>, vector<2x800xf32> -> vector<2x800xf32>
    %162 = arith.addf %156, %161 : vector<2x800xf32>
    %c0_144 = arith.constant 0 : index
    %c0_145 = arith.constant 0 : index
    %163 = vector.load %arg3[%c0_144, %c0_145] : memref<2x1xf32, #tpu.memory_space<vmem>>, vector<2x1xf32>
    %164 = vector.broadcast %163 : vector<2x1xf32> to vector<2x800xf32>
    %165 = arith.addf %162, %164 : vector<2x800xf32>
    %c0_146 = arith.constant 0 : index
    %c0_147 = arith.constant 0 : index
    %166 = vector.load %arg4[%c0_146, %c0_147] : memref<1x800xf32, #tpu.memory_space<vmem>>, vector<1x800xf32>
    %167 = vector.broadcast %166 : vector<1x800xf32> to vector<2x800xf32>
    %168 = arith.mulf %165, %167 : vector<2x800xf32>
    %cst_148 = arith.constant dense<0.000000e+00> : vector<2xf32>
    %169 = vector.multi_reduction <add>, %168, %cst_148 [1] : vector<2x800xf32> to vector<2xf32>
    %170 = vector.shape_cast %169 : vector<2xf32> to vector<2x1xf32>
    %cst_149 = arith.constant 0.001953125 : f32
    %171 = vector.broadcast %cst_149 : f32 to vector<2x1xf32>
    %172 = arith.mulf %170, %171 : vector<2x1xf32>
    %173 = vector.broadcast %172 : vector<2x1xf32> to vector<2x800xf32>
    %174 = arith.subf %165, %173 : vector<2x800xf32>
    %175 = vector.broadcast %166 : vector<1x800xf32> to vector<2x800xf32>
    %176 = arith.mulf %174, %175 : vector<2x800xf32>
    %177 = arith.mulf %176, %176 : vector<2x800xf32>
    %cst_150 = arith.constant dense<0.000000e+00> : vector<2xf32>
    %178 = vector.multi_reduction <add>, %177, %cst_150 [1] : vector<2x800xf32> to vector<2xf32>
    %179 = vector.shape_cast %178 : vector<2xf32> to vector<2x1xf32>
    %cst_151 = arith.constant 0.001953125 : f32
    %180 = vector.broadcast %cst_151 : f32 to vector<2x1xf32>
    %181 = arith.mulf %179, %180 : vector<2x1xf32>
    %cst_152 = arith.constant 9.99999974E-6 : f32
    %182 = vector.broadcast %cst_152 : f32 to vector<2x1xf32>
    %183 = arith.addf %181, %182 : vector<2x1xf32>
    %184 = math.rsqrt %183 : vector<2x1xf32>
    %185 = vector.broadcast %184 : vector<2x1xf32> to vector<2x800xf32>
    %186 = arith.mulf %176, %185 : vector<2x800xf32>
    %cst_153 = arith.constant 0.000000e+00 : f32
    %187 = vector.broadcast %cst_153 : f32 to vector<2x800xf32>
    %188 = arith.maximumf %186, %187 : vector<2x800xf32>
    %c0_154 = arith.constant 0 : index
    %c0_155 = arith.constant 0 : index
    %c0_156 = arith.constant 0 : index
    %189 = vector.load %arg5[%c0_154, %c0_155, %c0_156] : memref<1x2x800xf32, #tpu.memory_space<vmem>>, vector<1x2x800xf32>
    %190 = vector.shape_cast %189 : vector<1x2x800xf32> to vector<2x800xf32>
    %191 = vector.shape_cast %188 : vector<2x800xf32> to vector<1x2x800xf32>
    tpu.vector_store %arg5[%c0_154, %c0_155, %c0_156], %191 {strides = array<i32>} : memref<1x2x800xf32, #tpu.memory_space<vmem>>, vector<1x2x800xf32>,
    return
  }
  func.func @transform_0(%arg0: i32) -> (i32, i32, i32) {
    %c0_i32 = arith.constant 0 : i32
    %c0_i32_0 = arith.constant 0 : i32
    %c0_i32_1 = arith.constant 0 : i32
    return %arg0, %c0_i32, %c0_i32_0 : i32, i32, i32
  }
  func.func @transform_1(%arg0: i32) -> (i32, i32, i32) {
    %c0_i32 = arith.constant 0 : i32
    %c0_i32_0 = arith.constant 0 : i32
    %c0_i32_1 = arith.constant 0 : i32
    %c0_i32_2 = arith.constant 0 : i32
    return %c0_i32, %c0_i32_0, %c0_i32_1 : i32, i32, i32
  }
  func.func @transform_2(%arg0: i32) -> (i32, i32) {
    %c0_i32 = arith.constant 0 : i32
    %c0_i32_0 = arith.constant 0 : i32
    %c0_i32_1 = arith.constant 0 : i32
    return %c0_i32, %c0_i32_0 : i32, i32
  }
  func.func @transform_3(%arg0: i32) -> (i32, i32) {
    %c0_i32 = arith.constant 0 : i32
    %c0_i32_0 = arith.constant 0 : i32
    %c0_i32_1 = arith.constant 0 : i32
    return %c0_i32, %c0_i32_0 : i32, i32
  }
  func.func @transform_4(%arg0: i32) -> (i32, i32, i32) {
    %c0_i32 = arith.constant 0 : i32
    %c0_i32_0 = arith.constant 0 : i32
    %c0_i32_1 = arith.constant 0 : i32
    return %arg0, %c0_i32, %c0_i32_0 : i32, i32, i32
  }
}

</mosaic_0001>

<bundles_post_ra>
// kernel: up_forward.3
= control target key start
LH: loop header
LB: loop body
LE: loop exit
PB: predicated region body
PF: predicated region fallthrough
CT: control target
= control target key end

     0   :  { %s388_s12 = smov 0   ;;  %s419_s0 = inlined_call_operand.vmem [shape: f32[2,4,64], index: 0, kind: input, shape index: {}]   ;;  %s420_s1 = inlined_call_operand.vmem [shape: f32[16,4], index: 1, kind: input, shape index: {}]   ;;  %s421_s2 = inlined_call_operand.vmem [shape: f32[16,1], index: 2, kind: input, shape index: {}]   ;;  %s422_s3 = inlined_call_operand.vmem [shape: f32[2,16,64], index: 3, kind: output, shape index: {}]  }
   0x1 LB: > { %s327_s13 = sadd.s32 4294967295, %s365_s12   ;;  %p331_p0 = scmp.ge.s32.totalorder %s365_s12, 1  ;;  %s365_s12 = sphi %s388_s12, %s13_s12  }
   0x2   : > { %p136_p1 = scmp.lt.s32.totalorder %s365_s12, 3 }
   0x4   : > { %p137_p2 = pnand %p331_p0, %p136_p1 }
   0x5   : > { %p159_p3 = scmp.lt.s32.totalorder (!%p137_p2), %s327_s13, 1  ;;  %v168_v0 = vld [vmem:[%s420_s1] sm:$0xff] (!%p137_p2)  ;;  %vm183_vm0 = vcmask (!%p137_p2), 31744   ;;  %v367_v1 = vmov (!%p137_p2), 0   ;;  %v172_v3 = vld [vmem:[%s421_s2 + $0x8] sm:$0xff] (!%p137_p2)  ;;  %vm190_vm1 = vcmask (!%p137_p2), 1043456  }
   0x6   : > { %140 = sbr.rel (%p137_p2) target bundleno = 235 (0xeb), region = 32  ;;  %346 = vmatprep.mubr.msk.f32.mxu0 (!%p137_p2), %vm183_vm0, %v168_v0  ;;  %358 = vset.pattern.permute.xlu0 (!%p137_p2), %v367_v1  ;;  %v171_v2 = vld [vmem:[%s421_s2] sm:$0xff] (!%p137_p2)  ;;  %v169_v5 = vld [vmem:[%s420_s1 + $0x8] sm:$0xff] (!%p137_p2)  ;;  %vm269_vm2 = vcmask (!%p137_p2), 523264  }
   0x7   : > { %175 = vperm.xlu0 (!%p137_p2), %358, %v171_v2  }
   0xb   : > { %180 = vperm.xlu0 (!%p137_p2), %358, %v172_v3  }
   0xd   : > { %s424_s13 = smov (!%p159_p3, %s327_s13), 1 }
   0xe   : > { %s332_s20 = sshll.u32 %s424_s13, 2  ;;  %s340_s26 = sshll.u32 %s424_s13, 4 }
   0xf   : > { %s162_s23 = scalar_lea.vmem %s419_s0, %s332_s20  ;;  %s167_s29 = scalar_lea.vmem %s422_s3, %s340_s26 }
  0x10   : > { %v170_v4 = vld [vmem:[%s162_s23] sm:$0xf] }
  0x11   : > { %344 = vmatprep.subr.msk.mxu0 %vm190_vm1, %v170_v4 }
  0x12   : > { %345 = vmatpush3.msk.msra.mxu0 %vm190_vm1, %v170_v4 }
  0x13   : > { %347 = vmatmul.mubr.msk.f32.vlgmr.msra.gmra.mrb[0].mxu0 %vm183_vm0, %v169_v5 }
  0x86   : > { %v176_v6 = vpop.permute.xlu0 %175 }
  0x8a   : > { %v181_v7 = vpop.permute.xlu0 %180 }
  0xe6   : > { %v348_v8 = vpop.f32.mrb[0].mxu0 }
  0xe7   : > { %v266_v9 = vadd.f32 %v348_v8, %v181_v7  ;;  %v260_v10 = vpop.f32.mrb[1].mxu0 }
  0xe8   : > { %v261_v11 = vadd.f32 %v260_v10, %v176_v6 }
  0xe9   : > { %271 = vst.msk [vmem:[%s167_s29 + $0x8] sm:$0xff] %vm269_vm2, %v266_v9 }
  0xea   : > { %270 = vst.msk [vmem:[%s167_s29] sm:$0xff] %vm269_vm2, %v261_v11 }
  0xeb PF: > { %s13_s12 = sadd.s32 1, %s365_s12  }
  0xec   : > { %p10_p4 = scmp.ge.s32.totalorder %s13_s12, 4  }
  0xee   :  { %12 = sbr.rel (!%p10_p4) target bundleno = 1 (0x1), region = 62 }

// kernel: up_forward.5
= control target key start
LH: loop header
LB: loop body
LE: loop exit
PB: predicated region body
PF: predicated region fallthrough
CT: control target
= control target key end

     0   :  { %s11108_s15 = smov 0   ;;  %s12239_s0 = inlined_call_operand.vmem [shape: f32[2,2,1022], index: 0, kind: input, shape index: {}]   ;;  %s12240_s1 = inlined_call_operand.vmem [shape: f32[27,2,2], index: 1, kind: input, shape index: {}]   ;;  %s12241_s2 = inlined_call_operand.vmem [shape: f32[2,1], index: 2, kind: input, shape index: {}]   ;;  %s12242_s3 = inlined_call_operand.vmem [shape: f32[1,800], index: 3, kind: input, shape index: {}]   ;;  %s12243_s4 = inlined_call_operand.vmem [shape: f32[2,2,800], index: 4, kind: output, shape index: {}]  }
   0x1 LB: > { %s10302_s16 = sadd.s32 4294967295, %s11051_s15   ;;  %p10306_p0 = scmp.ge.s32.totalorder %s11051_s15, 1  ;;  %s11051_s15 = sphi %s11108_s15, %s14_s15  }
   0x2   : > { %p162_p1 = scmp.lt.s32.totalorder %s11051_s15, 3 }
   0x4   : > { %p163_p2 = pnand %p10306_p0, %p162_p1 }
   0x5   : > { %p188_p3 = scmp.lt.s32.totalorder (!%p163_p2), %s10302_s16, 1  ;;  %v209_v0 = vlaneseq (!%p163_p2)  ;;  %v11053_v1 = vmov (!%p163_p2), 1983009808   ;;  %s11054_s21 = smov (!%p163_p2), 127   ;;  %v11055_v13 = vmov (!%p163_p2), 0.0   ;;  %vm252_vm0 = vcmask (!%p163_p2), 1039360  }
   0x6   : > { %166 = sbr.rel (%p163_p2) target bundleno = 1077 (0x435), region = 36  ;;  %v207_v2 = vunpack.c.l.s4 (!%p163_p2), %v11053_v1  ;;  %342 = vmatprep.mubr.f32.mxu0 (!%p163_p2), %v11055_v13  ;;  %413 = vmatprep.mubr.f32.mxu1 (!%p163_p2), %v11055_v13  ;;  %s11056_s22 = smov (!%p163_p2), 126   ;;  %vm263_vm1 = vcmask (!%p163_p2), 1041408   ;;  %vm259_vm2 = vcmask (!%p163_p2), 15360   ;;  %vm914_vm3 = vcmask (!%p163_p2), 1031168  }
   0x7   : > { %v11118_v3 = vshrl.u32 (!%p163_p2), %v209_v0, 7  ;;  %s11057_s23 = smov (!%p163_p2), 118   ;;  %s11058_s24 = smov (!%p163_p2), 117   ;;  %vm11065_vm4 = vmmov (!%p163_p2), 0   ;;  %vm1281_vm5 = vcmask (!%p163_p2), 965632   ;;  %vm1648_vm6 = vcmask (!%p163_p2), 957440  }
   0x8   : > { %v208_v4 = vunpack.c.0.s8 (!%p163_p2), %v207_v2  ;;  %s11059_s25 = smov (!%p163_p2), 116   ;;  %s11060_s26 = smov (!%p163_p2), 108   ;;  %v10310_v2 = vld [vmem:[%s12240_s1 + $0x2] sm:$0x3] (!%p163_p2)  ;;  %vm2015_vm7 = vcmask (!%p163_p2), 949248   ;;  %vm2382_vm8 = vcmask (!%p163_p2), 883712  }
   0x9   : > { %s11061_s27 = smov (!%p163_p2), 107   ;;  %s11062_s28 = smov (!%p163_p2), 106   ;;  %vm2749_vm9 = vcmask (!%p163_p2), 875520   ;;  %vm3116_vm10 = vcmask (!%p163_p2), 867328   ;;  %vm3486_vm11 = vcmask (!%p163_p2), 228352   ;;  %vm3857_vm12 = vcmask (!%p163_p2), 220160  }
   0xa   : > { %v11127_v5 = vsub.s32 (!%p163_p2), %v208_v4, %v11118_v3  ;;  %s11063_s29 = smov (!%p163_p2), 28   ;;  %s11064_s6 = smov (!%p163_p2), 27   ;;  %vm4228_vm13 = vcmask (!%p163_p2), 211968   ;;  %vm4599_vm14 = vcmask (!%p163_p2), 146432   ;;  %vm4970_vm15 = vcmask (!%p163_p2), 138240  }
   0xb   : > { %s11066_s11 = smov (!%p163_p2), 26   ;;  %s11067_s14 = smov (!%p163_p2), 18  }
   0xc   : > { %s11071_s5 = smov (!%p163_p2), 7   ;;  %s11072_s8 = smov (!%p163_p2), 6  }
   0xd   : > { %s12245_s16 = smov (!%p188_p3, %s10302_s16), 1  ;;  %s11075_s19 = smov 54  }
   0xe   : > { %s10635_s17 = sshll.u32 %s12245_s16, 4  ;;  %s11079_s30 = smov 36  }
   0xf   : > { %s11124_s20 = scalar_lea.vmem %s12239_s0, %s10635_s17  ;;  %s11080_s7 = smov 35  }
  0x10   : > { %v200_v6 = vld [vmem:[%s11124_s20 + $0x8] sm:$0x3f]  ;;  %v199_v7 = vld [vmem:[%s11124_s20] sm:$0xff]  ;;  %s11081_s10 = smov 34   ;;  %s10981_s9 = smul.u32 14, %s12245_s16 }
  0x11   : > { %v11132_v8 = vrot.slane %v200_v6, %v11127_v5  ;;  %v11135_v9 = vrot.slane %v199_v7, %v11127_v5  ;;  %v205_v12 = vcombine.high %v199_v7, %v199_v7  ;;  %v222_v15 = vcombine.high %v200_v6, %v200_v6  ;;  %v864_v18 = vld [vmem:[%s11124_s20 + $0x8] sm:$0x3f] }
  0x12   : > { %v891_v19 = vrot.slane %v864_v18, %v11127_v5  ;;  %v884_v20 = vcombine.high %v864_v18, %v864_v18  ;;  %v1231_v23 = vld [vmem:[%s11124_s20 + $0x8] sm:$0x3f] }
  0x13   : > { %246 = vrot.lane.b32.xlu0 %v11132_v8, %s11054_s21  ;;  %238 = vrot.lane.b32.xlu1 %v11135_v9, %s11054_s21  ;;  %v11141_v10 = vcombine.high %v11132_v8, %v11132_v8  ;;  %v11145_v11 = vcombine.high %v11135_v9, %v11135_v9  ;;  %v11152_v14 = vrot.slane %v205_v12, %v11127_v5  ;;  %v1598_v28 = vld [vmem:[%s11124_s20 + $0x8] sm:$0x3f] }
  0x14   : > { %v11157_v16 = vrot.slane %v222_v15, %v11127_v5  ;;  %v899_v21 = vcombine.high %v891_v19, %v891_v19  ;;  %v898_v22 = vrot.slane %v884_v20, %v11127_v5  ;;  %v1258_v24 = vrot.slane %v1231_v23, %v11127_v5  ;;  %v1965_v33 = vld [vmem:[%s11124_s20 + $0x8] sm:$0x3f] }
  0x15   : > { %v11161_v17 = vcombine.high %v11152_v14, %v11152_v14  ;;  %v1251_v26 = vcombine.high %v1231_v23, %v1231_v23  ;;  %v1625_v29 = vrot.slane %v1598_v28, %v11127_v5  ;;  %v1618_v30 = vcombine.high %v1598_v28, %v1598_v28  ;;  %v2332_v38 = vld [vmem:[%s11124_s20 + $0x8] sm:$0x3f] }
  0x16   : > { %v1266_v25 = vcombine.high %v1258_v24, %v1258_v24  ;;  %v1992_v34 = vrot.slane %v1965_v33, %v11127_v5  ;;  %v1985_v36 = vcombine.high %v1965_v33, %v1965_v33  ;;  %v2359_v39 = vrot.slane %v2332_v38, %v11127_v5  ;;  %v2699_v43 = vld [vmem:[%s11124_s20 + $0x8] sm:$0x3f] }
  0x17   : > { %248 = vrot.lane.b32.xlu1 %v11141_v10, %s11054_s21  ;;  %240 = vrot.lane.b32.xlu0 %v11145_v11, %s11054_s21  ;;  %v1265_v27 = vrot.slane %v1251_v26, %v11127_v5  ;;  %v1633_v31 = vcombine.high %v1625_v29, %v1625_v29  ;;  %v1632_v32 = vrot.slane %v1618_v30, %v11127_v5  ;;  %v3066_v48 = vld [vmem:[%s11124_s20 + $0x8] sm:$0x3f] }
  0x18   : > { %v2000_v35 = vcombine.high %v1992_v34, %v1992_v34  ;;  %v1999_v37 = vrot.slane %v1985_v36, %v11127_v5  ;;  %v2352_v40 = vcombine.high %v2332_v38, %v2332_v38  ;;  %v2367_v41 = vcombine.high %v2359_v39, %v2359_v39  ;;  %v3433_v53 = vld [vmem:[%s11124_s20 + $0x8] sm:$0xff] }
  0x19   : > { %v2726_v44 = vrot.slane %v2699_v43, %v11127_v5  ;;  %v2719_v46 = vcombine.high %v2699_v43, %v2699_v43  ;;  %v3093_v49 = vrot.slane %v3066_v48, %v11127_v5  ;;  %v3086_v50 = vcombine.high %v3066_v48, %v3066_v48 }
  0x1a   : > { %v2366_v42 = vrot.slane %v2352_v40, %v11127_v5  ;;  %v11217_v54 = vrot.slane %v3433_v53, %v11127_v5  ;;  %v3453_v55 = vcombine.high %v3433_v53, %v3433_v53 }
  0x1b   : > { %902 = vrot.lane.b32.xlu1 %v11145_v11, %s11056_s22  ;;  %242 = vrot.lane.b32.xlu0 %v11152_v14, %s11054_s21  ;;  %v2734_v45 = vcombine.high %v2726_v44, %v2726_v44  ;;  %v2733_v47 = vrot.slane %v2719_v46, %v11127_v5  ;;  %v3101_v51 = vcombine.high %v3093_v49, %v3093_v49 }
  0x1c   : > { %v3100_v52 = vrot.slane %v3086_v50, %v11127_v5  ;;  %v11223_v58 = vcombine.high %v11217_v54, %v11217_v54  ;;  %v11226_v59 = vrot.slane %v3453_v55, %v11127_v5 }
  0x1e   : > { %v11232_v62 = vcombine.high %v11226_v59, %v11226_v59 }
  0x1f   : > { %250 = vrot.lane.b32.xlu0 %v11157_v16, %s11054_s21  ;;  %244 = vrot.lane.b32.xlu1 %v11161_v17, %s11054_s21 }
  0x23   : > { %904 = vrot.lane.b32.xlu0 %v11152_v14, %s11056_s22  ;;  %900 = vrot.lane.b32.xlu1 %v11135_v9, %s11056_s22 }
  0x27   : > { %906 = vrot.lane.b32.xlu0 %v11161_v17, %s11056_s22  ;;  %908 = vrot.lane.b32.xlu1 %v891_v19, %s11056_s22 }
  0x2b   : > { %910 = vrot.lane.b32.xlu0 %v899_v21, %s11056_s22  ;;  %912 = vrot.lane.b32.xlu1 %v898_v22, %s11056_s22  ;;  %v198_v22 = vld [vmem:[%s12240_s1] sm:$0x3]  ;;  %s11068_s22 = smov 17  }
  0x2f   : > { %1269 = vrot.lane.b32.xlu0 %v11145_v11, %s11057_s23  ;;  %1271 = vrot.lane.b32.xlu1 %v11152_v14, %s11057_s23 }
  0x33   : > { %1267 = vrot.lane.b32.xlu0 %v11135_v9, %s11057_s23  ;;  %1273 = vrot.lane.b32.xlu1 %v11161_v17, %s11057_s23 }
  0x37   : > { %1275 = vrot.lane.b32.xlu0 %v1258_v24, %s11057_s23  ;;  %1277 = vrot.lane.b32.xlu1 %v1266_v25, %s11057_s23 }
  0x3b   : > { %1279 = vrot.lane.b32.xlu0 %v1265_v27, %s11057_s23  ;;  %1636 = vrot.lane.b32.xlu1 %v11145_v11, %s11058_s24  ;;  %s11076_s23 = smov 46  }
  0x3f   : > { %1638 = vrot.lane.b32.xlu0 %v11152_v14, %s11058_s24  ;;  %1634 = vrot.lane.b32.xlu1 %v11135_v9, %s11058_s24 }
  0x43   : > { %1640 = vrot.lane.b32.xlu0 %v11161_v17, %s11058_s24  ;;  %1642 = vrot.lane.b32.xlu1 %v1625_v29, %s11058_s24 }
  0x47   : > { %1644 = vrot.lane.b32.xlu0 %v1633_v31, %s11058_s24  ;;  %1646 = vrot.lane.b32.xlu1 %v1632_v32, %s11058_s24  ;;  %v10333_v31 = vld [vmem:[%s12240_s1 + $0x4] sm:$0x3]  ;;  %s11077_s24 = smov 45  }
  0x4b   : > { %2003 = vrot.lane.b32.xlu0 %v11145_v11, %s11059_s25  ;;  %2005 = vrot.lane.b32.xlu1 %v11152_v14, %s11059_s25 }
  0x4f   : > { %2001 = vrot.lane.b32.xlu0 %v11135_v9, %s11059_s25  ;;  %2007 = vrot.lane.b32.xlu1 %v11161_v17, %s11059_s25 }
  0x53   : > { %2009 = vrot.lane.b32.xlu0 %v1992_v34, %s11059_s25  ;;  %2011 = vrot.lane.b32.xlu1 %v2000_v35, %s11059_s25 }
  0x57   : > { %2013 = vrot.lane.b32.xlu0 %v1999_v37, %s11059_s25  ;;  %2370 = vrot.lane.b32.xlu1 %v11145_v11, %s11060_s26  ;;  %s11069_s25 = smov 16  }
  0x5b   : > { %2372 = vrot.lane.b32.xlu0 %v11152_v14, %s11060_s26  ;;  %2368 = vrot.lane.b32.xlu1 %v11135_v9, %s11060_s26 }
  0x5f   : > { %2374 = vrot.lane.b32.xlu0 %v11161_v17, %s11060_s26  ;;  %2376 = vrot.lane.b32.xlu1 %v2359_v39, %s11060_s26 }
  0x63   : > { %2378 = vrot.lane.b32.xlu0 %v2367_v41, %s11060_s26  ;;  %2380 = vrot.lane.b32.xlu1 %v2366_v42, %s11060_s26  ;;  %v10345_v42 = vld [vmem:[%s12240_s1 + $0x6] sm:$0x3] }
  0x67   : > { %2737 = vrot.lane.b32.xlu0 %v11145_v11, %s11061_s27  ;;  %2739 = vrot.lane.b32.xlu1 %v11152_v14, %s11061_s27 }
  0x6b   : > { %2735 = vrot.lane.b32.xlu0 %v11135_v9, %s11061_s27  ;;  %2741 = vrot.lane.b32.xlu1 %v11161_v17, %s11061_s27 }
  0x6f   : > { %2743 = vrot.lane.b32.xlu0 %v2726_v44, %s11061_s27  ;;  %2745 = vrot.lane.b32.xlu1 %v2734_v45, %s11061_s27 }
  0x73   : > { %2747 = vrot.lane.b32.xlu0 %v2733_v47, %s11061_s27  ;;  %3104 = vrot.lane.b32.xlu1 %v11145_v11, %s11062_s28  ;;  %s11078_s27 = smov 44  }
  0x77   : > { %3106 = vrot.lane.b32.xlu0 %v11152_v14, %s11062_s28  ;;  %3102 = vrot.lane.b32.xlu1 %v11135_v9, %s11062_s28 }
  0x7b   : > { %3108 = vrot.lane.b32.xlu0 %v11161_v17, %s11062_s28  ;;  %3110 = vrot.lane.b32.xlu1 %v3093_v49, %s11062_s28 }
  0x7f   : > { %3112 = vrot.lane.b32.xlu0 %v3101_v51, %s11062_s28  ;;  %3114 = vrot.lane.b32.xlu1 %v3100_v52, %s11062_s28  ;;  %s11070_s28 = smov 8  }
  0x83   : > { %3472 = vrot.lane.b32.xlu0 %v11145_v11, %s11063_s29  ;;  %3474 = vrot.lane.b32.xlu1 %v11152_v14, %s11063_s29 }
  0x85   : > { %v247_v56 = vpop.permute.xlu0 %246  ;;  %v239_v57 = vpop.permute.xlu1 %238 }
  0x87   : > { %3470 = vrot.lane.b32.xlu0 %v11135_v9, %s11063_s29  ;;  %3476 = vrot.lane.b32.xlu1 %v11161_v17, %s11063_s29 }
  0x89   : > { %v249_v60 = vpop.permute.xlu1 %248  ;;  %v241_v61 = vpop.permute.xlu0 %240 }
  0x8a   : > { %v253_v4 = vsel %vm252_vm0, %v239_v57, %v241_v61  ;;  %v257_v19 = vsel %vm252_vm0, %v247_v56, %v249_v60 }
  0x8b   : > { %3478 = vrot.lane.b32.xlu0 %v11217_v54, %s11063_s29  ;;  %3480 = vrot.lane.b32.xlu1 %v11223_v58, %s11063_s29 }
  0x8d   : > { %v903_v63 = vpop.permute.xlu1 %902  ;;  %v243_v0 = vpop.permute.xlu0 %242 }
  0x8e   : > { %v254_v1 = vsel %vm252_vm0, %v241_v61, %v243_v0 }
  0x8f   : > { %3482 = vrot.lane.b32.xlu0 %v11226_v59, %s11063_s29  ;;  %10311 = vmatprep.subr.msk.mxu0 %vm263_vm1, %v254_v1 }
  0x90   : > { %3484 = vrot.lane.b32.xlu1 %v11232_v62, %s11063_s29  ;;  %10312 = vmatpush1.msk.msra.mxu0 %vm263_vm1, %v253_v4 }
  0x91   : > { %10313 = vmatmul.mubr.msk.f32.vlgmr.msra.gmra.mrb[0].mxu0 %vm259_vm2, %v10310_v2  ;;  %v251_v6 = vpop.permute.xlu0 %250  ;;  %v245_v7 = vpop.permute.xlu1 %244 }
  0x92   : > { %v258_v12 = vsel %vm252_vm0, %v249_v60, %v251_v6  ;;  %v256_v15 = vsel %vm252_vm0, %v245_v7, %v247_v56  ;;  %v255_v18 = vsel %vm252_vm0, %v243_v0, %v245_v7  ;;  %484 = vmatprep.mubr.f32.mxu0 %v11055_v13  ;;  %v10357_v60 = vld [vmem:[%s12240_s1 + $0x8] sm:$0x3]  ;;  %vm5341_vm0 = vcmask 130048  }
  0x93   : > { %3843 = vrot.lane.b32.xlu0 %v11145_v11, %s11064_s6  ;;  %10317 = vmatprep.subr.msk.mxu0 %vm263_vm1, %v258_v12 }
  0x94   : > { %3845 = vrot.lane.b32.xlu1 %v11152_v14, %s11064_s6  ;;  %10314 = vmatprep.subr.msk.mxu1 %vm263_vm1, %v256_v15  ;;  %v10369_v15 = vld [vmem:[%s12240_s1 + $0xa] sm:$0x3] }
  0x95   : > { %10315 = vmatpush1.msk.msra.mxu1 %vm263_vm1, %v255_v18  ;;  %10318 = vmatpush1.msk.msra.mxu0 %vm263_vm1, %v257_v19  ;;  %v905_v20 = vpop.permute.xlu0 %904  ;;  %v901_v21 = vpop.permute.xlu1 %900 }
  0x96   : > { %10319 = vmatmul.mubr.msk.f32.vlgmr.msra.gmra.mrb[2].mxu0 %vm259_vm2, %v10310_v2  ;;  %10316 = vmatmul.mubr.msk.f32.vlgmr.msra.gmra.mrb[0].mxu1 %vm259_vm2, %v10310_v2  ;;  %v916_v25 = vsel %vm914_vm3, %v903_v63, %v905_v20 }
  0x97   : > { %10690 = vmatprep.subr.mxu1 %v11055_v13  ;;  %10322 = vmatprep.subr.msk.mxu0 %vm263_vm1, %v11145_v11 }
  0x98   : > { %10691 = vmatpush3.msk.msra.mxu1 %vm263_vm1, %v251_v6  ;;  %3841 = vrot.lane.b32.xlu0 %v11135_v9, %s11064_s6 }
  0x99   : > { %10323 = vmatpush1.msk.msra.mxu0 %vm263_vm1, %v11135_v9  ;;  %3847 = vrot.lane.b32.xlu1 %v11161_v17, %s11064_s6  ;;  %v907_v23 = vpop.permute.xlu0 %906  ;;  %v909_v24 = vpop.permute.xlu1 %908 }
  0x9a   : > { %10692 = vmatprep.mubr.msk.f32.mxu1 %vm11065_vm4, %v11055_v13  ;;  %642 = vmatprep.mubr.f32.mxu0 %v11055_v13  ;;  %v918_v30 = vsel %vm914_vm3, %v907_v23, %v909_v24  ;;  %v917_v33 = vsel %vm914_vm3, %v905_v20, %v907_v23 }
  0x9b   : > { %10328 = vmatprep.subr.msk.mxu0 %vm263_vm1, %v11141_v10  ;;  %10324 = vmatmul.mubr.msk.f32.vlgmr.msra.gmra.mrb[0].mxu0 %vm259_vm2, %v198_v22 }
  0x9c   : > { %10329 = vmatpush1.msk.msra.mxu0 %vm263_vm1, %v11132_v8  ;;  %10693 = vmatmul.mubr.msk.f32.vlgmr.msra.gmra.mrb[2].mxu1 %vm259_vm2, %v10310_v2  ;;  %v915_v8 = vsel %vm914_vm3, %v901_v21, %v903_v63 }
  0x9d   : > { %10325 = vmatprep.subr.msk.mxu1 %vm263_vm1, %v11161_v17  ;;  %10334 = vmatprep.subr.msk.mxu0 %vm263_vm1, %v916_v25  ;;  %v911_v26 = vpop.permute.xlu0 %910  ;;  %v913_v27 = vpop.permute.xlu1 %912 }
  0x9e   : > { %3849 = vrot.lane.b32.xlu0 %v11217_v54, %s11064_s6  ;;  %3851 = vrot.lane.b32.xlu1 %v11223_v58, %s11064_s6  ;;  %v920_v10 = vsel %vm914_vm3, %v911_v26, %v913_v27  ;;  %v919_v34 = vsel %vm914_vm3, %v909_v24, %v911_v26  ;;  %vm5712_vm3 = vcmask 64512  }
  0x9f   : > { %10326 = vmatpush1.msk.msra.mxu1 %vm263_vm1, %v11152_v14  ;;  %713 = vmatprep.mubr.f32.mxu1 %v11055_v13 }
  0xa0   : > { %784 = vmatprep.mubr.f32.mxu0 %v11055_v13  ;;  %10695 = vmatprep.subr.mxu1 %v11055_v13 }
  0xa1   : > { %10330 = vmatmul.mubr.msk.f32.vlgmr.msra.gmra.mrb[2].mxu0 %vm259_vm2, %v198_v22  ;;  %10327 = vmatmul.mubr.msk.f32.vlgmr.msra.gmra.mrb[0].mxu1 %vm259_vm2, %v198_v22  ;;  %v1270_v28 = vpop.permute.xlu0 %1269  ;;  %v1272_v29 = vpop.permute.xlu1 %1271 }
  0xa2   : > { %10696 = vmatpush3.msk.msra.mxu1 %vm263_vm1, %v11157_v16  ;;  %10335 = vmatpush1.msk.msra.mxu0 %vm263_vm1, %v915_v8  ;;  %v1283_v35 = vsel %vm1281_vm5, %v1270_v28, %v1272_v29  ;;  %v10381_v8 = vld [vmem:[%s12240_s1 + $0xc] sm:$0x3] }
  0xa3   : > { %10337 = vmatprep.subr.msk.mxu1 %vm263_vm1, %v918_v30  ;;  %3853 = vrot.lane.b32.xlu0 %v11226_v59, %s11064_s6 }
  0xa4   : > { %3855 = vrot.lane.b32.xlu1 %v11232_v62, %s11064_s6  ;;  %10340 = vmatprep.subr.msk.mxu0 %vm263_vm1, %v920_v10 }
  0xa5   : > { %10697 = vmatprep.mubr.msk.f32.mxu1 %vm11065_vm4, %v11055_v13  ;;  %1002 = vmatprep.mubr.f32.mxu0 %v11055_v13  ;;  %v1268_v16 = vpop.permute.xlu0 %1267  ;;  %v1274_v32 = vpop.permute.xlu1 %1273 }
  0xa6   : > { %10698 = vmatmul.mubr.msk.f32.vlgmr.msra.gmra.mrb[4].mxu1 %vm259_vm2, %v198_v22  ;;  %10336 = vmatmul.mubr.msk.f32.vlgmr.msra.gmra.mrb[0].mxu0 %vm259_vm2, %v10333_v31  ;;  %v1282_v38 = vsel %vm1281_vm5, %v1268_v16, %v1270_v28  ;;  %v1284_v43 = vsel %vm1281_vm5, %v1272_v29, %v1274_v32 }
  0xa7   : > { %10338 = vmatpush1.msk.msra.mxu1 %vm263_vm1, %v917_v33  ;;  %10341 = vmatpush1.msk.msra.mxu0 %vm263_vm1, %v919_v34 }
  0xa8   : > { %4214 = vrot.lane.b32.xlu0 %v11145_v11, %s11066_s11  ;;  %4216 = vrot.lane.b32.xlu1 %v11152_v14, %s11066_s11 }
  0xa9   : > { %10346 = vmatprep.subr.msk.mxu0 %vm263_vm1, %v1283_v35  ;;  %1073 = vmatprep.mubr.f32.mxu1 %v11055_v13  ;;  %v1276_v36 = vpop.permute.xlu0 %1275  ;;  %v1278_v37 = vpop.permute.xlu1 %1277 }
  0xaa   : > { %10700 = vmatprep.subr.mxu1 %v11055_v13  ;;  %10339 = vmatmul.mubr.msk.f32.vlgmr.msra.gmra.mrb[0].mxu1 %vm259_vm2, %v10333_v31  ;;  %v1285_v39 = vsel %vm1281_vm5, %v1274_v32, %v1276_v36  ;;  %v1286_v48 = vsel %vm1281_vm5, %v1276_v36, %v1278_v37 }
  0xab   : > { %10701 = vmatpush3.msk.msra.mxu1 %vm263_vm1, %v913_v27  ;;  %1144 = vmatprep.mubr.f32.mxu0 %v11055_v13 }
  0xac   : > { %4212 = vrot.lane.b32.xlu0 %v11135_v9, %s11066_s11  ;;  %4218 = vrot.lane.b32.xlu1 %v11161_v17, %s11066_s11 }
  0xad   : > { %10342 = vmatmul.mubr.msk.f32.vlgmr.msra.gmra.mrb[2].mxu0 %vm259_vm2, %v10333_v31  ;;  %10702 = vmatprep.mubr.msk.f32.mxu1 %vm11065_vm4, %v11055_v13  ;;  %v1280_v40 = vpop.permute.xlu0 %1279  ;;  %v1637_v41 = vpop.permute.xlu1 %1636 }
  0xae   : > { %10347 = vmatpush1.msk.msra.mxu0 %vm263_vm1, %v1282_v38  ;;  %10703 = vmatmul.mubr.msk.f32.vlgmr.msra.gmra.mrb[6].mxu1 %vm259_vm2, %v10333_v31  ;;  %v1287_v44 = vsel %vm1281_vm5, %v1278_v37, %v1280_v40  ;;  %vm6083_vm5 = vcmask 56320  }
  0xaf   : > { %10349 = vmatprep.subr.msk.mxu1 %vm263_vm1, %v1285_v39  ;;  %1440 = vmatprep.mubr.f32.mxu1 %v11055_v13 }
  0xb0   : > { %4220 = vrot.lane.b32.xlu0 %v11217_v54, %s11066_s11  ;;  %4222 = vrot.lane.b32.xlu1 %v11223_v58, %s11066_s11 }
  0xb1   : > { %10350 = vmatpush1.msk.msra.mxu1 %vm263_vm1, %v1284_v43  ;;  %1369 = vmatprep.mubr.f32.mxu0 %v11055_v13  ;;  %v1639_v45 = vpop.permute.xlu0 %1638  ;;  %v1635_v46 = vpop.permute.xlu1 %1634 }
  0xb2   : > { %10705 = vmatprep.subr.mxu1 %v11055_v13  ;;  %10351 = vmatmul.mubr.msk.f32.vlgmr.msra.gmra.mrb[0].mxu1 %vm259_vm2, %v10345_v42  ;;  %v1650_v47 = vsel %vm1648_vm6, %v1637_v41, %v1639_v45  ;;  %v1649_v52 = vsel %vm1648_vm6, %v1635_v46, %v1637_v41 }
  0xb3   : > { %10706 = vmatpush3.msk.msra.mxu1 %vm263_vm1, %v1280_v40  ;;  %10352 = vmatprep.subr.msk.mxu0 %vm263_vm1, %v1287_v44  ;;  %v10393_v40 = vld [vmem:[%s12240_s1 + $0xe] sm:$0x3] }
  0xb4   : > { %4224 = vrot.lane.b32.xlu0 %v11226_v59, %s11066_s11  ;;  %4226 = vrot.lane.b32.xlu1 %v11232_v62, %s11066_s11  ;;  %s11073_s11 = smov 56  }
  0xb5   : > { %10348 = vmatmul.mubr.msk.f32.vlgmr.msra.gmra.mrb[0].mxu0 %vm259_vm2, %v10345_v42  ;;  %v1641_v49 = vpop.permute.xlu0 %1640  ;;  %v1643_v50 = vpop.permute.xlu1 %1642  ;;  %10707 = vmatprep.mubr.msk.f32.mxu1 %vm11065_vm4, %v11055_v13 }
  0xb6   : > { %10353 = vmatpush1.msk.msra.mxu0 %vm263_vm1, %v1286_v48  ;;  %1511 = vmatprep.mubr.f32.mxu0 %v11055_v13  ;;  %v1652_v51 = vsel %vm1648_vm6, %v1641_v49, %v1643_v50  ;;  %v1651_v53 = vsel %vm1648_vm6, %v1639_v45, %v1641_v49 }
  0xb7   : > { %10358 = vmatprep.subr.msk.mxu0 %vm263_vm1, %v1650_v47  ;;  %10361 = vmatprep.subr.msk.mxu1 %vm263_vm1, %v1652_v51 }
  0xb8   : > { %4585 = vrot.lane.b32.xlu0 %v11145_v11, %s11067_s14  ;;  %4587 = vrot.lane.b32.xlu1 %v11152_v14, %s11067_s14 }
  0xb9   : > { %10354 = vmatmul.mubr.msk.f32.vlgmr.msra.gmra.mrb[2].mxu0 %vm259_vm2, %v10345_v42  ;;  %10708 = vmatmul.mubr.msk.f32.vlgmr.msra.gmra.mrb[8].mxu1 %vm259_vm2, %v10345_v42  ;;  %v1645_v55 = vpop.permute.xlu0 %1644  ;;  %v1647_v56 = vpop.permute.xlu1 %1646 }
  0xba   : > { %10359 = vmatpush1.msk.msra.mxu0 %vm263_vm1, %v1649_v52  ;;  %10362 = vmatpush1.msk.msra.mxu1 %vm263_vm1, %v1651_v53  ;;  %v1654_v57 = vsel %vm1648_vm6, %v1645_v55, %v1647_v56  ;;  %v1653_v61 = vsel %vm1648_vm6, %v1643_v50, %v1645_v55  ;;  %v6029_v55 = vld [vmem:[%s11124_s20] sm:$0xff]  ;;  %vm6454_vm6 = vcmask 48128  }
  0xbb   : > { %1736 = vmatprep.mubr.f32.mxu0 %v11055_v13  ;;  %10364 = vmatprep.subr.msk.mxu0 %vm263_vm1, %v1654_v57 }
  0xbc   : > { %4583 = vrot.lane.b32.xlu0 %v11135_v9, %s11067_s14  ;;  %4589 = vrot.lane.b32.xlu1 %v11161_v17, %s11067_s14 }
  0xbd   : > { %10360 = vmatmul.mubr.msk.f32.vlgmr.msra.gmra.mrb[0].mxu0 %vm259_vm2, %v10357_v60  ;;  %v2004_v63 = vpop.permute.xlu0 %2003  ;;  %1807 = vmatprep.mubr.f32.mxu1 %v11055_v13  ;;  %v2006_v0 = vpop.permute.xlu1 %2005 }
  0xbe   : > { %10365 = vmatpush1.msk.msra.mxu0 %vm263_vm1, %v1653_v61  ;;  %10710 = vmatprep.subr.mxu1 %v11055_v13  ;;  %v2017_v1 = vsel %vm2015_vm7, %v2004_v63, %v2006_v0 }
  0xbf   : > { %10363 = vmatmul.mubr.msk.f32.vlgmr.msra.gmra.mrb[0].mxu1 %vm259_vm2, %v10357_v60  ;;  %10370 = vmatprep.subr.msk.mxu0 %vm263_vm1, %v2017_v1 }
  0xc0   : > { %4591 = vrot.lane.b32.xlu0 %v11217_v54, %s11067_s14  ;;  %4593 = vrot.lane.b32.xlu1 %v11223_v58, %s11067_s14 }
  0xc1   : > { %10711 = vmatpush3.msk.msra.mxu1 %vm263_vm1, %v1647_v56  ;;  %v2002_v2 = vpop.permute.xlu0 %2001  ;;  %v2008_v4 = vpop.permute.xlu1 %2007  ;;  %1878 = vmatprep.mubr.f32.mxu0 %v11055_v13 }
  0xc2   : > { %v2016_v6 = vsel %vm2015_vm7, %v2002_v2, %v2004_v63  ;;  %10366 = vmatmul.mubr.msk.f32.vlgmr.msra.gmra.mrb[2].mxu0 %vm259_vm2, %v10357_v60  ;;  %10712 = vmatprep.mubr.msk.f32.mxu1 %vm11065_vm4, %v11055_v13  ;;  %v2018_v19 = vsel %vm2015_vm7, %v2006_v0, %v2008_v4 }
  0xc3   : > { %10371 = vmatpush1.msk.msra.mxu0 %vm263_vm1, %v2016_v6  ;;  %10713 = vmatmul.mubr.msk.f32.vlgmr.msra.gmra.mrb[10].mxu1 %vm259_vm2, %v10357_v60 }
  0xc4   : > { %4595 = vrot.lane.b32.xlu0 %v11226_v59, %s11067_s14  ;;  %4597 = vrot.lane.b32.xlu1 %v11232_v62, %s11067_s14  ;;  %s11074_s14 = smov 55  }
  0xc5   : > { %v2010_v7 = vpop.permute.xlu0 %2009  ;;  %v2012_v12 = vpop.permute.xlu1 %2011  ;;  %2174 = vmatprep.mubr.f32.mxu1 %v11055_v13  ;;  %2103 = vmatprep.mubr.f32.mxu0 %v11055_v13 }
  0xc6   : > { %v2019_v18 = vsel %vm2015_vm7, %v2008_v4, %v2010_v7  ;;  %10372 = vmatmul.mubr.msk.f32.vlgmr.msra.gmra.mrb[0].mxu0 %vm259_vm2, %v10369_v15  ;;  %v2020_v23 = vsel %vm2015_vm7, %v2010_v7, %v2012_v12 }
  0xc7   : > { %10373 = vmatprep.subr.msk.mxu1 %vm263_vm1, %v2019_v18  ;;  %2245 = vmatprep.mubr.f32.mxu0 %v11055_v13 }
  0xc8   : > { %4956 = vrot.lane.b32.xlu0 %v11145_v11, %s11068_s22  ;;  %4958 = vrot.lane.b32.xlu1 %v11152_v14, %s11068_s22 }
  0xc9   : > { %10374 = vmatpush1.msk.msra.mxu1 %vm263_vm1, %v2018_v19  ;;  %v2014_v20 = vpop.permute.xlu0 %2013  ;;  %v2371_v21 = vpop.permute.xlu1 %2370 }
  0xca   : > { %10715 = vmatprep.subr.mxu1 %v11055_v13  ;;  %10375 = vmatmul.mubr.msk.f32.vlgmr.msra.gmra.mrb[0].mxu1 %vm259_vm2, %v10369_v15  ;;  %v2021_v22 = vsel %vm2015_vm7, %v2012_v12, %v2014_v20  ;;  %vm6822_vm7 = vcmask 457728  }
  0xcb   : > { %10716 = vmatpush3.msk.msra.mxu1 %vm263_vm1, %v2014_v20  ;;  %10376 = vmatprep.subr.msk.mxu0 %vm263_vm1, %v2021_v22  ;;  %v10417_v20 = vld [vmem:[%s12240_s1 + $0x12] sm:$0x3] }
  0xcc   : > { %4954 = vrot.lane.b32.xlu0 %v11135_v9, %s11068_s22  ;;  %4960 = vrot.lane.b32.xlu1 %v11161_v17, %s11068_s22 }
  0xcd   : > { %10377 = vmatpush1.msk.msra.mxu0 %vm263_vm1, %v2020_v23  ;;  %v2373_v24 = vpop.permute.xlu0 %2372  ;;  %v2369_v25 = vpop.permute.xlu1 %2368  ;;  %10717 = vmatprep.mubr.msk.f32.mxu1 %vm11065_vm4, %v11055_v13 }
  0xce   : > { %v2383_v26 = vsel %vm2382_vm8, %v2369_v25, %v2371_v21  ;;  %v2384_v27 = vsel %vm2382_vm8, %v2371_v21, %v2373_v24  ;;  %10378 = vmatmul.mubr.msk.f32.vlgmr.msra.gmra.mrb[2].mxu0 %vm259_vm2, %v10369_v15  ;;  %10718 = vmatmul.mubr.msk.f32.vlgmr.msra.gmra.mrb[12].mxu1 %vm259_vm2, %v10369_v15 }
  0xcf   : > { %10382 = vmatprep.subr.msk.mxu0 %vm263_vm1, %v2384_v27  ;;  %2470 = vmatprep.mubr.f32.mxu0 %v11055_v13 }
  0xd0   : > { %4962 = vrot.lane.b32.xlu0 %v11217_v54, %s11068_s22  ;;  %4964 = vrot.lane.b32.xlu1 %v11223_v58, %s11068_s22 }
  0xd1   : > { %10383 = vmatpush1.msk.msra.mxu0 %vm263_vm1, %v2383_v26  ;;  %v2375_v10 = vpop.permute.xlu0 %2374  ;;  %v2377_v28 = vpop.permute.xlu1 %2376  ;;  %2541 = vmatprep.mubr.f32.mxu1 %v11055_v13 }
  0xd2   : > { %v2385_v29 = vsel %vm2382_vm8, %v2373_v24, %v2375_v10  ;;  %v2386_v30 = vsel %vm2382_vm8, %v2375_v10, %v2377_v28  ;;  %10384 = vmatmul.mubr.msk.f32.vlgmr.msra.gmra.mrb[0].mxu0 %vm259_vm2, %v10381_v8 }
  0xd3   : > { %10385 = vmatprep.subr.msk.mxu1 %vm263_vm1, %v2386_v30  ;;  %2612 = vmatprep.mubr.f32.mxu0 %v11055_v13 }
  0xd4   : > { %4966 = vrot.lane.b32.xlu0 %v11226_v59, %s11068_s22  ;;  %4968 = vrot.lane.b32.xlu1 %v11232_v62, %s11068_s22 }
  0xd5   : > { %10386 = vmatpush1.msk.msra.mxu1 %vm263_vm1, %v2385_v29  ;;  %v2379_v31 = vpop.permute.xlu0 %2378  ;;  %v2381_v16 = vpop.permute.xlu1 %2380 }
  0xd6   : > { %v2387_v32 = vsel %vm2382_vm8, %v2377_v28, %v2379_v31  ;;  %v2388_v33 = vsel %vm2382_vm8, %v2379_v31, %v2381_v16  ;;  %10720 = vmatprep.subr.mxu1 %v11055_v13  ;;  %10387 = vmatmul.mubr.msk.f32.vlgmr.msra.gmra.mrb[0].mxu1 %vm259_vm2, %v10381_v8  ;;  %vm7189_vm8 = vcmask 449536  }
  0xd7   : > { %10388 = vmatprep.subr.msk.mxu0 %vm263_vm1, %v2388_v33  ;;  %10721 = vmatpush3.msk.msra.mxu1 %vm263_vm1, %v2381_v16  ;;  %v10429_v33 = vld [vmem:[%s12240_s1 + $0x14] sm:$0x3] }
  0xd8   : > { %5327 = vrot.lane.b32.xlu0 %v11145_v11, %s11069_s25  ;;  %5329 = vrot.lane.b32.xlu1 %v11152_v14, %s11069_s25 }
  0xd9   : > { %10389 = vmatpush1.msk.msra.mxu0 %vm263_vm1, %v2387_v32  ;;  %v2738_v34 = vpop.permute.xlu0 %2737  ;;  %v2740_v35 = vpop.permute.xlu1 %2739  ;;  %10722 = vmatprep.mubr.msk.f32.mxu1 %vm11065_vm4, %v11055_v13 }
  0xda   : > { %v2751_v36 = vsel %vm2749_vm9, %v2738_v34, %v2740_v35  ;;  %10390 = vmatmul.mubr.msk.f32.vlgmr.msra.gmra.mrb[2].mxu0 %vm259_vm2, %v10381_v8  ;;  %10723 = vmatmul.mubr.msk.f32.vlgmr.msra.gmra.mrb[14].mxu1 %vm259_vm2, %v10381_v8 }
  0xdb   : > { %10394 = vmatprep.subr.msk.mxu0 %vm263_vm1, %v2751_v36  ;;  %2908 = vmatprep.mubr.f32.mxu1 %v11055_v13 }
  0xdc   : > { %5325 = vrot.lane.b32.xlu0 %v11135_v9, %s11069_s25  ;;  %5331 = vrot.lane.b32.xlu1 %v11161_v17, %s11069_s25 }
  0xdd   : > { %v2736_v37 = vpop.permute.xlu0 %2735  ;;  %v2742_v38 = vpop.permute.xlu1 %2741  ;;  %2837 = vmatprep.mubr.f32.mxu0 %v11055_v13 }
  0xde   : > { %v2750_v39 = vsel %vm2749_vm9, %v2736_v37, %v2738_v34  ;;  %v2752_v44 = vsel %vm2749_vm9, %v2740_v35, %v2742_v38  ;;  %v6771_v34 = vld [vmem:[%s11124_s20 + $0x2] sm:$0xff] }
  0xdf   : > { %10395 = vmatpush1.msk.msra.mxu0 %vm263_vm1, %v2750_v39  ;;  %v11620_v37 = vrot.slane %v6771_v34, %v11127_v5 }
  0xe0   : > { %5333 = vrot.lane.b32.xlu0 %v11217_v54, %s11069_s25  ;;  %5335 = vrot.lane.b32.xlu1 %v11223_v58, %s11069_s25 }
  0xe1   : > { %v2744_v41 = vpop.permute.xlu0 %2743  ;;  %v2746_v42 = vpop.permute.xlu1 %2745  ;;  %10396 = vmatmul.mubr.msk.f32.vlgmr.msra.gmra.mrb[0].mxu0 %vm259_vm2, %v10393_v40 }
  0xe2   : > { %v2753_v43 = vsel %vm2749_vm9, %v2742_v38, %v2744_v41  ;;  %2979 = vmatprep.mubr.f32.mxu0 %v11055_v13  ;;  %v2754_v48 = vsel %vm2749_vm9, %v2744_v41, %v2746_v42  ;;  %v6775_v38 = vcombine.high %v6771_v34, %v6771_v34 }
  0xe3   : > { %10397 = vmatprep.subr.msk.mxu1 %vm263_vm1, %v2753_v43 }
  0xe4   : > { %5337 = vrot.lane.b32.xlu0 %v11226_v59, %s11069_s25  ;;  %5339 = vrot.lane.b32.xlu1 %v11232_v62, %s11069_s25 }
  0xe5   : > { %10398 = vmatpush1.msk.msra.mxu1 %vm263_vm1, %v2752_v44  ;;  %v2748_v45 = vpop.permute.xlu0 %2747  ;;  %v3105_v46 = vpop.permute.xlu1 %3104 }
  0xe6   : > { %10725 = vmatprep.subr.mxu1 %v11055_v13  ;;  %10399 = vmatmul.mubr.msk.f32.vlgmr.msra.gmra.mrb[0].mxu1 %vm259_vm2, %v10393_v40  ;;  %v2755_v47 = vsel %vm2749_vm9, %v2746_v42, %v2748_v45  ;;  %v6772_v42 = vld [vmem:[%s11124_s20 + $0xa] sm:$0x3f]  ;;  %vm7556_vm9 = vcmask 441344  }
  0xe7   : > { %10726 = vmatpush3.msk.msra.mxu1 %vm263_vm1, %v2748_v45  ;;  %10400 = vmatprep.subr.msk.mxu0 %vm263_vm1, %v2755_v47 }
  0xe8   : > { %5698 = vrot.lane.b32.xlu0 %v11145_v11, %s11070_s28  ;;  %5700 = vrot.lane.b32.xlu1 %v11152_v14, %s11070_s28  ;;  %v10405_v11 = vld [vmem:[%s12240_s1 + $0x10] sm:$0x3] }
  0xe9   : > { %10401 = vmatpush1.msk.msra.mxu0 %vm263_vm1, %v2754_v48  ;;  %v3107_v49 = vpop.permute.xlu0 %3106  ;;  %v3103_v50 = vpop.permute.xlu1 %3102  ;;  %10727 = vmatprep.mubr.msk.f32.mxu1 %vm11065_vm4, %v11055_v13 }
  0xea   : > { %v3117_v51 = vsel %vm3116_vm10, %v3103_v50, %v3105_v46  ;;  %v3118_v52 = vsel %vm3116_vm10, %v3105_v46, %v3107_v49  ;;  %10402 = vmatmul.mubr.msk.f32.vlgmr.msra.gmra.mrb[2].mxu0 %vm259_vm2, %v10393_v40  ;;  %10728 = vmatmul.mubr.msk.f32.vlgmr.msra.gmra.mrb[16].mxu1 %vm259_vm2, %v10393_v40  ;;  %v6799_v46 = vrot.slane %v6772_v42, %v11127_v5 }
  0xeb   : > { %10406 = vmatprep.subr.msk.mxu0 %vm263_vm1, %v3118_v52  ;;  %3204 = vmatprep.mubr.f32.mxu0 %v11055_v13 }
  0xec   : > { %5696 = vrot.lane.b32.xlu0 %v11135_v9, %s11070_s28  ;;  %5702 = vrot.lane.b32.xlu1 %v11161_v17, %s11070_s28  ;;  %v11543_v9 = vrot.slane %v6029_v55, %v11127_v5  ;;  %v6033_v17 = vcombine.high %v6029_v55, %v6029_v55  ;;  %v6807_v50 = vcombine.high %v6799_v46, %v6799_v46 }
  0xed   : > { %10407 = vmatpush1.msk.msra.mxu0 %vm263_vm1, %v3117_v51  ;;  %v3109_v14 = vpop.permute.xlu0 %3108  ;;  %v3111_v53 = vpop.permute.xlu1 %3110  ;;  %3275 = vmatprep.mubr.f32.mxu1 %v11055_v13  ;;  %v6792_v51 = vcombine.high %v6772_v42, %v6772_v42  ;;  %v10465_v42 = vld [vmem:[%s12240_s1 + $0x1a] sm:$0x3] }
  0xee   : > { %v3119_v56 = vsel %vm3116_vm10, %v3107_v49, %v3109_v14  ;;  %v3120_v57 = vsel %vm3116_vm10, %v3109_v14, %v3111_v53  ;;  %10408 = vmatmul.mubr.msk.f32.vlgmr.msra.gmra.mrb[0].mxu0 %vm259_vm2, %v10405_v11  ;;  %v6048_v1 = vcombine.high %v11543_v9, %v11543_v9  ;;  %v6047_v2 = vrot.slane %v6033_v17, %v11127_v5 }
  0xef   : > { %10409 = vmatprep.subr.msk.mxu1 %vm263_vm1, %v3120_v57  ;;  %3346 = vmatprep.mubr.f32.mxu0 %v11055_v13  ;;  %v6806_v55 = vrot.slane %v6792_v51, %v11127_v5 }
  0xf0   : > { %5704 = vrot.lane.b32.xlu0 %v11217_v54, %s11070_s28  ;;  %5706 = vrot.lane.b32.xlu1 %v11223_v58, %s11070_s28  ;;  %v6049_v12 = vcombine.high %v6047_v2, %v6047_v2 }
  0xf1   : > { %10410 = vmatpush1.msk.msra.mxu1 %vm263_vm1, %v3119_v56  ;;  %v3113_v60 = vpop.permute.xlu0 %3112  ;;  %v3115_v61 = vpop.permute.xlu1 %3114 }
  0xf2   : > { %v3121_v63 = vsel %vm3116_vm10, %v3111_v53, %v3113_v60  ;;  %v3122_v0 = vsel %vm3116_vm10, %v3113_v60, %v3115_v61  ;;  %10730 = vmatprep.subr.mxu1 %v11055_v13  ;;  %10411 = vmatmul.mubr.msk.f32.vlgmr.msra.gmra.mrb[0].mxu1 %vm259_vm2, %v10405_v11  ;;  %v10441_v53 = vld [vmem:[%s12240_s1 + $0x16] sm:$0x3]  ;;  %v7139_v60 = vld [vmem:[%s11124_s20 + $0xa] sm:$0x3f]  ;;  %vm7923_vm10 = vcmask 375808  }
  0xf3   : > { %10412 = vmatprep.subr.msk.mxu0 %vm263_vm1, %v3122_v0  ;;  %10731 = vmatpush3.msk.msra.mxu1 %vm263_vm1, %v3115_v61 }
  0xf4   : > { %5708 = vrot.lane.b32.xlu0 %v11226_v59, %s11070_s28  ;;  %5710 = vrot.lane.b32.xlu1 %v11232_v62, %s11070_s28 }
  0xf5   : > { %10413 = vmatpush1.msk.msra.mxu0 %vm263_vm1, %v3121_v63  ;;  %v3473_v4 = vpop.permute.xlu0 %3472  ;;  %v3475_v6 = vpop.permute.xlu1 %3474  ;;  %10732 = vmatprep.mubr.msk.f32.mxu1 %vm11065_vm4, %v11055_v13 }
  0xf6   : > { %v3488_v7 = vsel %vm3486_vm11, %v3473_v4, %v3475_v6  ;;  %10414 = vmatmul.mubr.msk.f32.vlgmr.msra.gmra.mrb[2].mxu0 %vm259_vm2, %v10405_v11  ;;  %10733 = vmatmul.mubr.msk.f32.vlgmr.msra.gmra.mrb[18].mxu1 %vm259_vm2, %v10405_v11 }
  0xf7   : > { %10418 = vmatprep.subr.msk.mxu0 %vm263_vm1, %v3488_v7  ;;  %3646 = vmatprep.mubr.f32.mxu1 %v11055_v13 }
  0xf8   : > { %6069 = vrot.lane.b32.xlu0 %v6048_v1, %s11071_s5  ;;  %6071 = vrot.lane.b32.xlu1 %v6047_v2, %s11071_s5 }
  0xf9   : > { %v3471_v15 = vpop.permute.xlu0 %3470  ;;  %v3477_v18 = vpop.permute.xlu1 %3476  ;;  %3575 = vmatprep.mubr.f32.mxu0 %v11055_v13 }
  0xfa   : > { %v3487_v19 = vsel %vm3486_vm11, %v3471_v15, %v3473_v4  ;;  %v3489_v24 = vsel %vm3486_vm11, %v3475_v6, %v3477_v18  ;;  %v7159_v4 = vcombine.high %v7139_v60, %v7139_v60 }
  0xfb   : > { %10419 = vmatpush1.msk.msra.mxu0 %vm263_vm1, %v3487_v19 }
  0xfc   : > { %6067 = vrot.lane.b32.xlu0 %v11543_v9, %s11071_s5  ;;  %6073 = vrot.lane.b32.xlu1 %v6049_v12, %s11071_s5  ;;  %v7173_v19 = vrot.slane %v7159_v4, %v11127_v5 }
  0xfd   : > { %v3479_v21 = vpop.permute.xlu0 %3478  ;;  %v3481_v22 = vpop.permute.xlu1 %3480  ;;  %10420 = vmatmul.mubr.msk.f32.vlgmr.msra.gmra.mrb[0].mxu0 %vm259_vm2, %v10417_v20 }
  0xfe   : > { %v3490_v23 = vsel %vm3486_vm11, %v3477_v18, %v3479_v21  ;;  %3717 = vmatprep.mubr.f32.mxu0 %v11055_v13  ;;  %v3491_v10 = vsel %vm3486_vm11, %v3479_v21, %v3481_v22 }
  0xff   : > { %10421 = vmatprep.subr.msk.mxu1 %vm263_vm1, %v3490_v23  ;;  %v10453_v23 = vld [vmem:[%s12240_s1 + $0x18] sm:$0x3] }
 0x100   : > { %6075 = vrot.lane.b32.xlu0 %v11217_v54, %s11071_s5  ;;  %6077 = vrot.lane.b32.xlu1 %v11223_v58, %s11071_s5 }
 0x101   : > { %10422 = vmatpush1.msk.msra.mxu1 %vm263_vm1, %v3489_v24  ;;  %v3483_v25 = vpop.permute.xlu0 %3482  ;;  %v7506_v24 = vld [vmem:[%s11124_s20 + $0xa] sm:$0x3f] }
 0x102   : > { %v3485_v26 = vpop.permute.xlu1 %3484  ;;  %10735 = vmatprep.subr.mxu1 %v11055_v13  ;;  %10423 = vmatmul.mubr.msk.f32.vlgmr.msra.gmra.mrb[0].mxu1 %vm259_vm2, %v10417_v20  ;;  %v3492_v27 = vsel %vm3486_vm11, %v3481_v22, %v3483_v25 }
 0x103   : > { %v3493_v8 = vsel %vm3486_vm11, %v3483_v25, %v3485_v26  ;;  %10424 = vmatprep.subr.msk.mxu0 %vm263_vm1, %v3492_v27  ;;  %10737 = vmatprep.mubr.msk.f32.mxu1 %vm11065_vm4, %v11055_v13  ;;  %vm8290_vm11 = vcmask 367616  }
 0x104   : > { %6079 = vrot.lane.b32.xlu0 %v11226_v59, %s11071_s5  ;;  %6081 = vrot.lane.b32.xlu1 %v11232_v62, %s11071_s5 }
 0x105   : > { %10736 = vmatpush3.msk.msra.mxu1 %vm263_vm1, %v3493_v8  ;;  %10425 = vmatpush1.msk.msra.mxu0 %vm263_vm1, %v3491_v10  ;;  %v3844_v28 = vpop.permute.xlu0 %3843  ;;  %v7533_v8 = vrot.slane %v7506_v24, %v11127_v5 }
 0x106   : > { %v3846_v29 = vpop.permute.xlu1 %3845  ;;  %10426 = vmatmul.mubr.msk.f32.vlgmr.msra.gmra.mrb[2].mxu0 %vm259_vm2, %v10417_v20  ;;  %10738 = vmatmul.mubr.msk.f32.vlgmr.msra.gmra.mrb[20].mxu1 %vm259_vm2, %v10417_v20 }
 0x107   : > { %v3859_v30 = vsel %vm3857_vm12, %v3844_v28, %v3846_v29  ;;  %4017 = vmatprep.mubr.f32.mxu1 %v11055_v13  ;;  %3946 = vmatprep.mubr.f32.mxu0 %v11055_v13 }
 0x108   : > { %6440 = vrot.lane.b32.xlu0 %v6048_v1, %s11072_s8  ;;  %6442 = vrot.lane.b32.xlu1 %v6047_v2, %s11072_s8  ;;  %v7166_v2 = vrot.slane %v7139_v60, %v11127_v5 }
 0x109   : > { %10430 = vmatprep.subr.msk.mxu0 %vm263_vm1, %v3859_v30 }
 0x10a   : > { %v3842_v31 = vpop.permute.xlu0 %3841  ;;  %v7174_v18 = vcombine.high %v7166_v2, %v7166_v2 }
 0x10b   : > { %v3858_v16 = vsel %vm3857_vm12, %v3842_v31, %v3844_v28  ;;  %v3848_v32 = vpop.permute.xlu1 %3847 }
 0x10c   : > { %6438 = vrot.lane.b32.xlu0 %v11543_v9, %s11072_s8  ;;  %6444 = vrot.lane.b32.xlu1 %v6049_v12, %s11072_s8  ;;  %v3860_v40 = vsel %vm3857_vm12, %v3846_v29, %v3848_v32 }
 0x10d   : > { %10431 = vmatpush1.msk.msra.mxu0 %vm263_vm1, %v3858_v16  ;;  %v7541_v16 = vcombine.high %v7533_v8, %v7533_v8 }
 0x10e   : > { %10432 = vmatmul.mubr.msk.f32.vlgmr.msra.gmra.mrb[0].mxu0 %vm259_vm2, %v10429_v33 }
 0x10f   : > { %4088 = vmatprep.mubr.f32.mxu0 %v11055_v13 }
 0x110   : > { %6446 = vrot.lane.b32.xlu0 %v11217_v54, %s11072_s8  ;;  %6448 = vrot.lane.b32.xlu1 %v11223_v58, %s11072_s8  ;;  %v3850_v35 = vpop.permute.xlu0 %3849  ;;  %v3852_v36 = vpop.permute.xlu1 %3851  ;;  %v11630_v54 = vcombine.high %v11620_v37, %v11620_v37  ;;  %v11633_v58 = vrot.slane %v6775_v38, %v11127_v5 }
 0x111   : > { %v3861_v39 = vsel %vm3857_vm12, %v3848_v32, %v3850_v35  ;;  %v7526_v32 = vcombine.high %v7506_v24, %v7506_v24 }
 0x112   : > { %10433 = vmatprep.subr.msk.mxu1 %vm263_vm1, %v3861_v39  ;;  %v11650_v45 = vcombine.high %v11633_v58, %v11633_v58 }
 0x113   : > { %10434 = vmatpush1.msk.msra.mxu1 %vm263_vm1, %v3860_v40  ;;  %v7540_v38 = vrot.slane %v7526_v32, %v11127_v5 }
 0x114   : > { %6450 = vrot.lane.b32.xlu0 %v11226_v59, %s11072_s8  ;;  %6452 = vrot.lane.b32.xlu1 %v11232_v62, %s11072_s8  ;;  %v3862_v62 = vsel %vm3857_vm12, %v3850_v35, %v3852_v36 }
 0x115   : > { %v3854_v41 = vpop.permute.xlu0 %3853  ;;  %10740 = vmatprep.subr.mxu1 %v11055_v13  ;;  %10435 = vmatmul.mubr.msk.f32.vlgmr.msra.gmra.mrb[0].mxu1 %vm259_vm2, %v10429_v33 }
 0x116   : > { %v3856_v43 = vpop.permute.xlu1 %3855  ;;  %v3863_v44 = vsel %vm3857_vm12, %v3852_v36, %v3854_v41  ;;  %10742 = vmatprep.mubr.msk.f32.mxu1 %vm11065_vm4, %v11055_v13 }
 0x117   : > { %v3864_v59 = vsel %vm3857_vm12, %v3854_v41, %v3856_v43  ;;  %10436 = vmatprep.subr.msk.mxu0 %vm263_vm1, %v3863_v44  ;;  %v7873_v43 = vld [vmem:[%s11124_s20 + $0xa] sm:$0x3f]  ;;  %vm8657_vm12 = vcmask 359424  }
 0x118   : > { %6810 = vrot.lane.b32.xlu0 %v11630_v54, %s11073_s11  ;;  %6812 = vrot.lane.b32.xlu1 %v11633_v58, %s11073_s11 }
 0x119   : > { %10741 = vmatpush3.msk.msra.mxu1 %vm263_vm1, %v3864_v59  ;;  %10437 = vmatpush1.msk.msra.mxu0 %vm263_vm1, %v3862_v62 }
 0x11a   : > { %v4215_v47 = vpop.permute.xlu0 %4214  ;;  %v4217_v48 = vpop.permute.xlu1 %4216  ;;  %10438 = vmatmul.mubr.msk.f32.vlgmr.msra.gmra.mrb[2].mxu0 %vm259_vm2, %v10429_v33  ;;  %10743 = vmatmul.mubr.msk.f32.vlgmr.msra.gmra.mrb[22].mxu1 %vm259_vm2, %v10429_v33 }
 0x11b   : > { %v4230_v49 = vsel %vm4228_vm13, %v4215_v47, %v4217_v48  ;;  %4388 = vmatprep.mubr.f32.mxu1 %v11055_v13  ;;  %4317 = vmatprep.mubr.f32.mxu0 %v11055_v13 }
 0x11c   : > { %6808 = vrot.lane.b32.xlu0 %v11620_v37, %s11073_s11  ;;  %6814 = vrot.lane.b32.xlu1 %v11650_v45, %s11073_s11 }
 0x11d   : > { %10442 = vmatprep.subr.msk.mxu0 %vm263_vm1, %v4230_v49 }
 0x11e   : > { %v4213_v52 = vpop.permute.xlu0 %4212  ;;  %v4219_v11 = vpop.permute.xlu1 %4218 }
 0x11f   : > { %v4229_v14 = vsel %vm4228_vm13, %v4213_v52, %v4215_v47  ;;  %v4231_v17 = vsel %vm4228_vm13, %v4217_v48, %v4219_v11  ;;  %v7893_v47 = vcombine.high %v7873_v43, %v7873_v43 }
 0x120   : > { %6816 = vrot.lane.b32.xlu0 %v6799_v46, %s11073_s11  ;;  %6818 = vrot.lane.b32.xlu1 %v6807_v50, %s11073_s11  ;;  %v7900_v46 = vrot.slane %v7873_v43, %v11127_v5 }
 0x121   : > { %10443 = vmatpush1.msk.msra.mxu0 %vm263_vm1, %v4229_v14  ;;  %v7907_v14 = vrot.slane %v7893_v47, %v11127_v5 }
 0x122   : > { %v4221_v56 = vpop.permute.xlu0 %4220  ;;  %v4223_v57 = vpop.permute.xlu1 %4222  ;;  %10444 = vmatmul.mubr.msk.f32.vlgmr.msra.gmra.mrb[0].mxu0 %vm259_vm2, %v10441_v53 }
 0x123   : > { %v4232_v9 = vsel %vm4228_vm13, %v4219_v11, %v4221_v56  ;;  %4459 = vmatprep.mubr.f32.mxu0 %v11055_v13  ;;  %v4233_v6 = vsel %vm4228_vm13, %v4221_v56, %v4223_v57  ;;  %v7908_v11 = vcombine.high %v7900_v46, %v7900_v46 }
 0x124   : > { %6820 = vrot.lane.b32.xlu0 %v6806_v55, %s11073_s11  ;;  %7177 = vrot.lane.b32.xlu1 %v11630_v54, %s11074_s14  ;;  %s197_s11 = scalar_lea.vmem %s12243_s4, %s10981_s9 }
 0x125   : > { %10445 = vmatprep.subr.msk.mxu1 %vm263_vm1, %v4232_v9  ;;  %v8240_v9 = vld [vmem:[%s11124_s20 + $0xa] sm:$0x3f] }
 0x126   : > { %10446 = vmatpush1.msk.msra.mxu1 %vm263_vm1, %v4231_v17  ;;  %v4225_v61 = vpop.permute.xlu0 %4224  ;;  %v4227_v63 = vpop.permute.xlu1 %4226 }
 0x127   : > { %v4235_v0 = vsel %vm4228_vm13, %v4225_v61, %v4227_v63  ;;  %10745 = vmatprep.subr.mxu1 %v11055_v13  ;;  %10447 = vmatmul.mubr.msk.f32.vlgmr.msra.gmra.mrb[0].mxu1 %vm259_vm2, %v10441_v53  ;;  %v4234_v1 = vsel %vm4228_vm13, %v4223_v57, %v4225_v61  ;;  %v8267_v63 = vrot.slane %v8240_v9, %v11127_v5  ;;  %vm9024_vm13 = vcmask 293888  }
 0x128   : > { %7179 = vrot.lane.b32.xlu0 %v11633_v58, %s11074_s14  ;;  %7175 = vrot.lane.b32.xlu1 %v11620_v37, %s11074_s14 }
 0x129   : > { %10448 = vmatprep.subr.msk.mxu0 %vm263_vm1, %v4234_v1  ;;  %10746 = vmatpush3.msk.msra.mxu1 %vm263_vm1, %v4235_v0  ;;  %v10477_v0 = vld [vmem:[%s12240_s1 + $0x1c] sm:$0x3] }
 0x12a   : > { %10449 = vmatpush1.msk.msra.mxu0 %vm263_vm1, %v4233_v6  ;;  %v4586_v7 = vpop.permute.xlu0 %4585  ;;  %v4588_v12 = vpop.permute.xlu1 %4587  ;;  %10747 = vmatprep.mubr.msk.f32.mxu1 %vm11065_vm4, %v11055_v13  ;;  %v8275_v6 = vcombine.high %v8267_v63, %v8267_v63 }
 0x12b   : > { %v4601_v15 = vsel %vm4599_vm14, %v4586_v7, %v4588_v12  ;;  %10450 = vmatmul.mubr.msk.f32.vlgmr.msra.gmra.mrb[2].mxu0 %vm259_vm2, %v10441_v53  ;;  %10748 = vmatmul.mubr.msk.f32.vlgmr.msra.gmra.mrb[24].mxu1 %vm259_vm2, %v10441_v53 }
 0x12c   : > { %7181 = vrot.lane.b32.xlu0 %v11650_v45, %s11074_s14  ;;  %7183 = vrot.lane.b32.xlu1 %v7166_v2, %s11074_s14 }
 0x12d   : > { %10454 = vmatprep.subr.msk.mxu0 %vm263_vm1, %v4601_v15  ;;  %4759 = vmatprep.mubr.f32.mxu1 %v11055_v13 }
 0x12e   : > { %v4584_v20 = vpop.permute.xlu0 %4583  ;;  %v4590_v21 = vpop.permute.xlu1 %4589  ;;  %4688 = vmatprep.mubr.f32.mxu0 %v11055_v13 }
 0x12f   : > { %v4600_v22 = vsel %vm4599_vm14, %v4584_v20, %v4586_v7  ;;  %v4602_v10 = vsel %vm4599_vm14, %v4588_v12, %v4590_v21  ;;  %v8260_v7 = vcombine.high %v8240_v9, %v8240_v9 }
 0x130   : > { %7185 = vrot.lane.b32.xlu0 %v7174_v18, %s11074_s14  ;;  %7187 = vrot.lane.b32.xlu1 %v7173_v19, %s11074_s14 }
 0x131   : > { %10455 = vmatpush1.msk.msra.mxu0 %vm263_vm1, %v4600_v22 }
 0x132   : > { %v4592_v25 = vpop.permute.xlu0 %4591  ;;  %v4594_v26 = vpop.permute.xlu1 %4593  ;;  %10456 = vmatmul.mubr.msk.f32.vlgmr.msra.gmra.mrb[0].mxu0 %vm259_vm2, %v10453_v23 }
 0x133   : > { %v4603_v27 = vsel %vm4599_vm14, %v4590_v21, %v4592_v25  ;;  %4830 = vmatprep.mubr.f32.mxu0 %v11055_v13  ;;  %v4604_v33 = vsel %vm4599_vm14, %v4592_v25, %v4594_v26  ;;  %v8274_v21 = vrot.slane %v8260_v7, %v11127_v5 }
 0x134   : > { %7544 = vrot.lane.b32.xlu0 %v11630_v54, %s11075_s19  ;;  %7546 = vrot.lane.b32.xlu1 %v11633_v58, %s11075_s19 }
 0x135   : > { %10457 = vmatprep.subr.msk.mxu1 %vm263_vm1, %v4603_v27 }
 0x136   : > { %10458 = vmatpush1.msk.msra.mxu1 %vm263_vm1, %v4602_v10  ;;  %v4596_v28 = vpop.permute.xlu0 %4595  ;;  %v4598_v29 = vpop.permute.xlu1 %4597 }
 0x137   : > { %v4606_v30 = vsel %vm4599_vm14, %v4596_v28, %v4598_v29  ;;  %10750 = vmatprep.subr.mxu1 %v11055_v13  ;;  %10459 = vmatmul.mubr.msk.f32.vlgmr.msra.gmra.mrb[0].mxu1 %vm259_vm2, %v10453_v23  ;;  %v4605_v31 = vsel %vm4599_vm14, %v4594_v26, %v4596_v28  ;;  %v8607_v26 = vld [vmem:[%s11124_s20 + $0xa] sm:$0x3f]  ;;  %vm9391_vm14 = vcmask 285696  }
 0x138   : > { %7542 = vrot.lane.b32.xlu0 %v11620_v37, %s11075_s19  ;;  %7548 = vrot.lane.b32.xlu1 %v11650_v45, %s11075_s19  ;;  %v8634_v28 = vrot.slane %v8607_v26, %v11127_v5  ;;  %v8627_v29 = vcombine.high %v8607_v26, %v8607_v26 }
 0x139   : > { %10460 = vmatprep.subr.msk.mxu0 %vm263_vm1, %v4605_v31  ;;  %10751 = vmatpush3.msk.msra.mxu1 %vm263_vm1, %v4606_v30  ;;  %v10489_v30 = vld [vmem:[%s12240_s1 + $0x1e] sm:$0x3] }
 0x13a   : > { %10461 = vmatpush1.msk.msra.mxu0 %vm263_vm1, %v4604_v33  ;;  %v4957_v34 = vpop.permute.xlu0 %4956  ;;  %v4959_v35 = vpop.permute.xlu1 %4958  ;;  %10752 = vmatprep.mubr.msk.f32.mxu1 %vm11065_vm4, %v11055_v13  ;;  %v8642_v33 = vcombine.high %v8634_v28, %v8634_v28 }
 0x13b   : > { %v4972_v36 = vsel %vm4970_vm15, %v4957_v34, %v4959_v35  ;;  %10462 = vmatmul.mubr.msk.f32.vlgmr.msra.gmra.mrb[2].mxu0 %vm259_vm2, %v10453_v23  ;;  %10753 = vmatmul.mubr.msk.f32.vlgmr.msra.gmra.mrb[26].mxu1 %vm259_vm2, %v10453_v23 }
 0x13c   : > { %7550 = vrot.lane.b32.xlu0 %v7533_v8, %s11075_s19  ;;  %7552 = vrot.lane.b32.xlu1 %v7541_v16, %s11075_s19 }
 0x13d   : > { %10466 = vmatprep.subr.msk.mxu0 %vm263_vm1, %v4972_v36  ;;  %5130 = vmatprep.mubr.f32.mxu1 %v11055_v13 }
 0x13e   : > { %v4955_v39 = vpop.permute.xlu0 %4954  ;;  %v4961_v40 = vpop.permute.xlu1 %4960  ;;  %5059 = vmatprep.mubr.f32.mxu0 %v11055_v13 }
 0x13f   : > { %v4971_v41 = vsel %vm4970_vm15, %v4955_v39, %v4957_v34  ;;  %v4973_v48 = vsel %vm4970_vm15, %v4959_v35, %v4961_v40  ;;  %v8641_v34 = vrot.slane %v8627_v29, %v11127_v5 }
 0x140   : > { %7554 = vrot.lane.b32.xlu0 %v7540_v38, %s11075_s19  ;;  %7911 = vrot.lane.b32.xlu1 %v11630_v54, %s11076_s23 }
 0x141   : > { %10467 = vmatpush1.msk.msra.mxu0 %vm263_vm1, %v4971_v41 }
 0x142   : > { %v4963_v44 = vpop.permute.xlu0 %4962  ;;  %v4965_v59 = vpop.permute.xlu1 %4964  ;;  %10468 = vmatmul.mubr.msk.f32.vlgmr.msra.gmra.mrb[0].mxu0 %vm259_vm2, %v10465_v42 }
 0x143   : > { %v4974_v62 = vsel %vm4970_vm15, %v4961_v40, %v4963_v44  ;;  %5201 = vmatprep.mubr.f32.mxu0 %v11055_v13  ;;  %v4975_v53 = vsel %vm4970_vm15, %v4963_v44, %v4965_v59 }
 0x144   : > { %7913 = vrot.lane.b32.xlu0 %v11633_v58, %s11076_s23  ;;  %7909 = vrot.lane.b32.xlu1 %v11620_v37, %s11076_s23 }
 0x145   : > { %10469 = vmatprep.subr.msk.mxu1 %vm263_vm1, %v4974_v62 }
 0x146   : > { %10470 = vmatpush1.msk.msra.mxu1 %vm263_vm1, %v4973_v48  ;;  %v4967_v49 = vpop.permute.xlu0 %4966  ;;  %v4969_v50 = vpop.permute.xlu1 %4968 }
 0x147   : > { %v4977_v51 = vsel %vm4970_vm15, %v4967_v49, %v4969_v50  ;;  %10755 = vmatprep.subr.mxu1 %v11055_v13  ;;  %10471 = vmatmul.mubr.msk.f32.vlgmr.msra.gmra.mrb[0].mxu1 %vm259_vm2, %v10465_v42  ;;  %v4976_v52 = vsel %vm4970_vm15, %v4965_v59, %v4967_v49  ;;  %vm9758_vm15 = vcmask 277504  }
 0x148   : > { %7915 = vrot.lane.b32.xlu0 %v11650_v45, %s11076_s23  ;;  %7917 = vrot.lane.b32.xlu1 %v7900_v46, %s11076_s23 }
 0x149   : > { %10472 = vmatprep.subr.msk.mxu0 %vm263_vm1, %v4976_v52  ;;  %10756 = vmatpush3.msk.msra.mxu1 %vm263_vm1, %v4977_v51  ;;  %v10501_v51 = vld [vmem:[%s12240_s1 + $0x20] sm:$0x3] }
 0x14a   : > { %10473 = vmatpush1.msk.msra.mxu0 %vm263_vm1, %v4975_v53  ;;  %v5328_v55 = vpop.permute.xlu0 %5327  ;;  %v5330_v56 = vpop.permute.xlu1 %5329  ;;  %10757 = vmatprep.mubr.msk.f32.mxu1 %vm11065_vm4, %v11055_v13 }
 0x14b   : > { %v5343_v57 = vsel %vm5341_vm0, %v5328_v55, %v5330_v56  ;;  %10474 = vmatmul.mubr.msk.f32.vlgmr.msra.gmra.mrb[2].mxu0 %vm259_vm2, %v10465_v42  ;;  %10758 = vmatmul.mubr.msk.f32.vlgmr.msra.gmra.mrb[28].mxu1 %vm259_vm2, %v10465_v42  ;;  %v8974_v42 = vld [vmem:[%s11124_s20 + $0xa] sm:$0x3f] }
 0x14c   : > { %7919 = vrot.lane.b32.xlu0 %v7908_v11, %s11076_s23  ;;  %7921 = vrot.lane.b32.xlu1 %v7907_v14, %s11076_s23  ;;  %v9001_v62 = vrot.slane %v8974_v42, %v11127_v5  ;;  %v8994_v50 = vcombine.high %v8974_v42, %v8974_v42 }
 0x14d   : > { %10478 = vmatprep.subr.msk.mxu0 %vm263_vm1, %v5343_v57  ;;  %5501 = vmatprep.mubr.f32.mxu1 %v11055_v13 }
 0x14e   : > { %v5326_v17 = vpop.permute.xlu0 %5325  ;;  %v5332_v60 = vpop.permute.xlu1 %5331  ;;  %5430 = vmatprep.mubr.f32.mxu0 %v11055_v13  ;;  %v9009_v49 = vcombine.high %v9001_v62, %v9001_v62  ;;  %v9008_v53 = vrot.slane %v8994_v50, %v11127_v5 }
 0x14f   : > { %v5342_v61 = vsel %vm5341_vm0, %v5326_v17, %v5328_v55  ;;  %v5344_v12 = vsel %vm5341_vm0, %v5330_v56, %v5332_v60 }
 0x150   : > { %8278 = vrot.lane.b32.xlu0 %v11630_v54, %s11077_s24  ;;  %8280 = vrot.lane.b32.xlu1 %v11633_v58, %s11077_s24 }
 0x151   : > { %10479 = vmatpush1.msk.msra.mxu0 %vm263_vm1, %v5342_v61  ;;  %v9341_v61 = vld [vmem:[%s11124_s20 + $0xa] sm:$0x3f] }
 0x152   : > { %v5334_v1 = vpop.permute.xlu0 %5333  ;;  %v5336_v2 = vpop.permute.xlu1 %5335  ;;  %10480 = vmatmul.mubr.msk.f32.vlgmr.msra.gmra.mrb[0].mxu0 %vm259_vm2, %v10477_v0 }
 0x153   : > { %v5345_v4 = vsel %vm5341_vm0, %v5332_v60, %v5334_v1  ;;  %5572 = vmatprep.mubr.f32.mxu0 %v11055_v13  ;;  %v5346_v22 = vsel %vm5341_vm0, %v5334_v1, %v5336_v2 }
 0x154   : > { %8276 = vrot.lane.b32.xlu0 %v11620_v37, %s11077_s24  ;;  %8282 = vrot.lane.b32.xlu1 %v11650_v45, %s11077_s24 }
 0x155   : > { %10481 = vmatprep.subr.msk.mxu1 %vm263_vm1, %v5345_v4  ;;  %v9361_v4 = vcombine.high %v9341_v61, %v9341_v61 }
 0x156   : > { %10482 = vmatpush1.msk.msra.mxu1 %vm263_vm1, %v5344_v12  ;;  %v5338_v15 = vpop.permute.xlu0 %5337  ;;  %v5340_v18 = vpop.permute.xlu1 %5339 }
 0x157   : > { %v5347_v19 = vsel %vm5341_vm0, %v5336_v2, %v5338_v15  ;;  %10483 = vmatmul.mubr.msk.f32.vlgmr.msra.gmra.mrb[0].mxu1 %vm259_vm2, %v10477_v0  ;;  %v5348_v20 = vsel %vm5341_vm0, %v5338_v15, %v5340_v18  ;;  %10760 = vmatprep.subr.mxu1 %v11055_v13  ;;  %v9368_v2 = vrot.slane %v9341_v61, %v11127_v5 }
 0x158   : > { %8284 = vrot.lane.b32.xlu0 %v8267_v63, %s11077_s24  ;;  %8286 = vrot.lane.b32.xlu1 %v8275_v6, %s11077_s24  ;;  %v9375_v18 = vrot.slane %v9361_v4, %v11127_v5 }
 0x159   : > { %10484 = vmatprep.subr.msk.mxu0 %vm263_vm1, %v5347_v19  ;;  %10761 = vmatpush3.msk.msra.mxu1 %vm263_vm1, %v5348_v20  ;;  %v9376_v15 = vcombine.high %v9368_v2, %v9368_v2  ;;  %v10513_v19 = vld [vmem:[%s12240_s1 + $0x22] sm:$0x3] }
 0x15a   : > { %10485 = vmatpush1.msk.msra.mxu0 %vm263_vm1, %v5346_v22  ;;  %10762 = vmatprep.mubr.msk.f32.mxu1 %vm11065_vm4, %v11055_v13  ;;  %v5699_v23 = vpop.permute.xlu0 %5698  ;;  %v5701_v24 = vpop.permute.xlu1 %5700 }
 0x15b   : > { %10763 = vmatmul.mubr.msk.f32.vlgmr.msra.gmra.mrb[30].mxu1 %vm259_vm2, %v10477_v0  ;;  %v5714_v25 = vsel %vm5712_vm3, %v5699_v23, %v5701_v24  ;;  %10486 = vmatmul.mubr.msk.f32.vlgmr.msra.gmra.mrb[2].mxu0 %vm259_vm2, %v10477_v0 }
 0x15c   : > { %8288 = vrot.lane.b32.xlu0 %v8274_v21, %s11077_s24  ;;  %8645 = vrot.lane.b32.xlu1 %v11630_v54, %s11078_s27 }
 0x15d   : > { %10490 = vmatprep.subr.msk.mxu0 %vm263_vm1, %v5714_v25  ;;  %5872 = vmatprep.mubr.f32.mxu1 %v11055_v13 }
 0x15e   : > { %v5697_v27 = vpop.permute.xlu0 %5696  ;;  %v5703_v8 = vpop.permute.xlu1 %5702  ;;  %5801 = vmatprep.mubr.f32.mxu0 %v11055_v13 }
 0x15f   : > { %v5713_v10 = vsel %vm5712_vm3, %v5697_v27, %v5699_v23  ;;  %v5715_v35 = vsel %vm5712_vm3, %v5701_v24, %v5703_v8  ;;  %v9708_v24 = vld [vmem:[%s11124_s20 + $0xa] sm:$0x3f] }
 0x160   : > { %8647 = vrot.lane.b32.xlu0 %v11633_v58, %s11078_s27  ;;  %8643 = vrot.lane.b32.xlu1 %v11620_v37, %s11078_s27 }
 0x161   : > { %10491 = vmatpush1.msk.msra.mxu0 %vm263_vm1, %v5713_v10  ;;  %v9735_v10 = vrot.slane %v9708_v24, %v11127_v5 }
 0x162   : > { %v5705_v31 = vpop.permute.xlu0 %5704  ;;  %v5707_v16 = vpop.permute.xlu1 %5706  ;;  %10492 = vmatmul.mubr.msk.f32.vlgmr.msra.gmra.mrb[0].mxu0 %vm259_vm2, %v10489_v30 }
 0x163   : > { %v5716_v32 = vsel %vm5712_vm3, %v5703_v8, %v5705_v31  ;;  %5943 = vmatprep.mubr.f32.mxu0 %v11055_v13  ;;  %v5717_v41 = vsel %vm5712_vm3, %v5705_v31, %v5707_v16  ;;  %v9743_v31 = vcombine.high %v9735_v10, %v9735_v10 }
 0x164   : > { %8649 = vrot.lane.b32.xlu0 %v11650_v45, %s11078_s27  ;;  %8651 = vrot.lane.b32.xlu1 %v8634_v28, %s11078_s27 }
 0x165   : > { %10493 = vmatprep.subr.msk.mxu1 %vm263_vm1, %v5716_v32 }
 0x166   : > { %10494 = vmatpush1.msk.msra.mxu1 %vm263_vm1, %v5715_v35  ;;  %v5709_v36 = vpop.permute.xlu0 %5708  ;;  %v5711_v38 = vpop.permute.xlu1 %5710 }
 0x167   : > { %v5718_v39 = vsel %vm5712_vm3, %v5707_v16, %v5709_v36  ;;  %10495 = vmatmul.mubr.msk.f32.vlgmr.msra.gmra.mrb[0].mxu1 %vm259_vm2, %v10489_v30  ;;  %v5719_v40 = vsel %vm5712_vm3, %v5709_v36, %v5711_v38  ;;  %10765 = vmatprep.subr.mxu1 %v11055_v13  ;;  %v9728_v16 = vcombine.high %v9708_v24, %v9708_v24  ;;  %v10549_v24 = vld [vmem:[%s12240_s1 + $0x28] sm:$0x3]  ;;  %vm10244_vm3 = vcmask 259076  }
 0x168   : > { %8653 = vrot.lane.b32.xlu0 %v8642_v33, %s11078_s27  ;;  %8655 = vrot.lane.b32.xlu1 %v8641_v34, %s11078_s27 }
 0x169   : > { %10496 = vmatprep.subr.msk.mxu0 %vm263_vm1, %v5718_v39  ;;  %10766 = vmatpush3.msk.msra.mxu1 %vm263_vm1, %v5719_v40  ;;  %v10525_v40 = vld [vmem:[%s12240_s1 + $0x24] sm:$0x3] }
 0x16a   : > { %10497 = vmatpush1.msk.msra.mxu0 %vm263_vm1, %v5717_v41  ;;  %10767 = vmatprep.mubr.msk.f32.mxu1 %vm11065_vm4, %v11055_v13  ;;  %v6070_v43 = vpop.permute.xlu0 %6069  ;;  %v6072_v44 = vpop.permute.xlu1 %6071 }
 0x16b   : > { %10768 = vmatmul.mubr.msk.f32.vlgmr.msra.gmra.mrb[32].mxu1 %vm259_vm2, %v10489_v30  ;;  %v6085_v59 = vsel %vm6083_vm5, %v6070_v43, %v6072_v44  ;;  %10498 = vmatmul.mubr.msk.f32.vlgmr.msra.gmra.mrb[2].mxu0 %vm259_vm2, %v10489_v30 }
 0x16c   : > { %9012 = vrot.lane.b32.xlu0 %v11630_v54, %s11079_s30  ;;  %9014 = vrot.lane.b32.xlu1 %v11633_v58, %s11079_s30 }
 0x16d   : > { %10502 = vmatprep.subr.msk.mxu0 %vm263_vm1, %v6085_v59  ;;  %6243 = vmatprep.mubr.f32.mxu1 %v11055_v13 }
 0x16e   : > { %v6068_v46 = vpop.permute.xlu0 %6067  ;;  %v6074_v47 = vpop.permute.xlu1 %6073  ;;  %6172 = vmatprep.mubr.f32.mxu0 %v11055_v13 }
 0x16f   : > { %v6084_v48 = vsel %vm6083_vm5, %v6068_v46, %v6070_v43  ;;  %v6086_v55 = vsel %vm6083_vm5, %v6072_v44, %v6074_v47 }
 0x170   : > { %9010 = vrot.lane.b32.xlu0 %v11620_v37, %s11079_s30  ;;  %9016 = vrot.lane.b32.xlu1 %v11650_v45, %s11079_s30 }
 0x171   : > { %10503 = vmatpush1.msk.msra.mxu0 %vm263_vm1, %v6084_v48 }
 0x172   : > { %v6076_v52 = vpop.permute.xlu0 %6075  ;;  %v6078_v11 = vpop.permute.xlu1 %6077  ;;  %10504 = vmatmul.mubr.msk.f32.vlgmr.msra.gmra.mrb[0].mxu0 %vm259_vm2, %v10501_v51 }
 0x173   : > { %v6087_v14 = vsel %vm6083_vm5, %v6074_v47, %v6076_v52  ;;  %6314 = vmatprep.mubr.f32.mxu0 %v11055_v13  ;;  %v6088_v60 = vsel %vm6083_vm5, %v6076_v52, %v6078_v11 }
 0x174   : > { %9018 = vrot.lane.b32.xlu0 %v9001_v62, %s11079_s30  ;;  %9020 = vrot.lane.b32.xlu1 %v9009_v49, %s11079_s30 }
 0x175   : > { %10505 = vmatprep.subr.msk.mxu1 %vm263_vm1, %v6087_v14 }
 0x176   : > { %10506 = vmatpush1.msk.msra.mxu1 %vm263_vm1, %v6086_v55  ;;  %v6080_v56 = vpop.permute.xlu0 %6079  ;;  %v6082_v57 = vpop.permute.xlu1 %6081 }
 0x177   : > { %v6089_v9 = vsel %vm6083_vm5, %v6078_v11, %v6080_v56  ;;  %10507 = vmatmul.mubr.msk.f32.vlgmr.msra.gmra.mrb[0].mxu1 %vm259_vm2, %v10501_v51  ;;  %v6090_v17 = vsel %vm6083_vm5, %v6080_v56, %v6082_v57  ;;  %10770 = vmatprep.subr.mxu1 %v11055_v13 }
 0x178   : > { %9022 = vrot.lane.b32.xlu0 %v9008_v53, %s11079_s30  ;;  %9379 = vrot.lane.b32.xlu1 %v11630_v54, %s11080_s7 }
 0x179   : > { %10508 = vmatprep.subr.msk.mxu0 %vm263_vm1, %v6089_v9  ;;  %10771 = vmatpush3.msk.msra.mxu1 %vm263_vm1, %v6090_v17  ;;  %v10537_v17 = vld [vmem:[%s12240_s1 + $0x26] sm:$0x3] }
 0x17a   : > { %10509 = vmatpush1.msk.msra.mxu0 %vm263_vm1, %v6088_v60  ;;  %10772 = vmatprep.mubr.msk.f32.mxu1 %vm11065_vm4, %v11055_v13  ;;  %v6441_v63 = vpop.permute.xlu0 %6440  ;;  %v6443_v0 = vpop.permute.xlu1 %6442 }
 0x17b   : > { %10773 = vmatmul.mubr.msk.f32.vlgmr.msra.gmra.mrb[34].mxu1 %vm259_vm2, %v10501_v51  ;;  %v6456_v1 = vsel %vm6454_vm6, %v6441_v63, %v6443_v0  ;;  %10510 = vmatmul.mubr.msk.f32.vlgmr.msra.gmra.mrb[2].mxu0 %vm259_vm2, %v10501_v51 }
 0x17c   : > { %9381 = vrot.lane.b32.xlu0 %v11633_v58, %s11080_s7  ;;  %9377 = vrot.lane.b32.xlu1 %v11620_v37, %s11080_s7 }
 0x17d   : > { %10514 = vmatprep.subr.msk.mxu0 %vm263_vm1, %v6456_v1  ;;  %6614 = vmatprep.mubr.f32.mxu1 %v11055_v13 }
 0x17e   : > { %v6439_v6 = vpop.permute.xlu0 %6438  ;;  %v6445_v7 = vpop.permute.xlu1 %6444  ;;  %6543 = vmatprep.mubr.f32.mxu0 %v11055_v13 }
 0x17f   : > { %v6455_v12 = vsel %vm6454_vm6, %v6439_v6, %v6441_v63  ;;  %v6457_v23 = vsel %vm6454_vm6, %v6443_v0, %v6445_v7 }
 0x180   : > { %9383 = vrot.lane.b32.xlu0 %v11650_v45, %s11080_s7  ;;  %9385 = vrot.lane.b32.xlu1 %v9368_v2, %s11080_s7 }
 0x181   : > { %10515 = vmatpush1.msk.msra.mxu0 %vm263_vm1, %v6455_v12 }
 0x182   : > { %v6447_v20 = vpop.permute.xlu0 %6446  ;;  %v6449_v21 = vpop.permute.xlu1 %6448  ;;  %10516 = vmatmul.mubr.msk.f32.vlgmr.msra.gmra.mrb[0].mxu0 %vm259_vm2, %v10513_v19 }
 0x183   : > { %v6458_v22 = vsel %vm6454_vm6, %v6445_v7, %v6447_v20  ;;  %6685 = vmatprep.mubr.f32.mxu0 %v11055_v13  ;;  %v6459_v28 = vsel %vm6454_vm6, %v6447_v20, %v6449_v21 }
 0x184   : > { %9387 = vrot.lane.b32.xlu0 %v9376_v15, %s11080_s7  ;;  %9389 = vrot.lane.b32.xlu1 %v9375_v18, %s11080_s7 }
 0x185   : > { %10517 = vmatprep.subr.msk.mxu1 %vm263_vm1, %v6458_v22 }
 0x186   : > { %10518 = vmatpush1.msk.msra.mxu1 %vm263_vm1, %v6457_v23  ;;  %v6451_v25 = vpop.permute.xlu0 %6450  ;;  %v6453_v26 = vpop.permute.xlu1 %6452 }
 0x187   : > { %v6460_v27 = vsel %vm6454_vm6, %v6449_v21, %v6451_v25  ;;  %10519 = vmatmul.mubr.msk.f32.vlgmr.msra.gmra.mrb[0].mxu1 %vm259_vm2, %v10513_v19  ;;  %v6461_v8 = vsel %vm6454_vm6, %v6451_v25, %v6453_v26  ;;  %10775 = vmatprep.subr.mxu1 %v11055_v13 }
 0x188   : > { %9746 = vrot.lane.b32.xlu0 %v11630_v54, %s11081_s10  ;;  %9748 = vrot.lane.b32.xlu1 %v11633_v58, %s11081_s10  ;;  %v557_v58 = vpop.f32.mrb[2].mxu1 }
 0x189   : > { %10520 = vmatprep.subr.msk.mxu0 %vm263_vm1, %v6460_v27  ;;  %10776 = vmatpush3.msk.msra.mxu1 %vm263_vm1, %v6461_v8  ;;  %v10694_v32 = vpop.f32.mrb[3].mxu1 }
 0x18a   : > { %10521 = vmatpush1.msk.msra.mxu0 %vm263_vm1, %v6459_v28  ;;  %10777 = vmatprep.mubr.msk.f32.mxu1 %vm11065_vm4, %v11055_v13  ;;  %v6811_v29 = vpop.permute.xlu0 %6810  ;;  %v6813_v30 = vpop.permute.xlu1 %6812 }
 0x18b   : > { %10778 = vmatmul.mubr.msk.f32.vlgmr.msra.gmra.mrb[36].mxu1 %vm259_vm2, %v10513_v19  ;;  %v6824_v54 = vsel %vm6822_vm7, %v6811_v29, %v6813_v30  ;;  %10522 = vmatmul.mubr.msk.f32.vlgmr.msra.gmra.mrb[2].mxu0 %vm259_vm2, %v10513_v19  ;;  %v857_v33 = vpop.f32.mrb[4].mxu1 }
 0x18c   : > { %9744 = vrot.lane.b32.xlu0 %v11620_v37, %s11081_s10  ;;  %9750 = vrot.lane.b32.xlu1 %v11650_v45, %s11081_s10  ;;  %v858_v36 = vadd.f32 %v857_v33, %v557_v58  ;;  %v10699_v39 = vpop.f32.mrb[5].mxu1  ;;  %v9742_v37 = vrot.slane %v9728_v16, %v11127_v5 }
 0x18d   : > { %10526 = vmatprep.subr.msk.mxu0 %vm263_vm1, %v6824_v54  ;;  %6981 = vmatprep.mubr.f32.mxu1 %v11055_v13  ;;  %v1217_v45 = vpop.f32.mrb[6].mxu1 }
 0x18e   : > { %v6809_v34 = vpop.permute.xlu0 %6808  ;;  %v6815_v35 = vpop.permute.xlu1 %6814  ;;  %6910 = vmatprep.mubr.f32.mxu0 %v11055_v13  ;;  %v1227_v41 = vadd.f32 %v1217_v45, %v858_v36 }
 0x18f   : > { %v6823_v38 = vsel %vm6822_vm7, %v6809_v34, %v6811_v29  ;;  %v10704_v42 = vpop.f32.mrb[7].mxu1  ;;  %v6825_v46 = vsel %vm6822_vm7, %v6813_v30, %v6815_v35 }
 0x190   : > { %9752 = vrot.lane.b32.xlu0 %v9735_v10, %s11081_s10  ;;  %9754 = vrot.lane.b32.xlu1 %v9743_v31, %s11081_s10  ;;  %v1584_v62 = vpop.f32.mrb[8].mxu1 }
 0x191   : > { %10527 = vmatpush1.msk.msra.mxu0 %vm263_vm1, %v6823_v38  ;;  %v1594_v47 = vadd.f32 %v1584_v62, %v1227_v41  ;;  %v10709_v48 = vpop.f32.mrb[9].mxu1 }
 0x192   : > { %v6817_v43 = vpop.permute.xlu0 %6816  ;;  %v6819_v44 = vpop.permute.xlu1 %6818  ;;  %10528 = vmatmul.mubr.msk.f32.vlgmr.msra.gmra.mrb[0].mxu0 %vm259_vm2, %v10525_v40 }
 0x193   : > { %v6826_v59 = vsel %vm6822_vm7, %v6815_v35, %v6817_v43  ;;  %7052 = vmatprep.mubr.f32.mxu0 %v11055_v13  ;;  %v6827_v11 = vsel %vm6822_vm7, %v6817_v43, %v6819_v44  ;;  %v10561_v35 = vld [vmem:[%s12240_s1 + $0x2a] sm:$0x3] }
 0x194   : > { %9756 = vrot.lane.b32.xlu0 %v9742_v37, %s11081_s10  ;;  %10529 = vmatprep.subr.msk.mxu1 %vm263_vm1, %v6826_v59 }
 0x195   : > { %10530 = vmatpush1.msk.msra.mxu1 %vm263_vm1, %v6825_v46 }
 0x196   : > { %v6821_v49 = vpop.permute.xlu0 %6820  ;;  %10531 = vmatmul.mubr.msk.f32.vlgmr.msra.gmra.mrb[0].mxu1 %vm259_vm2, %v10525_v40  ;;  %10780 = vmatprep.subr.mxu1 %v11055_v13  ;;  %v7178_v50 = vpop.permute.xlu1 %7177 }
 0x197   : > { %v6828_v51 = vsel %vm6822_vm7, %v6819_v44, %v6821_v49  ;;  %10781 = vmatpush3.msk.msra.mxu1 %vm263_vm1, %v6821_v49  ;;  %10782 = vmatprep.mubr.msk.f32.mxu1 %vm11065_vm4, %v11055_v13  ;;  %v1951_v52 = vpop.f32.mrb[10].mxu1 }
 0x198   : > { %10532 = vmatprep.subr.msk.mxu0 %vm263_vm1, %v6828_v51  ;;  %v1961_v14 = vadd.f32 %v1951_v52, %v1594_v47  ;;  %v10714_v53 = vpop.f32.mrb[11].mxu1  ;;  %v10573_v51 = vld [vmem:[%s12240_s1 + $0x2c] sm:$0x3] }
 0x199   : > { %10533 = vmatpush1.msk.msra.mxu0 %vm263_vm1, %v6827_v11 }
 0x19a   : > { %v7180_v55 = vpop.permute.xlu0 %7179  ;;  %10783 = vmatmul.mubr.msk.f32.vlgmr.msra.gmra.mrb[38].mxu1 %vm259_vm2, %v10525_v40  ;;  %v7176_v56 = vpop.permute.xlu1 %7175  ;;  %10534 = vmatmul.mubr.msk.f32.vlgmr.msra.gmra.mrb[2].mxu0 %vm259_vm2, %v10525_v40 }
 0x19b   : > { %v7191_v57 = vsel %vm7189_vm8, %v7178_v50, %v7180_v55  ;;  %v7190_v9 = vsel %vm7189_vm8, %v7176_v56, %v7178_v50  ;;  %7348 = vmatprep.mubr.f32.mxu1 %v11055_v13  ;;  %7277 = vmatprep.mubr.f32.mxu0 %v11055_v13 }
 0x19c   : > { %10538 = vmatprep.subr.msk.mxu0 %vm263_vm1, %v7191_v57 }
 0x19d   : > { %10539 = vmatpush1.msk.msra.mxu0 %vm263_vm1, %v7190_v9 }
 0x19e   : > { %v7182_v60 = vpop.permute.xlu0 %7181  ;;  %v7184_v61 = vpop.permute.xlu1 %7183  ;;  %10540 = vmatmul.mubr.msk.f32.vlgmr.msra.gmra.mrb[0].mxu0 %vm259_vm2, %v10537_v17 }
 0x19f   : > { %v7192_v63 = vsel %vm7189_vm8, %v7180_v55, %v7182_v60  ;;  %v7193_v0 = vsel %vm7189_vm8, %v7182_v60, %v7184_v61  ;;  %7419 = vmatprep.mubr.f32.mxu0 %v11055_v13 }
 0x1a0   : > { %10541 = vmatprep.subr.msk.mxu1 %vm263_vm1, %v7193_v0  ;;  %v11082_v0 = vmov 0  }
 0x1a1   : > { %10542 = vmatpush1.msk.msra.mxu1 %vm263_vm1, %v7192_v63  ;;  %v2318_v1 = vpop.f32.mrb[12].mxu1  ;;  %11020 = vset.pattern.permute.xlu1 %v11082_v0 }
 0x1a2   : > { %v7186_v2 = vpop.permute.xlu0 %7185  ;;  %10543 = vmatmul.mubr.msk.f32.vlgmr.msra.gmra.mrb[0].mxu1 %vm259_vm2, %v10537_v17  ;;  %v7188_v4 = vpop.permute.xlu1 %7187  ;;  %10785 = vmatprep.subr.mxu1 %v11055_v13  ;;  %v2328_v6 = vadd.f32 %v2318_v1, %v1961_v14 }
 0x1a3   : > { %v7194_v7 = vsel %vm7189_vm8, %v7184_v61, %v7186_v2  ;;  %v7195_v12 = vsel %vm7189_vm8, %v7186_v2, %v7188_v4  ;;  %10786 = vmatpush3.msk.msra.mxu1 %vm263_vm1, %v7188_v4  ;;  %10787 = vmatprep.mubr.msk.f32.mxu1 %vm11065_vm4, %v11055_v13  ;;  %v10719_v15 = vpop.f32.mrb[13].mxu1  ;;  %v10072_v61 = vld [vmem:[%s12241_s2] sm:$0x3] }
 0x1a4   : > { %10544 = vmatprep.subr.msk.mxu0 %vm263_vm1, %v7195_v12  ;;  %10075 = vperm.xlu1 %11020, %v10072_v61  }
 0x1a5   : > { %10545 = vmatpush1.msk.msra.mxu0 %vm263_vm1, %v7194_v7  ;;  %11021 = vset.pattern.permute.xlu0 %v11082_v0  ;;  %v10585_v7 = vld [vmem:[%s12240_s1 + $0x2e] sm:$0x3] }
 0x1a6   : > { %v7545_v18 = vpop.permute.xlu0 %7544  ;;  %10788 = vmatmul.mubr.msk.f32.vlgmr.msra.gmra.mrb[40].mxu1 %vm259_vm2, %v10537_v17  ;;  %v7547_v19 = vpop.permute.xlu1 %7546  ;;  %10546 = vmatmul.mubr.msk.f32.vlgmr.msra.gmra.mrb[2].mxu0 %vm259_vm2, %v10537_v17 }
 0x1a7   : > { %v7558_v20 = vsel %vm7556_vm9, %v7545_v18, %v7547_v19  ;;  %7715 = vmatprep.mubr.f32.mxu1 %v11055_v13  ;;  %7644 = vmatprep.mubr.f32.mxu0 %v11055_v13 }
 0x1a8   : > { %10550 = vmatprep.subr.msk.mxu0 %vm263_vm1, %v7558_v20 }
 0x1aa   : > { %v7543_v21 = vpop.permute.xlu0 %7542  ;;  %v7549_v22 = vpop.permute.xlu1 %7548 }
 0x1ab   : > { %v7557_v23 = vsel %vm7556_vm9, %v7543_v21, %v7545_v18  ;;  %v7559_v29 = vsel %vm7556_vm9, %v7547_v19, %v7549_v22 }
 0x1ac   : > { %10551 = vmatpush1.msk.msra.mxu0 %vm263_vm1, %v7557_v23 }
 0x1ad   : > { %10552 = vmatmul.mubr.msk.f32.vlgmr.msra.gmra.mrb[0].mxu0 %vm259_vm2, %v10549_v24  ;;  %v2685_v25 = vpop.f32.mrb[14].mxu1 }
 0x1ae   : > { %v7551_v26 = vpop.permute.xlu0 %7550  ;;  %v7553_v27 = vpop.permute.xlu1 %7552  ;;  %7786 = vmatprep.mubr.f32.mxu0 %v11055_v13  ;;  %v2695_v8 = vadd.f32 %v2685_v25, %v2328_v6 }
 0x1af   : > { %v7560_v10 = vsel %vm7556_vm9, %v7549_v22, %v7551_v26  ;;  %v10724_v28 = vpop.f32.mrb[15].mxu1  ;;  %v7561_v31 = vsel %vm7556_vm9, %v7551_v26, %v7553_v27 }
 0x1b0   : > { %10553 = vmatprep.subr.msk.mxu1 %vm263_vm1, %v7560_v10 }
 0x1b1   : > { %10554 = vmatpush1.msk.msra.mxu1 %vm263_vm1, %v7559_v29 }
 0x1b2   : > { %v7555_v30 = vpop.permute.xlu0 %7554  ;;  %10555 = vmatmul.mubr.msk.f32.vlgmr.msra.gmra.mrb[0].mxu1 %vm259_vm2, %v10549_v24  ;;  %10790 = vmatprep.subr.mxu1 %v11055_v13  ;;  %v7912_v54 = vpop.permute.xlu1 %7911 }
 0x1b3   : > { %v7562_v58 = vsel %vm7556_vm9, %v7553_v27, %v7555_v30  ;;  %10791 = vmatpush3.msk.msra.mxu1 %vm263_vm1, %v7555_v30  ;;  %10792 = vmatprep.mubr.msk.f32.mxu1 %vm11065_vm4, %v11055_v13 }
 0x1b4   : > { %10556 = vmatprep.subr.msk.mxu0 %vm263_vm1, %v7562_v58 }
 0x1b5   : > { %10557 = vmatpush1.msk.msra.mxu0 %vm263_vm1, %v7561_v31 }
 0x1b6   : > { %v7914_v16 = vpop.permute.xlu0 %7913  ;;  %10793 = vmatmul.mubr.msk.f32.vlgmr.msra.gmra.mrb[42].mxu1 %vm259_vm2, %v10549_v24  ;;  %v7910_v32 = vpop.permute.xlu1 %7909  ;;  %10558 = vmatmul.mubr.msk.f32.vlgmr.msra.gmra.mrb[2].mxu0 %vm259_vm2, %v10549_v24 }
 0x1b7   : > { %v7925_v33 = vsel %vm7923_vm10, %v7912_v54, %v7914_v16  ;;  %v7924_v34 = vsel %vm7923_vm10, %v7910_v32, %v7912_v54  ;;  %8082 = vmatprep.mubr.f32.mxu1 %v11055_v13  ;;  %8011 = vmatprep.mubr.f32.mxu0 %v11055_v13  ;;  %v10597_v54 = vld [vmem:[%s12240_s1 + $0x30] sm:$0x3] }
 0x1b8   : > { %10562 = vmatprep.subr.msk.mxu0 %vm263_vm1, %v7925_v33 }
 0x1b9   : > { %10563 = vmatpush1.msk.msra.mxu0 %vm263_vm1, %v7924_v34 }
 0x1ba   : > { %v7916_v36 = vpop.permute.xlu0 %7915  ;;  %v7918_v38 = vpop.permute.xlu1 %7917  ;;  %10564 = vmatmul.mubr.msk.f32.vlgmr.msra.gmra.mrb[0].mxu0 %vm259_vm2, %v10561_v35 }
 0x1bb   : > { %v7926_v39 = vsel %vm7923_vm10, %v7914_v16, %v7916_v36  ;;  %v7927_v37 = vsel %vm7923_vm10, %v7916_v36, %v7918_v38  ;;  %8153 = vmatprep.mubr.f32.mxu0 %v11055_v13 }
 0x1bc   : > { %10565 = vmatprep.subr.msk.mxu1 %vm263_vm1, %v7927_v37 }
 0x1bd   : > { %10566 = vmatpush1.msk.msra.mxu1 %vm263_vm1, %v7926_v39  ;;  %v3052_v45 = vpop.f32.mrb[16].mxu1 }
 0x1be   : > { %v7920_v40 = vpop.permute.xlu0 %7919  ;;  %10567 = vmatmul.mubr.msk.f32.vlgmr.msra.gmra.mrb[0].mxu1 %vm259_vm2, %v10561_v35  ;;  %v7922_v41 = vpop.permute.xlu1 %7921  ;;  %10795 = vmatprep.subr.mxu1 %v11055_v13  ;;  %v3062_v42 = vadd.f32 %v3052_v45, %v2695_v8 }
 0x1bf   : > { %v7928_v43 = vsel %vm7923_vm10, %v7918_v38, %v7920_v40  ;;  %v7929_v44 = vsel %vm7923_vm10, %v7920_v40, %v7922_v41  ;;  %10796 = vmatpush3.msk.msra.mxu1 %vm263_vm1, %v7922_v41  ;;  %10797 = vmatprep.mubr.msk.f32.mxu1 %vm11065_vm4, %v11055_v13  ;;  %v10729_v59 = vpop.f32.mrb[17].mxu1 }
 0x1c0   : > { %10568 = vmatprep.subr.msk.mxu0 %vm263_vm1, %v7929_v44 }
 0x1c1   : > { %10569 = vmatpush1.msk.msra.mxu0 %vm263_vm1, %v7928_v43  ;;  %v10609_v43 = vld [vmem:[%s12240_s1 + $0x32] sm:$0x3] }
 0x1c2   : > { %v8279_v62 = vpop.permute.xlu0 %8278  ;;  %10798 = vmatmul.mubr.msk.f32.vlgmr.msra.gmra.mrb[44].mxu1 %vm259_vm2, %v10561_v35  ;;  %v8281_v46 = vpop.permute.xlu1 %8280  ;;  %10570 = vmatmul.mubr.msk.f32.vlgmr.msra.gmra.mrb[2].mxu0 %vm259_vm2, %v10561_v35 }
 0x1c3   : > { %v8292_v47 = vsel %vm8290_vm11, %v8279_v62, %v8281_v46  ;;  %8449 = vmatprep.mubr.f32.mxu1 %v11055_v13  ;;  %8378 = vmatprep.mubr.f32.mxu0 %v11055_v13 }
 0x1c4   : > { %10574 = vmatprep.subr.msk.mxu0 %vm263_vm1, %v8292_v47 }
 0x1c6   : > { %v8277_v48 = vpop.permute.xlu0 %8276  ;;  %v8283_v49 = vpop.permute.xlu1 %8282 }
 0x1c7   : > { %v8291_v50 = vsel %vm8290_vm11, %v8277_v48, %v8279_v62  ;;  %v8293_v57 = vsel %vm8290_vm11, %v8281_v46, %v8283_v49 }
 0x1c8   : > { %10575 = vmatpush1.msk.msra.mxu0 %vm263_vm1, %v8291_v50 }
 0x1c9   : > { %10576 = vmatmul.mubr.msk.f32.vlgmr.msra.gmra.mrb[0].mxu0 %vm259_vm2, %v10573_v51  ;;  %v3419_v52 = vpop.f32.mrb[18].mxu1 }
 0x1ca   : > { %v8285_v11 = vpop.permute.xlu0 %8284  ;;  %v8287_v14 = vpop.permute.xlu1 %8286  ;;  %8520 = vmatprep.mubr.f32.mxu0 %v11055_v13  ;;  %v3429_v53 = vadd.f32 %v3419_v52, %v3062_v42 }
 0x1cb   : > { %v8294_v55 = vsel %vm8290_vm11, %v8283_v49, %v8285_v11  ;;  %v10734_v56 = vpop.f32.mrb[19].mxu1  ;;  %v8295_v63 = vsel %vm8290_vm11, %v8285_v11, %v8287_v14 }
 0x1cc   : > { %10577 = vmatprep.subr.msk.mxu1 %vm263_vm1, %v8294_v55 }
 0x1cd   : > { %10578 = vmatpush1.msk.msra.mxu1 %vm263_vm1, %v8293_v57 }
 0x1ce   : > { %v8289_v9 = vpop.permute.xlu0 %8288  ;;  %10579 = vmatmul.mubr.msk.f32.vlgmr.msra.gmra.mrb[0].mxu1 %vm259_vm2, %v10573_v51  ;;  %10800 = vmatprep.subr.mxu1 %v11055_v13  ;;  %v8646_v17 = vpop.permute.xlu1 %8645 }
 0x1cf   : > { %v8296_v60 = vsel %vm8290_vm11, %v8287_v14, %v8289_v9  ;;  %10801 = vmatpush3.msk.msra.mxu1 %vm263_vm1, %v8289_v9  ;;  %10802 = vmatprep.mubr.msk.f32.mxu1 %vm11065_vm4, %v11055_v13 }
 0x1d0   : > { %10580 = vmatprep.subr.msk.mxu0 %vm263_vm1, %v8296_v60 }
 0x1d1   : > { %10581 = vmatpush1.msk.msra.mxu0 %vm263_vm1, %v8295_v63 }
 0x1d2   : > { %v8648_v1 = vpop.permute.xlu0 %8647  ;;  %10803 = vmatmul.mubr.msk.f32.vlgmr.msra.gmra.mrb[46].mxu1 %vm259_vm2, %v10573_v51  ;;  %v8644_v2 = vpop.permute.xlu1 %8643  ;;  %10582 = vmatmul.mubr.msk.f32.vlgmr.msra.gmra.mrb[2].mxu0 %vm259_vm2, %v10573_v51 }
 0x1d3   : > { %v8659_v4 = vsel %vm8657_vm12, %v8646_v17, %v8648_v1  ;;  %v8658_v6 = vsel %vm8657_vm12, %v8644_v2, %v8646_v17  ;;  %8816 = vmatprep.mubr.f32.mxu1 %v11055_v13  ;;  %8745 = vmatprep.mubr.f32.mxu0 %v11055_v13 }
 0x1d4   : > { %10586 = vmatprep.subr.msk.mxu0 %vm263_vm1, %v8659_v4 }
 0x1d5   : > { %10587 = vmatpush1.msk.msra.mxu0 %vm263_vm1, %v8658_v6 }
 0x1d6   : > { %v8650_v12 = vpop.permute.xlu0 %8649  ;;  %v8652_v15 = vpop.permute.xlu1 %8651  ;;  %10588 = vmatmul.mubr.msk.f32.vlgmr.msra.gmra.mrb[0].mxu0 %vm259_vm2, %v10585_v7 }
 0x1d7   : > { %v8660_v18 = vsel %vm8657_vm12, %v8648_v1, %v8650_v12  ;;  %v8661_v19 = vsel %vm8657_vm12, %v8650_v12, %v8652_v15  ;;  %8887 = vmatprep.mubr.f32.mxu0 %v11055_v13 }
 0x1d8   : > { %10589 = vmatprep.subr.msk.mxu1 %vm263_vm1, %v8661_v19 }
 0x1d9   : > { %10590 = vmatpush1.msk.msra.mxu1 %vm263_vm1, %v8660_v18  ;;  %v3790_v20 = vpop.f32.mrb[20].mxu1 }
 0x1da   : > { %v8654_v21 = vpop.permute.xlu0 %8653  ;;  %10591 = vmatmul.mubr.msk.f32.vlgmr.msra.gmra.mrb[0].mxu1 %vm259_vm2, %v10585_v7  ;;  %v8656_v22 = vpop.permute.xlu1 %8655  ;;  %10805 = vmatprep.subr.mxu1 %v11055_v13  ;;  %v3800_v23 = vadd.f32 %v3790_v20, %v3429_v53  ;;  %v10621_v53 = vld [vmem:[%s12240_s1 + $0x34] sm:$0x3] }
 0x1db   : > { %v8662_v24 = vsel %vm8657_vm12, %v8652_v15, %v8654_v21  ;;  %v8663_v25 = vsel %vm8657_vm12, %v8654_v21, %v8656_v22  ;;  %10806 = vmatpush3.msk.msra.mxu1 %vm263_vm1, %v8656_v22  ;;  %10807 = vmatprep.mubr.msk.f32.mxu1 %vm11065_vm4, %v11055_v13  ;;  %v10739_v26 = vpop.f32.mrb[21].mxu1 }
 0x1dc   : > { %10592 = vmatprep.subr.msk.mxu0 %vm263_vm1, %v8663_v25 }
 0x1dd   : > { %10593 = vmatpush1.msk.msra.mxu0 %vm263_vm1, %v8662_v24 }
 0x1de   : > { %v9013_v27 = vpop.permute.xlu0 %9012  ;;  %10808 = vmatmul.mubr.msk.f32.vlgmr.msra.gmra.mrb[48].mxu1 %vm259_vm2, %v10585_v7  ;;  %v9015_v8 = vpop.permute.xlu1 %9014  ;;  %10594 = vmatmul.mubr.msk.f32.vlgmr.msra.gmra.mrb[2].mxu0 %vm259_vm2, %v10585_v7 }
 0x1df   : > { %v9026_v10 = vsel %vm9024_vm13, %v9013_v27, %v9015_v8  ;;  %9183 = vmatprep.mubr.f32.mxu1 %v11055_v13  ;;  %9112 = vmatprep.mubr.f32.mxu0 %v11055_v13 }
 0x1e0   : > { %10598 = vmatprep.subr.msk.mxu0 %vm263_vm1, %v9026_v10 }
 0x1e2   : > { %v9011_v28 = vpop.permute.xlu0 %9010  ;;  %v9017_v29 = vpop.permute.xlu1 %9016 }
 0x1e3   : > { %v9025_v30 = vsel %vm9024_vm13, %v9011_v28, %v9013_v27  ;;  %v9027_v32 = vsel %vm9024_vm13, %v9015_v8, %v9017_v29 }
 0x1e4   : > { %10599 = vmatpush1.msk.msra.mxu0 %vm263_vm1, %v9025_v30 }
 0x1e5   : > { %10600 = vmatmul.mubr.msk.f32.vlgmr.msra.gmra.mrb[0].mxu0 %vm259_vm2, %v10597_v54 }
 0x1e6   : > { %v9019_v58 = vpop.permute.xlu0 %9018  ;;  %v9021_v31 = vpop.permute.xlu1 %9020  ;;  %9254 = vmatprep.mubr.f32.mxu0 %v11055_v13 }
 0x1e7   : > { %v9028_v16 = vsel %vm9024_vm13, %v9017_v29, %v9019_v58  ;;  %v9029_v36 = vsel %vm9024_vm13, %v9019_v58, %v9021_v31 }
 0x1e8   : > { %10601 = vmatprep.subr.msk.mxu1 %vm263_vm1, %v9028_v16 }
 0x1e9   : > { %10602 = vmatpush1.msk.msra.mxu1 %vm263_vm1, %v9027_v32 }
 0x1ea   : > { %v9023_v33 = vpop.permute.xlu0 %9022  ;;  %10603 = vmatmul.mubr.msk.f32.vlgmr.msra.gmra.mrb[0].mxu1 %vm259_vm2, %v10597_v54  ;;  %10810 = vmatprep.subr.mxu1 %v11055_v13  ;;  %v9380_v34 = vpop.permute.xlu1 %9379 }
 0x1eb   : > { %v9030_v35 = vsel %vm9024_vm13, %v9021_v31, %v9023_v33  ;;  %10811 = vmatpush3.msk.msra.mxu1 %vm263_vm1, %v9023_v33  ;;  %10812 = vmatprep.mubr.msk.f32.mxu1 %vm11065_vm4, %v11055_v13 }
 0x1ec   : > { %10604 = vmatprep.subr.msk.mxu0 %vm263_vm1, %v9030_v35 }
 0x1ed   : > { %10605 = vmatpush1.msk.msra.mxu0 %vm263_vm1, %v9029_v36  ;;  %v4161_v38 = vpop.f32.mrb[22].mxu1 }
 0x1ee   : > { %v9382_v39 = vpop.permute.xlu0 %9381  ;;  %10813 = vmatmul.mubr.msk.f32.vlgmr.msra.gmra.mrb[50].mxu1 %vm259_vm2, %v10597_v54  ;;  %v9378_v37 = vpop.permute.xlu1 %9377  ;;  %10606 = vmatmul.mubr.msk.f32.vlgmr.msra.gmra.mrb[2].mxu0 %vm259_vm2, %v10597_v54  ;;  %v4171_v45 = vadd.f32 %v4161_v38, %v3800_v23 }
 0x1ef   : > { %v9393_v40 = vsel %vm9391_vm14, %v9380_v34, %v9382_v39  ;;  %v9392_v41 = vsel %vm9391_vm14, %v9378_v37, %v9380_v34  ;;  %9550 = vmatprep.mubr.f32.mxu1 %v11055_v13  ;;  %9479 = vmatprep.mubr.f32.mxu0 %v11055_v13  ;;  %v10744_v42 = vpop.f32.mrb[23].mxu1 }
 0x1f0   : > { %10610 = vmatprep.subr.msk.mxu0 %vm263_vm1, %v9393_v40 }
 0x1f1   : > { %10611 = vmatpush1.msk.msra.mxu0 %vm263_vm1, %v9392_v41 }
 0x1f2   : > { %v9384_v44 = vpop.permute.xlu0 %9383  ;;  %v9386_v59 = vpop.permute.xlu1 %9385  ;;  %10612 = vmatmul.mubr.msk.f32.vlgmr.msra.gmra.mrb[0].mxu0 %vm259_vm2, %v10609_v43 }
 0x1f3   : > { %v9394_v62 = vsel %vm9391_vm14, %v9382_v39, %v9384_v44  ;;  %v9395_v46 = vsel %vm9391_vm14, %v9384_v44, %v9386_v59  ;;  %9621 = vmatprep.mubr.f32.mxu0 %v11055_v13 }
 0x1f4   : > { %10613 = vmatprep.subr.msk.mxu1 %vm263_vm1, %v9395_v46 }
 0x1f5   : > { %10614 = vmatpush1.msk.msra.mxu1 %vm263_vm1, %v9394_v62 }
 0x1f6   : > { %v9388_v47 = vpop.permute.xlu0 %9387  ;;  %10615 = vmatmul.mubr.msk.f32.vlgmr.msra.gmra.mrb[0].mxu1 %vm259_vm2, %v10609_v43  ;;  %v9390_v48 = vpop.permute.xlu1 %9389  ;;  %10815 = vmatprep.subr.mxu1 %v11055_v13 }
 0x1f7   : > { %v9396_v49 = vsel %vm9391_vm14, %v9386_v59, %v9388_v47  ;;  %v9397_v50 = vsel %vm9391_vm14, %v9388_v47, %v9390_v48  ;;  %10816 = vmatpush3.msk.msra.mxu1 %vm263_vm1, %v9390_v48  ;;  %10817 = vmatprep.mubr.msk.f32.mxu1 %vm11065_vm4, %v11055_v13  ;;  %v10089_v48 = vsub.s32 0, %v11118_v3 }
 0x1f8   : > { %10616 = vmatprep.subr.msk.mxu0 %vm263_vm1, %v9397_v50  ;;  %v10093_v50 = vsub.s32 1, %v11118_v3 }
 0x1f9   : > { %10617 = vmatpush1.msk.msra.mxu0 %vm263_vm1, %v9396_v49  ;;  %v10085_v49 = vld [vmem:[%s12242_s3] sm:$0x7f] }
 0x1fa   : > { %v9747_v51 = vpop.permute.xlu0 %9746  ;;  %10818 = vmatmul.mubr.msk.f32.vlgmr.msra.gmra.mrb[52].mxu1 %vm259_vm2, %v10609_v43  ;;  %v9749_v52 = vpop.permute.xlu1 %9748  ;;  %10618 = vmatmul.mubr.msk.f32.vlgmr.msra.gmra.mrb[2].mxu0 %vm259_vm2, %v10609_v43 }
 0x1fb   : > { %v9760_v11 = vsel %vm9758_vm15, %v9747_v51, %v9749_v52  ;;  %9846 = vmatprep.mubr.f32.mxu0 %v11055_v13  ;;  %9917 = vmatprep.mubr.f32.mxu1 %v11055_v13 }
 0x1fc   : > { %10622 = vmatprep.subr.msk.mxu0 %vm263_vm1, %v9760_v11 }
 0x1fe   : > { %v9745_v14 = vpop.permute.xlu0 %9744  ;;  %v9751_v56 = vpop.permute.xlu1 %9750 }
 0x1ff   : > { %v9759_v55 = vsel %vm9758_vm15, %v9745_v14, %v9747_v51  ;;  %v4532_v57 = vpop.f32.mrb[24].mxu1  ;;  %v9761_v63 = vsel %vm9758_vm15, %v9749_v52, %v9751_v56  ;;  %v10090_v52 = vrot.slane %v10085_v49, %v10089_v48  ;;  %v10094_v14 = vrot.slane %v10085_v49, %v10093_v50 }
 0x200   : > { %10623 = vmatpush1.msk.msra.mxu0 %vm263_vm1, %v9759_v55  ;;  %v4542_v9 = vadd.f32 %v4532_v57, %v4171_v45  ;;  %v10749_v17 = vpop.f32.mrb[25].mxu1  ;;  %v10101_v57 = vsub.s32 3, %v11118_v3 }
 0x201   : > { %10624 = vmatmul.mubr.msk.f32.vlgmr.msra.gmra.mrb[0].mxu0 %vm259_vm2, %v10621_v53 }
 0x202   : > { %v9753_v60 = vpop.permute.xlu0 %9752  ;;  %9988 = vmatprep.mubr.f32.mxu0 %v11055_v13  ;;  %v9755_v0 = vpop.permute.xlu1 %9754 }
 0x203   : > { %v9762_v61 = vsel %vm9758_vm15, %v9751_v56, %v9753_v60  ;;  %v9763_v4 = vsel %vm9758_vm15, %v9753_v60, %v9755_v0 }
 0x204   : > { %10625 = vmatprep.subr.msk.mxu1 %vm263_vm1, %v9762_v61 }
 0x205   : > { %10626 = vmatpush1.msk.msra.mxu1 %vm263_vm1, %v9761_v63  ;;  %v10105_v63 = vsub.s32 4, %v11118_v3 }
 0x206   : > { %v9757_v1 = vpop.permute.xlu0 %9756  ;;  %10627 = vmatmul.mubr.msk.f32.vlgmr.msra.gmra.mrb[0].mxu1 %vm259_vm2, %v10621_v53  ;;  %10820 = vmatprep.subr.mxu1 %v11055_v13 }
 0x207   : > { %v9764_v2 = vsel %vm9758_vm15, %v9755_v0, %v9757_v1  ;;  %10821 = vmatpush3.msk.msra.mxu1 %vm263_vm1, %v9757_v1  ;;  %10822 = vmatprep.mubr.msk.f32.mxu1 %vm11065_vm4, %v11055_v13  ;;  %v10102_v1 = vrot.slane %v10085_v49, %v10101_v57  ;;  %vm10242_vm4 = vcmask 1043458  }
 0x208   : > { %10628 = vmatprep.subr.msk.mxu0 %vm263_vm1, %v9764_v2  ;;  %v10109_v2 = vsub.s32 5, %v11118_v3  ;;  %vm10243_vm0 = vmor %vm10242_vm4, %vm263_vm1 }
 0x209   : > { %10629 = vmatpush1.msk.msra.mxu0 %vm263_vm1, %v9763_v4  ;;  %vm10245_vm5 = vmor %vm10244_vm3, %vm10243_vm0 }
 0x20a   : > { %10630 = vmatmul.mubr.msk.f32.vlgmr.msra.gmra.mrb[2].mxu0 %vm259_vm2, %v10621_v53  ;;  %10823 = vmatmul.mubr.msk.f32.vlgmr.msra.gmra.mrb[54].mxu1 %vm259_vm2, %v10621_v53  ;;  %v10097_v53 = vsub.s32 2, %v11118_v3  ;;  %vm10140_vm2 = vcmask 254976  }
 0x20c   : > { %v10098_v61 = vrot.slane %v10085_v49, %v10097_v53 }
 0x20e   : > { %v4903_v6 = vpop.f32.mrb[26].mxu1 }
 0x20f   : > { %v4913_v7 = vadd.f32 %v4903_v6, %v4542_v9  ;;  %v10754_v12 = vpop.f32.mrb[27].mxu1 }
 0x21e   : > { %v5274_v15 = vpop.f32.mrb[28].mxu1 }
 0x21f   : > { %v5284_v18 = vadd.f32 %v5274_v15, %v4913_v7  ;;  %v10759_v19 = vpop.f32.mrb[29].mxu1  ;;  %v10113_v15 = vsub.s32 6, %v11118_v3 }
 0x223   : > { %v10076_v51 = vpop.permute.xlu1 %10075 }
 0x22e   : > { %v5645_v20 = vpop.f32.mrb[30].mxu1 }
 0x22f   : > { %v5655_v21 = vadd.f32 %v5645_v20, %v5284_v18  ;;  %v10764_v22 = vpop.f32.mrb[31].mxu1  ;;  %v10106_v20 = vrot.slane %v10085_v49, %v10105_v63 }
 0x23e   : > { %v6016_v13 = vpop.f32.mrb[32].mxu1 }
 0x23f   : > { %v6026_v23 = vadd.f32 %v6016_v13, %v5655_v21  ;;  %v10769_v24 = vpop.f32.mrb[33].mxu1 }
 0x240   : > { %v10110_v24 = vrot.slane %v10085_v49, %v10109_v2 }
 0x24e   : > { %v6387_v25 = vpop.f32.mrb[34].mxu1 }
 0x24f   : > { %v6397_v26 = vadd.f32 %v6387_v25, %v6026_v23  ;;  %v10774_v27 = vpop.f32.mrb[35].mxu1 }
 0x25e   : > { %v6758_v8 = vpop.f32.mrb[36].mxu1 }
 0x25f   : > { %v6768_v10 = vadd.f32 %v6758_v8, %v6397_v26  ;;  %v10779_v28 = vpop.f32.mrb[37].mxu1  ;;  %v10114_v8 = vrot.slane %v10085_v49, %v10113_v15 }
 0x26d   : > { %v7125_v29 = vpop.f32.mrb[38].mxu1 }
 0x26e   : > { %v7135_v30 = vadd.f32 %v7125_v29, %v6768_v10  ;;  %v10784_v54 = vpop.f32.mrb[39].mxu1 }
 0x279   : > { %v7492_v58 = vpop.f32.mrb[40].mxu1 }
 0x27a   : > { %v7502_v31 = vadd.f32 %v7492_v58, %v7135_v30  ;;  %v10789_v16 = vpop.f32.mrb[41].mxu1 }
 0x289   : > { %v7859_v32 = vpop.f32.mrb[42].mxu1 }
 0x28a   : > { %v7869_v33 = vadd.f32 %v7859_v32, %v7502_v31  ;;  %v10794_v34 = vpop.f32.mrb[43].mxu1 }
 0x295   : > { %v8226_v35 = vpop.f32.mrb[44].mxu1 }
 0x296   : > { %v8236_v36 = vadd.f32 %v8226_v35, %v7869_v33  ;;  %v10799_v38 = vpop.f32.mrb[45].mxu1 }
 0x2a5   : > { %v8593_v39 = vpop.f32.mrb[46].mxu1 }
 0x2a6   : > { %v8603_v37 = vadd.f32 %v8593_v39, %v8236_v36  ;;  %v10804_v45 = vpop.f32.mrb[47].mxu1 }
 0x2b1   : > { %v8960_v40 = vpop.f32.mrb[48].mxu1 }
 0x2b2   : > { %v8970_v41 = vadd.f32 %v8960_v40, %v8603_v37  ;;  %v10809_v42 = vpop.f32.mrb[49].mxu1 }
 0x2c1   : > { %v9327_v43 = vpop.f32.mrb[50].mxu1 }
 0x2c2   : > { %v9337_v44 = vadd.f32 %v9327_v43, %v8970_v41  ;;  %v10814_v59 = vpop.f32.mrb[51].mxu1 }
 0x2cd   : > { %v9694_v62 = vpop.f32.mrb[52].mxu1 }
 0x2ce   : > { %v9704_v46 = vadd.f32 %v9694_v62, %v9337_v44  ;;  %v10819_v47 = vpop.f32.mrb[53].mxu1 }
 0x2d4   : > { %v9848_v11 = vpop.f32.mrb[0].mxu0 }
 0x2d5   : > { %v9850_v55 = vpop.f32.mrb[1].mxu0  ;;  %v10078_v56 = vadd.f32 %v10076_v51, %v9848_v11 }
 0x2d6   : > { %v10079_v9 = vadd.f32 %v10076_v51, %v9850_v55 }
 0x2d7   : > { %v10122_v17 = vmul.f32 %v10090_v52, %v10078_v56 }
 0x2d8   : > { %v10123_v60 = vmul.f32 %v10094_v14, %v10079_v9 }
 0x2d9   : > { %v9919_v0 = vpop.f32.mrb[0].mxu1  ;;  %v10129_v4 = vsel %vm263_vm1, %v10122_v17, 0.0 }
 0x2da   : > { %v10130_v6 = vsel %vm263_vm1, %v10123_v60, 0.0  ;;  %v10080_v7 = vadd.f32 %v10076_v51, %v9919_v0  ;;  %v9921_v12 = vpop.f32.mrb[1].mxu1 }
 0x2db   : > { %v10081_v18 = vadd.f32 %v10076_v51, %v9921_v12  ;;  %v10131_v21 = vadd.f32 %v10130_v6, %v10129_v4 }
 0x2dc   : > { %v10124_v19 = vmul.f32 %v10098_v61, %v10080_v7 }
 0x2dd   : > { %v10125_v22 = vmul.f32 %v10102_v1, %v10081_v18  ;;  %v9990_v13 = vpop.f32.mrb[2].mxu0  ;;  %v10061_v23 = vpop.f32.mrb[54].mxu1 }
 0x2de   : > { %v10132_v25 = vsel %vm263_vm1, %v10124_v19, 0.0  ;;  %v10082_v26 = vadd.f32 %v10076_v51, %v9990_v13  ;;  %v10071_v27 = vadd.f32 %v10061_v23, %v9704_v46  ;;  %v9992_v10 = vpop.f32.mrb[3].mxu0  ;;  %v10824_v28 = vpop.f32.mrb[55].mxu1 }
 0x2df   : > { %v10133_v29 = vadd.f32 %v10132_v25, %v10131_v21  ;;  %v10134_v30 = vsel %vm263_vm1, %v10125_v22, 0.0  ;;  %v10083_v54 = vadd.f32 %v10076_v51, %v9992_v10 }
 0x2e0   : > { %v10126_v3 = vmul.f32 %v10106_v20, %v10082_v26  ;;  %v10084_v58 = vadd.f32 %v10076_v51, %v10071_v27 }
 0x2e1   : > { %v10135_v31 = vadd.f32 %v10134_v30, %v10133_v29  ;;  %v10127_v16 = vmul.f32 %v10110_v24, %v10083_v54 }
 0x2e2   : > { %v10136_v32 = vsel %vm263_vm1, %v10126_v3, 0.0  ;;  %v10128_v33 = vmul.f32 %v10114_v8, %v10084_v58 }
 0x2e3   : > { %v10137_v34 = vadd.f32 %v10136_v32, %v10135_v31  ;;  %v10138_v35 = vsel %vm263_vm1, %v10127_v16, 0.0 }
 0x2e4   : > { %v10141_v38 = vsel %vm10140_vm2, %v10128_v33, 0.0 }
 0x2e5   : > { %v10139_v36 = vadd.f32 %v10138_v35, %v10137_v34 }
 0x2e7   : > { %v10142_v39 = vadd.f32 %v10141_v38, %v10139_v36 }
 0x2e9   : > { %10143 = vadd.xlane.f32.xlu0 %v10142_v39 }
 0x376   : > { %v10144_v37 = vpop.xlane.xlu0 %10143 }
 0x377   : > { %v10145_v45 = vmul.f32 0.001953125, %v10144_v37 }
 0x379   : > { %v10146_v40 = vsub.f32 %v10078_v56, %v10145_v45  ;;  %v10147_v41 = vsub.f32 %v10079_v9, %v10145_v45  ;;  %v10148_v42 = vsub.f32 %v10080_v7, %v10145_v45  ;;  %v10149_v43 = vsub.f32 %v10081_v18, %v10145_v45 }
 0x37a   : > { %v10150_v44 = vsub.f32 %v10082_v26, %v10145_v45  ;;  %v10151_v59 = vsub.f32 %v10083_v54, %v10145_v45  ;;  %v10152_v49 = vsub.f32 %v10084_v58, %v10145_v45 }
 0x37b   : > { %v10153_v62 = vmul.f32 %v10146_v40, %v10090_v52  ;;  %v10154_v46 = vmul.f32 %v10147_v41, %v10094_v14  ;;  %v10155_v47 = vmul.f32 %v10148_v42, %v10098_v61  ;;  %v10156_v48 = vmul.f32 %v10149_v43, %v10102_v1 }
 0x37c   : > { %v10157_v50 = vmul.f32 %v10150_v44, %v10106_v20  ;;  %v10158_v55 = vmul.f32 %v10151_v59, %v10110_v24  ;;  %v10159_v60 = vmul.f32 %v10152_v49, %v10114_v8 }
 0x37d   : > { %v10160_v51 = vmul.f32 %v10153_v62, %v10153_v62  ;;  %v10161_v11 = vmul.f32 %v10154_v46, %v10154_v46  ;;  %v10162_v53 = vmul.f32 %v10155_v47, %v10155_v47  ;;  %v10163_v57 = vmul.f32 %v10156_v48, %v10156_v48 }
 0x37e   : > { %v10164_v63 = vmul.f32 %v10157_v50, %v10157_v50  ;;  %v10165_v14 = vmul.f32 %v10158_v55, %v10158_v55  ;;  %v10166_v2 = vmul.f32 %v10159_v60, %v10159_v60 }
 0x37f   : > { %v10167_v17 = vsel %vm263_vm1, %v10160_v51, 0.0  ;;  %v10168_v56 = vsel %vm263_vm1, %v10161_v11, 0.0  ;;  %v10170_v0 = vsel %vm263_vm1, %v10162_v53, 0.0  ;;  %v10172_v61 = vsel %vm263_vm1, %v10163_v57, 0.0 }
 0x380   : > { %v10169_v9 = vadd.f32 %v10168_v56, %v10167_v17  ;;  %v10174_v4 = vsel %vm263_vm1, %v10164_v63, 0.0  ;;  %v10176_v7 = vsel %vm263_vm1, %v10165_v14, 0.0  ;;  %v10178_v15 = vsel %vm10140_vm2, %v10166_v2, 0.0 }
 0x382   : > { %v10171_v52 = vadd.f32 %v10170_v0, %v10169_v9 }
 0x384   : > { %v10173_v1 = vadd.f32 %v10172_v61, %v10171_v52 }
 0x386   : > { %v10175_v6 = vadd.f32 %v10174_v4, %v10173_v1 }
 0x388   : > { %v10177_v12 = vadd.f32 %v10176_v7, %v10175_v6 }
 0x38a   : > { %v10179_v18 = vadd.f32 %v10178_v15, %v10177_v12 }
 0x38c   : > { %10180 = vadd.xlane.f32.xlu1 %v10179_v18 }
 0x419   : > { %v10181_v19 = vpop.xlane.xlu1 %10180 }
 0x41a   : > { %v10182_v20 = vmul.f32 0.001953125, %v10181_v19 }
 0x41c   : > { %v10183_v21 = vadd.f32 1e-05, %v10182_v20 }
 0x41e   : > { %11043 = vrsqrt.f32 %v10183_v21 }
 0x428   : > { %v11044_v22 = vpop.eup %11043 }
 0x429   : > { %v10185_v13 = vmul.f32 %v11044_v22, %v10153_v62  ;;  %v10186_v23 = vmul.f32 %v11044_v22, %v10154_v46  ;;  %v10187_v24 = vmul.f32 %v11044_v22, %v10155_v47  ;;  %v10188_v25 = vmul.f32 %v11044_v22, %v10156_v48 }
 0x42a   : > { %v10189_v26 = vmul.f32 %v11044_v22, %v10157_v50  ;;  %v10190_v27 = vmul.f32 %v11044_v22, %v10158_v55  ;;  %v10191_v8 = vmul.f32 %v11044_v22, %v10159_v60 }
 0x42b   : > { %v10192_v10 = vmax.f32 %v10185_v13, 0.0  ;;  %v10193_v28 = vmax.f32 %v10186_v23, 0.0  ;;  %v10194_v29 = vmax.f32 %v10187_v24, 0.0  ;;  %v10195_v30 = vmax.f32 %v10188_v25, 0.0 }
 0x42c   : > { %v10196_v54 = vmax.f32 %v10189_v26, 0.0  ;;  %v10197_v3 = vmax.f32 %v10190_v27, 0.0  ;;  %v10198_v58 = vmax.f32 %v10191_v8, 0.0 }
 0x42d   : > { %v10206_v31 = vcombine.low %v10192_v10, %v10193_v28  ;;  %v10207_v16 = vcombine.low %v10194_v29, %v10195_v30 }
 0x42e   : > { %v10223_v32 = vcombine.low %v10196_v54, %v10197_v3  ;;  %v10237_v36 = vrot.slane %v10198_v58, %v11127_v5 }
 0x42f   : > { %v10214_v33 = vrot.slane %v10206_v31, %v11127_v5  ;;  %v10221_v34 = vrot.slane %v10207_v16, %v11127_v5 }
 0x430   : > { %v10230_v35 = vrot.slane %v10223_v32, %v11127_v5 }
 0x431   : > { %v10222_v38 = vcombine.low %v10214_v33, %v10221_v34 }
 0x432   : > { %v10238_v39 = vcombine.low %v10230_v35, %v10237_v36 }
 0x433   : > { %10241 = vst [vmem:[%s197_s11] sm:$0xff] %v10222_v38 }
 0x434   : > { %10246 = vst.msk [vmem:[%s197_s11 + $0x8] sm:$0x3f] %vm10245_vm5, %v10238_v39 }
 0x435 PF: > { %s14_s15 = sadd.s32 1, %s11051_s15  }
 0x436   : > { %p11_p4 = scmp.ge.s32.totalorder %s14_s15, 4  }
 0x438   :  { %13 = sbr.rel (!%p11_p4) target bundleno = 1 (0x1), region = 92 }

// kernel: up_forward.4
= control target key start
LH: loop header
LB: loop body
LE: loop exit
PB: predicated region body
PF: predicated region fallthrough
CT: control target
= control target key end

     0   :  { %s21799_s21 = smov 0   ;;  %s24173_s0 = inlined_call_operand.vmem [shape: f32[2,2,1022], index: 0, kind: input, shape index: {}]   ;;  %s24174_s1 = inlined_call_operand.vmem [shape: f32[2,2,1022], index: 1, kind: input, shape index: {}]   ;;  %s24175_s2 = inlined_call_operand.vmem [shape: f32[27,2,2], index: 2, kind: input, shape index: {}]   ;;  %s24176_s3 = inlined_call_operand.vmem [shape: f32[27,2,2], index: 3, kind: input, shape index: {}]   ;;  %s24177_s4 = inlined_call_operand.vmem [shape: f32[2,1], index: 4, kind: input, shape index: {}]   ;;  %s24178_s5 = inlined_call_operand.vmem [shape: f32[1,800], index: 5, kind: input, shape index: {}]   ;;  %s24179_s6 = inlined_call_operand.vmem [shape: f32[2,2,800], index: 6, kind: output, shape index: {}]  }
   0x1 LB: > { %s20285_s22 = sadd.s32 4294967295, %s21732_s21   ;;  %p20289_p0 = scmp.ge.s32.totalorder %s21732_s21, 1  ;;  %s21732_s21 = sphi %s21799_s21, %s16_s21  }
   0x2   : > { %p222_p1 = scmp.lt.s32.totalorder %s21732_s21, 3 }
   0x4   : > { %p223_p2 = pnand %p20289_p0, %p222_p1 }
   0x5   : > { %p257_p3 = scmp.lt.s32.totalorder (!%p223_p2), %s20285_s22, 1  ;;  %v283_v0 = vlaneseq (!%p223_p2)  ;;  %v21734_v1 = vmov (!%p223_p2), 1983009808   ;;  %s21735_s27 = smov (!%p223_p2), 127   ;;  %v21736_v13 = vmov (!%p223_p2), 0.0   ;;  %vm326_vm0 = vcmask (!%p223_p2), 1039360  }
   0x6   : > { %226 = sbr.rel (%p223_p2) target bundleno = 1461 (0x5b5), region = 44  ;;  %v281_v2 = vunpack.c.l.s4 (!%p223_p2), %v21734_v1  ;;  %416 = vmatprep.mubr.f32.mxu0 (!%p223_p2), %v21736_v13  ;;  %487 = vmatprep.mubr.f32.mxu1 (!%p223_p2), %v21736_v13  ;;  %s21737_s28 = smov (!%p223_p2), 126   ;;  %vm337_vm1 = vcmask (!%p223_p2), 1041408   ;;  %vm333_vm2 = vcmask (!%p223_p2), 15360   ;;  %vm988_vm3 = vcmask (!%p223_p2), 1031168  }
   0x7   : > { %v21809_v3 = vshrl.u32 (!%p223_p2), %v283_v0, 7  ;;  %s21738_s29 = smov (!%p223_p2), 118   ;;  %s21739_s30 = smov (!%p223_p2), 117   ;;  %vm21746_vm4 = vmmov (!%p223_p2), 0   ;;  %vm1355_vm5 = vcmask (!%p223_p2), 965632   ;;  %vm1722_vm6 = vcmask (!%p223_p2), 957440  }
   0x8   : > { %v282_v4 = vunpack.c.0.s8 (!%p223_p2), %v281_v2  ;;  %s21740_s7 = smov (!%p223_p2), 116   ;;  %s21741_s8 = smov (!%p223_p2), 108   ;;  %v20295_v2 = vld [vmem:[%s24175_s2 + $0x2] sm:$0x3] (!%p223_p2)  ;;  %vm2089_vm7 = vcmask (!%p223_p2), 949248   ;;  %vm2456_vm8 = vcmask (!%p223_p2), 883712  }
   0x9   : > { %s21742_s9 = smov (!%p223_p2), 107   ;;  %s21743_s10 = smov (!%p223_p2), 106   ;;  %vm2823_vm9 = vcmask (!%p223_p2), 875520   ;;  %vm3190_vm10 = vcmask (!%p223_p2), 867328   ;;  %vm3560_vm11 = vcmask (!%p223_p2), 228352   ;;  %vm3931_vm12 = vcmask (!%p223_p2), 220160  }
   0xa   : > { %v21820_v5 = vsub.s32 (!%p223_p2), %v282_v4, %v21809_v3  ;;  %s21744_s11 = smov (!%p223_p2), 28   ;;  %s21745_s14 = smov (!%p223_p2), 27   ;;  %vm4302_vm13 = vcmask (!%p223_p2), 211968   ;;  %vm24186_vm14 = vcmask (!%p223_p2), 146432   ;;  %vm24189_vm15 = vcmask (!%p223_p2), 138240  }
   0xb   : > { %s21747_s19 = smov (!%p223_p2), 26   ;;  %s21748_s25 = smov (!%p223_p2), 18  }
   0xc   : > { %s21749_s17 = smov (!%p223_p2), 17   ;;  %s21750_s24 = smov (!%p223_p2), 16  }
   0xd   : > { %s24302_s22 = smov (!%p257_p3, %s20285_s22), 1  ;;  %s21751_s15 = smov 8  }
   0xe   : > { %s20943_s23 = sshll.u32 %s24302_s22, 4  ;;  %s21752_s20 = smov 7  }
   0xf   : > { %s21817_s26 = scalar_lea.vmem %s24173_s0, %s20943_s23  ;;  %s24182_s16 = smov 6  }
  0x10   : > { %v274_v6 = vld [vmem:[%s21817_s26 + $0x8] sm:$0x3f]  ;;  %v273_v7 = vld [vmem:[%s21817_s26] sm:$0xff]  ;;  %s24180_s13 = smov 56   ;;  %s24184_s18 = smov 55  }
  0x11   : > { %v21825_v8 = vrot.slane %v274_v6, %v21820_v5  ;;  %v21828_v9 = vrot.slane %v273_v7, %v21820_v5  ;;  %v279_v12 = vcombine.high %v273_v7, %v273_v7  ;;  %v296_v15 = vcombine.high %v274_v6, %v274_v6  ;;  %v938_v18 = vld [vmem:[%s21817_s26 + $0x8] sm:$0x3f] }
  0x12   : > { %v965_v19 = vrot.slane %v938_v18, %v21820_v5  ;;  %v958_v20 = vcombine.high %v938_v18, %v938_v18  ;;  %v1305_v23 = vld [vmem:[%s21817_s26 + $0x8] sm:$0x3f] }
  0x13   : > { %320 = vrot.lane.b32.xlu0 %v21825_v8, %s21735_s27  ;;  %312 = vrot.lane.b32.xlu1 %v21828_v9, %s21735_s27  ;;  %v21836_v10 = vcombine.high %v21825_v8, %v21825_v8  ;;  %v21840_v11 = vcombine.high %v21828_v9, %v21828_v9  ;;  %v21849_v14 = vrot.slane %v279_v12, %v21820_v5  ;;  %v1672_v28 = vld [vmem:[%s21817_s26 + $0x8] sm:$0x3f] }
  0x14   : > { %v21856_v16 = vrot.slane %v296_v15, %v21820_v5  ;;  %v973_v21 = vcombine.high %v965_v19, %v965_v19  ;;  %v972_v22 = vrot.slane %v958_v20, %v21820_v5  ;;  %v1332_v24 = vrot.slane %v1305_v23, %v21820_v5  ;;  %v2039_v33 = vld [vmem:[%s21817_s26 + $0x8] sm:$0x3f] }
  0x15   : > { %v21860_v17 = vcombine.high %v21849_v14, %v21849_v14  ;;  %v1325_v26 = vcombine.high %v1305_v23, %v1305_v23  ;;  %v1699_v29 = vrot.slane %v1672_v28, %v21820_v5  ;;  %v1692_v30 = vcombine.high %v1672_v28, %v1672_v28  ;;  %v2406_v38 = vld [vmem:[%s21817_s26 + $0x8] sm:$0x3f] }
  0x16   : > { %v1340_v25 = vcombine.high %v1332_v24, %v1332_v24  ;;  %v2066_v34 = vrot.slane %v2039_v33, %v21820_v5  ;;  %v2059_v36 = vcombine.high %v2039_v33, %v2039_v33  ;;  %v2433_v39 = vrot.slane %v2406_v38, %v21820_v5  ;;  %v2773_v43 = vld [vmem:[%s21817_s26 + $0x8] sm:$0x3f] }
  0x17   : > { %322 = vrot.lane.b32.xlu1 %v21836_v10, %s21735_s27  ;;  %314 = vrot.lane.b32.xlu0 %v21840_v11, %s21735_s27  ;;  %v1339_v27 = vrot.slane %v1325_v26, %v21820_v5  ;;  %v1707_v31 = vcombine.high %v1699_v29, %v1699_v29  ;;  %v1706_v32 = vrot.slane %v1692_v30, %v21820_v5  ;;  %v3140_v48 = vld [vmem:[%s21817_s26 + $0x8] sm:$0x3f] }
  0x18   : > { %v2074_v35 = vcombine.high %v2066_v34, %v2066_v34  ;;  %v2073_v37 = vrot.slane %v2059_v36, %v21820_v5  ;;  %v2426_v40 = vcombine.high %v2406_v38, %v2406_v38  ;;  %v2441_v41 = vcombine.high %v2433_v39, %v2433_v39  ;;  %v3507_v53 = vld [vmem:[%s21817_s26 + $0x8] sm:$0xff] }
  0x19   : > { %v2800_v44 = vrot.slane %v2773_v43, %v21820_v5  ;;  %v2793_v46 = vcombine.high %v2773_v43, %v2773_v43  ;;  %v3167_v49 = vrot.slane %v3140_v48, %v21820_v5  ;;  %v3160_v50 = vcombine.high %v3140_v48, %v3140_v48 }
  0x1a   : > { %v2440_v42 = vrot.slane %v2426_v40, %v21820_v5  ;;  %v21968_v54 = vrot.slane %v3507_v53, %v21820_v5  ;;  %v3527_v55 = vcombine.high %v3507_v53, %v3507_v53 }
  0x1b   : > { %976 = vrot.lane.b32.xlu1 %v21840_v11, %s21737_s28  ;;  %316 = vrot.lane.b32.xlu0 %v21849_v14, %s21735_s27  ;;  %v2808_v45 = vcombine.high %v2800_v44, %v2800_v44  ;;  %v2807_v47 = vrot.slane %v2793_v46, %v21820_v5  ;;  %v3175_v51 = vcombine.high %v3167_v49, %v3167_v49 }
  0x1c   : > { %v3174_v52 = vrot.slane %v3160_v50, %v21820_v5  ;;  %v21976_v58 = vcombine.high %v21968_v54, %v21968_v54  ;;  %v21979_v59 = vrot.slane %v3527_v55, %v21820_v5 }
  0x1e   : > { %v21987_v62 = vcombine.high %v21979_v59, %v21979_v59 }
  0x1f   : > { %324 = vrot.lane.b32.xlu0 %v21856_v16, %s21735_s27  ;;  %318 = vrot.lane.b32.xlu1 %v21860_v17, %s21735_s27 }
  0x23   : > { %978 = vrot.lane.b32.xlu0 %v21849_v14, %s21737_s28  ;;  %974 = vrot.lane.b32.xlu1 %v21828_v9, %s21737_s28 }
  0x27   : > { %980 = vrot.lane.b32.xlu0 %v21860_v17, %s21737_s28  ;;  %982 = vrot.lane.b32.xlu1 %v965_v19, %s21737_s28 }
  0x2b   : > { %984 = vrot.lane.b32.xlu0 %v973_v21, %s21737_s28  ;;  %986 = vrot.lane.b32.xlu1 %v972_v22, %s21737_s28  ;;  %v272_v22 = vld [vmem:[%s24175_s2] sm:$0x3] }
  0x2f   : > { %1343 = vrot.lane.b32.xlu0 %v21840_v11, %s21738_s29  ;;  %1345 = vrot.lane.b32.xlu1 %v21849_v14, %s21738_s29 }
  0x33   : > { %1341 = vrot.lane.b32.xlu0 %v21828_v9, %s21738_s29  ;;  %1347 = vrot.lane.b32.xlu1 %v21860_v17, %s21738_s29 }
  0x37   : > { %1349 = vrot.lane.b32.xlu0 %v1332_v24, %s21738_s29  ;;  %1351 = vrot.lane.b32.xlu1 %v1340_v25, %s21738_s29 }
  0x3b   : > { %1353 = vrot.lane.b32.xlu0 %v1339_v27, %s21738_s29  ;;  %1710 = vrot.lane.b32.xlu1 %v21840_v11, %s21739_s30 }
  0x3f   : > { %1712 = vrot.lane.b32.xlu0 %v21849_v14, %s21739_s30  ;;  %1708 = vrot.lane.b32.xlu1 %v21828_v9, %s21739_s30 }
  0x43   : > { %1714 = vrot.lane.b32.xlu0 %v21860_v17, %s21739_s30  ;;  %1716 = vrot.lane.b32.xlu1 %v1699_v29, %s21739_s30 }
  0x47   : > { %1718 = vrot.lane.b32.xlu0 %v1707_v31, %s21739_s30  ;;  %1720 = vrot.lane.b32.xlu1 %v1706_v32, %s21739_s30  ;;  %v20318_v31 = vld [vmem:[%s24175_s2 + $0x4] sm:$0x3] }
  0x4b   : > { %2077 = vrot.lane.b32.xlu0 %v21840_v11, %s21740_s7  ;;  %2079 = vrot.lane.b32.xlu1 %v21849_v14, %s21740_s7 }
  0x4f   : > { %2075 = vrot.lane.b32.xlu0 %v21828_v9, %s21740_s7  ;;  %2081 = vrot.lane.b32.xlu1 %v21860_v17, %s21740_s7 }
  0x53   : > { %2083 = vrot.lane.b32.xlu0 %v2066_v34, %s21740_s7  ;;  %2085 = vrot.lane.b32.xlu1 %v2074_v35, %s21740_s7 }
  0x57   : > { %2087 = vrot.lane.b32.xlu0 %v2073_v37, %s21740_s7  ;;  %2444 = vrot.lane.b32.xlu1 %v21840_v11, %s21741_s8 }
  0x5b   : > { %2446 = vrot.lane.b32.xlu0 %v21849_v14, %s21741_s8  ;;  %2442 = vrot.lane.b32.xlu1 %v21828_v9, %s21741_s8 }
  0x5f   : > { %2448 = vrot.lane.b32.xlu0 %v21860_v17, %s21741_s8  ;;  %2450 = vrot.lane.b32.xlu1 %v2433_v39, %s21741_s8 }
  0x63   : > { %2452 = vrot.lane.b32.xlu0 %v2441_v41, %s21741_s8  ;;  %2454 = vrot.lane.b32.xlu1 %v2440_v42, %s21741_s8  ;;  %v20330_v42 = vld [vmem:[%s24175_s2 + $0x6] sm:$0x3] }
  0x67   : > { %2811 = vrot.lane.b32.xlu0 %v21840_v11, %s21742_s9  ;;  %2813 = vrot.lane.b32.xlu1 %v21849_v14, %s21742_s9 }
  0x6b   : > { %2809 = vrot.lane.b32.xlu0 %v21828_v9, %s21742_s9  ;;  %2815 = vrot.lane.b32.xlu1 %v21860_v17, %s21742_s9 }
  0x6f   : > { %2817 = vrot.lane.b32.xlu0 %v2800_v44, %s21742_s9  ;;  %2819 = vrot.lane.b32.xlu1 %v2808_v45, %s21742_s9 }
  0x73   : > { %2821 = vrot.lane.b32.xlu0 %v2807_v47, %s21742_s9  ;;  %3178 = vrot.lane.b32.xlu1 %v21840_v11, %s21743_s10 }
  0x77   : > { %3180 = vrot.lane.b32.xlu0 %v21849_v14, %s21743_s10  ;;  %3176 = vrot.lane.b32.xlu1 %v21828_v9, %s21743_s10 }
  0x7b   : > { %3182 = vrot.lane.b32.xlu0 %v21860_v17, %s21743_s10  ;;  %3184 = vrot.lane.b32.xlu1 %v3167_v49, %s21743_s10 }
  0x7f   : > { %3186 = vrot.lane.b32.xlu0 %v3175_v51, %s21743_s10  ;;  %3188 = vrot.lane.b32.xlu1 %v3174_v52, %s21743_s10 }
  0x83   : > { %3546 = vrot.lane.b32.xlu0 %v21840_v11, %s21744_s11  ;;  %3548 = vrot.lane.b32.xlu1 %v21849_v14, %s21744_s11 }
  0x85   : > { %v321_v56 = vpop.permute.xlu0 %320  ;;  %v313_v57 = vpop.permute.xlu1 %312 }
  0x87   : > { %3544 = vrot.lane.b32.xlu0 %v21828_v9, %s21744_s11  ;;  %3550 = vrot.lane.b32.xlu1 %v21860_v17, %s21744_s11 }
  0x89   : > { %v323_v60 = vpop.permute.xlu1 %322  ;;  %v315_v61 = vpop.permute.xlu0 %314 }
  0x8a   : > { %v327_v4 = vsel %vm326_vm0, %v313_v57, %v315_v61  ;;  %v331_v19 = vsel %vm326_vm0, %v321_v56, %v323_v60  ;;  %v20342_v57 = vld [vmem:[%s24175_s2 + $0x8] sm:$0x3] }
  0x8b   : > { %3552 = vrot.lane.b32.xlu0 %v21968_v54, %s21744_s11  ;;  %3554 = vrot.lane.b32.xlu1 %v21976_v58, %s21744_s11 }
  0x8d   : > { %v977_v63 = vpop.permute.xlu1 %976  ;;  %v317_v0 = vpop.permute.xlu0 %316 }
  0x8e   : > { %v328_v1 = vsel %vm326_vm0, %v315_v61, %v317_v0 }
  0x8f   : > { %3556 = vrot.lane.b32.xlu0 %v21979_v59, %s21744_s11  ;;  %20296 = vmatprep.subr.msk.mxu0 %vm337_vm1, %v328_v1 }
  0x90   : > { %3558 = vrot.lane.b32.xlu1 %v21987_v62, %s21744_s11  ;;  %20297 = vmatpush1.msk.msra.mxu0 %vm337_vm1, %v327_v4 }
  0x91   : > { %20298 = vmatmul.mubr.msk.f32.vlgmr.msra.gmra.mrb[0].mxu0 %vm333_vm2, %v20295_v2  ;;  %v325_v6 = vpop.permute.xlu0 %324  ;;  %v319_v7 = vpop.permute.xlu1 %318 }
  0x92   : > { %v332_v12 = vsel %vm326_vm0, %v323_v60, %v325_v6  ;;  %v330_v15 = vsel %vm326_vm0, %v319_v7, %v321_v56  ;;  %v329_v18 = vsel %vm326_vm0, %v317_v0, %v319_v7  ;;  %558 = vmatprep.mubr.f32.mxu0 %v21736_v13 }
  0x93   : > { %3917 = vrot.lane.b32.xlu0 %v21840_v11, %s21745_s14  ;;  %20302 = vmatprep.subr.msk.mxu0 %vm337_vm1, %v332_v12 }
  0x94   : > { %3919 = vrot.lane.b32.xlu1 %v21849_v14, %s21745_s14  ;;  %20299 = vmatprep.subr.msk.mxu1 %vm337_vm1, %v330_v15 }
  0x95   : > { %20300 = vmatpush1.msk.msra.mxu1 %vm337_vm1, %v329_v18  ;;  %20303 = vmatpush1.msk.msra.mxu0 %vm337_vm1, %v331_v19  ;;  %v979_v20 = vpop.permute.xlu0 %978  ;;  %v975_v21 = vpop.permute.xlu1 %974  ;;  %v20354_v18 = vld [vmem:[%s24175_s2 + $0xa] sm:$0x3] }
  0x96   : > { %20304 = vmatmul.mubr.msk.f32.vlgmr.msra.gmra.mrb[2].mxu0 %vm333_vm2, %v20295_v2  ;;  %20301 = vmatmul.mubr.msk.f32.vlgmr.msra.gmra.mrb[0].mxu1 %vm333_vm2, %v20295_v2  ;;  %v990_v25 = vsel %vm988_vm3, %v977_v63, %v979_v20 }
  0x97   : > { %21053 = vmatprep.subr.mxu1 %v21736_v13  ;;  %20307 = vmatprep.subr.msk.mxu0 %vm337_vm1, %v21840_v11 }
  0x98   : > { %21054 = vmatpush3.msk.msra.mxu1 %vm337_vm1, %v325_v6  ;;  %3915 = vrot.lane.b32.xlu0 %v21828_v9, %s21745_s14 }
  0x99   : > { %20308 = vmatpush1.msk.msra.mxu0 %vm337_vm1, %v21828_v9  ;;  %3921 = vrot.lane.b32.xlu1 %v21860_v17, %s21745_s14  ;;  %v981_v23 = vpop.permute.xlu0 %980  ;;  %v983_v24 = vpop.permute.xlu1 %982 }
  0x9a   : > { %21055 = vmatprep.mubr.msk.f32.mxu1 %vm21746_vm4, %v21736_v13  ;;  %716 = vmatprep.mubr.f32.mxu0 %v21736_v13  ;;  %v992_v30 = vsel %vm988_vm3, %v981_v23, %v983_v24  ;;  %v991_v33 = vsel %vm988_vm3, %v979_v20, %v981_v23 }
  0x9b   : > { %20313 = vmatprep.subr.msk.mxu0 %vm337_vm1, %v21836_v10  ;;  %20309 = vmatmul.mubr.msk.f32.vlgmr.msra.gmra.mrb[0].mxu0 %vm333_vm2, %v272_v22 }
  0x9c   : > { %20314 = vmatpush1.msk.msra.mxu0 %vm337_vm1, %v21825_v8  ;;  %21056 = vmatmul.mubr.msk.f32.vlgmr.msra.gmra.mrb[2].mxu1 %vm333_vm2, %v20295_v2  ;;  %v989_v8 = vsel %vm988_vm3, %v975_v21, %v977_v63 }
  0x9d   : > { %20310 = vmatprep.subr.msk.mxu1 %vm337_vm1, %v21860_v17  ;;  %20319 = vmatprep.subr.msk.mxu0 %vm337_vm1, %v990_v25  ;;  %v985_v26 = vpop.permute.xlu0 %984  ;;  %v987_v27 = vpop.permute.xlu1 %986 }
  0x9e   : > { %3923 = vrot.lane.b32.xlu0 %v21968_v54, %s21745_s14  ;;  %3925 = vrot.lane.b32.xlu1 %v21976_v58, %s21745_s14  ;;  %v994_v10 = vsel %vm988_vm3, %v985_v26, %v987_v27  ;;  %v993_v34 = vsel %vm988_vm3, %v983_v24, %v985_v26 }
  0x9f   : > { %20311 = vmatpush1.msk.msra.mxu1 %vm337_vm1, %v21849_v14  ;;  %787 = vmatprep.mubr.f32.mxu1 %v21736_v13 }
  0xa0   : > { %858 = vmatprep.mubr.f32.mxu0 %v21736_v13  ;;  %21058 = vmatprep.subr.mxu1 %v21736_v13 }
  0xa1   : > { %20315 = vmatmul.mubr.msk.f32.vlgmr.msra.gmra.mrb[2].mxu0 %vm333_vm2, %v272_v22  ;;  %20312 = vmatmul.mubr.msk.f32.vlgmr.msra.gmra.mrb[0].mxu1 %vm333_vm2, %v272_v22  ;;  %v1344_v28 = vpop.permute.xlu0 %1343  ;;  %v1346_v29 = vpop.permute.xlu1 %1345 }
  0xa2   : > { %21059 = vmatpush3.msk.msra.mxu1 %vm337_vm1, %v21856_v16  ;;  %20320 = vmatpush1.msk.msra.mxu0 %vm337_vm1, %v989_v8  ;;  %v1357_v35 = vsel %vm1355_vm5, %v1344_v28, %v1346_v29 }
  0xa3   : > { %20322 = vmatprep.subr.msk.mxu1 %vm337_vm1, %v992_v30  ;;  %3927 = vrot.lane.b32.xlu0 %v21979_v59, %s21745_s14 }
  0xa4   : > { %3929 = vrot.lane.b32.xlu1 %v21987_v62, %s21745_s14  ;;  %20325 = vmatprep.subr.msk.mxu0 %vm337_vm1, %v994_v10 }
  0xa5   : > { %21060 = vmatprep.mubr.msk.f32.mxu1 %vm21746_vm4, %v21736_v13  ;;  %1076 = vmatprep.mubr.f32.mxu0 %v21736_v13  ;;  %v1342_v16 = vpop.permute.xlu0 %1341  ;;  %v1348_v32 = vpop.permute.xlu1 %1347 }
  0xa6   : > { %21061 = vmatmul.mubr.msk.f32.vlgmr.msra.gmra.mrb[4].mxu1 %vm333_vm2, %v272_v22  ;;  %20321 = vmatmul.mubr.msk.f32.vlgmr.msra.gmra.mrb[0].mxu0 %vm333_vm2, %v20318_v31  ;;  %v1356_v38 = vsel %vm1355_vm5, %v1342_v16, %v1344_v28  ;;  %v1358_v43 = vsel %vm1355_vm5, %v1346_v29, %v1348_v32  ;;  %v20366_v28 = vld [vmem:[%s24175_s2 + $0xc] sm:$0x3] }
  0xa7   : > { %20323 = vmatpush1.msk.msra.mxu1 %vm337_vm1, %v991_v33  ;;  %20326 = vmatpush1.msk.msra.mxu0 %vm337_vm1, %v993_v34 }
  0xa8   : > { %4288 = vrot.lane.b32.xlu0 %v21840_v11, %s21747_s19  ;;  %4290 = vrot.lane.b32.xlu1 %v21849_v14, %s21747_s19 }
  0xa9   : > { %20331 = vmatprep.subr.msk.mxu0 %vm337_vm1, %v1357_v35  ;;  %1147 = vmatprep.mubr.f32.mxu1 %v21736_v13  ;;  %v1350_v36 = vpop.permute.xlu0 %1349  ;;  %v1352_v37 = vpop.permute.xlu1 %1351 }
  0xaa   : > { %21063 = vmatprep.subr.mxu1 %v21736_v13  ;;  %20324 = vmatmul.mubr.msk.f32.vlgmr.msra.gmra.mrb[0].mxu1 %vm333_vm2, %v20318_v31  ;;  %v1359_v39 = vsel %vm1355_vm5, %v1348_v32, %v1350_v36  ;;  %v1360_v48 = vsel %vm1355_vm5, %v1350_v36, %v1352_v37 }
  0xab   : > { %21064 = vmatpush3.msk.msra.mxu1 %vm337_vm1, %v987_v27  ;;  %1218 = vmatprep.mubr.f32.mxu0 %v21736_v13 }
  0xac   : > { %4286 = vrot.lane.b32.xlu0 %v21828_v9, %s21747_s19  ;;  %4292 = vrot.lane.b32.xlu1 %v21860_v17, %s21747_s19 }
  0xad   : > { %20327 = vmatmul.mubr.msk.f32.vlgmr.msra.gmra.mrb[2].mxu0 %vm333_vm2, %v20318_v31  ;;  %21065 = vmatprep.mubr.msk.f32.mxu1 %vm21746_vm4, %v21736_v13  ;;  %v1354_v40 = vpop.permute.xlu0 %1353  ;;  %v1711_v41 = vpop.permute.xlu1 %1710 }
  0xae   : > { %20332 = vmatpush1.msk.msra.mxu0 %vm337_vm1, %v1356_v38  ;;  %21066 = vmatmul.mubr.msk.f32.vlgmr.msra.gmra.mrb[6].mxu1 %vm333_vm2, %v20318_v31  ;;  %v1361_v44 = vsel %vm1355_vm5, %v1352_v37, %v1354_v40 }
  0xaf   : > { %20334 = vmatprep.subr.msk.mxu1 %vm337_vm1, %v1359_v39  ;;  %1514 = vmatprep.mubr.f32.mxu1 %v21736_v13 }
  0xb0   : > { %4294 = vrot.lane.b32.xlu0 %v21968_v54, %s21747_s19  ;;  %4296 = vrot.lane.b32.xlu1 %v21976_v58, %s21747_s19 }
  0xb1   : > { %20335 = vmatpush1.msk.msra.mxu1 %vm337_vm1, %v1358_v43  ;;  %1443 = vmatprep.mubr.f32.mxu0 %v21736_v13  ;;  %v1713_v45 = vpop.permute.xlu0 %1712  ;;  %v1709_v46 = vpop.permute.xlu1 %1708 }
  0xb2   : > { %21068 = vmatprep.subr.mxu1 %v21736_v13  ;;  %20336 = vmatmul.mubr.msk.f32.vlgmr.msra.gmra.mrb[0].mxu1 %vm333_vm2, %v20330_v42  ;;  %v1724_v47 = vsel %vm1722_vm6, %v1711_v41, %v1713_v45  ;;  %v1723_v52 = vsel %vm1722_vm6, %v1709_v46, %v1711_v41 }
  0xb3   : > { %21069 = vmatpush3.msk.msra.mxu1 %vm337_vm1, %v1354_v40  ;;  %20337 = vmatprep.subr.msk.mxu0 %vm337_vm1, %v1361_v44  ;;  %v20378_v40 = vld [vmem:[%s24175_s2 + $0xe] sm:$0x3] }
  0xb4   : > { %4298 = vrot.lane.b32.xlu0 %v21979_v59, %s21747_s19  ;;  %4300 = vrot.lane.b32.xlu1 %v21987_v62, %s21747_s19 }
  0xb5   : > { %20333 = vmatmul.mubr.msk.f32.vlgmr.msra.gmra.mrb[0].mxu0 %vm333_vm2, %v20330_v42  ;;  %v1715_v49 = vpop.permute.xlu0 %1714  ;;  %21070 = vmatprep.mubr.msk.f32.mxu1 %vm21746_vm4, %v21736_v13  ;;  %v1717_v50 = vpop.permute.xlu1 %1716 }
  0xb6   : > { %20338 = vmatpush1.msk.msra.mxu0 %vm337_vm1, %v1360_v48  ;;  %1585 = vmatprep.mubr.f32.mxu0 %v21736_v13  ;;  %v1726_v51 = vsel %vm1722_vm6, %v1715_v49, %v1717_v50  ;;  %v1725_v53 = vsel %vm1722_vm6, %v1713_v45, %v1715_v49 }
  0xb7   : > { %20343 = vmatprep.subr.msk.mxu0 %vm337_vm1, %v1724_v47  ;;  %21071 = vmatmul.mubr.msk.f32.vlgmr.msra.gmra.mrb[8].mxu1 %vm333_vm2, %v20330_v42 }
  0xb8   : > { %4659 = vrot.lane.b32.xlu0 %v21840_v11, %s21748_s25  ;;  %4661 = vrot.lane.b32.xlu1 %v21849_v14, %s21748_s25 }
  0xb9   : > { %20339 = vmatmul.mubr.msk.f32.vlgmr.msra.gmra.mrb[2].mxu0 %vm333_vm2, %v20330_v42  ;;  %20346 = vmatprep.subr.msk.mxu1 %vm337_vm1, %v1726_v51  ;;  %v1719_v55 = vpop.permute.xlu0 %1718  ;;  %v1721_v56 = vpop.permute.xlu1 %1720 }
  0xba   : > { %20344 = vmatpush1.msk.msra.mxu0 %vm337_vm1, %v1723_v52  ;;  %20347 = vmatpush1.msk.msra.mxu1 %vm337_vm1, %v1725_v53  ;;  %v1728_v60 = vsel %vm1722_vm6, %v1719_v55, %v1721_v56  ;;  %v1727_v0 = vsel %vm1722_vm6, %v1717_v50, %v1719_v55  ;;  %v20390_v53 = vld [vmem:[%s24175_s2 + $0x10] sm:$0x3]  ;;  %v6103_v55 = vld [vmem:[%s21817_s26] sm:$0xff] }
  0xbb   : > { %1881 = vmatprep.mubr.f32.mxu1 %v21736_v13  ;;  %21073 = vmatprep.subr.mxu1 %v21736_v13 }
  0xbc   : > { %4657 = vrot.lane.b32.xlu0 %v21828_v9, %s21748_s25  ;;  %4663 = vrot.lane.b32.xlu1 %v21860_v17, %s21748_s25 }
  0xbd   : > { %20348 = vmatmul.mubr.msk.f32.vlgmr.msra.gmra.mrb[0].mxu1 %vm333_vm2, %v20342_v57  ;;  %1810 = vmatprep.mubr.f32.mxu0 %v21736_v13  ;;  %v2078_v61 = vpop.permute.xlu0 %2077  ;;  %v2080_v63 = vpop.permute.xlu1 %2079 }
  0xbe   : > { %21074 = vmatpush3.msk.msra.mxu1 %vm337_vm1, %v1721_v56  ;;  %20349 = vmatprep.subr.msk.mxu0 %vm337_vm1, %v1728_v60  ;;  %v2091_v1 = vsel %vm2089_vm7, %v2078_v61, %v2080_v63 }
  0xbf   : > { %20345 = vmatmul.mubr.msk.f32.vlgmr.msra.gmra.mrb[0].mxu0 %vm333_vm2, %v20342_v57  ;;  %21075 = vmatprep.mubr.msk.f32.mxu1 %vm21746_vm4, %v21736_v13 }
  0xc0   : > { %4665 = vrot.lane.b32.xlu0 %v21968_v54, %s21748_s25  ;;  %4667 = vrot.lane.b32.xlu1 %v21976_v58, %s21748_s25 }
  0xc1   : > { %20350 = vmatpush1.msk.msra.mxu0 %vm337_vm1, %v1727_v0  ;;  %v2076_v2 = vpop.permute.xlu0 %2075  ;;  %v2082_v4 = vpop.permute.xlu1 %2081  ;;  %1952 = vmatprep.mubr.f32.mxu0 %v21736_v13 }
  0xc2   : > { %20355 = vmatprep.subr.msk.mxu0 %vm337_vm1, %v2091_v1  ;;  %v2090_v6 = vsel %vm2089_vm7, %v2076_v2, %v2078_v61  ;;  %21076 = vmatmul.mubr.msk.f32.vlgmr.msra.gmra.mrb[10].mxu1 %vm333_vm2, %v20342_v57  ;;  %v2092_v19 = vsel %vm2089_vm7, %v2080_v63, %v2082_v4 }
  0xc3   : > { %20351 = vmatmul.mubr.msk.f32.vlgmr.msra.gmra.mrb[2].mxu0 %vm333_vm2, %v20342_v57  ;;  %2248 = vmatprep.mubr.f32.mxu1 %v21736_v13 }
  0xc4   : > { %4669 = vrot.lane.b32.xlu0 %v21979_v59, %s21748_s25  ;;  %4671 = vrot.lane.b32.xlu1 %v21987_v62, %s21748_s25 }
  0xc5   : > { %20356 = vmatpush1.msk.msra.mxu0 %vm337_vm1, %v2090_v6  ;;  %v2084_v7 = vpop.permute.xlu0 %2083  ;;  %v2086_v12 = vpop.permute.xlu1 %2085  ;;  %2177 = vmatprep.mubr.f32.mxu0 %v21736_v13 }
  0xc6   : > { %v2093_v15 = vsel %vm2089_vm7, %v2082_v4, %v2084_v7  ;;  %v2094_v23 = vsel %vm2089_vm7, %v2084_v7, %v2086_v12 }
  0xc7   : > { %20358 = vmatprep.subr.msk.mxu1 %vm337_vm1, %v2093_v15  ;;  %20357 = vmatmul.mubr.msk.f32.vlgmr.msra.gmra.mrb[0].mxu0 %vm333_vm2, %v20354_v18 }
  0xc8   : > { %5030 = vrot.lane.b32.xlu0 %v21840_v11, %s21749_s17  ;;  %5032 = vrot.lane.b32.xlu1 %v21849_v14, %s21749_s17 }
  0xc9   : > { %20359 = vmatpush1.msk.msra.mxu1 %vm337_vm1, %v2092_v19  ;;  %v2088_v20 = vpop.permute.xlu0 %2087  ;;  %v2445_v21 = vpop.permute.xlu1 %2444  ;;  %2319 = vmatprep.mubr.f32.mxu0 %v21736_v13 }
  0xca   : > { %21078 = vmatprep.subr.mxu1 %v21736_v13  ;;  %20360 = vmatmul.mubr.msk.f32.vlgmr.msra.gmra.mrb[0].mxu1 %vm333_vm2, %v20354_v18  ;;  %v2095_v22 = vsel %vm2089_vm7, %v2086_v12, %v2088_v20 }
  0xcb   : > { %21079 = vmatpush3.msk.msra.mxu1 %vm337_vm1, %v2088_v20  ;;  %20361 = vmatprep.subr.msk.mxu0 %vm337_vm1, %v2095_v22  ;;  %v20402_v20 = vld [vmem:[%s24175_s2 + $0x12] sm:$0x3] }
  0xcc   : > { %5028 = vrot.lane.b32.xlu0 %v21828_v9, %s21749_s17  ;;  %5034 = vrot.lane.b32.xlu1 %v21860_v17, %s21749_s17 }
  0xcd   : > { %20362 = vmatpush1.msk.msra.mxu0 %vm337_vm1, %v2094_v23  ;;  %v2447_v24 = vpop.permute.xlu0 %2446  ;;  %v2443_v25 = vpop.permute.xlu1 %2442  ;;  %21080 = vmatprep.mubr.msk.f32.mxu1 %vm21746_vm4, %v21736_v13 }
  0xce   : > { %v2457_v26 = vsel %vm2456_vm8, %v2443_v25, %v2445_v21  ;;  %v2458_v27 = vsel %vm2456_vm8, %v2445_v21, %v2447_v24  ;;  %20363 = vmatmul.mubr.msk.f32.vlgmr.msra.gmra.mrb[2].mxu0 %vm333_vm2, %v20354_v18  ;;  %21081 = vmatmul.mubr.msk.f32.vlgmr.msra.gmra.mrb[12].mxu1 %vm333_vm2, %v20354_v18 }
  0xcf   : > { %20367 = vmatprep.subr.msk.mxu0 %vm337_vm1, %v2458_v27  ;;  %2615 = vmatprep.mubr.f32.mxu1 %v21736_v13 }
  0xd0   : > { %5036 = vrot.lane.b32.xlu0 %v21968_v54, %s21749_s17  ;;  %5038 = vrot.lane.b32.xlu1 %v21976_v58, %s21749_s17 }
  0xd1   : > { %20368 = vmatpush1.msk.msra.mxu0 %vm337_vm1, %v2457_v26  ;;  %v2449_v8 = vpop.permute.xlu0 %2448  ;;  %v2451_v10 = vpop.permute.xlu1 %2450  ;;  %2544 = vmatprep.mubr.f32.mxu0 %v21736_v13 }
  0xd2   : > { %v2459_v29 = vsel %vm2456_vm8, %v2447_v24, %v2449_v8  ;;  %v2460_v30 = vsel %vm2456_vm8, %v2449_v8, %v2451_v10  ;;  %20369 = vmatmul.mubr.msk.f32.vlgmr.msra.gmra.mrb[0].mxu0 %vm333_vm2, %v20366_v28 }
  0xd3   : > { %20370 = vmatprep.subr.msk.mxu1 %vm337_vm1, %v2460_v30  ;;  %2686 = vmatprep.mubr.f32.mxu0 %v21736_v13 }
  0xd4   : > { %5040 = vrot.lane.b32.xlu0 %v21979_v59, %s21749_s17  ;;  %5042 = vrot.lane.b32.xlu1 %v21987_v62, %s21749_s17 }
  0xd5   : > { %20371 = vmatpush1.msk.msra.mxu1 %vm337_vm1, %v2459_v29  ;;  %v2453_v31 = vpop.permute.xlu0 %2452  ;;  %v2455_v16 = vpop.permute.xlu1 %2454 }
  0xd6   : > { %v2461_v32 = vsel %vm2456_vm8, %v2451_v10, %v2453_v31  ;;  %21083 = vmatprep.subr.mxu1 %v21736_v13  ;;  %20372 = vmatmul.mubr.msk.f32.vlgmr.msra.gmra.mrb[0].mxu1 %vm333_vm2, %v20366_v28  ;;  %v2462_v33 = vsel %vm2456_vm8, %v2453_v31, %v2455_v16 }
  0xd7   : > { %21084 = vmatpush3.msk.msra.mxu1 %vm337_vm1, %v2455_v16  ;;  %20373 = vmatprep.subr.msk.mxu0 %vm337_vm1, %v2462_v33  ;;  %v20414_v33 = vld [vmem:[%s24175_s2 + $0x14] sm:$0x3] }
  0xd8   : > { %5401 = vrot.lane.b32.xlu0 %v21840_v11, %s21750_s24  ;;  %5403 = vrot.lane.b32.xlu1 %v21849_v14, %s21750_s24 }
  0xd9   : > { %20374 = vmatpush1.msk.msra.mxu0 %vm337_vm1, %v2461_v32  ;;  %v2812_v34 = vpop.permute.xlu0 %2811  ;;  %v2814_v35 = vpop.permute.xlu1 %2813  ;;  %21085 = vmatprep.mubr.msk.f32.mxu1 %vm21746_vm4, %v21736_v13 }
  0xda   : > { %v2825_v36 = vsel %vm2823_vm9, %v2812_v34, %v2814_v35  ;;  %20375 = vmatmul.mubr.msk.f32.vlgmr.msra.gmra.mrb[2].mxu0 %vm333_vm2, %v20366_v28  ;;  %21086 = vmatmul.mubr.msk.f32.vlgmr.msra.gmra.mrb[14].mxu1 %vm333_vm2, %v20366_v28 }
  0xdb   : > { %20379 = vmatprep.subr.msk.mxu0 %vm337_vm1, %v2825_v36  ;;  %2982 = vmatprep.mubr.f32.mxu1 %v21736_v13 }
  0xdc   : > { %5399 = vrot.lane.b32.xlu0 %v21828_v9, %s21750_s24  ;;  %5405 = vrot.lane.b32.xlu1 %v21860_v17, %s21750_s24 }
  0xdd   : > { %v2810_v37 = vpop.permute.xlu0 %2809  ;;  %v2816_v38 = vpop.permute.xlu1 %2815  ;;  %2911 = vmatprep.mubr.f32.mxu0 %v21736_v13 }
  0xde   : > { %v2824_v39 = vsel %vm2823_vm9, %v2810_v37, %v2812_v34  ;;  %v2826_v44 = vsel %vm2823_vm9, %v2814_v35, %v2816_v38  ;;  %v6845_v34 = vld [vmem:[%s21817_s26 + $0x2] sm:$0xff] }
  0xdf   : > { %20380 = vmatpush1.msk.msra.mxu0 %vm337_vm1, %v2824_v39  ;;  %v22391_v37 = vrot.slane %v6845_v34, %v21820_v5 }
  0xe0   : > { %5407 = vrot.lane.b32.xlu0 %v21968_v54, %s21750_s24  ;;  %5409 = vrot.lane.b32.xlu1 %v21976_v58, %s21750_s24 }
  0xe1   : > { %v2818_v41 = vpop.permute.xlu0 %2817  ;;  %v2820_v42 = vpop.permute.xlu1 %2819  ;;  %20381 = vmatmul.mubr.msk.f32.vlgmr.msra.gmra.mrb[0].mxu0 %vm333_vm2, %v20378_v40 }
  0xe2   : > { %v2827_v43 = vsel %vm2823_vm9, %v2816_v38, %v2818_v41  ;;  %3053 = vmatprep.mubr.f32.mxu0 %v21736_v13  ;;  %v2828_v48 = vsel %vm2823_vm9, %v2818_v41, %v2820_v42  ;;  %v6849_v38 = vcombine.high %v6845_v34, %v6845_v34 }
  0xe3   : > { %20382 = vmatprep.subr.msk.mxu1 %vm337_vm1, %v2827_v43 }
  0xe4   : > { %5411 = vrot.lane.b32.xlu0 %v21979_v59, %s21750_s24  ;;  %5413 = vrot.lane.b32.xlu1 %v21987_v62, %s21750_s24 }
  0xe5   : > { %20383 = vmatpush1.msk.msra.mxu1 %vm337_vm1, %v2826_v44  ;;  %v2822_v45 = vpop.permute.xlu0 %2821  ;;  %v3179_v46 = vpop.permute.xlu1 %3178 }
  0xe6   : > { %21088 = vmatprep.subr.mxu1 %v21736_v13  ;;  %20384 = vmatmul.mubr.msk.f32.vlgmr.msra.gmra.mrb[0].mxu1 %vm333_vm2, %v20378_v40  ;;  %v2829_v47 = vsel %vm2823_vm9, %v2820_v42, %v2822_v45  ;;  %v6846_v42 = vld [vmem:[%s21817_s26 + $0xa] sm:$0x3f] }
  0xe7   : > { %21089 = vmatpush3.msk.msra.mxu1 %vm337_vm1, %v2822_v45  ;;  %20385 = vmatprep.subr.msk.mxu0 %vm337_vm1, %v2829_v47 }
  0xe8   : > { %5772 = vrot.lane.b32.xlu0 %v21840_v11, %s21751_s15  ;;  %5774 = vrot.lane.b32.xlu1 %v21849_v14, %s21751_s15 }
  0xe9   : > { %20386 = vmatpush1.msk.msra.mxu0 %vm337_vm1, %v2828_v48  ;;  %v3181_v49 = vpop.permute.xlu0 %3180  ;;  %v3177_v50 = vpop.permute.xlu1 %3176  ;;  %21090 = vmatprep.mubr.msk.f32.mxu1 %vm21746_vm4, %v21736_v13 }
  0xea   : > { %v3191_v51 = vsel %vm3190_vm10, %v3177_v50, %v3179_v46  ;;  %v3192_v52 = vsel %vm3190_vm10, %v3179_v46, %v3181_v49  ;;  %20387 = vmatmul.mubr.msk.f32.vlgmr.msra.gmra.mrb[2].mxu0 %vm333_vm2, %v20378_v40  ;;  %21091 = vmatmul.mubr.msk.f32.vlgmr.msra.gmra.mrb[16].mxu1 %vm333_vm2, %v20378_v40  ;;  %v6873_v46 = vrot.slane %v6846_v42, %v21820_v5 }
  0xeb   : > { %20391 = vmatprep.subr.msk.mxu0 %vm337_vm1, %v3192_v52  ;;  %3349 = vmatprep.mubr.f32.mxu1 %v21736_v13 }
  0xec   : > { %5770 = vrot.lane.b32.xlu0 %v21828_v9, %s21751_s15  ;;  %5776 = vrot.lane.b32.xlu1 %v21860_v17, %s21751_s15  ;;  %v22308_v9 = vrot.slane %v6103_v55, %v21820_v5  ;;  %v6107_v17 = vcombine.high %v6103_v55, %v6103_v55  ;;  %v6881_v50 = vcombine.high %v6873_v46, %v6873_v46 }
  0xed   : > { %20392 = vmatpush1.msk.msra.mxu0 %vm337_vm1, %v3191_v51  ;;  %v3183_v11 = vpop.permute.xlu0 %3182  ;;  %v3185_v14 = vpop.permute.xlu1 %3184  ;;  %3278 = vmatprep.mubr.f32.mxu0 %v21736_v13  ;;  %v6866_v51 = vcombine.high %v6846_v42, %v6846_v42  ;;  %v20450_v42 = vld [vmem:[%s24175_s2 + $0x1a] sm:$0x3] }
  0xee   : > { %v3193_v56 = vsel %vm3190_vm10, %v3181_v49, %v3183_v11  ;;  %v3194_v57 = vsel %vm3190_vm10, %v3183_v11, %v3185_v14  ;;  %20393 = vmatmul.mubr.msk.f32.vlgmr.msra.gmra.mrb[0].mxu0 %vm333_vm2, %v20390_v53  ;;  %v6122_v1 = vcombine.high %v22308_v9, %v22308_v9  ;;  %v6121_v2 = vrot.slane %v6107_v17, %v21820_v5 }
  0xef   : > { %20394 = vmatprep.subr.msk.mxu1 %vm337_vm1, %v3194_v57  ;;  %3420 = vmatprep.mubr.f32.mxu0 %v21736_v13  ;;  %v6880_v55 = vrot.slane %v6866_v51, %v21820_v5 }
  0xf0   : > { %5778 = vrot.lane.b32.xlu0 %v21968_v54, %s21751_s15  ;;  %5780 = vrot.lane.b32.xlu1 %v21976_v58, %s21751_s15  ;;  %v6123_v12 = vcombine.high %v6121_v2, %v6121_v2 }
  0xf1   : > { %20395 = vmatpush1.msk.msra.mxu1 %vm337_vm1, %v3193_v56  ;;  %v3187_v60 = vpop.permute.xlu0 %3186  ;;  %v3189_v61 = vpop.permute.xlu1 %3188 }
  0xf2   : > { %v3195_v63 = vsel %vm3190_vm10, %v3185_v14, %v3187_v60  ;;  %21093 = vmatprep.subr.mxu1 %v21736_v13  ;;  %20396 = vmatmul.mubr.msk.f32.vlgmr.msra.gmra.mrb[0].mxu1 %vm333_vm2, %v20390_v53  ;;  %v3196_v0 = vsel %vm3190_vm10, %v3187_v60, %v3189_v61  ;;  %v7213_v60 = vld [vmem:[%s21817_s26 + $0xa] sm:$0x3f] }
  0xf3   : > { %21094 = vmatpush3.msk.msra.mxu1 %vm337_vm1, %v3189_v61  ;;  %20397 = vmatprep.subr.msk.mxu0 %vm337_vm1, %v3196_v0 }
  0xf4   : > { %5782 = vrot.lane.b32.xlu0 %v21979_v59, %s21751_s15  ;;  %5784 = vrot.lane.b32.xlu1 %v21987_v62, %s21751_s15 }
  0xf5   : > { %20398 = vmatpush1.msk.msra.mxu0 %vm337_vm1, %v3195_v63  ;;  %v3547_v4 = vpop.permute.xlu0 %3546  ;;  %v3549_v6 = vpop.permute.xlu1 %3548  ;;  %21095 = vmatprep.mubr.msk.f32.mxu1 %vm21746_vm4, %v21736_v13 }
  0xf6   : > { %v3562_v7 = vsel %vm3560_vm11, %v3547_v4, %v3549_v6  ;;  %20399 = vmatmul.mubr.msk.f32.vlgmr.msra.gmra.mrb[2].mxu0 %vm333_vm2, %v20390_v53  ;;  %21096 = vmatmul.mubr.msk.f32.vlgmr.msra.gmra.mrb[18].mxu1 %vm333_vm2, %v20390_v53  ;;  %v20426_v53 = vld [vmem:[%s24175_s2 + $0x16] sm:$0x3] }
  0xf7   : > { %20403 = vmatprep.subr.msk.mxu0 %vm337_vm1, %v3562_v7  ;;  %3720 = vmatprep.mubr.f32.mxu1 %v21736_v13 }
  0xf8   : > { %6143 = vrot.lane.b32.xlu0 %v6122_v1, %s21752_s20  ;;  %6145 = vrot.lane.b32.xlu1 %v6121_v2, %s21752_s20 }
  0xf9   : > { %v3545_v15 = vpop.permute.xlu0 %3544  ;;  %v3551_v18 = vpop.permute.xlu1 %3550  ;;  %3649 = vmatprep.mubr.f32.mxu0 %v21736_v13 }
  0xfa   : > { %v3561_v19 = vsel %vm3560_vm11, %v3545_v15, %v3547_v4  ;;  %v3563_v24 = vsel %vm3560_vm11, %v3549_v6, %v3551_v18  ;;  %v7233_v4 = vcombine.high %v7213_v60, %v7213_v60 }
  0xfb   : > { %20404 = vmatpush1.msk.msra.mxu0 %vm337_vm1, %v3561_v19 }
  0xfc   : > { %6141 = vrot.lane.b32.xlu0 %v22308_v9, %s21752_s20  ;;  %6147 = vrot.lane.b32.xlu1 %v6123_v12, %s21752_s20  ;;  %v7247_v19 = vrot.slane %v7233_v4, %v21820_v5 }
  0xfd   : > { %v3553_v21 = vpop.permute.xlu0 %3552  ;;  %v3555_v22 = vpop.permute.xlu1 %3554  ;;  %20405 = vmatmul.mubr.msk.f32.vlgmr.msra.gmra.mrb[0].mxu0 %vm333_vm2, %v20402_v20 }
  0xfe   : > { %v3564_v23 = vsel %vm3560_vm11, %v3551_v18, %v3553_v21  ;;  %3791 = vmatprep.mubr.f32.mxu0 %v21736_v13  ;;  %v3565_v10 = vsel %vm3560_vm11, %v3553_v21, %v3555_v22 }
  0xff   : > { %20406 = vmatprep.subr.msk.mxu1 %vm337_vm1, %v3564_v23  ;;  %v20438_v23 = vld [vmem:[%s24175_s2 + $0x18] sm:$0x3] }
 0x100   : > { %6149 = vrot.lane.b32.xlu0 %v21968_v54, %s21752_s20  ;;  %6151 = vrot.lane.b32.xlu1 %v21976_v58, %s21752_s20 }
 0x101   : > { %20407 = vmatpush1.msk.msra.mxu1 %vm337_vm1, %v3563_v24  ;;  %v3557_v25 = vpop.permute.xlu0 %3556  ;;  %v7580_v24 = vld [vmem:[%s21817_s26 + $0xa] sm:$0x3f] }
 0x102   : > { %v3559_v26 = vpop.permute.xlu1 %3558  ;;  %21098 = vmatprep.subr.mxu1 %v21736_v13  ;;  %20408 = vmatmul.mubr.msk.f32.vlgmr.msra.gmra.mrb[0].mxu1 %vm333_vm2, %v20402_v20  ;;  %v3566_v27 = vsel %vm3560_vm11, %v3555_v22, %v3557_v25 }
 0x103   : > { %v3567_v8 = vsel %vm3560_vm11, %v3557_v25, %v3559_v26  ;;  %20409 = vmatprep.subr.msk.mxu0 %vm337_vm1, %v3566_v27  ;;  %21100 = vmatprep.mubr.msk.f32.mxu1 %vm21746_vm4, %v21736_v13 }
 0x104   : > { %6153 = vrot.lane.b32.xlu0 %v21979_v59, %s21752_s20  ;;  %6155 = vrot.lane.b32.xlu1 %v21987_v62, %s21752_s20 }
 0x105   : > { %21099 = vmatpush3.msk.msra.mxu1 %vm337_vm1, %v3567_v8  ;;  %20410 = vmatpush1.msk.msra.mxu0 %vm337_vm1, %v3565_v10  ;;  %v3918_v28 = vpop.permute.xlu0 %3917  ;;  %v7607_v8 = vrot.slane %v7580_v24, %v21820_v5 }
 0x106   : > { %v3920_v29 = vpop.permute.xlu1 %3919  ;;  %20411 = vmatmul.mubr.msk.f32.vlgmr.msra.gmra.mrb[2].mxu0 %vm333_vm2, %v20402_v20  ;;  %21101 = vmatmul.mubr.msk.f32.vlgmr.msra.gmra.mrb[20].mxu1 %vm333_vm2, %v20402_v20 }
 0x107   : > { %v3933_v30 = vsel %vm3931_vm12, %v3918_v28, %v3920_v29  ;;  %4091 = vmatprep.mubr.f32.mxu1 %v21736_v13  ;;  %4020 = vmatprep.mubr.f32.mxu0 %v21736_v13 }
 0x108   : > { %6514 = vrot.lane.b32.xlu0 %v6122_v1, %s24182_s16  ;;  %6516 = vrot.lane.b32.xlu1 %v6121_v2, %s24182_s16  ;;  %v7240_v2 = vrot.slane %v7213_v60, %v21820_v5 }
 0x109   : > { %20415 = vmatprep.subr.msk.mxu0 %vm337_vm1, %v3933_v30 }
 0x10a   : > { %v3916_v31 = vpop.permute.xlu0 %3915  ;;  %v7248_v18 = vcombine.high %v7240_v2, %v7240_v2 }
 0x10b   : > { %v3932_v16 = vsel %vm3931_vm12, %v3916_v31, %v3918_v28  ;;  %v3922_v32 = vpop.permute.xlu1 %3921 }
 0x10c   : > { %6512 = vrot.lane.b32.xlu0 %v22308_v9, %s24182_s16  ;;  %6518 = vrot.lane.b32.xlu1 %v6123_v12, %s24182_s16  ;;  %v3934_v40 = vsel %vm3931_vm12, %v3920_v29, %v3922_v32 }
 0x10d   : > { %20416 = vmatpush1.msk.msra.mxu0 %vm337_vm1, %v3932_v16  ;;  %v7615_v16 = vcombine.high %v7607_v8, %v7607_v8 }
 0x10e   : > { %20417 = vmatmul.mubr.msk.f32.vlgmr.msra.gmra.mrb[0].mxu0 %vm333_vm2, %v20414_v33 }
 0x10f   : > { %4162 = vmatprep.mubr.f32.mxu0 %v21736_v13 }
 0x110   : > { %6520 = vrot.lane.b32.xlu0 %v21968_v54, %s24182_s16  ;;  %6522 = vrot.lane.b32.xlu1 %v21976_v58, %s24182_s16  ;;  %v3924_v35 = vpop.permute.xlu0 %3923  ;;  %v3926_v36 = vpop.permute.xlu1 %3925  ;;  %v22403_v54 = vcombine.high %v22391_v37, %v22391_v37  ;;  %v22406_v58 = vrot.slane %v6849_v38, %v21820_v5 }
 0x111   : > { %v3935_v39 = vsel %vm3931_vm12, %v3922_v32, %v3924_v35  ;;  %v7600_v32 = vcombine.high %v7580_v24, %v7580_v24 }
 0x112   : > { %20418 = vmatprep.subr.msk.mxu1 %vm337_vm1, %v3935_v39  ;;  %v22423_v45 = vcombine.high %v22406_v58, %v22406_v58 }
 0x113   : > { %20419 = vmatpush1.msk.msra.mxu1 %vm337_vm1, %v3934_v40  ;;  %v7614_v38 = vrot.slane %v7600_v32, %v21820_v5 }
 0x114   : > { %6524 = vrot.lane.b32.xlu0 %v21979_v59, %s24182_s16  ;;  %6526 = vrot.lane.b32.xlu1 %v21987_v62, %s24182_s16  ;;  %v3936_v62 = vsel %vm3931_vm12, %v3924_v35, %v3926_v36  ;;  %s24187_s16 = smov 54  }
 0x115   : > { %v3928_v41 = vpop.permute.xlu0 %3927  ;;  %21103 = vmatprep.subr.mxu1 %v21736_v13  ;;  %20420 = vmatmul.mubr.msk.f32.vlgmr.msra.gmra.mrb[0].mxu1 %vm333_vm2, %v20414_v33 }
 0x116   : > { %v3930_v43 = vpop.permute.xlu1 %3929  ;;  %v3937_v44 = vsel %vm3931_vm12, %v3926_v36, %v3928_v41  ;;  %21105 = vmatprep.mubr.msk.f32.mxu1 %vm21746_vm4, %v21736_v13 }
 0x117   : > { %v3938_v59 = vsel %vm3931_vm12, %v3928_v41, %v3930_v43  ;;  %20421 = vmatprep.subr.msk.mxu0 %vm337_vm1, %v3937_v44  ;;  %v7947_v43 = vld [vmem:[%s21817_s26 + $0xa] sm:$0x3f] }
 0x118   : > { %6884 = vrot.lane.b32.xlu0 %v22403_v54, %s24180_s13  ;;  %6886 = vrot.lane.b32.xlu1 %v22406_v58, %s24180_s13 }
 0x119   : > { %21104 = vmatpush3.msk.msra.mxu1 %vm337_vm1, %v3938_v59  ;;  %20422 = vmatpush1.msk.msra.mxu0 %vm337_vm1, %v3936_v62 }
 0x11a   : > { %v4289_v47 = vpop.permute.xlu0 %4288  ;;  %v4291_v48 = vpop.permute.xlu1 %4290  ;;  %20423 = vmatmul.mubr.msk.f32.vlgmr.msra.gmra.mrb[2].mxu0 %vm333_vm2, %v20414_v33  ;;  %21106 = vmatmul.mubr.msk.f32.vlgmr.msra.gmra.mrb[22].mxu1 %vm333_vm2, %v20414_v33 }
 0x11b   : > { %v4304_v49 = vsel %vm4302_vm13, %v4289_v47, %v4291_v48  ;;  %4462 = vmatprep.mubr.f32.mxu1 %v21736_v13  ;;  %4391 = vmatprep.mubr.f32.mxu0 %v21736_v13 }
 0x11c   : > { %6882 = vrot.lane.b32.xlu0 %v22391_v37, %s24180_s13  ;;  %6888 = vrot.lane.b32.xlu1 %v22423_v45, %s24180_s13 }
 0x11d   : > { %20427 = vmatprep.subr.msk.mxu0 %vm337_vm1, %v4304_v49 }
 0x11e   : > { %v4287_v52 = vpop.permute.xlu0 %4286  ;;  %v4293_v11 = vpop.permute.xlu1 %4292 }
 0x11f   : > { %v4303_v14 = vsel %vm4302_vm13, %v4287_v52, %v4289_v47  ;;  %v4305_v17 = vsel %vm4302_vm13, %v4291_v48, %v4293_v11  ;;  %v7967_v47 = vcombine.high %v7947_v43, %v7947_v43 }
 0x120   : > { %6890 = vrot.lane.b32.xlu0 %v6873_v46, %s24180_s13  ;;  %6892 = vrot.lane.b32.xlu1 %v6881_v50, %s24180_s13  ;;  %v7974_v46 = vrot.slane %v7947_v43, %v21820_v5 }
 0x121   : > { %20428 = vmatpush1.msk.msra.mxu0 %vm337_vm1, %v4303_v14  ;;  %v7981_v14 = vrot.slane %v7967_v47, %v21820_v5 }
 0x122   : > { %v4295_v56 = vpop.permute.xlu0 %4294  ;;  %v4297_v57 = vpop.permute.xlu1 %4296  ;;  %20429 = vmatmul.mubr.msk.f32.vlgmr.msra.gmra.mrb[0].mxu0 %vm333_vm2, %v20426_v53 }
 0x123   : > { %v4306_v9 = vsel %vm4302_vm13, %v4293_v11, %v4295_v56  ;;  %4533 = vmatprep.mubr.f32.mxu0 %v21736_v13  ;;  %v4307_v6 = vsel %vm4302_vm13, %v4295_v56, %v4297_v57  ;;  %v7982_v11 = vcombine.high %v7974_v46, %v7974_v46 }
 0x124   : > { %6894 = vrot.lane.b32.xlu0 %v6880_v55, %s24180_s13  ;;  %7251 = vrot.lane.b32.xlu1 %v22403_v54, %s24184_s18  ;;  %s24193_s13 = smov 44  }
 0x125   : > { %20430 = vmatprep.subr.msk.mxu1 %vm337_vm1, %v4306_v9  ;;  %v8314_v9 = vld [vmem:[%s21817_s26 + $0xa] sm:$0x3f] }
 0x126   : > { %20431 = vmatpush1.msk.msra.mxu1 %vm337_vm1, %v4305_v17  ;;  %v4299_v61 = vpop.permute.xlu0 %4298  ;;  %v4301_v63 = vpop.permute.xlu1 %4300 }
 0x127   : > { %v4309_v0 = vsel %vm4302_vm13, %v4299_v61, %v4301_v63  ;;  %21108 = vmatprep.subr.mxu1 %v21736_v13  ;;  %20432 = vmatmul.mubr.msk.f32.vlgmr.msra.gmra.mrb[0].mxu1 %vm333_vm2, %v20426_v53  ;;  %v4308_v1 = vsel %vm4302_vm13, %v4297_v57, %v4299_v61  ;;  %v20462_v63 = vld [vmem:[%s24175_s2 + $0x1c] sm:$0x3] }
 0x128   : > { %7253 = vrot.lane.b32.xlu0 %v22406_v58, %s24184_s18  ;;  %7249 = vrot.lane.b32.xlu1 %v22391_v37, %s24184_s18 }
 0x129   : > { %20433 = vmatprep.subr.msk.mxu0 %vm337_vm1, %v4308_v1  ;;  %21109 = vmatpush3.msk.msra.mxu1 %vm337_vm1, %v4309_v0  ;;  %v8341_v0 = vrot.slane %v8314_v9, %v21820_v5 }
 0x12a   : > { %20434 = vmatpush1.msk.msra.mxu0 %vm337_vm1, %v4307_v6  ;;  %v4660_v7 = vpop.permute.xlu0 %4659  ;;  %v4662_v12 = vpop.permute.xlu1 %4661  ;;  %21110 = vmatprep.mubr.msk.f32.mxu1 %vm21746_vm4, %v21736_v13 }
 0x12b   : > { %v4675_v15 = vsel %vm24186_vm14, %v4660_v7, %v4662_v12  ;;  %20435 = vmatmul.mubr.msk.f32.vlgmr.msra.gmra.mrb[2].mxu0 %vm333_vm2, %v20426_v53  ;;  %21111 = vmatmul.mubr.msk.f32.vlgmr.msra.gmra.mrb[24].mxu1 %vm333_vm2, %v20426_v53  ;;  %v8349_v6 = vcombine.high %v8341_v0, %v8341_v0 }
 0x12c   : > { %7255 = vrot.lane.b32.xlu0 %v22423_v45, %s24184_s18  ;;  %7257 = vrot.lane.b32.xlu1 %v7240_v2, %s24184_s18 }
 0x12d   : > { %20439 = vmatprep.subr.msk.mxu0 %vm337_vm1, %v4675_v15  ;;  %4833 = vmatprep.mubr.f32.mxu1 %v21736_v13 }
 0x12e   : > { %v4658_v20 = vpop.permute.xlu0 %4657  ;;  %v4664_v21 = vpop.permute.xlu1 %4663  ;;  %4762 = vmatprep.mubr.f32.mxu0 %v21736_v13 }
 0x12f   : > { %v4674_v22 = vsel %vm24186_vm14, %v4658_v20, %v4660_v7  ;;  %v4676_v10 = vsel %vm24186_vm14, %v4662_v12, %v4664_v21  ;;  %v8334_v7 = vcombine.high %v8314_v9, %v8314_v9 }
 0x130   : > { %7259 = vrot.lane.b32.xlu0 %v7248_v18, %s24184_s18  ;;  %7261 = vrot.lane.b32.xlu1 %v7247_v19, %s24184_s18  ;;  %s24190_s18 = smov 46  }
 0x131   : > { %20440 = vmatpush1.msk.msra.mxu0 %vm337_vm1, %v4674_v22 }
 0x132   : > { %v4666_v25 = vpop.permute.xlu0 %4665  ;;  %v4668_v26 = vpop.permute.xlu1 %4667  ;;  %20441 = vmatmul.mubr.msk.f32.vlgmr.msra.gmra.mrb[0].mxu0 %vm333_vm2, %v20438_v23 }
 0x133   : > { %v4677_v27 = vsel %vm24186_vm14, %v4664_v21, %v4666_v25  ;;  %4904 = vmatprep.mubr.f32.mxu0 %v21736_v13  ;;  %v4678_v33 = vsel %vm24186_vm14, %v4666_v25, %v4668_v26  ;;  %v8348_v21 = vrot.slane %v8334_v7, %v21820_v5 }
 0x134   : > { %7618 = vrot.lane.b32.xlu0 %v22403_v54, %s24187_s16  ;;  %7620 = vrot.lane.b32.xlu1 %v22406_v58, %s24187_s16 }
 0x135   : > { %20442 = vmatprep.subr.msk.mxu1 %vm337_vm1, %v4677_v27 }
 0x136   : > { %20443 = vmatpush1.msk.msra.mxu1 %vm337_vm1, %v4676_v10  ;;  %v4670_v28 = vpop.permute.xlu0 %4669  ;;  %v4672_v29 = vpop.permute.xlu1 %4671 }
 0x137   : > { %v4680_v30 = vsel %vm24186_vm14, %v4670_v28, %v4672_v29  ;;  %21113 = vmatprep.subr.mxu1 %v21736_v13  ;;  %20444 = vmatmul.mubr.msk.f32.vlgmr.msra.gmra.mrb[0].mxu1 %vm333_vm2, %v20438_v23  ;;  %v4679_v31 = vsel %vm24186_vm14, %v4668_v26, %v4670_v28  ;;  %vm24192_vm14 = vcmask 130048   ;;  %v8681_v26 = vld [vmem:[%s21817_s26 + $0xa] sm:$0x3f]  ;;  %v20474_v28 = vld [vmem:[%s24175_s2 + $0x1e] sm:$0x3] }
 0x138   : > { %7616 = vrot.lane.b32.xlu0 %v22391_v37, %s24187_s16  ;;  %7622 = vrot.lane.b32.xlu1 %v22423_v45, %s24187_s16  ;;  %v8708_v29 = vrot.slane %v8681_v26, %v21820_v5 }
 0x139   : > { %20445 = vmatprep.subr.msk.mxu0 %vm337_vm1, %v4679_v31  ;;  %21114 = vmatpush3.msk.msra.mxu1 %vm337_vm1, %v4680_v30  ;;  %v8701_v30 = vcombine.high %v8681_v26, %v8681_v26 }
 0x13a   : > { %20446 = vmatpush1.msk.msra.mxu0 %vm337_vm1, %v4678_v33  ;;  %v5031_v34 = vpop.permute.xlu0 %5030  ;;  %v5033_v35 = vpop.permute.xlu1 %5032  ;;  %21115 = vmatprep.mubr.msk.f32.mxu1 %vm21746_vm4, %v21736_v13  ;;  %v8716_v33 = vcombine.high %v8708_v29, %v8708_v29 }
 0x13b   : > { %v5046_v36 = vsel %vm24189_vm15, %v5031_v34, %v5033_v35  ;;  %20447 = vmatmul.mubr.msk.f32.vlgmr.msra.gmra.mrb[2].mxu0 %vm333_vm2, %v20438_v23  ;;  %21116 = vmatmul.mubr.msk.f32.vlgmr.msra.gmra.mrb[26].mxu1 %vm333_vm2, %v20438_v23 }
 0x13c   : > { %7624 = vrot.lane.b32.xlu0 %v7607_v8, %s24187_s16  ;;  %7626 = vrot.lane.b32.xlu1 %v7615_v16, %s24187_s16 }
 0x13d   : > { %20451 = vmatprep.subr.msk.mxu0 %vm337_vm1, %v5046_v36  ;;  %5204 = vmatprep.mubr.f32.mxu1 %v21736_v13 }
 0x13e   : > { %v5029_v39 = vpop.permute.xlu0 %5028  ;;  %v5035_v40 = vpop.permute.xlu1 %5034  ;;  %5133 = vmatprep.mubr.f32.mxu0 %v21736_v13 }
 0x13f   : > { %v5045_v41 = vsel %vm24189_vm15, %v5029_v39, %v5031_v34  ;;  %v5047_v48 = vsel %vm24189_vm15, %v5033_v35, %v5035_v40  ;;  %v8715_v34 = vrot.slane %v8701_v30, %v21820_v5 }
 0x140   : > { %7628 = vrot.lane.b32.xlu0 %v7614_v38, %s24187_s16  ;;  %7985 = vrot.lane.b32.xlu1 %v22403_v54, %s24190_s18  ;;  %s24198_s16 = smov 45  }
 0x141   : > { %20452 = vmatpush1.msk.msra.mxu0 %vm337_vm1, %v5045_v41 }
 0x142   : > { %v5037_v44 = vpop.permute.xlu0 %5036  ;;  %v5039_v59 = vpop.permute.xlu1 %5038  ;;  %20453 = vmatmul.mubr.msk.f32.vlgmr.msra.gmra.mrb[0].mxu0 %vm333_vm2, %v20450_v42 }
 0x143   : > { %v5048_v62 = vsel %vm24189_vm15, %v5035_v40, %v5037_v44  ;;  %5275 = vmatprep.mubr.f32.mxu0 %v21736_v13  ;;  %v5049_v53 = vsel %vm24189_vm15, %v5037_v44, %v5039_v59 }
 0x144   : > { %7987 = vrot.lane.b32.xlu0 %v22406_v58, %s24190_s18  ;;  %7983 = vrot.lane.b32.xlu1 %v22391_v37, %s24190_s18 }
 0x145   : > { %20454 = vmatprep.subr.msk.mxu1 %vm337_vm1, %v5048_v62 }
 0x146   : > { %20455 = vmatpush1.msk.msra.mxu1 %vm337_vm1, %v5047_v48  ;;  %v5041_v49 = vpop.permute.xlu0 %5040  ;;  %v5043_v50 = vpop.permute.xlu1 %5042 }
 0x147   : > { %v5051_v51 = vsel %vm24189_vm15, %v5041_v49, %v5043_v50  ;;  %21118 = vmatprep.subr.mxu1 %v21736_v13  ;;  %20456 = vmatmul.mubr.msk.f32.vlgmr.msra.gmra.mrb[0].mxu1 %vm333_vm2, %v20450_v42  ;;  %v5050_v52 = vsel %vm24189_vm15, %v5039_v59, %v5041_v49  ;;  %vm24195_vm15 = vcmask 64512   ;;  %v20486_v49 = vld [vmem:[%s24175_s2 + $0x20] sm:$0x3] }
 0x148   : > { %7989 = vrot.lane.b32.xlu0 %v22423_v45, %s24190_s18  ;;  %7991 = vrot.lane.b32.xlu1 %v7974_v46, %s24190_s18 }
 0x149   : > { %20457 = vmatprep.subr.msk.mxu0 %vm337_vm1, %v5050_v52  ;;  %21119 = vmatpush3.msk.msra.mxu1 %vm337_vm1, %v5051_v51 }
 0x14a   : > { %20458 = vmatpush1.msk.msra.mxu0 %vm337_vm1, %v5049_v53  ;;  %v5402_v55 = vpop.permute.xlu0 %5401  ;;  %v5404_v56 = vpop.permute.xlu1 %5403  ;;  %21120 = vmatprep.mubr.msk.f32.mxu1 %vm21746_vm4, %v21736_v13 }
 0x14b   : > { %v5417_v57 = vsel %vm24192_vm14, %v5402_v55, %v5404_v56  ;;  %20459 = vmatmul.mubr.msk.f32.vlgmr.msra.gmra.mrb[2].mxu0 %vm333_vm2, %v20450_v42  ;;  %21121 = vmatmul.mubr.msk.f32.vlgmr.msra.gmra.mrb[28].mxu1 %vm333_vm2, %v20450_v42  ;;  %v9048_v42 = vld [vmem:[%s21817_s26 + $0xa] sm:$0x3f] }
 0x14c   : > { %7993 = vrot.lane.b32.xlu0 %v7982_v11, %s24190_s18  ;;  %7995 = vrot.lane.b32.xlu1 %v7981_v14, %s24190_s18  ;;  %s24196_s18 = smov 36   ;;  %v9075_v62 = vrot.slane %v9048_v42, %v21820_v5  ;;  %v9068_v51 = vcombine.high %v9048_v42, %v9048_v42 }
 0x14d   : > { %20463 = vmatprep.subr.msk.mxu0 %vm337_vm1, %v5417_v57  ;;  %5575 = vmatprep.mubr.f32.mxu1 %v21736_v13 }
 0x14e   : > { %v5400_v17 = vpop.permute.xlu0 %5399  ;;  %v5406_v60 = vpop.permute.xlu1 %5405  ;;  %5504 = vmatprep.mubr.f32.mxu0 %v21736_v13  ;;  %v9083_v50 = vcombine.high %v9075_v62, %v9075_v62  ;;  %v9082_v53 = vrot.slane %v9068_v51, %v21820_v5 }
 0x14f   : > { %v5416_v61 = vsel %vm24192_vm14, %v5400_v17, %v5402_v55  ;;  %v5418_v12 = vsel %vm24192_vm14, %v5404_v56, %v5406_v60 }
 0x150   : > { %8352 = vrot.lane.b32.xlu0 %v22403_v54, %s24198_s16  ;;  %8354 = vrot.lane.b32.xlu1 %v22406_v58, %s24198_s16 }
 0x151   : > { %20464 = vmatpush1.msk.msra.mxu0 %vm337_vm1, %v5416_v61  ;;  %v9415_v61 = vld [vmem:[%s21817_s26 + $0xa] sm:$0x3f] }
 0x152   : > { %v5408_v1 = vpop.permute.xlu0 %5407  ;;  %v5410_v2 = vpop.permute.xlu1 %5409  ;;  %20465 = vmatmul.mubr.msk.f32.vlgmr.msra.gmra.mrb[0].mxu0 %vm333_vm2, %v20462_v63 }
 0x153   : > { %v5419_v4 = vsel %vm24192_vm14, %v5406_v60, %v5408_v1  ;;  %5646 = vmatprep.mubr.f32.mxu0 %v21736_v13  ;;  %v5420_v22 = vsel %vm24192_vm14, %v5408_v1, %v5410_v2 }
 0x154   : > { %8350 = vrot.lane.b32.xlu0 %v22391_v37, %s24198_s16  ;;  %8356 = vrot.lane.b32.xlu1 %v22423_v45, %s24198_s16 }
 0x155   : > { %20466 = vmatprep.subr.msk.mxu1 %vm337_vm1, %v5419_v4  ;;  %v9435_v4 = vcombine.high %v9415_v61, %v9415_v61 }
 0x156   : > { %20467 = vmatpush1.msk.msra.mxu1 %vm337_vm1, %v5418_v12  ;;  %v5412_v15 = vpop.permute.xlu0 %5411  ;;  %v5414_v18 = vpop.permute.xlu1 %5413 }
 0x157   : > { %v5422_v19 = vsel %vm24192_vm14, %v5412_v15, %v5414_v18  ;;  %21123 = vmatprep.subr.mxu1 %v21736_v13  ;;  %20468 = vmatmul.mubr.msk.f32.vlgmr.msra.gmra.mrb[0].mxu1 %vm333_vm2, %v20462_v63  ;;  %v5421_v20 = vsel %vm24192_vm14, %v5410_v2, %v5412_v15  ;;  %vm24200_vm14 = vcmask 56320   ;;  %v9442_v2 = vrot.slane %v9415_v61, %v21820_v5  ;;  %v20498_v15 = vld [vmem:[%s24175_s2 + $0x22] sm:$0x3] }
 0x158   : > { %8358 = vrot.lane.b32.xlu0 %v8341_v0, %s24198_s16  ;;  %8360 = vrot.lane.b32.xlu1 %v8349_v6, %s24198_s16 }
 0x159   : > { %20469 = vmatprep.subr.msk.mxu0 %vm337_vm1, %v5421_v20  ;;  %21124 = vmatpush3.msk.msra.mxu1 %vm337_vm1, %v5422_v19  ;;  %v9450_v18 = vcombine.high %v9442_v2, %v9442_v2  ;;  %v9449_v19 = vrot.slane %v9435_v4, %v21820_v5 }
 0x15a   : > { %20470 = vmatpush1.msk.msra.mxu0 %vm337_vm1, %v5420_v22  ;;  %v5773_v23 = vpop.permute.xlu0 %5772  ;;  %v5775_v24 = vpop.permute.xlu1 %5774  ;;  %21125 = vmatprep.mubr.msk.f32.mxu1 %vm21746_vm4, %v21736_v13 }
 0x15b   : > { %v5788_v25 = vsel %vm24195_vm15, %v5773_v23, %v5775_v24  ;;  %20471 = vmatmul.mubr.msk.f32.vlgmr.msra.gmra.mrb[2].mxu0 %vm333_vm2, %v20462_v63  ;;  %21126 = vmatmul.mubr.msk.f32.vlgmr.msra.gmra.mrb[30].mxu1 %vm333_vm2, %v20462_v63 }
 0x15c   : > { %8362 = vrot.lane.b32.xlu0 %v8348_v21, %s24198_s16  ;;  %8719 = vrot.lane.b32.xlu1 %v22403_v54, %s24193_s13  ;;  %s22718_s16 = scalar_lea.vmem %s24174_s1, %s20943_s23  ;;  %s24209_s23 = smov 6  }
 0x15d   : > { %20475 = vmatprep.subr.msk.mxu0 %vm337_vm1, %v5788_v25  ;;  %5946 = vmatprep.mubr.f32.mxu1 %v21736_v13 }
 0x15e   : > { %v5771_v27 = vpop.permute.xlu0 %5770  ;;  %v5777_v8 = vpop.permute.xlu1 %5776  ;;  %5875 = vmatprep.mubr.f32.mxu0 %v21736_v13 }
 0x15f   : > { %v5787_v10 = vsel %vm24195_vm15, %v5771_v27, %v5773_v23  ;;  %v5789_v35 = vsel %vm24195_vm15, %v5775_v24, %v5777_v8  ;;  %v9782_v24 = vld [vmem:[%s21817_s26 + $0xa] sm:$0x3f]  ;;  %s21762_s26 = smov 34  }
 0x160   : > { %8721 = vrot.lane.b32.xlu0 %v22406_v58, %s24193_s13  ;;  %8717 = vrot.lane.b32.xlu1 %v22391_v37, %s24193_s13 }
 0x161   : > { %20476 = vmatpush1.msk.msra.mxu0 %vm337_vm1, %v5787_v10  ;;  %v9809_v10 = vrot.slane %v9782_v24, %v21820_v5 }
 0x162   : > { %v5779_v31 = vpop.permute.xlu0 %5778  ;;  %v5781_v16 = vpop.permute.xlu1 %5780  ;;  %20477 = vmatmul.mubr.msk.f32.vlgmr.msra.gmra.mrb[0].mxu0 %vm333_vm2, %v20474_v28 }
 0x163   : > { %v5790_v32 = vsel %vm24195_vm15, %v5777_v8, %v5779_v31  ;;  %6017 = vmatprep.mubr.f32.mxu0 %v21736_v13  ;;  %v5791_v41 = vsel %vm24195_vm15, %v5779_v31, %v5781_v16 }
 0x164   : > { %8723 = vrot.lane.b32.xlu0 %v22423_v45, %s24193_s13  ;;  %8725 = vrot.lane.b32.xlu1 %v8708_v29, %s24193_s13  ;;  %v10493_v29 = vld [vmem:[%s22718_s16] sm:$0xff] }
 0x165   : > { %20478 = vmatprep.subr.msk.mxu1 %vm337_vm1, %v5790_v32  ;;  %v22745_v32 = vrot.slane %v10493_v29, %v21820_v5 }
 0x166   : > { %20479 = vmatpush1.msk.msra.mxu1 %vm337_vm1, %v5789_v35  ;;  %v5783_v36 = vpop.permute.xlu0 %5782  ;;  %v5785_v38 = vpop.permute.xlu1 %5784 }
 0x167   : > { %v5793_v39 = vsel %vm24195_vm15, %v5783_v36, %v5785_v38  ;;  %21128 = vmatprep.subr.mxu1 %v21736_v13  ;;  %20480 = vmatmul.mubr.msk.f32.vlgmr.msra.gmra.mrb[0].mxu1 %vm333_vm2, %v20474_v28  ;;  %v5792_v40 = vsel %vm24195_vm15, %v5781_v16, %v5783_v36  ;;  %vm24201_vm15 = vcmask 48128   ;;  %v9802_v16 = vcombine.high %v9782_v24, %v9782_v24  ;;  %v20510_v38 = vld [vmem:[%s24175_s2 + $0x24] sm:$0x3] }
 0x168   : > { %8727 = vrot.lane.b32.xlu0 %v8716_v33, %s24193_s13  ;;  %8729 = vrot.lane.b32.xlu1 %v8715_v34, %s24193_s13  ;;  %s21761_s13 = smov 35   ;;  %v10497_v36 = vcombine.high %v10493_v29, %v10493_v29 }
 0x169   : > { %20481 = vmatprep.subr.msk.mxu0 %vm337_vm1, %v5792_v40  ;;  %21129 = vmatpush3.msk.msra.mxu1 %vm337_vm1, %v5793_v39 }
 0x16a   : > { %20482 = vmatpush1.msk.msra.mxu0 %vm337_vm1, %v5791_v41  ;;  %v6144_v43 = vpop.permute.xlu0 %6143  ;;  %v6146_v44 = vpop.permute.xlu1 %6145  ;;  %21130 = vmatprep.mubr.msk.f32.mxu1 %vm21746_vm4, %v21736_v13  ;;  %v22769_v42 = vrot.slane %v10497_v36, %v21820_v5  ;;  %v20546_v36 = vld [vmem:[%s24175_s2 + $0x2a] sm:$0x3] }
 0x16b   : > { %v6159_v59 = vsel %vm24200_vm14, %v6144_v43, %v6146_v44  ;;  %20483 = vmatmul.mubr.msk.f32.vlgmr.msra.gmra.mrb[2].mxu0 %vm333_vm2, %v20474_v28  ;;  %21131 = vmatmul.mubr.msk.f32.vlgmr.msra.gmra.mrb[32].mxu1 %vm333_vm2, %v20474_v28 }
 0x16c   : > { %9086 = vrot.lane.b32.xlu0 %v22403_v54, %s24196_s18  ;;  %9088 = vrot.lane.b32.xlu1 %v22406_v58, %s24196_s18 }
 0x16d   : > { %20487 = vmatprep.subr.msk.mxu0 %vm337_vm1, %v6159_v59  ;;  %6317 = vmatprep.mubr.f32.mxu1 %v21736_v13 }
 0x16e   : > { %v6142_v46 = vpop.permute.xlu0 %6141  ;;  %v6148_v47 = vpop.permute.xlu1 %6147  ;;  %6246 = vmatprep.mubr.f32.mxu0 %v21736_v13 }
 0x16f   : > { %v6158_v48 = vsel %vm24200_vm14, %v6142_v46, %v6144_v43  ;;  %v6160_v55 = vsel %vm24200_vm14, %v6146_v44, %v6148_v47 }
 0x170   : > { %9084 = vrot.lane.b32.xlu0 %v22391_v37, %s24196_s18  ;;  %9090 = vrot.lane.b32.xlu1 %v22423_v45, %s24196_s18 }
 0x171   : > { %20488 = vmatpush1.msk.msra.mxu0 %vm337_vm1, %v6158_v48 }
 0x172   : > { %v6150_v52 = vpop.permute.xlu0 %6149  ;;  %v6152_v11 = vpop.permute.xlu1 %6151  ;;  %20489 = vmatmul.mubr.msk.f32.vlgmr.msra.gmra.mrb[0].mxu0 %vm333_vm2, %v20486_v49 }
 0x173   : > { %v6161_v14 = vsel %vm24200_vm14, %v6148_v47, %v6150_v52  ;;  %6388 = vmatprep.mubr.f32.mxu0 %v21736_v13  ;;  %v6162_v60 = vsel %vm24200_vm14, %v6150_v52, %v6152_v11  ;;  %v22783_v47 = vcombine.high %v22769_v42, %v22769_v42 }
 0x174   : > { %9092 = vrot.lane.b32.xlu0 %v9075_v62, %s24196_s18  ;;  %9094 = vrot.lane.b32.xlu1 %v9083_v50, %s24196_s18  ;;  %v10494_v62 = vld [vmem:[%s22718_s16 + $0x8] sm:$0x3f] }
 0x175   : > { %20490 = vmatprep.subr.msk.mxu1 %vm337_vm1, %v6161_v14  ;;  %v10514_v50 = vcombine.high %v10494_v62, %v10494_v62 }
 0x176   : > { %20491 = vmatpush1.msk.msra.mxu1 %vm337_vm1, %v6160_v55  ;;  %v6154_v56 = vpop.permute.xlu0 %6153  ;;  %v6156_v57 = vpop.permute.xlu1 %6155 }
 0x177   : > { %v6164_v9 = vsel %vm24200_vm14, %v6154_v56, %v6156_v57  ;;  %21133 = vmatprep.subr.mxu1 %v21736_v13  ;;  %20492 = vmatmul.mubr.msk.f32.vlgmr.msra.gmra.mrb[0].mxu1 %vm333_vm2, %v20486_v49  ;;  %v6163_v17 = vsel %vm24200_vm14, %v6152_v11, %v6154_v56  ;;  %vm24202_vm14 = vcmask 457728   ;;  %v10528_v55 = vrot.slane %v10514_v50, %v21820_v5 }
 0x178   : > { %9096 = vrot.lane.b32.xlu0 %v9082_v53, %s24196_s18  ;;  %9453 = vrot.lane.b32.xlu1 %v22403_v54, %s21761_s13 }
 0x179   : > { %20493 = vmatprep.subr.msk.mxu0 %vm337_vm1, %v6163_v17  ;;  %21134 = vmatpush3.msk.msra.mxu1 %vm337_vm1, %v6164_v9  ;;  %v20522_v9 = vld [vmem:[%s24175_s2 + $0x26] sm:$0x3] }
 0x17a   : > { %20494 = vmatpush1.msk.msra.mxu0 %vm337_vm1, %v6162_v60  ;;  %v6515_v63 = vpop.permute.xlu0 %6514  ;;  %v6517_v0 = vpop.permute.xlu1 %6516  ;;  %21135 = vmatprep.mubr.msk.f32.mxu1 %vm21746_vm4, %v21736_v13 }
 0x17b   : > { %v6530_v1 = vsel %vm24201_vm15, %v6515_v63, %v6517_v0  ;;  %20495 = vmatmul.mubr.msk.f32.vlgmr.msra.gmra.mrb[2].mxu0 %vm333_vm2, %v20486_v49  ;;  %21136 = vmatmul.mubr.msk.f32.vlgmr.msra.gmra.mrb[34].mxu1 %vm333_vm2, %v20486_v49  ;;  %v10521_v49 = vrot.slane %v10494_v62, %v21820_v5 }
 0x17c   : > { %9455 = vrot.lane.b32.xlu0 %v22406_v58, %s21761_s13  ;;  %9451 = vrot.lane.b32.xlu1 %v22391_v37, %s21761_s13 }
 0x17d   : > { %20499 = vmatprep.subr.msk.mxu0 %vm337_vm1, %v6530_v1  ;;  %6688 = vmatprep.mubr.f32.mxu1 %v21736_v13  ;;  %v10529_v53 = vcombine.high %v10521_v49, %v10521_v49 }
 0x17e   : > { %v6513_v6 = vpop.permute.xlu0 %6512  ;;  %v6519_v7 = vpop.permute.xlu1 %6518  ;;  %6617 = vmatprep.mubr.f32.mxu0 %v21736_v13 }
 0x17f   : > { %v6529_v12 = vsel %vm24201_vm15, %v6513_v6, %v6515_v63  ;;  %v6531_v23 = vsel %vm24201_vm15, %v6517_v0, %v6519_v7  ;;  %v10860_v0 = vld [vmem:[%s22718_s16 + $0x8] sm:$0x3f] }
 0x180   : > { %9457 = vrot.lane.b32.xlu0 %v22423_v45, %s21761_s13  ;;  %9459 = vrot.lane.b32.xlu1 %v9442_v2, %s21761_s13  ;;  %v10887_v4 = vrot.slane %v10860_v0, %v21820_v5 }
 0x181   : > { %20500 = vmatpush1.msk.msra.mxu0 %vm337_vm1, %v6529_v12 }
 0x182   : > { %v6521_v20 = vpop.permute.xlu0 %6520  ;;  %v6523_v21 = vpop.permute.xlu1 %6522  ;;  %20501 = vmatmul.mubr.msk.f32.vlgmr.msra.gmra.mrb[0].mxu0 %vm333_vm2, %v20498_v15 }
 0x183   : > { %v6532_v22 = vsel %vm24201_vm15, %v6519_v7, %v6521_v20  ;;  %6759 = vmatprep.mubr.f32.mxu0 %v21736_v13  ;;  %v6533_v28 = vsel %vm24201_vm15, %v6521_v20, %v6523_v21 }
 0x184   : > { %9461 = vrot.lane.b32.xlu0 %v9450_v18, %s21761_s13  ;;  %9463 = vrot.lane.b32.xlu1 %v9449_v19, %s21761_s13  ;;  %v10895_v18 = vcombine.high %v10887_v4, %v10887_v4 }
 0x185   : > { %20502 = vmatprep.subr.msk.mxu1 %vm337_vm1, %v6532_v22 }
 0x186   : > { %20503 = vmatpush1.msk.msra.mxu1 %vm337_vm1, %v6531_v23  ;;  %v6525_v25 = vpop.permute.xlu0 %6524  ;;  %v6527_v26 = vpop.permute.xlu1 %6526  ;;  %v20534_v23 = vld [vmem:[%s24175_s2 + $0x28] sm:$0x3] }
 0x187   : > { %v6535_v27 = vsel %vm24201_vm15, %v6525_v25, %v6527_v26  ;;  %21138 = vmatprep.subr.mxu1 %v21736_v13  ;;  %20504 = vmatmul.mubr.msk.f32.vlgmr.msra.gmra.mrb[0].mxu1 %vm333_vm2, %v20498_v15  ;;  %v6534_v8 = vsel %vm24201_vm15, %v6523_v21, %v6525_v25  ;;  %vm24203_vm15 = vcmask 449536  }
 0x188   : > { %9820 = vrot.lane.b32.xlu0 %v22403_v54, %s21762_s26  ;;  %9822 = vrot.lane.b32.xlu1 %v22406_v58, %s21762_s26  ;;  %v9817_v58 = vcombine.high %v9809_v10, %v9809_v10 }
 0x189   : > { %20505 = vmatprep.subr.msk.mxu0 %vm337_vm1, %v6534_v8  ;;  %21139 = vmatpush3.msk.msra.mxu1 %vm337_vm1, %v6535_v27 }
 0x18a   : > { %20506 = vmatpush1.msk.msra.mxu0 %vm337_vm1, %v6533_v28  ;;  %v6885_v30 = vpop.permute.xlu0 %6884  ;;  %v6887_v31 = vpop.permute.xlu1 %6886  ;;  %21140 = vmatprep.mubr.msk.f32.mxu1 %vm21746_vm4, %v21736_v13  ;;  %v11226_v28 = vld [vmem:[%s22718_s16 + $0x8] sm:$0x3f] }
 0x18b   : > { %v6898_v54 = vsel %vm24202_vm14, %v6885_v30, %v6887_v31  ;;  %20507 = vmatmul.mubr.msk.f32.vlgmr.msra.gmra.mrb[2].mxu0 %vm333_vm2, %v20498_v15  ;;  %21141 = vmatmul.mubr.msk.f32.vlgmr.msra.gmra.mrb[36].mxu1 %vm333_vm2, %v20498_v15  ;;  %v10880_v15 = vcombine.high %v10860_v0, %v10860_v0 }
 0x18c   : > { %9818 = vrot.lane.b32.xlu0 %v22391_v37, %s21762_s26  ;;  %9824 = vrot.lane.b32.xlu1 %v22423_v45, %s21762_s26  ;;  %v9816_v37 = vrot.slane %v9802_v16, %v21820_v5  ;;  %v22756_v45 = vcombine.high %v22745_v32, %v22745_v32 }
 0x18d   : > { %20511 = vmatprep.subr.msk.mxu0 %vm337_vm1, %v6898_v54  ;;  %7055 = vmatprep.mubr.f32.mxu1 %v21736_v13  ;;  %v10894_v22 = vrot.slane %v10880_v15, %v21820_v5  ;;  %v11246_v54 = vcombine.high %v11226_v28, %v11226_v28 }
 0x18e   : > { %v6883_v33 = vpop.permute.xlu0 %6882  ;;  %v6889_v34 = vpop.permute.xlu1 %6888  ;;  %6984 = vmatprep.mubr.f32.mxu0 %v21736_v13 }
 0x18f   : > { %v6897_v35 = vsel %vm24202_vm14, %v6883_v33, %v6885_v30  ;;  %v6899_v43 = vsel %vm24202_vm14, %v6887_v31, %v6889_v34  ;;  %v11253_v31 = vrot.slane %v11226_v28, %v21820_v5 }
 0x190   : > { %9826 = vrot.lane.b32.xlu0 %v9809_v10, %s21762_s26  ;;  %9828 = vrot.lane.b32.xlu1 %v9817_v58, %s21762_s26 }
 0x191   : > { %20512 = vmatpush1.msk.msra.mxu0 %vm337_vm1, %v6897_v35  ;;  %v11261_v35 = vcombine.high %v11253_v31, %v11253_v31 }
 0x192   : > { %v6891_v39 = vpop.permute.xlu0 %6890  ;;  %v6893_v40 = vpop.permute.xlu1 %6892  ;;  %20513 = vmatmul.mubr.msk.f32.vlgmr.msra.gmra.mrb[0].mxu0 %vm333_vm2, %v20510_v38 }
 0x193   : > { %v6900_v41 = vsel %vm24202_vm14, %v6889_v34, %v6891_v39  ;;  %7126 = vmatprep.mubr.f32.mxu0 %v21736_v13  ;;  %v6901_v48 = vsel %vm24202_vm14, %v6891_v39, %v6893_v40 }
 0x194   : > { %9830 = vrot.lane.b32.xlu0 %v9816_v37, %s21762_s26  ;;  %10532 = vrot.lane.b32.xlu1 %v22756_v45, %s21735_s27  ;;  %v11260_v37 = vrot.slane %v11246_v54, %v21820_v5 }
 0x195   : > { %20514 = vmatprep.subr.msk.mxu1 %vm337_vm1, %v6900_v41 }
 0x196   : > { %20515 = vmatpush1.msk.msra.mxu1 %vm337_vm1, %v6899_v43  ;;  %v6895_v44 = vpop.permute.xlu0 %6894  ;;  %v7252_v59 = vpop.permute.xlu1 %7251 }
 0x197   : > { %21143 = vmatprep.subr.mxu1 %v21736_v13  ;;  %20516 = vmatmul.mubr.msk.f32.vlgmr.msra.gmra.mrb[0].mxu1 %vm333_vm2, %v20510_v38  ;;  %v6902_v46 = vsel %vm24202_vm14, %v6893_v40, %v6895_v44  ;;  %vm24204_vm14 = vcmask 441344  }
 0x198   : > { %21144 = vmatpush3.msk.msra.mxu1 %vm337_vm1, %v6895_v44  ;;  %10534 = vrot.lane.b32.xlu0 %v22769_v42, %s21735_s27 }
 0x199   : > { %10530 = vrot.lane.b32.xlu1 %v22745_v32, %s21735_s27  ;;  %20517 = vmatprep.subr.msk.mxu0 %vm337_vm1, %v6902_v46 }
 0x19a   : > { %20518 = vmatpush1.msk.msra.mxu0 %vm337_vm1, %v6901_v48  ;;  %v7254_v51 = vpop.permute.xlu0 %7253  ;;  %v7250_v52 = vpop.permute.xlu1 %7249  ;;  %21145 = vmatprep.mubr.msk.f32.mxu1 %vm21746_vm4, %v21736_v13 }
 0x19b   : > { %v7264_v11 = vsel %vm24203_vm15, %v7250_v52, %v7252_v59  ;;  %v7265_v14 = vsel %vm24203_vm15, %v7252_v59, %v7254_v51  ;;  %20519 = vmatmul.mubr.msk.f32.vlgmr.msra.gmra.mrb[2].mxu0 %vm333_vm2, %v20510_v38  ;;  %21146 = vmatmul.mubr.msk.f32.vlgmr.msra.gmra.mrb[38].mxu1 %vm333_vm2, %v20510_v38  ;;  %v11592_v59 = vld [vmem:[%s22718_s16 + $0x8] sm:$0x3f] }
 0x19c   : > { %10536 = vrot.lane.b32.xlu0 %v22783_v47, %s21735_s27  ;;  %20523 = vmatprep.subr.msk.mxu0 %vm337_vm1, %v7265_v14  ;;  %v11619_v48 = vrot.slane %v11592_v59, %v21820_v5  ;;  %v11612_v52 = vcombine.high %v11592_v59, %v11592_v59 }
 0x19d   : > { %10538 = vrot.lane.b32.xlu1 %v10521_v49, %s21735_s27  ;;  %20524 = vmatpush1.msk.msra.mxu0 %vm337_vm1, %v7264_v11 }
 0x19e   : > { %v7256_v56 = vpop.permute.xlu0 %7255  ;;  %v7258_v57 = vpop.permute.xlu1 %7257  ;;  %7422 = vmatprep.mubr.f32.mxu1 %v21736_v13  ;;  %7351 = vmatprep.mubr.f32.mxu0 %v21736_v13  ;;  %v11627_v11 = vcombine.high %v11619_v48, %v11619_v48 }
 0x19f   : > { %v7266_v17 = vsel %vm24203_vm15, %v7254_v51, %v7256_v56  ;;  %v7267_v60 = vsel %vm24203_vm15, %v7256_v56, %v7258_v57  ;;  %20525 = vmatmul.mubr.msk.f32.vlgmr.msra.gmra.mrb[0].mxu0 %vm333_vm2, %v20522_v9  ;;  %v11626_v56 = vrot.slane %v11612_v52, %v21820_v5 }
 0x1a0   : > { %10540 = vrot.lane.b32.xlu0 %v10529_v53, %s21735_s27  ;;  %20526 = vmatprep.subr.msk.mxu1 %vm337_vm1, %v7267_v60 }
 0x1a1   : > { %10542 = vrot.lane.b32.xlu1 %v10528_v55, %s21735_s27  ;;  %20527 = vmatpush1.msk.msra.mxu1 %vm337_vm1, %v7266_v17 }
 0x1a2   : > { %v7260_v61 = vpop.permute.xlu0 %7259  ;;  %21148 = vmatprep.subr.mxu1 %v21736_v13  ;;  %v7262_v63 = vpop.permute.xlu1 %7261  ;;  %20528 = vmatmul.mubr.msk.f32.vlgmr.msra.gmra.mrb[0].mxu1 %vm333_vm2, %v20522_v9 }
 0x1a3   : > { %v7268_v1 = vsel %vm24203_vm15, %v7258_v57, %v7260_v61  ;;  %21149 = vmatpush3.msk.msra.mxu1 %vm337_vm1, %v7262_v63  ;;  %v7269_v2 = vsel %vm24203_vm15, %v7260_v61, %v7262_v63  ;;  %7493 = vmatprep.mubr.f32.mxu0 %v21736_v13  ;;  %vm24205_vm15 = vcmask 375808   ;;  %v20558_v57 = vld [vmem:[%s24175_s2 + $0x2c] sm:$0x3] }
 0x1a4   : > { %10898 = vrot.lane.b32.xlu0 %v22756_v45, %s21737_s28  ;;  %20529 = vmatprep.subr.msk.mxu0 %vm337_vm1, %v7269_v2 }
 0x1a5   : > { %10900 = vrot.lane.b32.xlu1 %v22769_v42, %s21737_s28  ;;  %20530 = vmatpush1.msk.msra.mxu0 %vm337_vm1, %v7268_v1  ;;  %v11958_v1 = vld [vmem:[%s22718_s16 + $0x8] sm:$0x3f] }
 0x1a6   : > { %v7619_v6 = vpop.permute.xlu0 %7618  ;;  %v7621_v7 = vpop.permute.xlu1 %7620  ;;  %20531 = vmatmul.mubr.msk.f32.vlgmr.msra.gmra.mrb[2].mxu0 %vm333_vm2, %v20522_v9  ;;  %21150 = vmatprep.mubr.msk.f32.mxu1 %vm21746_vm4, %v21736_v13 }
 0x1a7   : > { %v7632_v12 = vsel %vm24204_vm14, %v7619_v6, %v7621_v7  ;;  %21151 = vmatmul.mubr.msk.f32.vlgmr.msra.gmra.mrb[40].mxu1 %vm333_vm2, %v20522_v9  ;;  %7718 = vmatprep.mubr.f32.mxu0 %v21736_v13 }
 0x1a8   : > { %10896 = vrot.lane.b32.xlu0 %v22745_v32, %s21737_s28  ;;  %20535 = vmatprep.subr.msk.mxu0 %vm337_vm1, %v7632_v12 }
 0x1a9   : > { %10902 = vrot.lane.b32.xlu1 %v22783_v47, %s21737_s28  ;;  %7789 = vmatprep.mubr.f32.mxu1 %v21736_v13 }
 0x1aa   : > { %v7617_v19 = vpop.permute.xlu0 %7616  ;;  %v7623_v20 = vpop.permute.xlu1 %7622 }
 0x1ab   : > { %v7631_v21 = vsel %vm24204_vm14, %v7617_v19, %v7619_v6  ;;  %v7633_v27 = vsel %vm24204_vm14, %v7621_v7, %v7623_v20  ;;  %v11985_v6 = vrot.slane %v11958_v1, %v21820_v5  ;;  %v11978_v7 = vcombine.high %v11958_v1, %v11958_v1 }
 0x1ac   : > { %10904 = vrot.lane.b32.xlu0 %v10887_v4, %s21737_s28  ;;  %20536 = vmatpush1.msk.msra.mxu0 %vm337_vm1, %v7631_v21 }
 0x1ad   : > { %10906 = vrot.lane.b32.xlu1 %v10895_v18, %s21737_s28  ;;  %20537 = vmatmul.mubr.msk.f32.vlgmr.msra.gmra.mrb[0].mxu0 %vm333_vm2, %v20534_v23  ;;  %v11992_v21 = vrot.slane %v11978_v7, %v21820_v5 }
 0x1ae   : > { %v7625_v24 = vpop.permute.xlu0 %7624  ;;  %v7627_v25 = vpop.permute.xlu1 %7626  ;;  %7860 = vmatprep.mubr.f32.mxu0 %v21736_v13 }
 0x1af   : > { %v7634_v26 = vsel %vm24204_vm14, %v7623_v20, %v7625_v24  ;;  %v7635_v30 = vsel %vm24204_vm14, %v7625_v24, %v7627_v25  ;;  %v11993_v20 = vcombine.high %v11985_v6, %v11985_v6 }
 0x1b0   : > { %10908 = vrot.lane.b32.xlu0 %v10894_v22, %s21737_s28  ;;  %20538 = vmatprep.subr.msk.mxu1 %vm337_vm1, %v7634_v26  ;;  %v20570_v22 = vld [vmem:[%s24175_s2 + $0x2e] sm:$0x3] }
 0x1b1   : > { %11264 = vrot.lane.b32.xlu1 %v22756_v45, %s21738_s29  ;;  %20539 = vmatpush1.msk.msra.mxu1 %vm337_vm1, %v7633_v27 }
 0x1b2   : > { %v7629_v8 = vpop.permute.xlu0 %7628  ;;  %21153 = vmatprep.subr.mxu1 %v21736_v13  ;;  %v7986_v10 = vpop.permute.xlu1 %7985  ;;  %20540 = vmatmul.mubr.msk.f32.vlgmr.msra.gmra.mrb[0].mxu1 %vm333_vm2, %v20534_v23 }
 0x1b3   : > { %21154 = vmatpush3.msk.msra.mxu1 %vm337_vm1, %v7629_v8  ;;  %v7636_v29 = vsel %vm24204_vm14, %v7627_v25, %v7629_v8  ;;  %21155 = vmatprep.mubr.msk.f32.mxu1 %vm21746_vm4, %v21736_v13  ;;  %vm24206_vm14 = vcmask 367616  }
 0x1b4   : > { %11266 = vrot.lane.b32.xlu0 %v22769_v42, %s21738_s29  ;;  %20541 = vmatprep.subr.msk.mxu0 %vm337_vm1, %v7636_v29 }
 0x1b5   : > { %11262 = vrot.lane.b32.xlu1 %v22745_v32, %s21738_s29  ;;  %20542 = vmatpush1.msk.msra.mxu0 %vm337_vm1, %v7635_v30 }
 0x1b6   : > { %v7988_v58 = vpop.permute.xlu0 %7987  ;;  %v7984_v16 = vpop.permute.xlu1 %7983  ;;  %20543 = vmatmul.mubr.msk.f32.vlgmr.msra.gmra.mrb[2].mxu0 %vm333_vm2, %v20534_v23  ;;  %21156 = vmatmul.mubr.msk.f32.vlgmr.msra.gmra.mrb[42].mxu1 %vm333_vm2, %v20534_v23 }
 0x1b7   : > { %v7998_v33 = vsel %vm24205_vm15, %v7984_v16, %v7986_v10  ;;  %v7999_v34 = vsel %vm24205_vm15, %v7986_v10, %v7988_v58  ;;  %8156 = vmatprep.mubr.f32.mxu1 %v21736_v13  ;;  %8085 = vmatprep.mubr.f32.mxu0 %v21736_v13  ;;  %v12324_v10 = vld [vmem:[%s22718_s16 + $0x8] sm:$0x3f] }
 0x1b8   : > { %11268 = vrot.lane.b32.xlu0 %v22783_v47, %s21738_s29  ;;  %20547 = vmatprep.subr.msk.mxu0 %vm337_vm1, %v7999_v34  ;;  %v12351_v30 = vrot.slane %v12324_v10, %v21820_v5  ;;  %v12344_v16 = vcombine.high %v12324_v10, %v12324_v10 }
 0x1b9   : > { %11270 = vrot.lane.b32.xlu1 %v11253_v31, %s21738_s29  ;;  %20548 = vmatpush1.msk.msra.mxu0 %vm337_vm1, %v7998_v33 }
 0x1ba   : > { %v7990_v38 = vpop.permute.xlu0 %7989  ;;  %v7992_v39 = vpop.permute.xlu1 %7991  ;;  %20549 = vmatmul.mubr.msk.f32.vlgmr.msra.gmra.mrb[0].mxu0 %vm333_vm2, %v20546_v36  ;;  %v12359_v33 = vcombine.high %v12351_v30, %v12351_v30 }
 0x1bb   : > { %v8000_v40 = vsel %vm24205_vm15, %v7988_v58, %v7990_v38  ;;  %v8001_v41 = vsel %vm24205_vm15, %v7990_v38, %v7992_v39  ;;  %8227 = vmatprep.mubr.f32.mxu0 %v21736_v13  ;;  %v20582_v38 = vld [vmem:[%s24175_s2 + $0x30] sm:$0x3] }
 0x1bc   : > { %11272 = vrot.lane.b32.xlu0 %v11261_v35, %s21738_s29  ;;  %20550 = vmatprep.subr.msk.mxu1 %vm337_vm1, %v8001_v41 }
 0x1bd   : > { %11274 = vrot.lane.b32.xlu1 %v11260_v37, %s21738_s29  ;;  %20551 = vmatpush1.msk.msra.mxu1 %vm337_vm1, %v8000_v40 }
 0x1be   : > { %v7994_v43 = vpop.permute.xlu0 %7993  ;;  %21158 = vmatprep.subr.mxu1 %v21736_v13  ;;  %v7996_v44 = vpop.permute.xlu1 %7995  ;;  %20552 = vmatmul.mubr.msk.f32.vlgmr.msra.gmra.mrb[0].mxu1 %vm333_vm2, %v20546_v36 }
 0x1bf   : > { %v8002_v62 = vsel %vm24205_vm15, %v7992_v39, %v7994_v43  ;;  %21159 = vmatpush3.msk.msra.mxu1 %vm337_vm1, %v7996_v44  ;;  %v8003_v46 = vsel %vm24205_vm15, %v7994_v43, %v7996_v44  ;;  %21160 = vmatprep.mubr.msk.f32.mxu1 %vm21746_vm4, %v21736_v13  ;;  %vm24207_vm15 = vcmask 359424  }
 0x1c0   : > { %11630 = vrot.lane.b32.xlu0 %v22756_v45, %s21739_s30  ;;  %20553 = vmatprep.subr.msk.mxu0 %vm337_vm1, %v8003_v46 }
 0x1c1   : > { %11632 = vrot.lane.b32.xlu1 %v22769_v42, %s21739_s30  ;;  %20554 = vmatpush1.msk.msra.mxu0 %vm337_vm1, %v8002_v62  ;;  %v12690_v62 = vld [vmem:[%s22718_s16 + $0x8] sm:$0x3f] }
 0x1c2   : > { %v8353_v49 = vpop.permute.xlu0 %8352  ;;  %v8355_v50 = vpop.permute.xlu1 %8354  ;;  %20555 = vmatmul.mubr.msk.f32.vlgmr.msra.gmra.mrb[2].mxu0 %vm333_vm2, %v20546_v36  ;;  %21161 = vmatmul.mubr.msk.f32.vlgmr.msra.gmra.mrb[44].mxu1 %vm333_vm2, %v20546_v36  ;;  %v12358_v36 = vrot.slane %v12344_v16, %v21820_v5 }
 0x1c3   : > { %v8366_v51 = vsel %vm24206_vm14, %v8353_v49, %v8355_v50  ;;  %8523 = vmatprep.mubr.f32.mxu1 %v21736_v13  ;;  %8452 = vmatprep.mubr.f32.mxu0 %v21736_v13 }
 0x1c4   : > { %11628 = vrot.lane.b32.xlu0 %v22745_v32, %s21739_s30  ;;  %20559 = vmatprep.subr.msk.mxu0 %vm337_vm1, %v8366_v51 }
 0x1c5   : > { %11634 = vrot.lane.b32.xlu1 %v22783_v47, %s21739_s30 }
 0x1c6   : > { %v8351_v14 = vpop.permute.xlu0 %8350  ;;  %v8357_v53 = vpop.permute.xlu1 %8356 }
 0x1c7   : > { %v8365_v55 = vsel %vm24206_vm14, %v8351_v14, %v8353_v49  ;;  %v8367_v61 = vsel %vm24206_vm14, %v8355_v50, %v8357_v53  ;;  %v12717_v49 = vrot.slane %v12690_v62, %v21820_v5  ;;  %v12710_v50 = vcombine.high %v12690_v62, %v12690_v62 }
 0x1c8   : > { %11636 = vrot.lane.b32.xlu0 %v11619_v48, %s21739_s30  ;;  %20560 = vmatpush1.msk.msra.mxu0 %vm337_vm1, %v8365_v55 }
 0x1c9   : > { %11638 = vrot.lane.b32.xlu1 %v11627_v11, %s21739_s30  ;;  %20561 = vmatmul.mubr.msk.f32.vlgmr.msra.gmra.mrb[0].mxu0 %vm333_vm2, %v20558_v57  ;;  %v12724_v55 = vrot.slane %v12710_v50, %v21820_v5 }
 0x1ca   : > { %v8359_v9 = vpop.permute.xlu0 %8358  ;;  %v8361_v17 = vpop.permute.xlu1 %8360  ;;  %8594 = vmatprep.mubr.f32.mxu0 %v21736_v13 }
 0x1cb   : > { %v8368_v60 = vsel %vm24206_vm14, %v8357_v53, %v8359_v9  ;;  %v8369_v4 = vsel %vm24206_vm14, %v8359_v9, %v8361_v17  ;;  %v12725_v53 = vcombine.high %v12717_v49, %v12717_v49 }
 0x1cc   : > { %11640 = vrot.lane.b32.xlu0 %v11626_v56, %s21739_s30  ;;  %20562 = vmatprep.subr.msk.mxu1 %vm337_vm1, %v8368_v60  ;;  %v20594_v56 = vld [vmem:[%s24175_s2 + $0x32] sm:$0x3] }
 0x1cd   : > { %11996 = vrot.lane.b32.xlu1 %v22756_v45, %s21740_s7  ;;  %20563 = vmatpush1.msk.msra.mxu1 %vm337_vm1, %v8367_v61 }
 0x1ce   : > { %v8363_v63 = vpop.permute.xlu0 %8362  ;;  %21163 = vmatprep.subr.mxu1 %v21736_v13  ;;  %v8720_v0 = vpop.permute.xlu1 %8719  ;;  %20564 = vmatmul.mubr.msk.f32.vlgmr.msra.gmra.mrb[0].mxu1 %vm333_vm2, %v20558_v57 }
 0x1cf   : > { %21164 = vmatpush3.msk.msra.mxu1 %vm337_vm1, %v8363_v63  ;;  %v8370_v2 = vsel %vm24206_vm14, %v8361_v17, %v8363_v63  ;;  %21165 = vmatprep.mubr.msk.f32.mxu1 %vm21746_vm4, %v21736_v13  ;;  %vm24208_vm14 = vcmask 293888  }
 0x1d0   : > { %11998 = vrot.lane.b32.xlu0 %v22769_v42, %s21740_s7  ;;  %20565 = vmatprep.subr.msk.mxu0 %vm337_vm1, %v8370_v2 }
 0x1d1   : > { %11994 = vrot.lane.b32.xlu1 %v22745_v32, %s21740_s7  ;;  %20566 = vmatpush1.msk.msra.mxu0 %vm337_vm1, %v8369_v4 }
 0x1d2   : > { %v8722_v12 = vpop.permute.xlu0 %8721  ;;  %v8718_v15 = vpop.permute.xlu1 %8717  ;;  %20567 = vmatmul.mubr.msk.f32.vlgmr.msra.gmra.mrb[2].mxu0 %vm333_vm2, %v20558_v57  ;;  %21166 = vmatmul.mubr.msk.f32.vlgmr.msra.gmra.mrb[46].mxu1 %vm333_vm2, %v20558_v57 }
 0x1d3   : > { %v8732_v18 = vsel %vm24207_vm15, %v8718_v15, %v8720_v0  ;;  %v8733_v19 = vsel %vm24207_vm15, %v8720_v0, %v8722_v12  ;;  %8890 = vmatprep.mubr.f32.mxu1 %v21736_v13  ;;  %8819 = vmatprep.mubr.f32.mxu0 %v21736_v13  ;;  %v13056_v0 = vld [vmem:[%s22718_s16 + $0x8] sm:$0x3f] }
 0x1d4   : > { %12000 = vrot.lane.b32.xlu0 %v22783_v47, %s21740_s7  ;;  %20571 = vmatprep.subr.msk.mxu0 %vm337_vm1, %v8733_v19  ;;  %v13083_v4 = vrot.slane %v13056_v0, %v21820_v5  ;;  %v13076_v15 = vcombine.high %v13056_v0, %v13056_v0 }
 0x1d5   : > { %12002 = vrot.lane.b32.xlu1 %v11985_v6, %s21740_s7  ;;  %20572 = vmatpush1.msk.msra.mxu0 %vm337_vm1, %v8732_v18 }
 0x1d6   : > { %v8724_v23 = vpop.permute.xlu0 %8723  ;;  %v8726_v24 = vpop.permute.xlu1 %8725  ;;  %20573 = vmatmul.mubr.msk.f32.vlgmr.msra.gmra.mrb[0].mxu0 %vm333_vm2, %v20570_v22  ;;  %v13091_v18 = vcombine.high %v13083_v4, %v13083_v4 }
 0x1d7   : > { %v8734_v25 = vsel %vm24207_vm15, %v8722_v12, %v8724_v23  ;;  %v8735_v26 = vsel %vm24207_vm15, %v8724_v23, %v8726_v24  ;;  %8961 = vmatprep.mubr.f32.mxu0 %v21736_v13  ;;  %v13090_v23 = vrot.slane %v13076_v15, %v21820_v5 }
 0x1d8   : > { %12004 = vrot.lane.b32.xlu0 %v11993_v20, %s21740_s7  ;;  %20574 = vmatprep.subr.msk.mxu1 %vm337_vm1, %v8735_v26 }
 0x1d9   : > { %12006 = vrot.lane.b32.xlu1 %v11992_v21, %s21740_s7  ;;  %20575 = vmatpush1.msk.msra.mxu1 %vm337_vm1, %v8734_v25  ;;  %v20606_v21 = vld [vmem:[%s24175_s2 + $0x34] sm:$0x3]  ;;  %s24211_s7 = smov 55  }
 0x1da   : > { %v8728_v27 = vpop.permute.xlu0 %8727  ;;  %21168 = vmatprep.subr.mxu1 %v21736_v13  ;;  %v8730_v8 = vpop.permute.xlu1 %8729  ;;  %20576 = vmatmul.mubr.msk.f32.vlgmr.msra.gmra.mrb[0].mxu1 %vm333_vm2, %v20570_v22 }
 0x1db   : > { %v8736_v28 = vsel %vm24207_vm15, %v8726_v24, %v8728_v27  ;;  %21169 = vmatpush3.msk.msra.mxu1 %vm337_vm1, %v8730_v8  ;;  %v8737_v29 = vsel %vm24207_vm15, %v8728_v27, %v8730_v8  ;;  %21170 = vmatprep.mubr.msk.f32.mxu1 %vm21746_vm4, %v21736_v13  ;;  %vm9465_vm15 = vcmask 285696   ;;  %v10148_v8 = vld [vmem:[%s22718_s16 + $0x8] sm:$0x3f] }
 0x1dc   : > { %12362 = vrot.lane.b32.xlu0 %v22756_v45, %s21741_s8  ;;  %20577 = vmatprep.subr.msk.mxu0 %vm337_vm1, %v8737_v29  ;;  %v13422_v29 = vld [vmem:[%s22718_s16 + $0x8] sm:$0xff] }
 0x1dd   : > { %12364 = vrot.lane.b32.xlu1 %v22769_v42, %s21741_s8  ;;  %20578 = vmatpush1.msk.msra.mxu0 %vm337_vm1, %v8736_v28 }
 0x1de   : > { %v9087_v31 = vpop.permute.xlu0 %9086  ;;  %v9089_v54 = vpop.permute.xlu1 %9088  ;;  %20579 = vmatmul.mubr.msk.f32.vlgmr.msra.gmra.mrb[2].mxu0 %vm333_vm2, %v20570_v22  ;;  %21171 = vmatmul.mubr.msk.f32.vlgmr.msra.gmra.mrb[48].mxu1 %vm333_vm2, %v20570_v22 }
 0x1df   : > { %v9100_v58 = vsel %vm24208_vm14, %v9087_v31, %v9089_v54  ;;  %9257 = vmatprep.mubr.f32.mxu1 %v21736_v13  ;;  %9186 = vmatprep.mubr.f32.mxu0 %v21736_v13 }
 0x1e0   : > { %12360 = vrot.lane.b32.xlu0 %v22745_v32, %s21741_s8  ;;  %20583 = vmatprep.subr.msk.mxu0 %vm337_vm1, %v9100_v58  ;;  %v23115_v58 = vrot.slane %v13422_v29, %v21820_v5 }
 0x1e1   : > { %12366 = vrot.lane.b32.xlu1 %v22783_v47, %s21741_s8 }
 0x1e2   : > { %v9085_v34 = vpop.permute.xlu0 %9084  ;;  %v9091_v35 = vpop.permute.xlu1 %9090 }
 0x1e3   : > { %v9099_v37 = vsel %vm24208_vm14, %v9085_v34, %v9087_v31  ;;  %v9101_v43 = vsel %vm24208_vm14, %v9089_v54, %v9091_v35  ;;  %v10175_v31 = vrot.slane %v10148_v8, %v21820_v5 }
 0x1e4   : > { %12368 = vrot.lane.b32.xlu0 %v12351_v30, %s21741_s8  ;;  %20584 = vmatpush1.msk.msra.mxu0 %vm337_vm1, %v9099_v37  ;;  %v13442_v37 = vcombine.high %v13422_v29, %v13422_v29 }
 0x1e5   : > { %12370 = vrot.lane.b32.xlu1 %v12359_v33, %s21741_s8  ;;  %20585 = vmatmul.mubr.msk.f32.vlgmr.msra.gmra.mrb[0].mxu0 %vm333_vm2, %v20582_v38  ;;  %v10168_v33 = vcombine.high %v10148_v8, %v10148_v8 }
 0x1e6   : > { %v9093_v39 = vpop.permute.xlu0 %9092  ;;  %v9095_v40 = vpop.permute.xlu1 %9094  ;;  %9328 = vmatprep.mubr.f32.mxu0 %v21736_v13 }
 0x1e7   : > { %v9102_v41 = vsel %vm24208_vm14, %v9091_v35, %v9093_v39  ;;  %v9103_v48 = vsel %vm24208_vm14, %v9093_v39, %v9095_v40  ;;  %v10183_v35 = vcombine.high %v10175_v31, %v10175_v31  ;;  %v10182_v39 = vrot.slane %v10168_v33, %v21820_v5 }
 0x1e8   : > { %12372 = vrot.lane.b32.xlu0 %v12358_v36, %s21741_s8  ;;  %20586 = vmatprep.subr.msk.mxu1 %vm337_vm1, %v9102_v41  ;;  %v10146_v36 = vld [vmem:[%s24176_s3] sm:$0x3] }
 0x1e9   : > { %12728 = vrot.lane.b32.xlu1 %v22756_v45, %s21742_s9  ;;  %20587 = vmatpush1.msk.msra.mxu1 %vm337_vm1, %v9101_v43  ;;  %v23144_v43 = vrot.slane %v13442_v37, %v21820_v5 }
 0x1ea   : > { %v9097_v44 = vpop.permute.xlu0 %9096  ;;  %21173 = vmatprep.subr.mxu1 %v21736_v13  ;;  %v9454_v59 = vpop.permute.xlu1 %9453  ;;  %20588 = vmatmul.mubr.msk.f32.vlgmr.msra.gmra.mrb[0].mxu1 %vm333_vm2, %v20582_v38 }
 0x1eb   : > { %21174 = vmatpush3.msk.msra.mxu1 %vm337_vm1, %v9097_v44  ;;  %v9104_v46 = vsel %vm24208_vm14, %v9095_v40, %v9097_v44  ;;  %21175 = vmatprep.mubr.msk.f32.mxu1 %vm21746_vm4, %v21736_v13  ;;  %vm9832_vm14 = vcmask 277504   ;;  %v23139_v40 = vcombine.high %v23115_v58, %v23115_v58 }
 0x1ec   : > { %12730 = vrot.lane.b32.xlu0 %v22769_v42, %s21742_s9  ;;  %20589 = vmatprep.subr.msk.mxu0 %vm337_vm1, %v9104_v46 }
 0x1ed   : > { %12726 = vrot.lane.b32.xlu1 %v22745_v32, %s21742_s9  ;;  %20590 = vmatpush1.msk.msra.mxu0 %vm337_vm1, %v9103_v48  ;;  %v23160_v48 = vcombine.high %v23144_v43, %v23144_v43 }
 0x1ee   : > { %v9456_v51 = vpop.permute.xlu0 %9455  ;;  %v9452_v52 = vpop.permute.xlu1 %9451  ;;  %20591 = vmatmul.mubr.msk.f32.vlgmr.msra.gmra.mrb[2].mxu0 %vm333_vm2, %v20582_v38  ;;  %21176 = vmatmul.mubr.msk.f32.vlgmr.msra.gmra.mrb[50].mxu1 %vm333_vm2, %v20582_v38 }
 0x1ef   : > { %v9466_v11 = vsel %vm9465_vm15, %v9452_v52, %v9454_v59  ;;  %v9467_v14 = vsel %vm9465_vm15, %v9454_v59, %v9456_v51  ;;  %9624 = vmatprep.mubr.f32.mxu1 %v21736_v13  ;;  %9553 = vmatprep.mubr.f32.mxu0 %v21736_v13 }
 0x1f0   : > { %12732 = vrot.lane.b32.xlu0 %v22783_v47, %s21742_s9  ;;  %20595 = vmatprep.subr.msk.mxu0 %vm337_vm1, %v9467_v14 }
 0x1f1   : > { %12734 = vrot.lane.b32.xlu1 %v12717_v49, %s21742_s9  ;;  %20596 = vmatpush1.msk.msra.mxu0 %vm337_vm1, %v9466_v11  ;;  %v20629_v11 = vld [vmem:[%s24176_s3 + $0x2] sm:$0x3] }
 0x1f2   : > { %v9458_v57 = vpop.permute.xlu0 %9457  ;;  %v9460_v9 = vpop.permute.xlu1 %9459  ;;  %20597 = vmatmul.mubr.msk.f32.vlgmr.msra.gmra.mrb[0].mxu0 %vm333_vm2, %v20594_v56 }
 0x1f3   : > { %v9468_v17 = vsel %vm9465_vm15, %v9456_v51, %v9458_v57  ;;  %v9469_v60 = vsel %vm9465_vm15, %v9458_v57, %v9460_v9  ;;  %9695 = vmatprep.mubr.f32.mxu0 %v21736_v13  ;;  %v14161_v57 = vld [vmem:[%s22718_s16] sm:$0xff] }
 0x1f4   : > { %12736 = vrot.lane.b32.xlu0 %v12725_v53, %s21742_s9  ;;  %20598 = vmatprep.subr.msk.mxu1 %vm337_vm1, %v9469_v60 }
 0x1f5   : > { %12738 = vrot.lane.b32.xlu1 %v12724_v55, %s21742_s9  ;;  %20599 = vmatpush1.msk.msra.mxu1 %vm337_vm1, %v9468_v17  ;;  %s24224_s9 = smov 46  }
 0x1f6   : > { %v9462_v61 = vpop.permute.xlu0 %9461  ;;  %21178 = vmatprep.subr.mxu1 %v21736_v13  ;;  %v9464_v63 = vpop.permute.xlu1 %9463  ;;  %20600 = vmatmul.mubr.msk.f32.vlgmr.msra.gmra.mrb[0].mxu1 %vm333_vm2, %v20594_v56 }
 0x1f7   : > { %v9470_v1 = vsel %vm9465_vm15, %v9460_v9, %v9462_v61  ;;  %21179 = vmatpush3.msk.msra.mxu1 %vm337_vm1, %v9464_v63  ;;  %v9471_v2 = vsel %vm9465_vm15, %v9462_v61, %v9464_v63  ;;  %21180 = vmatprep.mubr.msk.f32.mxu1 %vm21746_vm4, %v21736_v13  ;;  %v23211_v61 = vrot.slane %v14161_v57, %v21820_v5 }
 0x1f8   : > { %13094 = vrot.lane.b32.xlu0 %v22756_v45, %s21743_s10  ;;  %20601 = vmatprep.subr.msk.mxu0 %vm337_vm1, %v9471_v2 }
 0x1f9   : > { %13096 = vrot.lane.b32.xlu1 %v22769_v42, %s21743_s10  ;;  %20602 = vmatpush1.msk.msra.mxu0 %vm337_vm1, %v9470_v1  ;;  %v23227_v2 = vcombine.high %v23211_v61, %v23211_v61 }
 0x1fa   : > { %v9821_v6 = vpop.permute.xlu0 %9820  ;;  %v9823_v7 = vpop.permute.xlu1 %9822  ;;  %20603 = vmatmul.mubr.msk.f32.vlgmr.msra.gmra.mrb[2].mxu0 %vm333_vm2, %v20594_v56  ;;  %21181 = vmatmul.mubr.msk.f32.vlgmr.msra.gmra.mrb[52].mxu1 %vm333_vm2, %v20594_v56 }
 0x1fb   : > { %v9834_v12 = vsel %vm9832_vm14, %v9821_v6, %v9823_v7  ;;  %9920 = vmatprep.mubr.f32.mxu0 %v21736_v13  ;;  %9991 = vmatprep.mubr.f32.mxu1 %v21736_v13 }
 0x1fc   : > { %13092 = vrot.lane.b32.xlu0 %v22745_v32, %s21743_s10  ;;  %20607 = vmatprep.subr.msk.mxu0 %vm337_vm1, %v9834_v12 }
 0x1fd   : > { %13098 = vrot.lane.b32.xlu1 %v22783_v47, %s21743_s10 }
 0x1fe   : > { %v9819_v19 = vpop.permute.xlu0 %9818  ;;  %v9825_v20 = vpop.permute.xlu1 %9824 }
 0x1ff   : > { %v9833_v22 = vsel %vm9832_vm14, %v9819_v19, %v9821_v6  ;;  %v9835_v27 = vsel %vm9832_vm14, %v9823_v7, %v9825_v20 }
 0x200   : > { %13100 = vrot.lane.b32.xlu0 %v13083_v4, %s21743_s10  ;;  %20608 = vmatpush1.msk.msra.mxu0 %vm337_vm1, %v9833_v22  ;;  %v14165_v4 = vcombine.high %v14161_v57, %v14161_v57 }
 0x201   : > { %13102 = vrot.lane.b32.xlu1 %v13091_v18, %s21743_s10  ;;  %20609 = vmatmul.mubr.msk.f32.vlgmr.msra.gmra.mrb[0].mxu0 %vm333_vm2, %v20606_v21 }
 0x202   : > { %v9827_v24 = vpop.permute.xlu0 %9826  ;;  %v9829_v25 = vpop.permute.xlu1 %9828  ;;  %10062 = vmatprep.mubr.f32.mxu0 %v21736_v13  ;;  %v23244_v19 = vrot.slane %v14165_v4, %v21820_v5 }
 0x203   : > { %v9836_v26 = vsel %vm9832_vm14, %v9825_v20, %v9827_v24  ;;  %v9837_v54 = vsel %vm9832_vm14, %v9827_v24, %v9829_v25 }
 0x204   : > { %13104 = vrot.lane.b32.xlu0 %v13090_v23, %s21743_s10  ;;  %20610 = vmatprep.subr.msk.mxu1 %vm337_vm1, %v9836_v26  ;;  %v23259_v23 = vcombine.high %v23244_v19, %v23244_v19  ;;  %s24238_s10 = smov 44  }
 0x205   : > { %13461 = vrot.lane.b32.xlu1 %v22756_v45, %s21744_s11  ;;  %20611 = vmatpush1.msk.msra.mxu1 %vm337_vm1, %v9835_v27 }
 0x206   : > { %v9831_v10 = vpop.permute.xlu0 %9830  ;;  %20612 = vmatmul.mubr.msk.f32.vlgmr.msra.gmra.mrb[0].mxu1 %vm333_vm2, %v20606_v21  ;;  %21183 = vmatprep.subr.mxu1 %v21736_v13  ;;  %v10533_v28 = vpop.permute.xlu1 %10532 }
 0x207   : > { %21184 = vmatpush3.msk.msra.mxu1 %vm337_vm1, %v9831_v10  ;;  %v9838_v30 = vsel %vm9832_vm14, %v9829_v25, %v9831_v10  ;;  %21185 = vmatprep.mubr.msk.f32.mxu1 %vm21746_vm4, %v21736_v13  ;;  %v20653_v25 = vld [vmem:[%s24176_s3 + $0x6] sm:$0x3] }
 0x208   : > { %13463 = vrot.lane.b32.xlu0 %v22769_v42, %s21744_s11  ;;  %20613 = vmatprep.subr.msk.mxu0 %vm337_vm1, %v9838_v30 }
 0x209   : > { %13459 = vrot.lane.b32.xlu1 %v22745_v32, %s21744_s11  ;;  %20614 = vmatpush1.msk.msra.mxu0 %vm337_vm1, %v9837_v54 }
 0x20a   : > { %v10535_v16 = vpop.permute.xlu0 %10534  ;;  %20615 = vmatmul.mubr.msk.f32.vlgmr.msra.gmra.mrb[2].mxu0 %vm333_vm2, %v20606_v21  ;;  %21186 = vmatmul.mubr.msk.f32.vlgmr.msra.gmra.mrb[54].mxu1 %vm333_vm2, %v20606_v21 }
 0x20b   : > { %v10531_v34 = vpop.permute.xlu1 %10530  ;;  %20618 = vmatprep.subr.msk.mxu0 %vm337_vm1, %v22756_v45  ;;  %20621 = vmatprep.subr.msk.mxu1 %vm337_vm1, %v22783_v47  ;;  %v10545_v44 = vsel %vm326_vm0, %v10533_v28, %v10535_v16 }
 0x20c   : > { %13465 = vrot.lane.b32.xlu0 %v22783_v47, %s21744_s11  ;;  %20619 = vmatpush1.msk.msra.mxu0 %vm337_vm1, %v22745_v32  ;;  %v10544_v49 = vsel %vm326_vm0, %v10531_v34, %v10533_v28 }
 0x20d   : > { %13467 = vrot.lane.b32.xlu1 %v23115_v58, %s21744_s11  ;;  %10265 = vmatprep.mubr.f32.mxu0 %v21736_v13 }
 0x20e   : > { %20622 = vmatpush1.msk.msra.mxu1 %vm337_vm1, %v22769_v42  ;;  %10336 = vmatprep.mubr.f32.mxu1 %v21736_v13  ;;  %v10537_v38 = vpop.permute.xlu0 %10536 }
 0x20f   : > { %20624 = vmatprep.subr.msk.mxu0 %vm337_vm1, %v10183_v35  ;;  %20620 = vmatmul.mubr.msk.f32.vlgmr.msra.gmra.mrb[0].mxu0 %vm333_vm2, %v10146_v36  ;;  %v10539_v41 = vpop.permute.xlu1 %10538  ;;  %v10546_v50 = vsel %vm326_vm0, %v10535_v16, %v10537_v38 }
 0x210   : > { %20623 = vmatmul.mubr.msk.f32.vlgmr.msra.gmra.mrb[0].mxu1 %vm333_vm2, %v10146_v36  ;;  %20625 = vmatpush1.msk.msra.mxu0 %vm337_vm1, %v10175_v31  ;;  %v10547_v59 = vsel %vm326_vm0, %v10537_v38, %v10539_v41  ;;  %v631_v31 = vpop.f32.mrb[2].mxu1 }
 0x211   : > { %21188 = vmatprep.subr.mxu1 %v21736_v13  ;;  %20630 = vmatprep.subr.msk.mxu0 %vm337_vm1, %v10545_v44  ;;  %v21057_v54 = vpop.f32.mrb[3].mxu1 }
 0x212   : > { %21189 = vmatpush3.msk.msra.mxu1 %vm337_vm1, %v10182_v39  ;;  %13469 = vrot.lane.b32.xlu0 %v23139_v40, %s21744_s11  ;;  %v10541_v62 = vpop.permute.xlu0 %10540  ;;  %v931_v33 = vpop.f32.mrb[4].mxu1  ;;  %v20665_v39 = vld [vmem:[%s24176_s3 + $0x8] sm:$0x3] }
 0x213   : > { %13471 = vrot.lane.b32.xlu1 %v23144_v43, %s21744_s11  ;;  %20633 = vmatprep.subr.msk.mxu1 %vm337_vm1, %v10547_v59  ;;  %v10543_v46 = vpop.permute.xlu1 %10542  ;;  %v10548_v53 = vsel %vm326_vm0, %v10539_v41, %v10541_v62  ;;  %v932_v37 = vadd.f32 %v931_v33, %v631_v31 }
 0x214   : > { %10407 = vmatprep.mubr.f32.mxu0 %v21736_v13  ;;  %21190 = vmatprep.mubr.msk.f32.mxu1 %vm21746_vm4, %v21736_v13  ;;  %v10549_v51 = vsel %vm326_vm0, %v10541_v62, %v10543_v46  ;;  %vm24212_vm0 = vcmask 146432  }
 0x215   : > { %20626 = vmatmul.mubr.msk.f32.vlgmr.msra.gmra.mrb[2].mxu0 %vm333_vm2, %v10146_v36  ;;  %21191 = vmatmul.mubr.msk.f32.vlgmr.msra.gmra.mrb[56].mxu1 %vm333_vm2, %v10146_v36  ;;  %v21062_v36 = vpop.f32.mrb[5].mxu1 }
 0x216   : > { %20631 = vmatpush1.msk.msra.mxu0 %vm337_vm1, %v10544_v49  ;;  %20634 = vmatpush1.msk.msra.mxu1 %vm337_vm1, %v10546_v50  ;;  %v10899_v52 = vpop.permute.xlu0 %10898  ;;  %v1291_v38 = vpop.f32.mrb[6].mxu1 }
 0x217   : > { %13473 = vrot.lane.b32.xlu0 %v23160_v48, %s21744_s11  ;;  %13831 = vrot.lane.b32.xlu1 %v22756_v45, %s21745_s14  ;;  %v10901_v14 = vpop.permute.xlu1 %10900  ;;  %v1301_v41 = vadd.f32 %v1291_v38, %v932_v37  ;;  %v21067_v44 = vpop.f32.mrb[7].mxu1  ;;  %s24210_s11 = smov 56  }
 0x218   : > { %20636 = vmatprep.subr.msk.mxu0 %vm337_vm1, %v10549_v51  ;;  %10631 = vmatprep.mubr.f32.mxu0 %v21736_v13  ;;  %v10911_v45 = vsel %vm988_vm3, %v10899_v52, %v10901_v14  ;;  %v1658_v62 = vpop.f32.mrb[8].mxu1 }
 0x219   : > { %10702 = vmatprep.mubr.f32.mxu1 %v21736_v13  ;;  %21193 = vmatprep.subr.mxu1 %v21736_v13  ;;  %v1668_v50 = vadd.f32 %v1658_v62, %v1301_v41  ;;  %v21072_v51 = vpop.f32.mrb[9].mxu1 }
 0x21a   : > { %20632 = vmatmul.mubr.msk.f32.vlgmr.msra.gmra.mrb[0].mxu0 %vm333_vm2, %v20629_v11  ;;  %20635 = vmatmul.mubr.msk.f32.vlgmr.msra.gmra.mrb[0].mxu1 %vm333_vm2, %v20629_v11  ;;  %v10897_v55 = vpop.permute.xlu0 %10896 }
 0x21b   : > { %20637 = vmatpush1.msk.msra.mxu0 %vm337_vm1, %v10548_v53  ;;  %21194 = vmatpush3.msk.msra.mxu1 %vm337_vm1, %v10543_v46  ;;  %v10903_v56 = vpop.permute.xlu1 %10902  ;;  %v10910_v9 = vsel %vm988_vm3, %v10897_v55, %v10899_v52  ;;  %v2025_v52 = vpop.f32.mrb[10].mxu1 }
 0x21c   : > { %13833 = vrot.lane.b32.xlu0 %v22769_v42, %s21745_s14  ;;  %13829 = vrot.lane.b32.xlu1 %v22745_v32, %s21745_s14  ;;  %v20641_v32 = vld [vmem:[%s24176_s3 + $0x4] sm:$0x3]  ;;  %v10912_v63 = vsel %vm988_vm3, %v10901_v14, %v10903_v56  ;;  %v2035_v14 = vadd.f32 %v2025_v52, %v1668_v50  ;;  %v21077_v53 = vpop.f32.mrb[11].mxu1 }
 0x21d   : > { %20642 = vmatprep.subr.msk.mxu0 %vm337_vm1, %v10911_v45  ;;  %21195 = vmatprep.mubr.msk.f32.mxu1 %vm21746_vm4, %v21736_v13  ;;  %v2392_v55 = vpop.f32.mrb[12].mxu1 }
 0x21e   : > { %21196 = vmatmul.mubr.msk.f32.vlgmr.msra.gmra.mrb[58].mxu1 %vm333_vm2, %v20629_v11  ;;  %10773 = vmatprep.mubr.f32.mxu0 %v21736_v13  ;;  %v10905_v17 = vpop.permute.xlu0 %10904 }
 0x21f   : > { %20638 = vmatmul.mubr.msk.f32.vlgmr.msra.gmra.mrb[2].mxu0 %vm333_vm2, %v20629_v11  ;;  %v10907_v60 = vpop.permute.xlu1 %10906  ;;  %v10913_v42 = vsel %vm988_vm3, %v10903_v56, %v10905_v17  ;;  %11068 = vmatprep.mubr.f32.mxu1 %v21736_v13 }
 0x220   : > { %13835 = vrot.lane.b32.xlu0 %v22783_v47, %s21745_s14  ;;  %13837 = vrot.lane.b32.xlu1 %v23115_v58, %s21745_s14  ;;  %v10914_v6 = vsel %vm988_vm3, %v10905_v17, %v10907_v60  ;;  %v21082_v17 = vpop.f32.mrb[13].mxu1 }
 0x221   : > { %20643 = vmatpush1.msk.msra.mxu0 %vm337_vm1, %v10910_v9  ;;  %20645 = vmatprep.subr.msk.mxu1 %vm337_vm1, %v10913_v42  ;;  %v2402_v9 = vadd.f32 %v2392_v55, %v2035_v14 }
 0x222   : > { %20646 = vmatpush1.msk.msra.mxu1 %vm337_vm1, %v10912_v63  ;;  %v10909_v0 = vpop.permute.xlu0 %10908  ;;  %10997 = vmatprep.mubr.f32.mxu0 %v21736_v13 }
 0x223   : > { %20647 = vmatmul.mubr.msk.f32.vlgmr.msra.gmra.mrb[0].mxu1 %vm333_vm2, %v20641_v32  ;;  %21198 = vmatprep.subr.mxu1 %v21736_v13  ;;  %v11265_v47 = vpop.permute.xlu1 %11264  ;;  %v10915_v1 = vsel %vm988_vm3, %v10907_v60, %v10909_v0  ;;  %v2759_v60 = vpop.f32.mrb[14].mxu1  ;;  %vm24213_vm3 = vmmov %vm24212_vm0 }
 0x224   : > { %13839 = vrot.lane.b32.xlu0 %v23139_v40, %s21745_s14  ;;  %13841 = vrot.lane.b32.xlu1 %v23144_v43, %s21745_s14  ;;  %v21087_v63 = vpop.f32.mrb[15].mxu1 }
 0x225   : > { %21199 = vmatpush3.msk.msra.mxu1 %vm337_vm1, %v10909_v0  ;;  %20648 = vmatprep.subr.msk.mxu0 %vm337_vm1, %v10915_v1 }
 0x226   : > { %20644 = vmatmul.mubr.msk.f32.vlgmr.msra.gmra.mrb[0].mxu0 %vm333_vm2, %v20641_v32  ;;  %21200 = vmatprep.mubr.msk.f32.mxu1 %vm21746_vm4, %v21736_v13  ;;  %v11267_v7 = vpop.permute.xlu0 %11266 }
 0x227   : > { %20649 = vmatpush1.msk.msra.mxu0 %vm337_vm1, %v10914_v6  ;;  %21201 = vmatmul.mubr.msk.f32.vlgmr.msra.gmra.mrb[60].mxu1 %vm333_vm2, %v20641_v32  ;;  %v11263_v12 = vpop.permute.xlu1 %11262  ;;  %v11277_v15 = vsel %vm1355_vm5, %v11265_v47, %v11267_v7 }
 0x228   : > { %13843 = vrot.lane.b32.xlu0 %v23160_v48, %s21745_s14  ;;  %14201 = vrot.lane.b32.xlu1 %v23227_v2, %s21747_s19  ;;  %v11276_v18 = vsel %vm1355_vm5, %v11263_v12, %v11265_v47  ;;  %v3126_v47 = vpop.f32.mrb[16].mxu1 }
 0x229   : > { %11139 = vmatprep.mubr.f32.mxu0 %v21736_v13  ;;  %20654 = vmatprep.subr.msk.mxu0 %vm337_vm1, %v11277_v15 }
 0x22a   : > { %20650 = vmatmul.mubr.msk.f32.vlgmr.msra.gmra.mrb[2].mxu0 %vm333_vm2, %v20641_v32  ;;  %v11269_v20 = vpop.permute.xlu0 %11268  ;;  %11434 = vmatprep.mubr.f32.mxu1 %v21736_v13  ;;  %v2769_v32 = vadd.f32 %v2759_v60, %v2402_v9  ;;  %v20689_v9 = vld [vmem:[%s24176_s3 + $0xc] sm:$0x3] }
 0x22b   : > { %20655 = vmatpush1.msk.msra.mxu0 %vm337_vm1, %v11276_v18  ;;  %v11278_v21 = vsel %vm1355_vm5, %v11267_v7, %v11269_v20  ;;  %v11271_v22 = vpop.permute.xlu1 %11270  ;;  %11363 = vmatprep.mubr.f32.mxu0 %v21736_v13  ;;  %v21092_v7 = vpop.f32.mrb[17].mxu1 }
 0x22c   : > { %14203 = vrot.lane.b32.xlu0 %v23244_v19, %s21747_s19  ;;  %14199 = vrot.lane.b32.xlu1 %v23211_v61, %s21747_s19  ;;  %v11279_v24 = vsel %vm1355_vm5, %v11269_v20, %v11271_v22  ;;  %v3136_v6 = vadd.f32 %v3126_v47, %v2769_v32  ;;  %v3493_v15 = vpop.f32.mrb[18].mxu1 }
 0x22d   : > { %20657 = vmatprep.subr.msk.mxu1 %vm337_vm1, %v11279_v24  ;;  %v21097_v20 = vpop.f32.mrb[19].mxu1 }
 0x22e   : > { %20658 = vmatpush1.msk.msra.mxu1 %vm337_vm1, %v11278_v21  ;;  %v11273_v26 = vpop.permute.xlu0 %11272  ;;  %20656 = vmatmul.mubr.msk.f32.vlgmr.msra.gmra.mrb[0].mxu0 %vm333_vm2, %v20653_v25  ;;  %v3503_v18 = vadd.f32 %v3493_v15, %v3136_v6  ;;  %v3864_v24 = vpop.f32.mrb[20].mxu1 }
 0x22f   : > { %v11280_v27 = vsel %vm1355_vm5, %v11271_v22, %v11273_v26  ;;  %20659 = vmatmul.mubr.msk.f32.vlgmr.msra.gmra.mrb[0].mxu1 %vm333_vm2, %v20653_v25  ;;  %21203 = vmatprep.subr.mxu1 %v21736_v13  ;;  %v11275_v8 = vpop.permute.xlu1 %11274  ;;  %v20677_v22 = vld [vmem:[%s24176_s3 + $0xa] sm:$0x3] }
 0x230   : > { %14205 = vrot.lane.b32.xlu0 %v23259_v23, %s21747_s19  ;;  %14207 = vrot.lane.b32.xlu1 %v23115_v58, %s21747_s19  ;;  %v11281_v10 = vsel %vm1355_vm5, %v11273_v26, %v11275_v8  ;;  %vm24214_vm5 = vmmov %vm24212_vm0 }
 0x231   : > { %21204 = vmatpush3.msk.msra.mxu1 %vm337_vm1, %v11275_v8  ;;  %20660 = vmatprep.subr.msk.mxu0 %vm337_vm1, %v11281_v10  ;;  %v21102_v8 = vpop.f32.mrb[21].mxu1 }
 0x232   : > { %20661 = vmatpush1.msk.msra.mxu0 %vm337_vm1, %v11280_v27  ;;  %21205 = vmatprep.mubr.msk.f32.mxu1 %vm21746_vm4, %v21736_v13  ;;  %v11631_v28 = vpop.permute.xlu0 %11630  ;;  %v3874_v27 = vadd.f32 %v3864_v24, %v3503_v18 }
 0x233   : > { %21206 = vmatmul.mubr.msk.f32.vlgmr.msra.gmra.mrb[62].mxu1 %vm333_vm2, %v20653_v25  ;;  %v11633_v29 = vpop.permute.xlu1 %11632  ;;  %11505 = vmatprep.mubr.f32.mxu0 %v21736_v13 }
 0x234   : > { %14209 = vrot.lane.b32.xlu0 %v23139_v40, %s21747_s19  ;;  %14211 = vrot.lane.b32.xlu1 %v23144_v43, %s21747_s19  ;;  %v11643_v30 = vsel %vm1722_vm6, %v11631_v28, %v11633_v29 }
 0x235   : > { %20666 = vmatprep.subr.msk.mxu0 %vm337_vm1, %v11643_v30  ;;  %20662 = vmatmul.mubr.msk.f32.vlgmr.msra.gmra.mrb[2].mxu0 %vm333_vm2, %v20653_v25 }
 0x236   : > { %v11629_v16 = vpop.permute.xlu0 %11628  ;;  %11800 = vmatprep.mubr.f32.mxu1 %v21736_v13  ;;  %11729 = vmatprep.mubr.f32.mxu0 %v21736_v13 }
 0x237   : > { %v11642_v34 = vsel %vm1722_vm6, %v11629_v16, %v11631_v28  ;;  %v11635_v35 = vpop.permute.xlu1 %11634  ;;  %v4235_v28 = vpop.f32.mrb[22].mxu1 }
 0x238   : > { %14213 = vrot.lane.b32.xlu0 %v23160_v48, %s21747_s19  ;;  %14571 = vrot.lane.b32.xlu1 %v23227_v2, %s21748_s25  ;;  %v11644_v11 = vsel %vm1722_vm6, %v11633_v29, %v11635_v35  ;;  %v4245_v29 = vadd.f32 %v4235_v28, %v3874_v27  ;;  %v21107_v30 = vpop.f32.mrb[23].mxu1  ;;  %s24216_s19 = smov 54  }
 0x239   : > { %20667 = vmatpush1.msk.msra.mxu0 %vm337_vm1, %v11642_v34  ;;  %v4606_v54 = vpop.f32.mrb[24].mxu1 }
 0x23a   : > { %v11637_v59 = vpop.permute.xlu0 %11636  ;;  %20668 = vmatmul.mubr.msk.f32.vlgmr.msra.gmra.mrb[0].mxu0 %vm333_vm2, %v20665_v39  ;;  %v4616_v34 = vadd.f32 %v4606_v54, %v4245_v29 }
 0x23b   : > { %v11639_v46 = vpop.permute.xlu1 %11638  ;;  %v11645_v49 = vsel %vm1722_vm6, %v11635_v35, %v11637_v59  ;;  %11871 = vmatprep.mubr.f32.mxu0 %v21736_v13  ;;  %v21112_v35 = vpop.f32.mrb[25].mxu1 }
 0x23c   : > { %14573 = vrot.lane.b32.xlu0 %v23244_v19, %s21748_s25  ;;  %14569 = vrot.lane.b32.xlu1 %v23211_v61, %s21748_s25  ;;  %v11646_v42 = vsel %vm1722_vm6, %v11637_v59, %v11639_v46  ;;  %v4977_v36 = vpop.f32.mrb[26].mxu1 }
 0x23d   : > { %20669 = vmatprep.subr.msk.mxu1 %vm337_vm1, %v11645_v49  ;;  %v4987_v38 = vadd.f32 %v4977_v36, %v4616_v34 }
 0x23e   : > { %20670 = vmatpush1.msk.msra.mxu1 %vm337_vm1, %v11644_v11  ;;  %v11641_v45 = vpop.permute.xlu0 %11640 }
 0x23f   : > { %20671 = vmatmul.mubr.msk.f32.vlgmr.msra.gmra.mrb[0].mxu1 %vm333_vm2, %v20665_v39  ;;  %21208 = vmatprep.subr.mxu1 %v21736_v13  ;;  %v11997_v56 = vpop.permute.xlu1 %11996  ;;  %v11647_v57 = vsel %vm1722_vm6, %v11639_v46, %v11641_v45  ;;  %vm24215_vm6 = vmmov %vm24212_vm0 }
 0x240   : > { %14575 = vrot.lane.b32.xlu0 %v23259_v23, %s21748_s25  ;;  %14577 = vrot.lane.b32.xlu1 %v23115_v58, %s21748_s25 }
 0x241   : > { %21209 = vmatpush3.msk.msra.mxu1 %vm337_vm1, %v11641_v45  ;;  %20672 = vmatprep.subr.msk.mxu0 %vm337_vm1, %v11647_v57 }
 0x242   : > { %20673 = vmatpush1.msk.msra.mxu0 %vm337_vm1, %v11646_v42  ;;  %21210 = vmatprep.mubr.msk.f32.mxu1 %vm21746_vm4, %v21736_v13  ;;  %v11999_v0 = vpop.permute.xlu0 %11998 }
 0x243   : > { %21211 = vmatmul.mubr.msk.f32.vlgmr.msra.gmra.mrb[64].mxu1 %vm333_vm2, %v20665_v39  ;;  %v11995_v1 = vpop.permute.xlu1 %11994  ;;  %v12009_v4 = vsel %vm2089_vm7, %v11997_v56, %v11999_v0  ;;  %20674 = vmatmul.mubr.msk.f32.vlgmr.msra.gmra.mrb[2].mxu0 %vm333_vm2, %v20665_v39  ;;  %v21117_v39 = vpop.f32.mrb[27].mxu1 }
 0x244   : > { %14579 = vrot.lane.b32.xlu0 %v23139_v40, %s21748_s25  ;;  %14581 = vrot.lane.b32.xlu1 %v23144_v43, %s21748_s25  ;;  %v12008_v12 = vsel %vm2089_vm7, %v11995_v1, %v11997_v56  ;;  %v5348_v44 = vpop.f32.mrb[28].mxu1  ;;  %v20713_v39 = vld [vmem:[%s24176_s3 + $0x10] sm:$0x3] }
 0x245   : > { %20678 = vmatprep.subr.msk.mxu0 %vm337_vm1, %v12009_v4  ;;  %12166 = vmatprep.mubr.f32.mxu1 %v21736_v13  ;;  %v5358_v62 = vadd.f32 %v5348_v44, %v4987_v38  ;;  %v21122_v46 = vpop.f32.mrb[29].mxu1 }
 0x246   : > { %20679 = vmatpush1.msk.msra.mxu0 %vm337_vm1, %v12008_v12  ;;  %v12001_v21 = vpop.permute.xlu0 %12000  ;;  %12095 = vmatprep.mubr.f32.mxu0 %v21736_v13  ;;  %v5719_v50 = vpop.f32.mrb[30].mxu1 }
 0x247   : > { %v12010_v25 = vsel %vm2089_vm7, %v11999_v0, %v12001_v21  ;;  %v12003_v26 = vpop.permute.xlu1 %12002  ;;  %20680 = vmatmul.mubr.msk.f32.vlgmr.msra.gmra.mrb[0].mxu0 %vm333_vm2, %v20677_v22  ;;  %v5729_v51 = vadd.f32 %v5719_v50, %v5358_v62  ;;  %v21127_v52 = vpop.f32.mrb[31].mxu1 }
 0x248   : > { %14583 = vrot.lane.b32.xlu0 %v23160_v48, %s21748_s25  ;;  %14941 = vrot.lane.b32.xlu1 %v23227_v2, %s21749_s17  ;;  %v12011_v10 = vsel %vm2089_vm7, %v12001_v21, %v12003_v26  ;;  %v6090_v14 = vpop.f32.mrb[32].mxu1 }
 0x249   : > { %20681 = vmatprep.subr.msk.mxu1 %vm337_vm1, %v12011_v10  ;;  %12237 = vmatprep.mubr.f32.mxu0 %v21736_v13  ;;  %v6100_v55 = vadd.f32 %v6090_v14, %v5729_v51  ;;  %v21132_v56 = vpop.f32.mrb[33].mxu1 }
 0x24a   : > { %20682 = vmatpush1.msk.msra.mxu1 %vm337_vm1, %v12010_v25  ;;  %v12005_v31 = vpop.permute.xlu0 %12004  ;;  %v20701_v25 = vld [vmem:[%s24176_s3 + $0xe] sm:$0x3] }
 0x24b   : > { %v12012_v16 = vsel %vm2089_vm7, %v12003_v26, %v12005_v31  ;;  %20683 = vmatmul.mubr.msk.f32.vlgmr.msra.gmra.mrb[0].mxu1 %vm333_vm2, %v20677_v22  ;;  %21213 = vmatprep.subr.mxu1 %v21736_v13  ;;  %v12007_v33 = vpop.permute.xlu1 %12006 }
 0x24c   : > { %14943 = vrot.lane.b32.xlu0 %v23244_v19, %s21749_s17  ;;  %14939 = vrot.lane.b32.xlu1 %v23211_v61, %s21749_s17  ;;  %v12013_v37 = vsel %vm2089_vm7, %v12005_v31, %v12007_v33  ;;  %vm24217_vm7 = vmmov %vm24212_vm0 }
 0x24d   : > { %21214 = vmatpush3.msk.msra.mxu1 %vm337_vm1, %v12007_v33  ;;  %20684 = vmatprep.subr.msk.mxu0 %vm337_vm1, %v12013_v37 }
 0x24e   : > { %20685 = vmatpush1.msk.msra.mxu0 %vm337_vm1, %v12012_v16  ;;  %21215 = vmatprep.mubr.msk.f32.mxu1 %vm21746_vm4, %v21736_v13  ;;  %v12363_v41 = vpop.permute.xlu0 %12362  ;;  %v6461_v57 = vpop.f32.mrb[34].mxu1 }
 0x24f   : > { %21216 = vmatmul.mubr.msk.f32.vlgmr.msra.gmra.mrb[66].mxu1 %vm333_vm2, %v20677_v22  ;;  %v12365_v59 = vpop.permute.xlu1 %12364  ;;  %20686 = vmatmul.mubr.msk.f32.vlgmr.msra.gmra.mrb[2].mxu0 %vm333_vm2, %v20677_v22  ;;  %v6471_v17 = vadd.f32 %v6461_v57, %v6100_v55  ;;  %v21137_v60 = vpop.f32.mrb[35].mxu1  ;;  %v20725_v57 = vld [vmem:[%s24176_s3 + $0x12] sm:$0x3] }
 0x250   : > { %14945 = vrot.lane.b32.xlu0 %v23259_v23, %s21749_s17  ;;  %14947 = vrot.lane.b32.xlu1 %v23115_v58, %s21749_s17  ;;  %v12375_v49 = vsel %vm2456_vm8, %v12363_v41, %v12365_v59 }
 0x251   : > { %20690 = vmatprep.subr.msk.mxu0 %vm337_vm1, %v12375_v49  ;;  %12532 = vmatprep.mubr.f32.mxu1 %v21736_v13 }
 0x252   : > { %v12361_v11 = vpop.permute.xlu0 %12360  ;;  %12461 = vmatprep.mubr.f32.mxu0 %v21736_v13 }
 0x253   : > { %v12374_v53 = vsel %vm2456_vm8, %v12361_v11, %v12363_v41  ;;  %v12367_v45 = vpop.permute.xlu1 %12366 }
 0x254   : > { %14949 = vrot.lane.b32.xlu0 %v23139_v40, %s21749_s17  ;;  %14951 = vrot.lane.b32.xlu1 %v23144_v43, %s21749_s17  ;;  %v12376_v0 = vsel %vm2456_vm8, %v12365_v59, %v12367_v45 }
 0x255   : > { %20691 = vmatpush1.msk.msra.mxu0 %vm337_vm1, %v12374_v53 }
 0x256   : > { %v12369_v42 = vpop.permute.xlu0 %12368  ;;  %20692 = vmatmul.mubr.msk.f32.vlgmr.msra.gmra.mrb[0].mxu0 %vm333_vm2, %v20689_v9 }
 0x257   : > { %v12371_v32 = vpop.permute.xlu1 %12370  ;;  %v12377_v63 = vsel %vm2456_vm8, %v12367_v45, %v12369_v42  ;;  %12603 = vmatprep.mubr.f32.mxu0 %v21736_v13 }
 0x258   : > { %14953 = vrot.lane.b32.xlu0 %v23160_v48, %s21749_s17  ;;  %15311 = vrot.lane.b32.xlu1 %v23227_v2, %s21750_s24  ;;  %v12378_v6 = vsel %vm2456_vm8, %v12369_v42, %v12371_v32  ;;  %s24230_s17 = smov 45  }
 0x259   : > { %20693 = vmatprep.subr.msk.mxu1 %vm337_vm1, %v12377_v63 }
 0x25a   : > { %20694 = vmatpush1.msk.msra.mxu1 %vm337_vm1, %v12376_v0  ;;  %v12373_v47 = vpop.permute.xlu0 %12372 }
 0x25b   : > { %20695 = vmatmul.mubr.msk.f32.vlgmr.msra.gmra.mrb[0].mxu1 %vm333_vm2, %v20689_v9  ;;  %21218 = vmatprep.subr.mxu1 %v21736_v13  ;;  %v12729_v1 = vpop.permute.xlu1 %12728  ;;  %v12379_v4 = vsel %vm2456_vm8, %v12371_v32, %v12373_v47  ;;  %vm24218_vm8 = vmmov %vm24212_vm0 }
 0x25c   : > { %15313 = vrot.lane.b32.xlu0 %v23244_v19, %s21750_s24  ;;  %15309 = vrot.lane.b32.xlu1 %v23211_v61, %s21750_s24 }
 0x25d   : > { %21219 = vmatpush3.msk.msra.mxu1 %vm337_vm1, %v12373_v47  ;;  %20696 = vmatprep.subr.msk.mxu0 %vm337_vm1, %v12379_v4 }
 0x25e   : > { %20697 = vmatpush1.msk.msra.mxu0 %vm337_vm1, %v12378_v6  ;;  %21220 = vmatprep.mubr.msk.f32.mxu1 %vm21746_vm4, %v21736_v13  ;;  %v12731_v7 = vpop.permute.xlu0 %12730  ;;  %v6832_v12 = vpop.f32.mrb[36].mxu1 }
 0x25f   : > { %21221 = vmatmul.mubr.msk.f32.vlgmr.msra.gmra.mrb[68].mxu1 %vm333_vm2, %v20689_v9  ;;  %v12727_v15 = vpop.permute.xlu1 %12726  ;;  %v12741_v18 = vsel %vm2823_vm9, %v12729_v1, %v12731_v7  ;;  %20698 = vmatmul.mubr.msk.f32.vlgmr.msra.gmra.mrb[2].mxu0 %vm333_vm2, %v20689_v9  ;;  %v6842_v20 = vadd.f32 %v6832_v12, %v6471_v17  ;;  %v21142_v21 = vpop.f32.mrb[37].mxu1 }
 0x260   : > { %15315 = vrot.lane.b32.xlu0 %v23259_v23, %s21750_s24  ;;  %15317 = vrot.lane.b32.xlu1 %v23115_v58, %s21750_s24  ;;  %v12740_v22 = vsel %vm2823_vm9, %v12727_v15, %v12729_v1 }
 0x261   : > { %20702 = vmatprep.subr.msk.mxu0 %vm337_vm1, %v12741_v18  ;;  %12898 = vmatprep.mubr.f32.mxu1 %v21736_v13 }
 0x262   : > { %20703 = vmatpush1.msk.msra.mxu0 %vm337_vm1, %v12740_v22  ;;  %v12733_v24 = vpop.permute.xlu0 %12732  ;;  %12827 = vmatprep.mubr.f32.mxu0 %v21736_v13 }
 0x263   : > { %v12742_v26 = vsel %vm2823_vm9, %v12731_v7, %v12733_v24  ;;  %v12735_v27 = vpop.permute.xlu1 %12734  ;;  %20704 = vmatmul.mubr.msk.f32.vlgmr.msra.gmra.mrb[0].mxu0 %vm333_vm2, %v20701_v25 }
 0x264   : > { %15319 = vrot.lane.b32.xlu0 %v23139_v40, %s21750_s24  ;;  %15321 = vrot.lane.b32.xlu1 %v23144_v43, %s21750_s24  ;;  %v12743_v8 = vsel %vm2823_vm9, %v12733_v24, %v12735_v27 }
 0x265   : > { %20705 = vmatprep.subr.msk.mxu1 %vm337_vm1, %v12743_v8  ;;  %12969 = vmatprep.mubr.f32.mxu0 %v21736_v13 }
 0x266   : > { %20706 = vmatpush1.msk.msra.mxu1 %vm337_vm1, %v12742_v26  ;;  %v12737_v10 = vpop.permute.xlu0 %12736 }
 0x267   : > { %v12744_v28 = vsel %vm2823_vm9, %v12735_v27, %v12737_v10  ;;  %20707 = vmatmul.mubr.msk.f32.vlgmr.msra.gmra.mrb[0].mxu1 %vm333_vm2, %v20701_v25  ;;  %21223 = vmatprep.subr.mxu1 %v21736_v13  ;;  %v12739_v29 = vpop.permute.xlu1 %12738 }
 0x268   : > { %15323 = vrot.lane.b32.xlu0 %v23160_v48, %s21750_s24  ;;  %15681 = vrot.lane.b32.xlu1 %v23227_v2, %s21751_s15  ;;  %v12745_v30 = vsel %vm2823_vm9, %v12737_v10, %v12739_v29  ;;  %vm24219_vm9 = vmmov %vm24212_vm0 }
 0x269   : > { %21224 = vmatpush3.msk.msra.mxu1 %vm337_vm1, %v12739_v29  ;;  %20708 = vmatprep.subr.msk.mxu0 %vm337_vm1, %v12745_v30 }
 0x26a   : > { %20709 = vmatpush1.msk.msra.mxu0 %vm337_vm1, %v12744_v28  ;;  %21225 = vmatprep.mubr.msk.f32.mxu1 %vm21746_vm4, %v21736_v13  ;;  %v13095_v31 = vpop.permute.xlu0 %13094 }
 0x26b   : > { %21226 = vmatmul.mubr.msk.f32.vlgmr.msra.gmra.mrb[70].mxu1 %vm333_vm2, %v20701_v25  ;;  %v13097_v54 = vpop.permute.xlu1 %13096  ;;  %20710 = vmatmul.mubr.msk.f32.vlgmr.msra.gmra.mrb[2].mxu0 %vm333_vm2, %v20701_v25 }
 0x26c   : > { %15683 = vrot.lane.b32.xlu0 %v23244_v19, %s21751_s15  ;;  %15679 = vrot.lane.b32.xlu1 %v23211_v61, %s21751_s15  ;;  %v13107_v16 = vsel %vm3190_vm10, %v13095_v31, %v13097_v54 }
 0x26d   : > { %20714 = vmatprep.subr.msk.mxu0 %vm337_vm1, %v13107_v16  ;;  %13264 = vmatprep.mubr.f32.mxu1 %v21736_v13 }
 0x26e   : > { %v13093_v33 = vpop.permute.xlu0 %13092  ;;  %13193 = vmatprep.mubr.f32.mxu0 %v21736_v13  ;;  %v7199_v34 = vpop.f32.mrb[38].mxu1 }
 0x26f   : > { %v13106_v35 = vsel %vm3190_vm10, %v13093_v33, %v13095_v31  ;;  %v13099_v37 = vpop.permute.xlu1 %13098  ;;  %v7209_v36 = vadd.f32 %v7199_v34, %v6842_v20  ;;  %v21147_v38 = vpop.f32.mrb[39].mxu1 }
 0x270   : > { %15685 = vrot.lane.b32.xlu0 %v23259_v23, %s21751_s15  ;;  %15687 = vrot.lane.b32.xlu1 %v23115_v58, %s21751_s15  ;;  %v13108_v62 = vsel %vm3190_vm10, %v13097_v54, %v13099_v37  ;;  %v16752_v54 = vld [vmem:[%s22718_s16 + $0xa] sm:$0x3f] }
 0x271   : > { %20715 = vmatpush1.msk.msra.mxu0 %vm337_vm1, %v13106_v35  ;;  %v16779_v35 = vrot.slane %v16752_v54, %v21820_v5 }
 0x272   : > { %v13101_v41 = vpop.permute.xlu0 %13100  ;;  %20716 = vmatmul.mubr.msk.f32.vlgmr.msra.gmra.mrb[0].mxu0 %vm333_vm2, %v20713_v39 }
 0x273   : > { %v13103_v44 = vpop.permute.xlu1 %13102  ;;  %v13109_v59 = vsel %vm3190_vm10, %v13099_v37, %v13101_v41  ;;  %13335 = vmatprep.mubr.f32.mxu0 %v21736_v13  ;;  %v16772_v37 = vcombine.high %v16752_v54, %v16752_v54 }
 0x274   : > { %15689 = vrot.lane.b32.xlu0 %v23139_v40, %s21751_s15  ;;  %15691 = vrot.lane.b32.xlu1 %v23144_v43, %s21751_s15  ;;  %v13110_v51 = vsel %vm3190_vm10, %v13101_v41, %v13103_v44 }
 0x275   : > { %20717 = vmatprep.subr.msk.mxu1 %vm337_vm1, %v13109_v59  ;;  %v16786_v59 = vrot.slane %v16772_v37, %v21820_v5 }
 0x276   : > { %20718 = vmatpush1.msk.msra.mxu1 %vm337_vm1, %v13108_v62  ;;  %v13105_v46 = vpop.permute.xlu0 %13104  ;;  %v20749_v62 = vld [vmem:[%s24176_s3 + $0x16] sm:$0x3] }
 0x277   : > { %20719 = vmatmul.mubr.msk.f32.vlgmr.msra.gmra.mrb[0].mxu1 %vm333_vm2, %v20713_v39  ;;  %21228 = vmatprep.subr.mxu1 %v21736_v13  ;;  %v13462_v49 = vpop.permute.xlu1 %13461  ;;  %v13111_v50 = vsel %vm3190_vm10, %v13103_v44, %v13105_v46  ;;  %v16787_v44 = vcombine.high %v16779_v35, %v16779_v35  ;;  %vm24220_vm10 = vcmask 138240  }
 0x278   : > { %15693 = vrot.lane.b32.xlu0 %v23160_v48, %s21751_s15  ;;  %16051 = vrot.lane.b32.xlu1 %v23227_v2, %s21752_s20 }
 0x279   : > { %21229 = vmatpush3.msk.msra.mxu1 %vm337_vm1, %v13105_v46  ;;  %20720 = vmatprep.subr.msk.mxu0 %vm337_vm1, %v13111_v50 }
 0x27a   : > { %20721 = vmatpush1.msk.msra.mxu0 %vm337_vm1, %v13110_v51  ;;  %21230 = vmatprep.mubr.msk.f32.mxu1 %vm21746_vm4, %v21736_v13  ;;  %v13464_v52 = vpop.permute.xlu0 %13463  ;;  %v7566_v11 = vpop.f32.mrb[40].mxu1 }
 0x27b   : > { %21231 = vmatmul.mubr.msk.f32.vlgmr.msra.gmra.mrb[72].mxu1 %vm333_vm2, %v20713_v39  ;;  %v13460_v14 = vpop.permute.xlu1 %13459  ;;  %v13476_v53 = vsel %vm3560_vm11, %v13462_v49, %v13464_v52  ;;  %20722 = vmatmul.mubr.msk.f32.vlgmr.msra.gmra.mrb[2].mxu0 %vm333_vm2, %v20713_v39  ;;  %v7576_v45 = vadd.f32 %v7566_v11, %v7209_v36  ;;  %v21152_v55 = vpop.f32.mrb[41].mxu1 }
 0x27c   : > { %16053 = vrot.lane.b32.xlu0 %v23244_v19, %s21752_s20  ;;  %16049 = vrot.lane.b32.xlu1 %v23211_v61, %s21752_s20  ;;  %v13475_v56 = vsel %vm3560_vm11, %v13460_v14, %v13462_v49 }
 0x27d   : > { %20726 = vmatprep.subr.msk.mxu0 %vm337_vm1, %v13476_v53  ;;  %13563 = vmatprep.mubr.f32.mxu0 %v21736_v13 }
 0x27e   : > { %20727 = vmatpush1.msk.msra.mxu0 %vm337_vm1, %v13475_v56  ;;  %v13466_v9 = vpop.permute.xlu0 %13465  ;;  %13634 = vmatprep.mubr.f32.mxu1 %v21736_v13 }
 0x27f   : > { %v13477_v17 = vsel %vm3560_vm11, %v13464_v52, %v13466_v9  ;;  %v13468_v60 = vpop.permute.xlu1 %13467  ;;  %20728 = vmatmul.mubr.msk.f32.vlgmr.msra.gmra.mrb[0].mxu0 %vm333_vm2, %v20725_v57  ;;  %v17118_v52 = vld [vmem:[%s22718_s16 + $0xa] sm:$0x3f] }
 0x280   : > { %16055 = vrot.lane.b32.xlu0 %v23259_v23, %s21752_s20  ;;  %16057 = vrot.lane.b32.xlu1 %v23115_v58, %s21752_s20  ;;  %v13478_v42 = vsel %vm3560_vm11, %v13466_v9, %v13468_v60  ;;  %v17145_v9 = vrot.slane %v17118_v52, %v21820_v5 }
 0x281   : > { %20729 = vmatprep.subr.msk.mxu1 %vm337_vm1, %v13478_v42  ;;  %13705 = vmatprep.mubr.f32.mxu0 %v21736_v13 }
 0x282   : > { %20730 = vmatpush1.msk.msra.mxu1 %vm337_vm1, %v13477_v17 }
 0x283   : > { %20731 = vmatmul.mubr.msk.f32.vlgmr.msra.gmra.mrb[0].mxu1 %vm333_vm2, %v20725_v57  ;;  %21233 = vmatprep.subr.mxu1 %v21736_v13 }
 0x284   : > { %16059 = vrot.lane.b32.xlu0 %v23139_v40, %s21752_s20  ;;  %16061 = vrot.lane.b32.xlu1 %v23144_v43, %s21752_s20  ;;  %v13470_v32 = vpop.permute.xlu0 %13469 }
 0x285   : > { %v13472_v63 = vpop.permute.xlu1 %13471  ;;  %21235 = vmatprep.mubr.msk.f32.mxu1 %vm21746_vm4, %v21736_v13  ;;  %v13479_v0 = vsel %vm3560_vm11, %v13468_v60, %v13470_v32 }
 0x286   : > { %v13480_v47 = vsel %vm3560_vm11, %v13470_v32, %v13472_v63  ;;  %v17153_v32 = vcombine.high %v17145_v9, %v17145_v9 }
 0x287   : > { %20732 = vmatprep.subr.msk.mxu0 %vm337_vm1, %v13480_v47 }
 0x288   : > { %16063 = vrot.lane.b32.xlu0 %v23160_v48, %s21752_s20  ;;  %16421 = vrot.lane.b32.xlu1 %v23227_v2, %s24209_s23  ;;  %v16751_v2 = vld [vmem:[%s22718_s16 + $0x2] sm:$0xff] }
 0x289   : > { %20733 = vmatpush1.msk.msra.mxu0 %vm337_vm1, %v13479_v0  ;;  %v13474_v1 = vpop.permute.xlu0 %13473  ;;  %v13832_v4 = vpop.permute.xlu1 %13831  ;;  %v16755_v27 = vcombine.high %v16751_v2, %v16751_v2 }
 0x28a   : > { %v13481_v6 = vsel %vm3560_vm11, %v13472_v63, %v13474_v1  ;;  %20734 = vmatmul.mubr.msk.f32.vlgmr.msra.gmra.mrb[2].mxu0 %vm333_vm2, %v20725_v57  ;;  %v7933_v7 = vpop.f32.mrb[42].mxu1  ;;  %v17138_v63 = vcombine.high %v17118_v52, %v17118_v52  ;;  %vm24221_vm11 = vmmov %vm24220_vm10 }
 0x28b   : > { %21234 = vmatpush3.msk.msra.mxu1 %vm337_vm1, %v13481_v6  ;;  %13933 = vmatprep.mubr.f32.mxu0 %v21736_v13  ;;  %v7943_v12 = vadd.f32 %v7933_v7, %v7576_v45  ;;  %v21157_v15 = vpop.f32.mrb[43].mxu1  ;;  %v23573_v31 = vrot.slane %v16755_v27, %v21820_v5  ;;  %v20761_v7 = vld [vmem:[%s24176_s3 + $0x18] sm:$0x3] }
 0x28c   : > { %16423 = vrot.lane.b32.xlu0 %v23244_v19, %s24209_s23  ;;  %16419 = vrot.lane.b32.xlu1 %v23211_v61, %s24209_s23  ;;  %v23543_v19 = vrot.slane %v16751_v2, %v21820_v5  ;;  %v20737_v61 = vld [vmem:[%s24176_s3 + $0x14] sm:$0x3]  ;;  %v17152_v6 = vrot.slane %v17138_v63, %v21820_v5  ;;  %v20785_v63 = vld [vmem:[%s24176_s3 + $0x1c] sm:$0x3] }
 0x28d   : > { %21236 = vmatmul.mubr.msk.f32.vlgmr.msra.gmra.mrb[74].mxu1 %vm333_vm2, %v20725_v57 }
 0x28e   : > { %v13834_v18 = vpop.permute.xlu0 %13833  ;;  %v13830_v20 = vpop.permute.xlu1 %13829  ;;  %14004 = vmatprep.mubr.f32.mxu1 %v21736_v13 }
 0x28f   : > { %v13845_v21 = vsel %vm3931_vm12, %v13830_v20, %v13832_v4  ;;  %v13846_v22 = vsel %vm3931_vm12, %v13832_v4, %v13834_v18 }
 0x290   : > { %16425 = vrot.lane.b32.xlu0 %v23259_v23, %s24209_s23  ;;  %16427 = vrot.lane.b32.xlu1 %v23115_v58, %s24209_s23  ;;  %v23559_v58 = vcombine.high %v23543_v19, %v23543_v19 }
 0x291   : > { %20738 = vmatprep.subr.msk.mxu0 %vm337_vm1, %v13846_v22 }
 0x292   : > { %20739 = vmatpush1.msk.msra.mxu0 %vm337_vm1, %v13845_v21  ;;  %v13836_v24 = vpop.permute.xlu0 %13835  ;;  %v13838_v25 = vpop.permute.xlu1 %13837 }
 0x293   : > { %v13847_v26 = vsel %vm3931_vm12, %v13834_v18, %v13836_v24  ;;  %v13848_v23 = vsel %vm3931_vm12, %v13836_v24, %v13838_v25  ;;  %20740 = vmatmul.mubr.msk.f32.vlgmr.msra.gmra.mrb[0].mxu0 %vm333_vm2, %v20737_v61 }
 0x294   : > { %16429 = vrot.lane.b32.xlu0 %v23139_v40, %s24209_s23  ;;  %16431 = vrot.lane.b32.xlu1 %v23144_v43, %s24209_s23 }
 0x295   : > { %20741 = vmatprep.subr.msk.mxu1 %vm337_vm1, %v13848_v23  ;;  %14075 = vmatprep.mubr.f32.mxu0 %v21736_v13  ;;  %v8300_v8 = vpop.f32.mrb[44].mxu1 }
 0x296   : > { %20742 = vmatpush1.msk.msra.mxu1 %vm337_vm1, %v13847_v26  ;;  %v13840_v10 = vpop.permute.xlu0 %13839  ;;  %v13842_v28 = vpop.permute.xlu1 %13841  ;;  %v8310_v29 = vadd.f32 %v8300_v8, %v7943_v12 }
 0x297   : > { %v13849_v40 = vsel %vm3931_vm12, %v13838_v25, %v13840_v10  ;;  %v13850_v43 = vsel %vm3931_vm12, %v13840_v10, %v13842_v28  ;;  %20743 = vmatmul.mubr.msk.f32.vlgmr.msra.gmra.mrb[0].mxu1 %vm333_vm2, %v20737_v61  ;;  %21238 = vmatprep.subr.mxu1 %v21736_v13  ;;  %v21162_v30 = vpop.f32.mrb[45].mxu1 }
 0x298   : > { %16433 = vrot.lane.b32.xlu0 %v23160_v48, %s24209_s23  ;;  %16790 = vrot.lane.b32.xlu1 %v23559_v58, %s24210_s11  ;;  %v23588_v48 = vcombine.high %v23573_v31, %v23573_v31  ;;  %s24244_s23 = smov 36  }
 0x299   : > { %20744 = vmatprep.subr.msk.mxu0 %vm337_vm1, %v13850_v43  ;;  %21240 = vmatprep.mubr.msk.f32.mxu1 %vm21746_vm4, %v21736_v13 }
 0x29a   : > { %20745 = vmatpush1.msk.msra.mxu0 %vm337_vm1, %v13849_v40  ;;  %v13844_v16 = vpop.permute.xlu0 %13843  ;;  %v14202_v33 = vpop.permute.xlu1 %14201 }
 0x29b   : > { %v13851_v34 = vsel %vm3931_vm12, %v13842_v28, %v13844_v16  ;;  %20746 = vmatmul.mubr.msk.f32.vlgmr.msra.gmra.mrb[2].mxu0 %vm333_vm2, %v20737_v61  ;;  %vm24222_vm12 = vmmov %vm24220_vm10 }
 0x29c   : > { %16792 = vrot.lane.b32.xlu0 %v23573_v31, %s24210_s11  ;;  %16788 = vrot.lane.b32.xlu1 %v23543_v19, %s24210_s11 }
 0x29d   : > { %21239 = vmatpush3.msk.msra.mxu1 %vm337_vm1, %v13851_v34  ;;  %14303 = vmatprep.mubr.f32.mxu0 %v21736_v13  ;;  %v20773_v34 = vld [vmem:[%s24176_s3 + $0x1a] sm:$0x3] }
 0x29e   : > { %21241 = vmatmul.mubr.msk.f32.vlgmr.msra.gmra.mrb[76].mxu1 %vm333_vm2, %v20737_v61  ;;  %v14204_v36 = vpop.permute.xlu0 %14203  ;;  %v14200_v38 = vpop.permute.xlu1 %14199  ;;  %v17484_v61 = vld [vmem:[%s22718_s16 + $0xa] sm:$0x3f] }
 0x29f   : > { %v14215_v39 = vsel %vm4302_vm13, %v14200_v38, %v14202_v33  ;;  %v14216_v41 = vsel %vm4302_vm13, %v14202_v33, %v14204_v36  ;;  %14374 = vmatprep.mubr.f32.mxu1 %v21736_v13  ;;  %v17511_v27 = vrot.slane %v17484_v61, %v21820_v5  ;;  %v17504_v8 = vcombine.high %v17484_v61, %v17484_v61 }
 0x2a0   : > { %16794 = vrot.lane.b32.xlu0 %v23588_v48, %s24210_s11  ;;  %16796 = vrot.lane.b32.xlu1 %v16779_v35, %s24210_s11  ;;  %v17850_v35 = vld [vmem:[%s22718_s16 + $0xa] sm:$0x3f] }
 0x2a1   : > { %20750 = vmatprep.subr.msk.mxu0 %vm337_vm1, %v14216_v41  ;;  %v17519_v40 = vcombine.high %v17511_v27, %v17511_v27  ;;  %v17518_v43 = vrot.slane %v17504_v8, %v21820_v5 }
 0x2a2   : > { %20751 = vmatpush1.msk.msra.mxu0 %vm337_vm1, %v14215_v39  ;;  %v14206_v46 = vpop.permute.xlu0 %14205  ;;  %v14208_v49 = vpop.permute.xlu1 %14207 }
 0x2a3   : > { %v14217_v50 = vsel %vm4302_vm13, %v14204_v36, %v14206_v46  ;;  %v14218_v51 = vsel %vm4302_vm13, %v14206_v46, %v14208_v49  ;;  %20752 = vmatmul.mubr.msk.f32.vlgmr.msra.gmra.mrb[0].mxu0 %vm333_vm2, %v20749_v62 }
 0x2a4   : > { %16798 = vrot.lane.b32.xlu0 %v16787_v44, %s24210_s11  ;;  %16800 = vrot.lane.b32.xlu1 %v16786_v59, %s24210_s11 }
 0x2a5   : > { %20753 = vmatprep.subr.msk.mxu1 %vm337_vm1, %v14218_v51  ;;  %14445 = vmatprep.mubr.f32.mxu0 %v21736_v13  ;;  %v8667_v11 = vpop.f32.mrb[46].mxu1 }
 0x2a6   : > { %20754 = vmatpush1.msk.msra.mxu1 %vm337_vm1, %v14217_v50  ;;  %v14210_v14 = vpop.permute.xlu0 %14209  ;;  %v14212_v53 = vpop.permute.xlu1 %14211  ;;  %v8677_v45 = vadd.f32 %v8667_v11, %v8310_v29  ;;  %v17870_v11 = vcombine.high %v17850_v35, %v17850_v35 }
 0x2a7   : > { %v14219_v55 = vsel %vm4302_vm13, %v14208_v49, %v14210_v14  ;;  %v14220_v56 = vsel %vm4302_vm13, %v14210_v14, %v14212_v53  ;;  %20755 = vmatmul.mubr.msk.f32.vlgmr.msra.gmra.mrb[0].mxu1 %vm333_vm2, %v20749_v62  ;;  %21243 = vmatprep.subr.mxu1 %v21736_v13  ;;  %v21167_v57 = vpop.f32.mrb[47].mxu1 }
 0x2a8   : > { %17156 = vrot.lane.b32.xlu0 %v23559_v58, %s24211_s7  ;;  %17158 = vrot.lane.b32.xlu1 %v23573_v31, %s24211_s7 }
 0x2a9   : > { %20756 = vmatprep.subr.msk.mxu0 %vm337_vm1, %v14220_v56  ;;  %21245 = vmatprep.mubr.msk.f32.mxu1 %vm21746_vm4, %v21736_v13 }
 0x2aa   : > { %20757 = vmatpush1.msk.msra.mxu0 %vm337_vm1, %v14219_v55  ;;  %v14214_v17 = vpop.permute.xlu0 %14213  ;;  %v14572_v60 = vpop.permute.xlu1 %14571  ;;  %v17884_v55 = vrot.slane %v17870_v11, %v21820_v5 }
 0x2ab   : > { %v14221_v42 = vsel %vm4302_vm13, %v14212_v53, %v14214_v17  ;;  %20758 = vmatmul.mubr.msk.f32.vlgmr.msra.gmra.mrb[2].mxu0 %vm333_vm2, %v20749_v62  ;;  %vm24223_vm13 = vmmov %vm24220_vm10 }
 0x2ac   : > { %17154 = vrot.lane.b32.xlu0 %v23543_v19, %s24211_s7  ;;  %17160 = vrot.lane.b32.xlu1 %v23588_v48, %s24211_s7 }
 0x2ad   : > { %21244 = vmatpush3.msk.msra.mxu1 %vm337_vm1, %v14221_v42  ;;  %14673 = vmatprep.mubr.f32.mxu0 %v21736_v13 }
 0x2ae   : > { %21246 = vmatmul.mubr.msk.f32.vlgmr.msra.gmra.mrb[78].mxu1 %vm333_vm2, %v20749_v62  ;;  %v14574_v0 = vpop.permute.xlu0 %14573  ;;  %v14570_v47 = vpop.permute.xlu1 %14569  ;;  %v17877_v62 = vrot.slane %v17850_v35, %v21820_v5 }
 0x2af   : > { %v14585_v1 = vsel %vm24212_vm0, %v14570_v47, %v14572_v60  ;;  %v14586_v4 = vsel %vm24213_vm3, %v14572_v60, %v14574_v0  ;;  %14744 = vmatprep.mubr.f32.mxu1 %v21736_v13  ;;  %vm24225_vm0 = vmmov %vm24220_vm10 }
 0x2b0   : > { %17162 = vrot.lane.b32.xlu0 %v17145_v9, %s24211_s7  ;;  %17164 = vrot.lane.b32.xlu1 %v17153_v32, %s24211_s7  ;;  %vm24226_vm3 = vmmov %vm24225_vm0  ;;  %v17885_v52 = vcombine.high %v17877_v62, %v17877_v62 }
 0x2b1   : > { %20762 = vmatprep.subr.msk.mxu0 %vm337_vm1, %v14586_v4  ;;  %v9034_v12 = vpop.f32.mrb[48].mxu1 }
 0x2b2   : > { %20763 = vmatpush1.msk.msra.mxu0 %vm337_vm1, %v14585_v1  ;;  %v14576_v15 = vpop.permute.xlu0 %14575  ;;  %v14578_v2 = vpop.permute.xlu1 %14577  ;;  %v9044_v18 = vadd.f32 %v9034_v12, %v8677_v45 }
 0x2b3   : > { %v14587_v20 = vsel %vm24214_vm5, %v14574_v0, %v14576_v15  ;;  %v14588_v21 = vsel %vm24215_vm6, %v14576_v15, %v14578_v2  ;;  %20764 = vmatmul.mubr.msk.f32.vlgmr.msra.gmra.mrb[0].mxu0 %vm333_vm2, %v20761_v7  ;;  %v21172_v22 = vpop.f32.mrb[49].mxu1  ;;  %vm24227_vm5 = vmmov %vm24225_vm0  ;;  %vm24228_vm6 = vcmask 130048   ;;  %v18216_v0 = vld [vmem:[%s22718_s16 + $0xa] sm:$0x3f] }
 0x2b4   : > { %17166 = vrot.lane.b32.xlu0 %v17152_v6, %s24211_s7  ;;  %17522 = vrot.lane.b32.xlu1 %v23559_v58, %s24216_s19  ;;  %v18236_v12 = vcombine.high %v18216_v0, %v18216_v0 }
 0x2b5   : > { %20765 = vmatprep.subr.msk.mxu1 %vm337_vm1, %v14588_v21  ;;  %14815 = vmatprep.mubr.f32.mxu0 %v21736_v13 }
 0x2b6   : > { %20766 = vmatpush1.msk.msra.mxu1 %vm337_vm1, %v14587_v20  ;;  %v14580_v24 = vpop.permute.xlu0 %14579  ;;  %v14582_v25 = vpop.permute.xlu1 %14581  ;;  %v18250_v22 = vrot.slane %v18236_v12, %v21820_v5 }
 0x2b7   : > { %v14589_v26 = vsel %vm24217_vm7, %v14578_v2, %v14580_v24  ;;  %v14590_v23 = vsel %vm24218_vm8, %v14580_v24, %v14582_v25  ;;  %20767 = vmatmul.mubr.msk.f32.vlgmr.msra.gmra.mrb[0].mxu1 %vm333_vm2, %v20761_v7  ;;  %21248 = vmatprep.subr.mxu1 %v21736_v13  ;;  %vm24229_vm7 = vmmov %vm24228_vm6 }
 0x2b8   : > { %17524 = vrot.lane.b32.xlu0 %v23573_v31, %s24216_s19  ;;  %17520 = vrot.lane.b32.xlu1 %v23543_v19, %s24216_s19  ;;  %vm24231_vm8 = vmmov %vm24228_vm6 }
 0x2b9   : > { %20768 = vmatprep.subr.msk.mxu0 %vm337_vm1, %v14590_v23  ;;  %21250 = vmatprep.mubr.msk.f32.mxu1 %vm21746_vm4, %v21736_v13 }
 0x2ba   : > { %20769 = vmatpush1.msk.msra.mxu0 %vm337_vm1, %v14589_v26  ;;  %v14584_v10 = vpop.permute.xlu0 %14583  ;;  %v14942_v28 = vpop.permute.xlu1 %14941  ;;  %v18582_v26 = vld [vmem:[%s22718_s16 + $0xa] sm:$0x3f] }
 0x2bb   : > { %v14591_v29 = vsel %vm24219_vm9, %v14582_v25, %v14584_v10  ;;  %20770 = vmatmul.mubr.msk.f32.vlgmr.msra.gmra.mrb[2].mxu0 %vm333_vm2, %v20761_v7  ;;  %vm24232_vm9 = vmmov %vm24228_vm6 }
 0x2bc   : > { %17526 = vrot.lane.b32.xlu0 %v23588_v48, %s24216_s19  ;;  %17528 = vrot.lane.b32.xlu1 %v17511_v27, %s24216_s19 }
 0x2bd   : > { %21249 = vmatpush3.msk.msra.mxu1 %vm337_vm1, %v14591_v29  ;;  %15043 = vmatprep.mubr.f32.mxu0 %v21736_v13 }
 0x2be   : > { %21251 = vmatmul.mubr.msk.f32.vlgmr.msra.gmra.mrb[80].mxu1 %vm333_vm2, %v20761_v7  ;;  %v14944_v30 = vpop.permute.xlu0 %14943  ;;  %v14940_v54 = vpop.permute.xlu1 %14939  ;;  %v18243_v7 = vrot.slane %v18216_v0, %v21820_v5 }
 0x2bf   : > { %v14955_v16 = vsel %vm24220_vm10, %v14940_v54, %v14942_v28  ;;  %v14956_v33 = vsel %vm24221_vm11, %v14942_v28, %v14944_v30  ;;  %15114 = vmatprep.mubr.f32.mxu1 %v21736_v13  ;;  %vm24233_vm10 = vmmov %vm24228_vm6 }
 0x2c0   : > { %17530 = vrot.lane.b32.xlu0 %v17519_v40, %s24216_s19  ;;  %17532 = vrot.lane.b32.xlu1 %v17518_v43, %s24216_s19  ;;  %vm24234_vm11 = vmmov %vm24228_vm6  ;;  %v18251_v21 = vcombine.high %v18243_v7, %v18243_v7  ;;  %v18609_v43 = vrot.slane %v18582_v26, %v21820_v5 }
 0x2c1   : > { %20774 = vmatprep.subr.msk.mxu0 %vm337_vm1, %v14956_v33  ;;  %v9401_v37 = vpop.f32.mrb[50].mxu1 }
 0x2c2   : > { %20775 = vmatpush1.msk.msra.mxu0 %vm337_vm1, %v14955_v16  ;;  %v14946_v36 = vpop.permute.xlu0 %14945  ;;  %v14948_v38 = vpop.permute.xlu1 %14947  ;;  %v9411_v39 = vadd.f32 %v9401_v37, %v9044_v18  ;;  %v18617_v35 = vcombine.high %v18609_v43, %v18609_v43  ;;  %v18602_v37 = vcombine.high %v18582_v26, %v18582_v26 }
 0x2c3   : > { %v14957_v41 = vsel %vm24222_vm12, %v14944_v30, %v14946_v36  ;;  %v14958_v44 = vsel %vm24223_vm13, %v14946_v36, %v14948_v38  ;;  %20776 = vmatmul.mubr.msk.f32.vlgmr.msra.gmra.mrb[0].mxu0 %vm333_vm2, %v20773_v34  ;;  %v21177_v59 = vpop.f32.mrb[51].mxu1  ;;  %vm24235_vm12 = vmmov %vm24228_vm6  ;;  %vm24236_vm13 = vcmask 64512   ;;  %v20797_v30 = vld [vmem:[%s24176_s3 + $0x1e] sm:$0x3] }
 0x2c4   : > { %17888 = vrot.lane.b32.xlu0 %v23559_v58, %s24224_s9  ;;  %17890 = vrot.lane.b32.xlu1 %v23573_v31, %s24224_s9 }
 0x2c5   : > { %20777 = vmatprep.subr.msk.mxu1 %vm337_vm1, %v14958_v44  ;;  %15185 = vmatprep.mubr.f32.mxu0 %v21736_v13  ;;  %v18616_v44 = vrot.slane %v18602_v37, %v21820_v5 }
 0x2c6   : > { %20778 = vmatpush1.msk.msra.mxu1 %vm337_vm1, %v14957_v41  ;;  %v14950_v46 = vpop.permute.xlu0 %14949  ;;  %v14952_v49 = vpop.permute.xlu1 %14951 }
 0x2c7   : > { %v14959_v50 = vsel %vm24225_vm0, %v14948_v38, %v14950_v46  ;;  %v14960_v51 = vsel %vm24226_vm3, %v14950_v46, %v14952_v49  ;;  %20779 = vmatmul.mubr.msk.f32.vlgmr.msra.gmra.mrb[0].mxu1 %vm333_vm2, %v20773_v34  ;;  %21253 = vmatprep.subr.mxu1 %v21736_v13  ;;  %vm24237_vm0 = vmmov %vm24236_vm13 }
 0x2c8   : > { %17886 = vrot.lane.b32.xlu0 %v23543_v19, %s24224_s9  ;;  %17892 = vrot.lane.b32.xlu1 %v23588_v48, %s24224_s9  ;;  %vm24239_vm3 = vmmov %vm24237_vm0 }
 0x2c9   : > { %20780 = vmatprep.subr.msk.mxu0 %vm337_vm1, %v14960_v51  ;;  %21255 = vmatprep.mubr.msk.f32.mxu1 %vm21746_vm4, %v21736_v13 }
 0x2ca   : > { %20781 = vmatpush1.msk.msra.mxu0 %vm337_vm1, %v14959_v50  ;;  %v14954_v14 = vpop.permute.xlu0 %14953  ;;  %v15312_v53 = vpop.permute.xlu1 %15311 }
 0x2cb   : > { %v14961_v45 = vsel %vm24227_vm5, %v14952_v49, %v14954_v14  ;;  %20782 = vmatmul.mubr.msk.f32.vlgmr.msra.gmra.mrb[2].mxu0 %vm333_vm2, %v20773_v34  ;;  %vm24240_vm5 = vmmov %vm24237_vm0 }
 0x2cc   : > { %17894 = vrot.lane.b32.xlu0 %v17877_v62, %s24224_s9  ;;  %17896 = vrot.lane.b32.xlu1 %v17885_v52, %s24224_s9  ;;  %v18948_v52 = vld [vmem:[%s22718_s16 + $0xa] sm:$0x3f] }
 0x2cd   : > { %21254 = vmatpush3.msk.msra.mxu1 %vm337_vm1, %v14961_v45  ;;  %15413 = vmatprep.mubr.f32.mxu0 %v21736_v13  ;;  %v9768_v56 = vpop.f32.mrb[52].mxu1 }
 0x2ce   : > { %21256 = vmatmul.mubr.msk.f32.vlgmr.msra.gmra.mrb[82].mxu1 %vm333_vm2, %v20773_v34  ;;  %v15314_v57 = vpop.permute.xlu0 %15313  ;;  %v15310_v9 = vpop.permute.xlu1 %15309  ;;  %v9778_v17 = vadd.f32 %v9768_v56, %v9411_v39  ;;  %v18968_v56 = vcombine.high %v18948_v52, %v18948_v52 }
 0x2cf   : > { %v15326_v60 = vsel %vm24228_vm6, %v15312_v53, %v15314_v57  ;;  %v15325_v42 = vsel %vm24229_vm7, %v15310_v9, %v15312_v53  ;;  %15484 = vmatprep.mubr.f32.mxu1 %v21736_v13  ;;  %v21182_v32 = vpop.f32.mrb[53].mxu1  ;;  %vm24241_vm6 = vmmov %vm24237_vm0 }
 0x2d0   : > { %17898 = vrot.lane.b32.xlu0 %v17884_v55, %s24224_s9  ;;  %18254 = vrot.lane.b32.xlu1 %v23559_v58, %s24230_s17  ;;  %vm24242_vm7 = vmmov %vm24237_vm0  ;;  %v18975_v55 = vrot.slane %v18948_v52, %v21820_v5 }
 0x2d1   : > { %20786 = vmatprep.subr.msk.mxu0 %vm337_vm1, %v15326_v60 }
 0x2d2   : > { %20787 = vmatpush1.msk.msra.mxu0 %vm337_vm1, %v15325_v42  ;;  %v15316_v47 = vpop.permute.xlu0 %15315  ;;  %v15318_v1 = vpop.permute.xlu1 %15317 }
 0x2d3   : > { %v15327_v4 = vsel %vm24231_vm8, %v15314_v57, %v15316_v47  ;;  %v15328_v6 = vsel %vm24232_vm9, %v15316_v47, %v15318_v1  ;;  %20788 = vmatmul.mubr.msk.f32.vlgmr.msra.gmra.mrb[0].mxu0 %vm333_vm2, %v20785_v63  ;;  %vm24243_vm8 = vmmov %vm24237_vm0  ;;  %vm24245_vm9 = vcmask 56320   ;;  %v20809_v57 = vld [vmem:[%s24176_s3 + $0x20] sm:$0x3]  ;;  %v18983_v47 = vcombine.high %v18975_v55, %v18975_v55 }
 0x2d4   : > { %18256 = vrot.lane.b32.xlu0 %v23573_v31, %s24230_s17  ;;  %18252 = vrot.lane.b32.xlu1 %v23543_v19, %s24230_s17 }
 0x2d5   : > { %20789 = vmatprep.subr.msk.mxu1 %vm337_vm1, %v15328_v6  ;;  %15555 = vmatprep.mubr.f32.mxu0 %v21736_v13 }
 0x2d6   : > { %20790 = vmatpush1.msk.msra.mxu1 %vm337_vm1, %v15327_v4  ;;  %v15320_v15 = vpop.permute.xlu0 %15319  ;;  %v15322_v2 = vpop.permute.xlu1 %15321 }
 0x2d7   : > { %v15329_v18 = vsel %vm24233_vm10, %v15318_v1, %v15320_v15  ;;  %v15330_v20 = vsel %vm24234_vm11, %v15320_v15, %v15322_v2  ;;  %20791 = vmatmul.mubr.msk.f32.vlgmr.msra.gmra.mrb[0].mxu1 %vm333_vm2, %v20785_v63  ;;  %21258 = vmatprep.subr.mxu1 %v21736_v13  ;;  %vm24246_vm10 = vmmov %vm24245_vm9  ;;  %v18982_v1 = vrot.slane %v18968_v56, %v21820_v5  ;;  %v19314_v15 = vld [vmem:[%s22718_s16 + $0xa] sm:$0x3f] }
 0x2d8   : > { %18258 = vrot.lane.b32.xlu0 %v23588_v48, %s24230_s17  ;;  %18260 = vrot.lane.b32.xlu1 %v18243_v7, %s24230_s17  ;;  %vm24247_vm11 = vmmov %vm24245_vm9 }
 0x2d9   : > { %20792 = vmatprep.subr.msk.mxu0 %vm337_vm1, %v15330_v20  ;;  %21260 = vmatprep.mubr.msk.f32.mxu1 %vm21746_vm4, %v21736_v13 }
 0x2da   : > { %20793 = vmatpush1.msk.msra.mxu0 %vm337_vm1, %v15329_v18  ;;  %v15324_v61 = vpop.permute.xlu0 %15323  ;;  %v15682_v24 = vpop.permute.xlu1 %15681 }
 0x2db   : > { %v15331_v25 = vsel %vm24235_vm12, %v15322_v2, %v15324_v61  ;;  %20794 = vmatmul.mubr.msk.f32.vlgmr.msra.gmra.mrb[2].mxu0 %vm333_vm2, %v20785_v63  ;;  %vm24248_vm12 = vmmov %vm24245_vm9  ;;  %v19341_v61 = vrot.slane %v19314_v15, %v21820_v5 }
 0x2dc   : > { %18262 = vrot.lane.b32.xlu0 %v18251_v21, %s24230_s17  ;;  %18264 = vrot.lane.b32.xlu1 %v18250_v22, %s24230_s17 }
 0x2dd   : > { %21259 = vmatpush3.msk.msra.mxu1 %vm337_vm1, %v15331_v25  ;;  %15783 = vmatprep.mubr.f32.mxu0 %v21736_v13  ;;  %v10135_v23 = vpop.f32.mrb[54].mxu1 }
 0x2de   : > { %21261 = vmatmul.mubr.msk.f32.vlgmr.msra.gmra.mrb[84].mxu1 %vm333_vm2, %v20785_v63  ;;  %v15684_v27 = vpop.permute.xlu0 %15683  ;;  %v15680_v8 = vpop.permute.xlu1 %15679  ;;  %v10145_v10 = vadd.f32 %v10135_v23, %v9778_v17 }
 0x2df   : > { %v15696_v28 = vsel %vm24236_vm13, %v15682_v24, %v15684_v27  ;;  %v15695_v29 = vsel %vm24237_vm0, %v15680_v8, %v15682_v24  ;;  %15854 = vmatprep.mubr.f32.mxu1 %v21736_v13  ;;  %v21187_v40 = vpop.f32.mrb[55].mxu1  ;;  %vm24249_vm13 = vmmov %vm24245_vm9  ;;  %v19349_v8 = vcombine.high %v19341_v61, %v19341_v61 }
 0x2e0   : > { %18620 = vrot.lane.b32.xlu0 %v23559_v58, %s24238_s10  ;;  %18622 = vrot.lane.b32.xlu1 %v23573_v31, %s24238_s10  ;;  %vm24250_vm0 = vmmov %vm24245_vm9 }
 0x2e1   : > { %20798 = vmatprep.subr.msk.mxu0 %vm337_vm1, %v15696_v28  ;;  %v20821_v28 = vld [vmem:[%s24176_s3 + $0x22] sm:$0x3] }
 0x2e2   : > { %20799 = vmatpush1.msk.msra.mxu0 %vm337_vm1, %v15695_v29  ;;  %v15686_v54 = vpop.permute.xlu0 %15685  ;;  %v15688_v16 = vpop.permute.xlu1 %15687 }
 0x2e3   : > { %v15697_v33 = vsel %vm24239_vm3, %v15684_v27, %v15686_v54  ;;  %v15698_v34 = vsel %vm24240_vm5, %v15686_v54, %v15688_v16  ;;  %20800 = vmatmul.mubr.msk.f32.vlgmr.msra.gmra.mrb[0].mxu0 %vm333_vm2, %v20797_v30  ;;  %vm24251_vm3 = vmmov %vm24250_vm0  ;;  %vm24252_vm5 = vcmask 48128  }
 0x2e4   : > { %18618 = vrot.lane.b32.xlu0 %v23543_v19, %s24238_s10  ;;  %18624 = vrot.lane.b32.xlu1 %v23588_v48, %s24238_s10 }
 0x2e5   : > { %20801 = vmatprep.subr.msk.mxu1 %vm337_vm1, %v15698_v34  ;;  %15925 = vmatprep.mubr.f32.mxu0 %v21736_v13 }
 0x2e6   : > { %20802 = vmatpush1.msk.msra.mxu1 %vm337_vm1, %v15697_v33  ;;  %v15690_v36 = vpop.permute.xlu0 %15689  ;;  %v15692_v38 = vpop.permute.xlu1 %15691 }
 0x2e7   : > { %v15699_v39 = vsel %vm24241_vm6, %v15688_v16, %v15690_v36  ;;  %v15700_v41 = vsel %vm24242_vm7, %v15690_v36, %v15692_v38  ;;  %20803 = vmatmul.mubr.msk.f32.vlgmr.msra.gmra.mrb[0].mxu1 %vm333_vm2, %v20797_v30  ;;  %21263 = vmatprep.subr.mxu1 %v21736_v13  ;;  %vm24253_vm6 = vmmov %vm24252_vm5 }
 0x2e8   : > { %18626 = vrot.lane.b32.xlu0 %v18609_v43, %s24238_s10  ;;  %18628 = vrot.lane.b32.xlu1 %v18617_v35, %s24238_s10  ;;  %v10480_v59 = vpop.f32.mrb[56].mxu1  ;;  %vm24254_vm7 = vmmov %vm24252_vm5 }
 0x2e9   : > { %20804 = vmatprep.subr.msk.mxu0 %vm337_vm1, %v15700_v41  ;;  %v10490_v62 = vadd.f32 %v10480_v59, %v10145_v10  ;;  %21265 = vmatprep.mubr.msk.f32.mxu1 %vm21746_vm4, %v21736_v13  ;;  %v21192_v46 = vpop.f32.mrb[57].mxu1  ;;  %v19334_v10 = vcombine.high %v19314_v15, %v19314_v15 }
 0x2ea   : > { %20805 = vmatpush1.msk.msra.mxu0 %vm337_vm1, %v15699_v39  ;;  %v15694_v49 = vpop.permute.xlu0 %15693  ;;  %v16052_v50 = vpop.permute.xlu1 %16051  ;;  %v19680_v39 = vld [vmem:[%s22718_s16 + $0xa] sm:$0x3f]  ;;  %s21641_s16 = smul.u32 14, %s24302_s22 }
 0x2eb   : > { %v15701_v51 = vsel %vm24243_vm8, %v15692_v38, %v15694_v49  ;;  %20806 = vmatmul.mubr.msk.f32.vlgmr.msra.gmra.mrb[2].mxu0 %vm333_vm2, %v20797_v30  ;;  %vm24255_vm8 = vmmov %vm24252_vm5  ;;  %v19348_v54 = vrot.slane %v19334_v10, %v21820_v5 }
 0x2ec   : > { %18630 = vrot.lane.b32.xlu0 %v18616_v44, %s24238_s10  ;;  %18986 = vrot.lane.b32.xlu1 %v23559_v58, %s24244_s23  ;;  %s271_s14 = scalar_lea.vmem %s24179_s6, %s21641_s16 }
 0x2ed   : > { %21264 = vmatpush3.msk.msra.mxu1 %vm337_vm1, %v15701_v51  ;;  %16153 = vmatprep.mubr.f32.mxu0 %v21736_v13 }
 0x2ee   : > { %21266 = vmatmul.mubr.msk.f32.vlgmr.msra.gmra.mrb[86].mxu1 %vm333_vm2, %v20797_v30  ;;  %v16054_v11 = vpop.permute.xlu0 %16053  ;;  %v16050_v14 = vpop.permute.xlu1 %16049 }
 0x2ef   : > { %v16066_v53 = vsel %vm24245_vm9, %v16052_v50, %v16054_v11  ;;  %v16065_v45 = vsel %vm24246_vm10, %v16050_v14, %v16052_v50  ;;  %16224 = vmatprep.mubr.f32.mxu1 %v21736_v13  ;;  %vm24256_vm9 = vmmov %vm24252_vm5  ;;  %v20833_v14 = vld [vmem:[%s24176_s3 + $0x24] sm:$0x3] }
 0x2f0   : > { %18988 = vrot.lane.b32.xlu0 %v23573_v31, %s24244_s23  ;;  %18984 = vrot.lane.b32.xlu1 %v23543_v19, %s24244_s23  ;;  %vm24257_vm10 = vmmov %vm24252_vm5 }
 0x2f1   : > { %20810 = vmatprep.subr.msk.mxu0 %vm337_vm1, %v16066_v53  ;;  %v10846_v9 = vpop.f32.mrb[58].mxu1 }
 0x2f2   : > { %v10856_v17 = vadd.f32 %v10846_v9, %v10490_v62  ;;  %20811 = vmatpush1.msk.msra.mxu0 %vm337_vm1, %v16065_v45  ;;  %v16056_v60 = vpop.permute.xlu0 %16055  ;;  %v16058_v42 = vpop.permute.xlu1 %16057  ;;  %v19700_v62 = vcombine.high %v19680_v39, %v19680_v39 }
 0x2f3   : > { %v16067_v32 = vsel %vm24247_vm11, %v16054_v11, %v16056_v60  ;;  %v16068_v63 = vsel %vm24248_vm12, %v16056_v60, %v16058_v42  ;;  %20812 = vmatmul.mubr.msk.f32.vlgmr.msra.gmra.mrb[0].mxu0 %vm333_vm2, %v20809_v57  ;;  %v21197_v0 = vpop.f32.mrb[59].mxu1  ;;  %vm24258_vm11 = vmmov %vm24252_vm5  ;;  %vm24259_vm12 = vcmask 457728  }
 0x2f4   : > { %18990 = vrot.lane.b32.xlu0 %v23588_v48, %s24244_s23  ;;  %18992 = vrot.lane.b32.xlu1 %v18975_v55, %s24244_s23 }
 0x2f5   : > { %20813 = vmatprep.subr.msk.mxu1 %vm337_vm1, %v16068_v63  ;;  %16295 = vmatprep.mubr.f32.mxu0 %v21736_v13 }
 0x2f6   : > { %20814 = vmatpush1.msk.msra.mxu1 %vm337_vm1, %v16067_v32  ;;  %v16060_v4 = vpop.permute.xlu0 %16059  ;;  %v16062_v6 = vpop.permute.xlu1 %16061 }
 0x2f7   : > { %v16069_v7 = vsel %vm24249_vm13, %v16058_v42, %v16060_v4  ;;  %v16070_v12 = vsel %vm24250_vm0, %v16060_v4, %v16062_v6  ;;  %20815 = vmatmul.mubr.msk.f32.vlgmr.msra.gmra.mrb[0].mxu1 %vm333_vm2, %v20809_v57  ;;  %21268 = vmatprep.subr.mxu1 %v21736_v13  ;;  %vm24260_vm13 = vmmov %vm24259_vm12  ;;  %v20845_v4 = vld [vmem:[%s24176_s3 + $0x26] sm:$0x3] }
 0x2f8   : > { %18994 = vrot.lane.b32.xlu0 %v18983_v47, %s24244_s23  ;;  %18996 = vrot.lane.b32.xlu1 %v18982_v1, %s24244_s23  ;;  %vm24261_vm0 = vmmov %vm24259_vm12 }
 0x2f9   : > { %20816 = vmatprep.subr.msk.mxu0 %vm337_vm1, %v16070_v12  ;;  %21270 = vmatprep.mubr.msk.f32.mxu1 %vm21746_vm4, %v21736_v13 }
 0x2fa   : > { %20817 = vmatpush1.msk.msra.mxu0 %vm337_vm1, %v16069_v7  ;;  %v16064_v2 = vpop.permute.xlu0 %16063  ;;  %v16422_v18 = vpop.permute.xlu1 %16421 }
 0x2fb   : > { %v16071_v20 = vsel %vm24251_vm3, %v16062_v6, %v16064_v2  ;;  %v11212_v21 = vpop.f32.mrb[60].mxu1  ;;  %20818 = vmatmul.mubr.msk.f32.vlgmr.msra.gmra.mrb[2].mxu0 %vm333_vm2, %v20809_v57  ;;  %vm24262_vm3 = vmmov %vm24261_vm0 }
 0x2fc   : > { %19352 = vrot.lane.b32.xlu0 %v23559_v58, %s21761_s13  ;;  %19354 = vrot.lane.b32.xlu1 %v23573_v31, %s21761_s13  ;;  %v11222_v22 = vadd.f32 %v11212_v21, %v10856_v17  ;;  %v21202_v24 = vpop.f32.mrb[61].mxu1 }
 0x2fd   : > { %21269 = vmatpush3.msk.msra.mxu1 %vm337_vm1, %v16071_v20  ;;  %16523 = vmatprep.mubr.f32.mxu0 %v21736_v13 }
 0x2fe   : > { %21271 = vmatmul.mubr.msk.f32.vlgmr.msra.gmra.mrb[88].mxu1 %vm333_vm2, %v20809_v57  ;;  %v16424_v25 = vpop.permute.xlu0 %16423  ;;  %v16420_v26 = vpop.permute.xlu1 %16419 }
 0x2ff   : > { %v16436_v23 = vsel %vm24252_vm5, %v16422_v18, %v16424_v25  ;;  %v16435_v27 = vsel %vm24253_vm6, %v16420_v26, %v16422_v18  ;;  %16594 = vmatprep.mubr.f32.mxu1 %v21736_v13  ;;  %vm24263_vm5 = vmmov %vm24261_vm0 }
 0x300   : > { %19350 = vrot.lane.b32.xlu0 %v23543_v19, %s21761_s13  ;;  %19356 = vrot.lane.b32.xlu1 %v23588_v48, %s21761_s13  ;;  %vm24264_vm6 = vmmov %vm24261_vm0 }
 0x301   : > { %20822 = vmatprep.subr.msk.mxu0 %vm337_vm1, %v16436_v23 }
 0x302   : > { %20823 = vmatpush1.msk.msra.mxu0 %vm337_vm1, %v16435_v27  ;;  %v16426_v29 = vpop.permute.xlu0 %16425  ;;  %v16428_v40 = vpop.permute.xlu1 %16427 }
 0x303   : > { %v16437_v43 = vsel %vm24254_vm7, %v16424_v25, %v16426_v29  ;;  %v16438_v30 = vsel %vm24255_vm8, %v16426_v29, %v16428_v40  ;;  %20824 = vmatmul.mubr.msk.f32.vlgmr.msra.gmra.mrb[0].mxu0 %vm333_vm2, %v20821_v28  ;;  %vm24265_vm7 = vcmask 449536  }
 0x304   : > { %19358 = vrot.lane.b32.xlu0 %v19341_v61, %s21761_s13  ;;  %19360 = vrot.lane.b32.xlu1 %v19349_v8, %s21761_s13  ;;  %vm24266_vm8 = vmmov %vm24265_vm7  ;;  %v20857_v8 = vld [vmem:[%s24176_s3 + $0x28] sm:$0x3] }
 0x305   : > { %20825 = vmatprep.subr.msk.mxu1 %vm337_vm1, %v16438_v30  ;;  %16665 = vmatprep.mubr.f32.mxu0 %v21736_v13 }
 0x306   : > { %20826 = vmatpush1.msk.msra.mxu1 %vm337_vm1, %v16437_v43  ;;  %v16430_v16 = vpop.permute.xlu0 %16429  ;;  %v16432_v33 = vpop.permute.xlu1 %16431 }
 0x307   : > { %v16439_v34 = vsel %vm24256_vm9, %v16428_v40, %v16430_v16  ;;  %v16440_v35 = vsel %vm24257_vm10, %v16430_v16, %v16432_v33  ;;  %v11578_v37 = vpop.f32.mrb[62].mxu1  ;;  %20827 = vmatmul.mubr.msk.f32.vlgmr.msra.gmra.mrb[0].mxu1 %vm333_vm2, %v20821_v28  ;;  %21273 = vmatprep.subr.mxu1 %v21736_v13  ;;  %vm24267_vm9 = vmmov %vm24265_vm7 }
 0x308   : > { %19362 = vrot.lane.b32.xlu0 %v19348_v54, %s21761_s13  ;;  %19718 = vrot.lane.b32.xlu1 %v23559_v58, %s21762_s26  ;;  %v11588_v36 = vadd.f32 %v11578_v37, %v11222_v22  ;;  %v21207_v38 = vpop.f32.mrb[63].mxu1  ;;  %v19707_v58 = vrot.slane %v19680_v39, %v21820_v5  ;;  %vm24268_vm10 = vmmov %vm24265_vm7 }
 0x309   : > { %20828 = vmatprep.subr.msk.mxu0 %vm337_vm1, %v16440_v35  ;;  %21275 = vmatprep.mubr.msk.f32.mxu1 %vm21746_vm4, %v21736_v13 }
 0x30a   : > { %20829 = vmatpush1.msk.msra.mxu0 %vm337_vm1, %v16439_v34  ;;  %v16434_v41 = vpop.permute.xlu0 %16433  ;;  %v16791_v44 = vpop.permute.xlu1 %16790 }
 0x30b   : > { %v16441_v59 = vsel %vm24258_vm11, %v16432_v33, %v16434_v41  ;;  %20830 = vmatmul.mubr.msk.f32.vlgmr.msra.gmra.mrb[2].mxu0 %vm333_vm2, %v20821_v28  ;;  %vm24269_vm11 = vmmov %vm24265_vm7 }
 0x30c   : > { %19720 = vrot.lane.b32.xlu0 %v23573_v31, %s21762_s26  ;;  %19716 = vrot.lane.b32.xlu1 %v23543_v19, %s21762_s26  ;;  %v19715_v19 = vcombine.high %v19707_v58, %v19707_v58  ;;  %v19714_v31 = vrot.slane %v19700_v62, %v21820_v5 }
 0x30d   : > { %21274 = vmatpush3.msk.msra.mxu1 %vm337_vm1, %v16441_v59  ;;  %16889 = vmatprep.mubr.f32.mxu0 %v21736_v13  ;;  %v20869_v59 = vld [vmem:[%s24176_s3 + $0x2a] sm:$0x3] }
 0x30e   : > { %21276 = vmatmul.mubr.msk.f32.vlgmr.msra.gmra.mrb[90].mxu1 %vm333_vm2, %v20821_v28  ;;  %v16793_v46 = vpop.permute.xlu0 %16792  ;;  %v16789_v49 = vpop.permute.xlu1 %16788 }
 0x30f   : > { %v16803_v50 = vsel %vm24259_vm12, %v16791_v44, %v16793_v46  ;;  %v16802_v51 = vsel %vm24260_vm13, %v16789_v49, %v16791_v44  ;;  %16960 = vmatprep.mubr.f32.mxu1 %v21736_v13  ;;  %vm24270_vm12 = vmmov %vm24265_vm7  ;;  %vm24271_vm13 = vcmask 441344  }
 0x310   : > { %19722 = vrot.lane.b32.xlu0 %v23588_v48, %s21762_s26  ;;  %19724 = vrot.lane.b32.xlu1 %v19707_v58, %s21762_s26 }
 0x311   : > { %20834 = vmatprep.subr.msk.mxu0 %vm337_vm1, %v16803_v50 }
 0x312   : > { %20835 = vmatpush1.msk.msra.mxu0 %vm337_vm1, %v16802_v51  ;;  %v16795_v52 = vpop.permute.xlu0 %16794  ;;  %v16797_v11 = vpop.permute.xlu1 %16796 }
 0x313   : > { %v16804_v53 = vsel %vm24261_vm0, %v16793_v46, %v16795_v52  ;;  %v16805_v45 = vsel %vm24262_vm3, %v16795_v52, %v16797_v11  ;;  %20836 = vmatmul.mubr.msk.f32.vlgmr.msra.gmra.mrb[0].mxu0 %vm333_vm2, %v20833_v14  ;;  %vm24272_vm0 = vmmov %vm24271_vm13 }
 0x314   : > { %19726 = vrot.lane.b32.xlu0 %v19715_v19, %s21762_s26  ;;  %19728 = vrot.lane.b32.xlu1 %v19714_v31, %s21762_s26  ;;  %vm24273_vm3 = vmmov %vm24272_vm0 }
 0x315   : > { %20837 = vmatprep.subr.msk.mxu1 %vm337_vm1, %v16805_v45  ;;  %17031 = vmatprep.mubr.f32.mxu0 %v21736_v13 }
 0x316   : > { %20838 = vmatpush1.msk.msra.mxu1 %vm337_vm1, %v16804_v53  ;;  %v16799_v48 = vpop.permute.xlu0 %16798  ;;  %v16801_v55 = vpop.permute.xlu1 %16800 }
 0x317   : > { %v16806_v56 = vsel %vm24263_vm5, %v16797_v11, %v16799_v48  ;;  %20839 = vmatmul.mubr.msk.f32.vlgmr.msra.gmra.mrb[0].mxu1 %vm333_vm2, %v20833_v14  ;;  %21278 = vmatprep.subr.mxu1 %v21736_v13  ;;  %v16807_v57 = vsel %vm24264_vm6, %v16799_v48, %v16801_v55  ;;  %v11944_v9 = vpop.f32.mrb[64].mxu1  ;;  %vm24274_vm5 = vmmov %vm24272_vm0 }
 0x318   : > { %21279 = vmatpush3.msk.msra.mxu1 %vm337_vm1, %v16801_v55  ;;  %20840 = vmatprep.subr.msk.mxu0 %vm337_vm1, %v16807_v57  ;;  %v11954_v17 = vadd.f32 %v11944_v9, %v11588_v36  ;;  %v21212_v60 = vpop.f32.mrb[65].mxu1  ;;  %vm24275_vm6 = vmmov %vm24272_vm0 }
 0x319   : > { %20841 = vmatpush1.msk.msra.mxu0 %vm337_vm1, %v16806_v56  ;;  %21280 = vmatprep.mubr.msk.f32.mxu1 %vm21746_vm4, %v21736_v13  ;;  %v20881_v56 = vld [vmem:[%s24176_s3 + $0x2c] sm:$0x3] }
 0x31a   : > { %v17157_v42 = vpop.permute.xlu0 %17156  ;;  %v17159_v32 = vpop.permute.xlu1 %17158  ;;  %20842 = vmatmul.mubr.msk.f32.vlgmr.msra.gmra.mrb[2].mxu0 %vm333_vm2, %v20833_v14 }
 0x31b   : > { %21281 = vmatmul.mubr.msk.f32.vlgmr.msra.gmra.mrb[92].mxu1 %vm333_vm2, %v20833_v14  ;;  %v17169_v63 = vsel %vm24265_vm7, %v17157_v42, %v17159_v32  ;;  %17255 = vmatprep.mubr.f32.mxu0 %v21736_v13  ;;  %vm24276_vm7 = vmmov %vm24272_vm0 }
 0x31c   : > { %20846 = vmatprep.subr.msk.mxu0 %vm337_vm1, %v17169_v63  ;;  %17326 = vmatprep.mubr.f32.mxu1 %v21736_v13 }
 0x31e   : > { %v17155_v0 = vpop.permute.xlu0 %17154  ;;  %v17161_v47 = vpop.permute.xlu1 %17160 }
 0x31f   : > { %v17168_v1 = vsel %vm24266_vm8, %v17155_v0, %v17157_v42  ;;  %v17170_v2 = vsel %vm24268_vm10, %v17159_v32, %v17161_v47  ;;  %vm24277_vm8 = vcmask 375808  }
 0x320   : > { %20847 = vmatpush1.msk.msra.mxu0 %vm337_vm1, %v17168_v1  ;;  %vm24279_vm10 = vmmov %vm24277_vm8 }
 0x321   : > { %20848 = vmatmul.mubr.msk.f32.vlgmr.msra.gmra.mrb[0].mxu0 %vm333_vm2, %v20845_v4 }
 0x322   : > { %v17163_v6 = vpop.permute.xlu0 %17162  ;;  %v17165_v7 = vpop.permute.xlu1 %17164  ;;  %17397 = vmatprep.mubr.f32.mxu0 %v21736_v13 }
 0x323   : > { %v17171_v12 = vsel %vm24267_vm9, %v17161_v47, %v17163_v6  ;;  %v12310_v15 = vpop.f32.mrb[66].mxu1  ;;  %v17172_v24 = vsel %vm24270_vm12, %v17163_v6, %v17165_v7  ;;  %vm24278_vm9 = vmmov %vm24277_vm8 }
 0x324   : > { %20849 = vmatprep.subr.msk.mxu1 %vm337_vm1, %v17171_v12  ;;  %v12320_v18 = vadd.f32 %v12310_v15, %v11954_v17  ;;  %v21217_v20 = vpop.f32.mrb[67].mxu1  ;;  %vm24281_vm12 = vmmov %vm24277_vm8  ;;  %v20043_v12 = vld [vmem:[%s24177_s4] sm:$0x3] }
 0x325   : > { %20850 = vmatpush1.msk.msra.mxu1 %vm337_vm1, %v17170_v2  ;;  %v21763_v2 = vmov 0  }
 0x326   : > { %v17167_v21 = vpop.permute.xlu0 %17166  ;;  %20851 = vmatmul.mubr.msk.f32.vlgmr.msra.gmra.mrb[0].mxu1 %vm333_vm2, %v20845_v4  ;;  %21283 = vmatprep.subr.mxu1 %v21736_v13  ;;  %v17523_v22 = vpop.permute.xlu1 %17522 }
 0x327   : > { %v17173_v61 = vsel %vm24269_vm11, %v17165_v7, %v17167_v21  ;;  %21284 = vmatpush3.msk.msra.mxu1 %vm337_vm1, %v17167_v21  ;;  %21285 = vmatprep.mubr.msk.f32.mxu1 %vm21746_vm4, %v21736_v13  ;;  %vm24280_vm11 = vmmov %vm24277_vm8 }
 0x328   : > { %20852 = vmatprep.subr.msk.mxu0 %vm337_vm1, %v17173_v61  ;;  %21680 = vset.pattern.permute.xlu0 %v21763_v2 }
 0x329   : > { %20853 = vmatpush1.msk.msra.mxu0 %vm337_vm1, %v17172_v24  ;;  %20046 = vperm.xlu0 %21680, %v20043_v12  }
 0x32a   : > { %v17525_v25 = vpop.permute.xlu0 %17524  ;;  %21286 = vmatmul.mubr.msk.f32.vlgmr.msra.gmra.mrb[94].mxu1 %vm333_vm2, %v20845_v4  ;;  %v17521_v26 = vpop.permute.xlu1 %17520  ;;  %20854 = vmatmul.mubr.msk.f32.vlgmr.msra.gmra.mrb[2].mxu0 %vm333_vm2, %v20845_v4 }
 0x32b   : > { %v17535_v23 = vsel %vm24271_vm13, %v17523_v22, %v17525_v25  ;;  %v17534_v27 = vsel %vm24272_vm0, %v17521_v26, %v17523_v22  ;;  %17692 = vmatprep.mubr.f32.mxu1 %v21736_v13  ;;  %17621 = vmatprep.mubr.f32.mxu0 %v21736_v13  ;;  %vm24282_vm13 = vmmov %vm24277_vm8  ;;  %vm24283_vm0 = vcmask 367616   ;;  %v20893_v22 = vld [vmem:[%s24176_s3 + $0x2e] sm:$0x3] }
 0x32c   : > { %20858 = vmatprep.subr.msk.mxu0 %vm337_vm1, %v17535_v23 }
 0x32d   : > { %20859 = vmatpush1.msk.msra.mxu0 %vm337_vm1, %v17534_v27 }
 0x32e   : > { %v17527_v10 = vpop.permute.xlu0 %17526  ;;  %v17529_v28 = vpop.permute.xlu1 %17528  ;;  %20860 = vmatmul.mubr.msk.f32.vlgmr.msra.gmra.mrb[0].mxu0 %vm333_vm2, %v20857_v8 }
 0x32f   : > { %v17536_v29 = vsel %vm24273_vm3, %v17525_v25, %v17527_v10  ;;  %v17537_v40 = vsel %vm24274_vm5, %v17527_v10, %v17529_v28  ;;  %17763 = vmatprep.mubr.f32.mxu0 %v21736_v13  ;;  %vm24284_vm3 = vmmov %vm24283_vm0 }
 0x330   : > { %20861 = vmatprep.subr.msk.mxu1 %vm337_vm1, %v17537_v40  ;;  %vm24285_vm5 = vmmov %vm24283_vm0 }
 0x331   : > { %20862 = vmatpush1.msk.msra.mxu1 %vm337_vm1, %v17536_v29 }
 0x332   : > { %v17531_v43 = vpop.permute.xlu0 %17530  ;;  %20863 = vmatmul.mubr.msk.f32.vlgmr.msra.gmra.mrb[0].mxu1 %vm333_vm2, %v20857_v8  ;;  %21288 = vmatprep.subr.mxu1 %v21736_v13  ;;  %v17533_v30 = vpop.permute.xlu1 %17532 }
 0x333   : > { %v17538_v54 = vsel %vm24275_vm6, %v17529_v28, %v17531_v43  ;;  %v17539_v16 = vsel %vm24276_vm7, %v17531_v43, %v17533_v30  ;;  %21289 = vmatpush3.msk.msra.mxu1 %vm337_vm1, %v17533_v30  ;;  %v12676_v33 = vpop.f32.mrb[68].mxu1  ;;  %21290 = vmatprep.mubr.msk.f32.mxu1 %vm21746_vm4, %v21736_v13  ;;  %vm24286_vm6 = vmmov %vm24283_vm0 }
 0x334   : > { %20864 = vmatprep.subr.msk.mxu0 %vm337_vm1, %v17539_v16  ;;  %v12686_v34 = vadd.f32 %v12676_v33, %v12320_v18  ;;  %v21222_v35 = vpop.f32.mrb[69].mxu1  ;;  %vm24287_vm7 = vmmov %vm24283_vm0  ;;  %v20905_v33 = vld [vmem:[%s24176_s3 + $0x30] sm:$0x3] }
 0x335   : > { %20865 = vmatpush1.msk.msra.mxu0 %vm337_vm1, %v17538_v54 }
 0x336   : > { %v17889_v37 = vpop.permute.xlu0 %17888  ;;  %21291 = vmatmul.mubr.msk.f32.vlgmr.msra.gmra.mrb[96].mxu1 %vm333_vm2, %v20857_v8  ;;  %v17891_v36 = vpop.permute.xlu1 %17890  ;;  %20866 = vmatmul.mubr.msk.f32.vlgmr.msra.gmra.mrb[2].mxu0 %vm333_vm2, %v20857_v8 }
 0x337   : > { %v17901_v38 = vsel %vm24277_vm8, %v17889_v37, %v17891_v36  ;;  %18058 = vmatprep.mubr.f32.mxu1 %v21736_v13  ;;  %17987 = vmatprep.mubr.f32.mxu0 %v21736_v13  ;;  %vm24288_vm8 = vmmov %vm24283_vm0 }
 0x338   : > { %20870 = vmatprep.subr.msk.mxu0 %vm337_vm1, %v17901_v38 }
 0x33a   : > { %v17887_v39 = vpop.permute.xlu0 %17886  ;;  %v17893_v41 = vpop.permute.xlu1 %17892 }
 0x33b   : > { %v17900_v44 = vsel %vm24278_vm9, %v17887_v39, %v17889_v37  ;;  %v17902_v50 = vsel %vm24280_vm11, %v17891_v36, %v17893_v41  ;;  %vm24289_vm9 = vcmask 359424  }
 0x33c   : > { %20871 = vmatpush1.msk.msra.mxu0 %vm337_vm1, %v17900_v44  ;;  %vm24291_vm11 = vmmov %vm24289_vm9 }
 0x33d   : > { %20872 = vmatmul.mubr.msk.f32.vlgmr.msra.gmra.mrb[0].mxu0 %vm333_vm2, %v20869_v59 }
 0x33e   : > { %v17895_v58 = vpop.permute.xlu0 %17894  ;;  %v17897_v62 = vpop.permute.xlu1 %17896  ;;  %18129 = vmatprep.mubr.f32.mxu0 %v21736_v13 }
 0x33f   : > { %v17903_v46 = vsel %vm24279_vm10, %v17893_v41, %v17895_v58  ;;  %v13042_v49 = vpop.f32.mrb[70].mxu1  ;;  %v17904_v14 = vsel %vm24282_vm13, %v17895_v58, %v17897_v62  ;;  %vm24290_vm10 = vmmov %vm24289_vm9 }
 0x340   : > { %20873 = vmatprep.subr.msk.mxu1 %vm337_vm1, %v17903_v46  ;;  %v13052_v51 = vadd.f32 %v13042_v49, %v12686_v34  ;;  %v21227_v19 = vpop.f32.mrb[71].mxu1  ;;  %vm24293_vm13 = vmmov %vm24289_vm9 }
 0x341   : > { %20874 = vmatpush1.msk.msra.mxu1 %vm337_vm1, %v17902_v50  ;;  %v20917_v19 = vld [vmem:[%s24176_s3 + $0x32] sm:$0x3] }
 0x342   : > { %v17899_v31 = vpop.permute.xlu0 %17898  ;;  %20875 = vmatmul.mubr.msk.f32.vlgmr.msra.gmra.mrb[0].mxu1 %vm333_vm2, %v20869_v59  ;;  %21293 = vmatprep.subr.mxu1 %v21736_v13  ;;  %v18255_v52 = vpop.permute.xlu1 %18254 }
 0x343   : > { %v17905_v11 = vsel %vm24281_vm12, %v17897_v62, %v17899_v31  ;;  %21294 = vmatpush3.msk.msra.mxu1 %vm337_vm1, %v17899_v31  ;;  %21295 = vmatprep.mubr.msk.f32.mxu1 %vm21746_vm4, %v21736_v13  ;;  %vm24292_vm12 = vmmov %vm24289_vm9 }
 0x344   : > { %20876 = vmatprep.subr.msk.mxu0 %vm337_vm1, %v17905_v11 }
 0x345   : > { %20877 = vmatpush1.msk.msra.mxu0 %vm337_vm1, %v17904_v14 }
 0x346   : > { %v18257_v53 = vpop.permute.xlu0 %18256  ;;  %21296 = vmatmul.mubr.msk.f32.vlgmr.msra.gmra.mrb[98].mxu1 %vm333_vm2, %v20869_v59  ;;  %v18253_v45 = vpop.permute.xlu1 %18252  ;;  %20878 = vmatmul.mubr.msk.f32.vlgmr.msra.gmra.mrb[2].mxu0 %vm333_vm2, %v20869_v59 }
 0x347   : > { %v18267_v48 = vsel %vm24283_vm0, %v18255_v52, %v18257_v53  ;;  %v18266_v55 = vsel %vm24284_vm3, %v18253_v45, %v18255_v52  ;;  %18424 = vmatprep.mubr.f32.mxu1 %v21736_v13  ;;  %18353 = vmatprep.mubr.f32.mxu0 %v21736_v13  ;;  %vm24294_vm0 = vmmov %vm24289_vm9  ;;  %vm24295_vm3 = vcmask 293888  }
 0x348   : > { %20882 = vmatprep.subr.msk.mxu0 %vm337_vm1, %v18267_v48 }
 0x349   : > { %20883 = vmatpush1.msk.msra.mxu0 %vm337_vm1, %v18266_v55 }
 0x34a   : > { %v18259_v57 = vpop.permute.xlu0 %18258  ;;  %v18261_v9 = vpop.permute.xlu1 %18260  ;;  %20884 = vmatmul.mubr.msk.f32.vlgmr.msra.gmra.mrb[0].mxu0 %vm333_vm2, %v20881_v56 }
 0x34b   : > { %v18268_v17 = vsel %vm24285_vm5, %v18257_v53, %v18259_v57  ;;  %v18269_v60 = vsel %vm24286_vm6, %v18259_v57, %v18261_v9  ;;  %18495 = vmatprep.mubr.f32.mxu0 %v21736_v13  ;;  %vm24296_vm5 = vmmov %vm24295_vm3 }
 0x34c   : > { %20885 = vmatprep.subr.msk.mxu1 %vm337_vm1, %v18269_v60  ;;  %vm24297_vm6 = vmmov %vm24295_vm3 }
 0x34d   : > { %20886 = vmatpush1.msk.msra.mxu1 %vm337_vm1, %v18268_v17 }
 0x34e   : > { %v18263_v42 = vpop.permute.xlu0 %18262  ;;  %20887 = vmatmul.mubr.msk.f32.vlgmr.msra.gmra.mrb[0].mxu1 %vm333_vm2, %v20881_v56  ;;  %21298 = vmatprep.subr.mxu1 %v21736_v13  ;;  %v18265_v32 = vpop.permute.xlu1 %18264 }
 0x34f   : > { %v18270_v63 = vsel %vm24287_vm7, %v18261_v9, %v18263_v42  ;;  %v18271_v0 = vsel %vm24288_vm8, %v18263_v42, %v18265_v32  ;;  %21299 = vmatpush3.msk.msra.mxu1 %vm337_vm1, %v18265_v32  ;;  %v13408_v47 = vpop.f32.mrb[72].mxu1  ;;  %21300 = vmatprep.mubr.msk.f32.mxu1 %vm21746_vm4, %v21736_v13  ;;  %vm24298_vm7 = vmmov %vm24295_vm3  ;;  %v20929_v32 = vld [vmem:[%s24176_s3 + $0x34] sm:$0x3] }
 0x350   : > { %20888 = vmatprep.subr.msk.mxu0 %vm337_vm1, %v18271_v0  ;;  %v13418_v1 = vadd.f32 %v13408_v47, %v13052_v51  ;;  %v21232_v4 = vpop.f32.mrb[73].mxu1  ;;  %vm24299_vm8 = vmmov %vm24295_vm3 }
 0x351   : > { %20889 = vmatpush1.msk.msra.mxu0 %vm337_vm1, %v18270_v63 }
 0x352   : > { %v18621_v6 = vpop.permute.xlu0 %18620  ;;  %21301 = vmatmul.mubr.msk.f32.vlgmr.msra.gmra.mrb[100].mxu1 %vm333_vm2, %v20881_v56  ;;  %v18623_v7 = vpop.permute.xlu1 %18622  ;;  %20890 = vmatmul.mubr.msk.f32.vlgmr.msra.gmra.mrb[2].mxu0 %vm333_vm2, %v20881_v56 }
 0x353   : > { %v18633_v15 = vsel %vm24289_vm9, %v18621_v6, %v18623_v7  ;;  %18790 = vmatprep.mubr.f32.mxu1 %v21736_v13  ;;  %18719 = vmatprep.mubr.f32.mxu0 %v21736_v13  ;;  %vm24300_vm9 = vmmov %vm24295_vm3 }
 0x354   : > { %20894 = vmatprep.subr.msk.mxu0 %vm337_vm1, %v18633_v15 }
 0x356   : > { %v18619_v18 = vpop.permute.xlu0 %18618  ;;  %v18625_v20 = vpop.permute.xlu1 %18624 }
 0x357   : > { %v18632_v21 = vsel %vm24290_vm10, %v18619_v18, %v18621_v6  ;;  %v18634_v26 = vsel %vm24292_vm12, %v18623_v7, %v18625_v20 }
 0x358   : > { %20895 = vmatpush1.msk.msra.mxu0 %vm337_vm1, %v18632_v21 }
 0x359   : > { %20896 = vmatmul.mubr.msk.f32.vlgmr.msra.gmra.mrb[0].mxu0 %vm333_vm2, %v20893_v22 }
 0x35a   : > { %v18627_v61 = vpop.permute.xlu0 %18626  ;;  %v18629_v24 = vpop.permute.xlu1 %18628  ;;  %18861 = vmatprep.mubr.f32.mxu0 %v21736_v13 }
 0x35b   : > { %v18635_v25 = vsel %vm24291_vm11, %v18625_v20, %v18627_v61  ;;  %v18636_v10 = vsel %vm24294_vm0, %v18627_v61, %v18629_v24 }
 0x35c   : > { %20897 = vmatprep.subr.msk.mxu1 %vm337_vm1, %v18635_v25 }
 0x35d   : > { %20898 = vmatpush1.msk.msra.mxu1 %vm337_vm1, %v18634_v26 }
 0x35e   : > { %v18631_v23 = vpop.permute.xlu0 %18630  ;;  %20899 = vmatmul.mubr.msk.f32.vlgmr.msra.gmra.mrb[0].mxu1 %vm333_vm2, %v20893_v22  ;;  %21303 = vmatprep.subr.mxu1 %v21736_v13  ;;  %v18987_v27 = vpop.permute.xlu1 %18986 }
 0x35f   : > { %v18637_v8 = vsel %vm24293_vm13, %v18629_v24, %v18631_v23  ;;  %21304 = vmatpush3.msk.msra.mxu1 %vm337_vm1, %v18631_v23  ;;  %21305 = vmatprep.mubr.msk.f32.mxu1 %vm21746_vm4, %v21736_v13 }
 0x360   : > { %v13778_v28 = vpop.f32.mrb[74].mxu1  ;;  %20900 = vmatprep.subr.msk.mxu0 %vm337_vm1, %v18637_v8 }
 0x361   : > { %v13788_v29 = vadd.f32 %v13778_v28, %v13418_v1  ;;  %20901 = vmatpush1.msk.msra.mxu0 %vm337_vm1, %v18636_v10  ;;  %v21237_v40 = vpop.f32.mrb[75].mxu1 }
 0x362   : > { %v18989_v43 = vpop.permute.xlu0 %18988  ;;  %21306 = vmatmul.mubr.msk.f32.vlgmr.msra.gmra.mrb[102].mxu1 %vm333_vm2, %v20893_v22  ;;  %v18985_v30 = vpop.permute.xlu1 %18984  ;;  %20902 = vmatmul.mubr.msk.f32.vlgmr.msra.gmra.mrb[2].mxu0 %vm333_vm2, %v20893_v22 }
 0x363   : > { %v18999_v54 = vsel %vm24295_vm3, %v18987_v27, %v18989_v43  ;;  %v18998_v16 = vsel %vm24296_vm5, %v18985_v30, %v18987_v27  ;;  %19156 = vmatprep.mubr.f32.mxu1 %v21736_v13  ;;  %19085 = vmatprep.mubr.f32.mxu0 %v21736_v13 }
 0x364   : > { %20906 = vmatprep.subr.msk.mxu0 %vm337_vm1, %v18999_v54 }
 0x365   : > { %20907 = vmatpush1.msk.msra.mxu0 %vm337_vm1, %v18998_v16 }
 0x366   : > { %v18991_v34 = vpop.permute.xlu0 %18990  ;;  %v18993_v35 = vpop.permute.xlu1 %18992  ;;  %20908 = vmatmul.mubr.msk.f32.vlgmr.msra.gmra.mrb[0].mxu0 %vm333_vm2, %v20905_v33 }
 0x367   : > { %v19000_v37 = vsel %vm24297_vm6, %v18989_v43, %v18991_v34  ;;  %v19001_v36 = vsel %vm24298_vm7, %v18991_v34, %v18993_v35  ;;  %19227 = vmatprep.mubr.f32.mxu0 %v21736_v13 }
 0x368   : > { %20909 = vmatprep.subr.msk.mxu1 %vm337_vm1, %v19001_v36 }
 0x369   : > { %20910 = vmatpush1.msk.msra.mxu1 %vm337_vm1, %v19000_v37 }
 0x36a   : > { %v18995_v38 = vpop.permute.xlu0 %18994  ;;  %20911 = vmatmul.mubr.msk.f32.vlgmr.msra.gmra.mrb[0].mxu1 %vm333_vm2, %v20905_v33  ;;  %21308 = vmatprep.subr.mxu1 %v21736_v13  ;;  %v18997_v39 = vpop.permute.xlu1 %18996 }
 0x36b   : > { %v19002_v41 = vsel %vm24299_vm8, %v18993_v35, %v18995_v38  ;;  %v19003_v44 = vsel %vm24300_vm9, %v18995_v38, %v18997_v39  ;;  %21309 = vmatpush3.msk.msra.mxu1 %vm337_vm1, %v18997_v39  ;;  %21310 = vmatprep.mubr.msk.f32.mxu1 %vm21746_vm4, %v21736_v13 }
 0x36c   : > { %20912 = vmatprep.subr.msk.mxu0 %vm337_vm1, %v19003_v44 }
 0x36d   : > { %20913 = vmatpush1.msk.msra.mxu0 %vm337_vm1, %v19002_v41 }
 0x36e   : > { %v19353_v59 = vpop.permute.xlu0 %19352  ;;  %21311 = vmatmul.mubr.msk.f32.vlgmr.msra.gmra.mrb[104].mxu1 %vm333_vm2, %v20905_v33  ;;  %v19355_v58 = vpop.permute.xlu1 %19354  ;;  %20914 = vmatmul.mubr.msk.f32.vlgmr.msra.gmra.mrb[2].mxu0 %vm333_vm2, %v20905_v33 }
 0x36f   : > { %v19365_v62 = vsel %vm9465_vm15, %v19353_v59, %v19355_v58  ;;  %19451 = vmatprep.mubr.f32.mxu0 %v21736_v13  ;;  %19522 = vmatprep.mubr.f32.mxu1 %v21736_v13 }
 0x370   : > { %20918 = vmatprep.subr.msk.mxu0 %vm337_vm1, %v19365_v62 }
 0x371   : > { %v14148_v46 = vpop.f32.mrb[76].mxu1 }
 0x372   : > { %v14158_v49 = vadd.f32 %v14148_v46, %v13788_v29  ;;  %v19351_v50 = vpop.permute.xlu0 %19350  ;;  %v19357_v51 = vpop.permute.xlu1 %19356 }
 0x373   : > { %v19364_v31 = vsel %vm9465_vm15, %v19351_v50, %v19353_v59  ;;  %v21242_v52 = vpop.f32.mrb[77].mxu1  ;;  %v19366_v45 = vsel %vm9465_vm15, %v19355_v58, %v19357_v51 }
 0x374   : > { %20919 = vmatpush1.msk.msra.mxu0 %vm337_vm1, %v19364_v31 }
 0x375   : > { %20920 = vmatmul.mubr.msk.f32.vlgmr.msra.gmra.mrb[0].mxu0 %vm333_vm2, %v20917_v19 }
 0x376   : > { %v19359_v11 = vpop.permute.xlu0 %19358  ;;  %v19361_v14 = vpop.permute.xlu1 %19360  ;;  %19593 = vmatprep.mubr.f32.mxu0 %v21736_v13 }
 0x377   : > { %v19367_v53 = vsel %vm9465_vm15, %v19357_v51, %v19359_v11  ;;  %v19368_v57 = vsel %vm9465_vm15, %v19359_v11, %v19361_v14 }
 0x378   : > { %20921 = vmatprep.subr.msk.mxu1 %vm337_vm1, %v19367_v53 }
 0x379   : > { %20922 = vmatpush1.msk.msra.mxu1 %vm337_vm1, %v19366_v45  ;;  %v20056_v45 = vld [vmem:[%s24178_s5] sm:$0x7f] }
 0x37a   : > { %v19363_v48 = vpop.permute.xlu0 %19362  ;;  %20923 = vmatmul.mubr.msk.f32.vlgmr.msra.gmra.mrb[0].mxu1 %vm333_vm2, %v20917_v19  ;;  %21313 = vmatprep.subr.mxu1 %v21736_v13  ;;  %v19719_v55 = vpop.permute.xlu1 %19718 }
 0x37b   : > { %v19369_v56 = vsel %vm9465_vm15, %v19361_v14, %v19363_v48  ;;  %21314 = vmatpush3.msk.msra.mxu1 %vm337_vm1, %v19363_v48  ;;  %21315 = vmatprep.mubr.msk.f32.mxu1 %vm21746_vm4, %v21736_v13  ;;  %v20060_v14 = vsub.s32 0, %v21809_v3  ;;  %v20064_v48 = vsub.s32 1, %v21809_v3  ;;  %vm20215_vm15 = vcmask 259076  }
 0x37c   : > { %20924 = vmatprep.subr.msk.mxu0 %vm337_vm1, %v19369_v56 }
 0x37d   : > { %20925 = vmatpush1.msk.msra.mxu0 %vm337_vm1, %v19368_v57 }
 0x37e   : > { %v19721_v9 = vpop.permute.xlu0 %19720  ;;  %20926 = vmatmul.mubr.msk.f32.vlgmr.msra.gmra.mrb[2].mxu0 %vm333_vm2, %v20917_v19  ;;  %21316 = vmatmul.mubr.msk.f32.vlgmr.msra.gmra.mrb[106].mxu1 %vm333_vm2, %v20917_v19  ;;  %v19717_v17 = vpop.permute.xlu1 %19716 }
 0x37f   : > { %v19731_v60 = vsel %vm9832_vm14, %v19719_v55, %v19721_v9  ;;  %v19730_v42 = vsel %vm9832_vm14, %v19717_v17, %v19719_v55  ;;  %19817 = vmatprep.mubr.f32.mxu0 %v21736_v13  ;;  %19888 = vmatprep.mubr.f32.mxu1 %v21736_v13  ;;  %v20068_v17 = vsub.s32 2, %v21809_v3 }
 0x380   : > { %20930 = vmatprep.subr.msk.mxu0 %vm337_vm1, %v19731_v60 }
 0x381   : > { %v14518_v63 = vpop.f32.mrb[78].mxu1  ;;  %20931 = vmatpush1.msk.msra.mxu0 %vm337_vm1, %v19730_v42  ;;  %v20065_v42 = vrot.slane %v20056_v45, %v20064_v48 }
 0x382   : > { %v14528_v0 = vadd.f32 %v14518_v63, %v14158_v49  ;;  %v19723_v47 = vpop.permute.xlu0 %19722  ;;  %20932 = vmatmul.mubr.msk.f32.vlgmr.msra.gmra.mrb[0].mxu0 %vm333_vm2, %v20929_v32  ;;  %v19725_v1 = vpop.permute.xlu1 %19724 }
 0x383   : > { %v19732_v4 = vsel %vm9832_vm14, %v19721_v9, %v19723_v47  ;;  %v19733_v6 = vsel %vm9832_vm14, %v19723_v47, %v19725_v1  ;;  %19959 = vmatprep.mubr.f32.mxu0 %v21736_v13  ;;  %v21247_v7 = vpop.f32.mrb[79].mxu1  ;;  %v20061_v9 = vrot.slane %v20056_v45, %v20060_v14 }
 0x384   : > { %20933 = vmatprep.subr.msk.mxu1 %vm337_vm1, %v19733_v6  ;;  %v20076_v6 = vsub.s32 4, %v21809_v3 }
 0x385   : > { %20934 = vmatpush1.msk.msra.mxu1 %vm337_vm1, %v19732_v4  ;;  %v20069_v4 = vrot.slane %v20056_v45, %v20068_v17 }
 0x386   : > { %v19727_v12 = vpop.permute.xlu0 %19726  ;;  %20935 = vmatmul.mubr.msk.f32.vlgmr.msra.gmra.mrb[0].mxu1 %vm333_vm2, %v20929_v32  ;;  %21318 = vmatprep.subr.mxu1 %v21736_v13  ;;  %v19729_v15 = vpop.permute.xlu1 %19728 }
 0x387   : > { %v19734_v2 = vsel %vm9832_vm14, %v19725_v1, %v19727_v12  ;;  %v19735_v18 = vsel %vm9832_vm14, %v19727_v12, %v19729_v15  ;;  %21319 = vmatpush3.msk.msra.mxu1 %vm337_vm1, %v19729_v15  ;;  %21320 = vmatprep.mubr.msk.f32.mxu1 %vm21746_vm4, %v21736_v13  ;;  %vm20213_vm4 = vcmask 1043458  }
 0x388   : > { %20936 = vmatprep.subr.msk.mxu0 %vm337_vm1, %v19735_v18  ;;  %vm20214_vm14 = vmor %vm20213_vm4, %vm337_vm1 }
 0x389   : > { %20937 = vmatpush1.msk.msra.mxu0 %vm337_vm1, %v19734_v2  ;;  %v20080_v2 = vsub.s32 5, %v21809_v3  ;;  %vm20216_vm10 = vmor %vm20215_vm15, %vm20214_vm14 }
 0x38a   : > { %20938 = vmatmul.mubr.msk.f32.vlgmr.msra.gmra.mrb[2].mxu0 %vm333_vm2, %v20929_v32  ;;  %21321 = vmatmul.mubr.msk.f32.vlgmr.msra.gmra.mrb[108].mxu1 %vm333_vm2, %v20929_v32  ;;  %v20072_v32 = vsub.s32 3, %v21809_v3  ;;  %vm20111_vm2 = vcmask 254976  }
 0x38c   : > { %v20073_v15 = vrot.slane %v20056_v45, %v20072_v32 }
 0x391   : > { %v14888_v20 = vpop.f32.mrb[80].mxu1 }
 0x392   : > { %v14898_v21 = vadd.f32 %v14888_v20, %v14528_v0  ;;  %v21252_v22 = vpop.f32.mrb[81].mxu1 }
 0x393   : > { %v20084_v22 = vsub.s32 6, %v21809_v3 }
 0x3a1   : > { %v15258_v61 = vpop.f32.mrb[82].mxu1 }
 0x3a2   : > { %v15268_v24 = vadd.f32 %v15258_v61, %v14898_v21  ;;  %v21257_v25 = vpop.f32.mrb[83].mxu1 }
 0x3a8   : > { %v20047_v57 = vpop.permute.xlu0 %20046 }
 0x3b1   : > { %v15628_v26 = vpop.f32.mrb[84].mxu1 }
 0x3b2   : > { %v15638_v23 = vadd.f32 %v15628_v26, %v15268_v24  ;;  %v21262_v27 = vpop.f32.mrb[85].mxu1 }
 0x3c1   : > { %v15998_v8 = vpop.f32.mrb[86].mxu1 }
 0x3c2   : > { %v16008_v10 = vadd.f32 %v15998_v8, %v15638_v23  ;;  %v21267_v13 = vpop.f32.mrb[87].mxu1  ;;  %v20077_v23 = vrot.slane %v20056_v45, %v20076_v6 }
 0x3c3   : > { %v20081_v13 = vrot.slane %v20056_v45, %v20080_v2 }
 0x3d1   : > { %v16368_v28 = vpop.f32.mrb[88].mxu1 }
 0x3d2   : > { %v16378_v29 = vadd.f32 %v16368_v28, %v16008_v10  ;;  %v21272_v40 = vpop.f32.mrb[89].mxu1 }
 0x3e1   : > { %v16738_v43 = vpop.f32.mrb[90].mxu1 }
 0x3e2   : > { %v16748_v30 = vadd.f32 %v16738_v43, %v16378_v29  ;;  %v21277_v54 = vpop.f32.mrb[91].mxu1  ;;  %v20085_v43 = vrot.slane %v20056_v45, %v20084_v22 }
 0x3ee   : > { %v17104_v16 = vpop.f32.mrb[92].mxu1 }
 0x3ef   : > { %v17114_v33 = vadd.f32 %v17104_v16, %v16748_v30  ;;  %v21282_v34 = vpop.f32.mrb[93].mxu1 }
 0x3fd   : > { %v17470_v35 = vpop.f32.mrb[94].mxu1 }
 0x3fe   : > { %v17480_v37 = vadd.f32 %v17470_v35, %v17114_v33  ;;  %v21287_v36 = vpop.f32.mrb[95].mxu1 }
 0x409   : > { %v17836_v38 = vpop.f32.mrb[96].mxu1 }
 0x40a   : > { %v17846_v39 = vadd.f32 %v17836_v38, %v17480_v37  ;;  %v21292_v41 = vpop.f32.mrb[97].mxu1 }
 0x419   : > { %v18202_v44 = vpop.f32.mrb[98].mxu1 }
 0x41a   : > { %v18212_v59 = vadd.f32 %v18202_v44, %v17846_v39  ;;  %v21297_v58 = vpop.f32.mrb[99].mxu1 }
 0x425   : > { %v18568_v62 = vpop.f32.mrb[100].mxu1 }
 0x426   : > { %v18578_v46 = vadd.f32 %v18568_v62, %v18212_v59  ;;  %v21302_v49 = vpop.f32.mrb[101].mxu1 }
 0x435   : > { %v18934_v50 = vpop.f32.mrb[102].mxu1 }
 0x436   : > { %v18944_v51 = vadd.f32 %v18934_v50, %v18578_v46  ;;  %v21307_v19 = vpop.f32.mrb[103].mxu1 }
 0x441   : > { %v19300_v31 = vpop.f32.mrb[104].mxu1 }
 0x442   : > { %v19310_v52 = vadd.f32 %v19300_v31, %v18944_v51  ;;  %v21312_v11 = vpop.f32.mrb[105].mxu1 }
 0x451   : > { %v19666_v53 = vpop.f32.mrb[106].mxu1 }
 0x452   : > { %v19676_v55 = vadd.f32 %v19666_v53, %v19310_v52  ;;  %v21317_v56 = vpop.f32.mrb[107].mxu1 }
 0x455   : > { %v19819_v60 = vpop.f32.mrb[0].mxu0 }
 0x456   : > { %v20049_v63 = vadd.f32 %v20047_v57, %v19819_v60  ;;  %v19821_v0 = vpop.f32.mrb[1].mxu0 }
 0x457   : > { %v20050_v47 = vadd.f32 %v20047_v57, %v19821_v0 }
 0x458   : > { %v20093_v1 = vmul.f32 %v20061_v9, %v20049_v63 }
 0x459   : > { %v20094_v7 = vmul.f32 %v20065_v42, %v20050_v47  ;;  %v19890_v12 = vpop.f32.mrb[0].mxu1 }
 0x45a   : > { %v20100_v18 = vsel %vm337_vm1, %v20093_v1, 0.0  ;;  %v20051_v20 = vadd.f32 %v20047_v57, %v19890_v12  ;;  %v19892_v21 = vpop.f32.mrb[1].mxu1 }
 0x45b   : > { %v20101_v61 = vsel %vm337_vm1, %v20094_v7, 0.0  ;;  %v20052_v24 = vadd.f32 %v20047_v57, %v19892_v21 }
 0x45c   : > { %v20102_v25 = vadd.f32 %v20101_v61, %v20100_v18  ;;  %v20095_v26 = vmul.f32 %v20069_v4, %v20051_v20 }
 0x45d   : > { %v20096_v27 = vmul.f32 %v20073_v15, %v20052_v24  ;;  %v19961_v8 = vpop.f32.mrb[2].mxu0  ;;  %v20032_v10 = vpop.f32.mrb[108].mxu1 }
 0x45e   : > { %v20103_v28 = vsel %vm337_vm1, %v20095_v26, 0.0  ;;  %v20053_v29 = vadd.f32 %v20047_v57, %v19961_v8  ;;  %v20042_v40 = vadd.f32 %v20032_v10, %v19676_v55  ;;  %v19963_v30 = vpop.f32.mrb[3].mxu0  ;;  %v21322_v54 = vpop.f32.mrb[109].mxu1 }
 0x45f   : > { %v20104_v16 = vadd.f32 %v20103_v28, %v20102_v25  ;;  %v20105_v3 = vsel %vm337_vm1, %v20096_v27, 0.0  ;;  %v20054_v33 = vadd.f32 %v20047_v57, %v19963_v30 }
 0x460   : > { %v20097_v34 = vmul.f32 %v20077_v23, %v20053_v29  ;;  %v20055_v35 = vadd.f32 %v20047_v57, %v20042_v40 }
 0x461   : > { %v20106_v37 = vadd.f32 %v20105_v3, %v20104_v16  ;;  %v20098_v36 = vmul.f32 %v20081_v13, %v20054_v33 }
 0x462   : > { %v20107_v38 = vsel %vm337_vm1, %v20097_v34, 0.0  ;;  %v20099_v39 = vmul.f32 %v20085_v43, %v20055_v35 }
 0x463   : > { %v20108_v41 = vadd.f32 %v20107_v38, %v20106_v37  ;;  %v20109_v44 = vsel %vm337_vm1, %v20098_v36, 0.0 }
 0x464   : > { %v20112_v58 = vsel %vm20111_vm2, %v20099_v39, 0.0 }
 0x465   : > { %v20110_v59 = vadd.f32 %v20109_v44, %v20108_v41 }
 0x467   : > { %v20113_v62 = vadd.f32 %v20112_v58, %v20110_v59 }
 0x469   : > { %20114 = vadd.xlane.f32.xlu1 %v20113_v62 }
 0x4f6   : > { %v20115_v46 = vpop.xlane.xlu1 %20114 }
 0x4f7   : > { %v20116_v49 = vmul.f32 0.001953125, %v20115_v46 }
 0x4f9   : > { %v20117_v50 = vsub.f32 %v20049_v63, %v20116_v49  ;;  %v20118_v51 = vsub.f32 %v20050_v47, %v20116_v49  ;;  %v20119_v19 = vsub.f32 %v20051_v20, %v20116_v49  ;;  %v20120_v31 = vsub.f32 %v20052_v24, %v20116_v49 }
 0x4fa   : > { %v20121_v52 = vsub.f32 %v20053_v29, %v20116_v49  ;;  %v20122_v11 = vsub.f32 %v20054_v33, %v20116_v49  ;;  %v20123_v55 = vsub.f32 %v20055_v35, %v20116_v49 }
 0x4fb   : > { %v20124_v14 = vmul.f32 %v20117_v50, %v20061_v9  ;;  %v20125_v53 = vmul.f32 %v20118_v51, %v20065_v42  ;;  %v20126_v45 = vmul.f32 %v20119_v19, %v20069_v4  ;;  %v20127_v48 = vmul.f32 %v20120_v31, %v20073_v15 }
 0x4fc   : > { %v20128_v56 = vmul.f32 %v20121_v52, %v20077_v23  ;;  %v20129_v32 = vmul.f32 %v20122_v11, %v20081_v13  ;;  %v20130_v6 = vmul.f32 %v20123_v55, %v20085_v43 }
 0x4fd   : > { %v20131_v57 = vmul.f32 %v20124_v14, %v20124_v14  ;;  %v20132_v17 = vmul.f32 %v20125_v53, %v20125_v53  ;;  %v20133_v60 = vmul.f32 %v20126_v45, %v20126_v45  ;;  %v20134_v0 = vmul.f32 %v20127_v48, %v20127_v48 }
 0x4fe   : > { %v20135_v7 = vmul.f32 %v20128_v56, %v20128_v56  ;;  %v20136_v42 = vmul.f32 %v20129_v32, %v20129_v32  ;;  %v20137_v2 = vmul.f32 %v20130_v6, %v20130_v6 }
 0x4ff   : > { %v20138_v1 = vsel %vm337_vm1, %v20131_v57, 0.0  ;;  %v20139_v63 = vsel %vm337_vm1, %v20132_v17, 0.0  ;;  %v20141_v12 = vsel %vm337_vm1, %v20133_v60, 0.0  ;;  %v20143_v4 = vsel %vm337_vm1, %v20134_v0, 0.0 }
 0x500   : > { %v20140_v47 = vadd.f32 %v20139_v63, %v20138_v1  ;;  %v20145_v18 = vsel %vm337_vm1, %v20135_v7, 0.0  ;;  %v20147_v21 = vsel %vm337_vm1, %v20136_v42, 0.0  ;;  %v20149_v61 = vsel %vm20111_vm2, %v20137_v2, 0.0 }
 0x502   : > { %v20142_v9 = vadd.f32 %v20141_v12, %v20140_v47 }
 0x504   : > { %v20144_v15 = vadd.f32 %v20143_v4, %v20142_v9 }
 0x506   : > { %v20146_v20 = vadd.f32 %v20145_v18, %v20144_v15 }
 0x508   : > { %v20148_v22 = vadd.f32 %v20147_v21, %v20146_v20 }
 0x50a   : > { %v20150_v24 = vadd.f32 %v20149_v61, %v20148_v22 }
 0x50c   : > { %20151 = vadd.xlane.f32.xlu0 %v20150_v24 }
 0x599   : > { %v20152_v25 = vpop.xlane.xlu0 %20151 }
 0x59a   : > { %v20153_v26 = vmul.f32 0.001953125, %v20152_v25 }
 0x59c   : > { %v20154_v23 = vadd.f32 1e-05, %v20153_v26 }
 0x59e   : > { %21724 = vrsqrt.f32 %v20154_v23 }
 0x5a8   : > { %v21725_v27 = vpop.eup %21724 }
 0x5a9   : > { %v20156_v8 = vmul.f32 %v21725_v27, %v20124_v14  ;;  %v20157_v10 = vmul.f32 %v21725_v27, %v20125_v53  ;;  %v20158_v13 = vmul.f32 %v21725_v27, %v20126_v45  ;;  %v20159_v28 = vmul.f32 %v21725_v27, %v20127_v48 }
 0x5aa   : > { %v20160_v29 = vmul.f32 %v21725_v27, %v20128_v56  ;;  %v20161_v40 = vmul.f32 %v21725_v27, %v20129_v32  ;;  %v20162_v43 = vmul.f32 %v21725_v27, %v20130_v6 }
 0x5ab   : > { %v20163_v30 = vmax.f32 %v20156_v8, 0.0  ;;  %v20164_v54 = vmax.f32 %v20157_v10, 0.0  ;;  %v20165_v16 = vmax.f32 %v20158_v13, 0.0  ;;  %v20166_v3 = vmax.f32 %v20159_v28, 0.0 }
 0x5ac   : > { %v20167_v33 = vmax.f32 %v20160_v29, 0.0  ;;  %v20168_v34 = vmax.f32 %v20161_v40, 0.0  ;;  %v20169_v35 = vmax.f32 %v20162_v43, 0.0 }
 0x5ad   : > { %v20177_v37 = vcombine.low %v20163_v30, %v20164_v54  ;;  %v20178_v36 = vcombine.low %v20165_v16, %v20166_v3 }
 0x5ae   : > { %v20194_v38 = vcombine.low %v20167_v33, %v20168_v34  ;;  %v20208_v59 = vrot.slane %v20169_v35, %v21820_v5 }
 0x5af   : > { %v20185_v39 = vrot.slane %v20177_v37, %v21820_v5  ;;  %v20192_v41 = vrot.slane %v20178_v36, %v21820_v5 }
 0x5b0   : > { %v20201_v44 = vrot.slane %v20194_v38, %v21820_v5 }
 0x5b1   : > { %v20193_v58 = vcombine.low %v20185_v39, %v20192_v41 }
 0x5b2   : > { %v20209_v62 = vcombine.low %v20201_v44, %v20208_v59 }
 0x5b3   : > { %20212 = vst [vmem:[%s271_s14] sm:$0xff] %v20193_v58 }
 0x5b4   : > { %20217 = vst.msk [vmem:[%s271_s14 + $0x8] sm:$0x3f] %vm20216_vm10, %v20209_v62 }
 0x5b5 PF: > { %s16_s21 = sadd.s32 1, %s21732_s21  }
 0x5b6   : > { %p13_p4 = scmp.ge.s32.totalorder %s16_s21, 4  }
 0x5b8   :  { %15 = sbr.rel (!%p13_p4) target bundleno = 1 (0x1), region = 129 }

</bundles_post_ra>
